<compile_context>
chip_gen: v7x
topology: tpu7x:2x2x1
jax: 0.10.0
libtpu: 0.0.40
codegen_flags: <defaults>
</compile_context>

<pallas_src>
import functools

import jax
import jax.numpy as jnp
from jax.experimental import pallas as pl
from jax.experimental.pallas import tpu as pltpu

LN_EPS = 1e-5  # torch.nn.LayerNorm default
_F32 = jnp.float32


def _vmem_spec():
    return pl.BlockSpec(memory_space=pltpu.MemorySpace.VMEM)


# ----------------------------- in-kernel math ------------------------------

def _erf(x):
    # TODO(synk): exact erf lowering in Mosaic is not guaranteed; use
    # Abramowitz & Stegun 7.1.26 (|err| < 1.5e-7) built from exp/mul/rcp.
    a1, a2, a3, a4, a5 = 0.254829592, -0.284496736, 1.421413741, -1.453152027, 1.061405429
    p = 0.3275911
    ax = jnp.abs(x)
    t = pl.reciprocal(1.0 + p * ax, approx=True)
    poly = ((((a5 * t + a4) * t + a3) * t + a2) * t + a1) * t
    y = 1.0 - poly * jnp.exp(-ax * ax)
    return jnp.where(x >= 0, y, -y)


def _gelu(x):
    # torch.nn.GELU default (erf form)
    return 0.5 * x * (1.0 + _erf(x * 0.7071067811865476))


def _layernorm(x, g, b):
    mu = jnp.mean(x, axis=-1, keepdims=True)
    d = x - mu
    var = jnp.mean(d * d, axis=-1, keepdims=True)
    return d * jax.lax.rsqrt(var + LN_EPS) * g + b


def _softmax(x):
    m = jnp.max(x, axis=-1, keepdims=True)
    e = jnp.exp(x - m)
    return e * pl.reciprocal(jnp.sum(e, axis=-1, keepdims=True), approx=True)


# ------------------------------ fused kernel -------------------------------

def _fused_kernel(x_ref, wemb_ref, bemb_ref,
                  wqkv_ref, wout_ref, bout_ref, w1_ref, b1_ref, w2_ref, b2_ref,
                  lng_ref, lnb_ref,
                  wdg0_ref, bdg0_ref, wdg1_ref, bdg1_ref,
                  wda0_ref, bda0_ref, wda1_ref, bda1_ref,
                  h1g_ref, h1beta_ref, h1w_ref, h1b_ref,
                  h2g_ref, h2beta_ref, h2w_ref, h2b_ref,
                  h3g_ref, h3beta_ref, h3w_ref, h3b_ref,
                  o1_ref, o2a_ref, o3a_ref, o2b_ref, o3b_ref,
                  *, heads, dim_head, alpha):
    dim = wemb_ref.shape[1]
    inner = heads * dim_head

    def attn_block(x, li, att_soft_scaled):
        # 1/sqrt(dim_head) scale is pre-folded into the Q columns of wqkv.
        qkv = jnp.dot(x, wqkv_ref[li], preferred_element_type=_F32)
        wout = wout_ref[li]
        out = None
        dots_all = []
        for h in range(heads):
            q = qkv[:, h * dim_head:(h + 1) * dim_head]
            k = qkv[:, inner + h * dim_head: inner + (h + 1) * dim_head]
            v = qkv[:, 2 * inner + h * dim_head: 2 * inner + (h + 1) * dim_head]
            dots = jax.lax.dot_general(q, k, (((1,), (1,)), ((), ())),
                                       preferred_element_type=_F32)
            dots_all.append(dots)
            attn = _softmax(dots)
            if att_soft_scaled is not None:
                # alpha*softmax(dots) + (1-alpha)*softmax(att); softmax(att)
                # is hoisted & pre-scaled once outside the layer loop.
                attn = alpha * attn + att_soft_scaled[h]
            out_h = jnp.dot(attn, v, preferred_element_type=_F32)
            # rearrange 'b h n d -> b n (h d)' + to_out == per-head partial matmul sum
            contrib = jnp.dot(out_h, wout[h * dim_head:(h + 1) * dim_head, :],
                              preferred_element_type=_F32)
            out = contrib if out is None else out + contrib
        return out + bout_ref[li], dots_all

    def transformer(x, first_layer, ln_i, att_soft_scaled=None):
        g = lng_ref[ln_i]
        beta = lnb_ref[ln_i]
        give = None
        for j in range(2):  # depth = 2 for every transformer in this model
            li = first_layer + j
            a_out, dots = attn_block(x, li, att_soft_scaled)
            give = dots
            x = _layernorm(a_out + x, g, beta)
            h = _gelu(jnp.dot(x, w1_ref[li], preferred_element_type=_F32) + b1_ref[li])
            f_out = jnp.dot(h, w2_ref[li], preferred_element_type=_F32) + b2_ref[li]
            x = _layernorm(f_out + x, g, beta)
        return x, give

    def dense(parts, w_ref, b_ref):
        # fused cat(parts, -1) @ W + b via split-weight accumulation
        w = w_ref[...]
        out = b_ref[...]
        for idx, part in enumerate(parts):
            out = out + jnp.dot(part, w[idx * dim:(idx + 1) * dim, :],
                                preferred_element_type=_F32)
        return out

    def head(x, g_ref, beta_ref, w_ref, b_ref):
        h = _layernorm(x, g_ref[...], beta_ref[...])
        return jnp.dot(h, w_ref[...], preferred_element_type=_F32) + b_ref[...]

    # ---- embedding + lob transformer ----
    x = jnp.dot(x_ref[...], wemb_ref[...], preferred_element_type=_F32) + bemb_ref[...]
    in0 = x
    x, _ = transformer(x, 0, 0)
    in1 = x
    x1_1 = x

    # ---- give branch (AirwayFormer_give) ----
    xg = dense([in0, in1], wdg0_ref, bdg0_ref)
    x2_1, _ = transformer(xg, 2, 1)
    xg = dense([in0, in1, x2_1], wdg1_ref, bdg1_ref)
    x3_1, give_dots = transformer(xg, 4, 2)

    # softmax(att) is invariant across all att-mode layers/heads: compute once,
    # pre-scale by (1-alpha).  (give.detach() is a no-op for forward-only.)
    att_soft_scaled = [(1.0 - alpha) * _softmax(d) for d in give_dots]

    # ---- accept branch (AirwayFormer_accept) ----
    xa = dense([in0, in1], wda0_ref, bda0_ref)
    x2_2, _ = transformer(xa, 6, 3, att_soft_scaled=att_soft_scaled)
    xa = dense([in0, in1, x2_2], wda1_ref, bda1_ref)
    x3_2, _ = transformer(xa, 8, 4)

    # ---- classification heads ----
    # TODO(synk): on v7x the give/accept branches + heads could be split over
    # the 2 TensorCores with pl.core_map; at these shapes the single fused
    # kernel is already dominated by one dispatch, so this is left out.
    o1_ref[...] = head(x1_1, h1g_ref, h1beta_ref, h1w_ref, h1b_ref)
    o2a_ref[...] = head(x2_1, h2g_ref, h2beta_ref, h2w_ref, h2b_ref)
    o3a_ref[...] = head(x3_1, h3g_ref, h3beta_ref, h3w_ref, h3b_ref)
    o2b_ref[...] = head(x2_2, h2g_ref, h2beta_ref, h2w_ref, h2b_ref)
    o3b_ref[...] = head(x3_2, h3g_ref, h3beta_ref, h3w_ref, h3b_ref)


# --------------------------- packing / forward ------------------------------

def pack_params(params):
    """Flatten nested params into the 31 weight arrays the fused kernel takes.

    Layer order: lob[0:2], give.tr0[2:4], give.tr1[4:6], accept.tr0[6:8],
    accept.tr1[8:10].  LN order: lob, give.tr0, give.tr1, accept.tr0, accept.tr1.
    The attention scale (dim_head**-0.5) is folded into the Q columns of wqkv.
    """
    heads, dim_head = params['heads'], params['dim_head']
    inner = heads * dim_head
    scale = dim_head ** -0.5

    layer_list, ln_g, ln_b = [], [], []

    def add_tr(tp):
        ln_g.append(tp['ln_g'].reshape(1, -1))
        ln_b.append(tp['ln_b'].reshape(1, -1))
        layer_list.extend(tp['layers'])

    add_tr(params['lob'])
    add_tr(params['give']['tr'][0])
    add_tr(params['give']['tr'][1])
    add_tr(params['accept']['tr'][0])
    add_tr(params['accept']['tr'][1])

    def fold(wqkv):
        return wqkv.at[:, :inner].multiply(scale)

    packed = [
        params['to_embedding']['w'], params['to_embedding']['b'].reshape(1, -1),
        jnp.stack([fold(l['attn']['wqkv']) for l in layer_list]),
        jnp.stack([l['attn']['wout'] for l in layer_list]),
        jnp.stack([l['attn']['bout'].reshape(1, -1) for l in layer_list]),
        jnp.stack([l['ff']['w1'] for l in layer_list]),
        jnp.stack([l['ff']['b1'].reshape(1, -1) for l in layer_list]),
        jnp.stack([l['ff']['w2'] for l in layer_list]),
        jnp.stack([l['ff']['b2'].reshape(1, -1) for l in layer_list]),
        jnp.stack(ln_g), jnp.stack(ln_b),
        params['give']['dense'][0]['w'], params['give']['dense'][0]['b'].reshape(1, -1),
        params['give']['dense'][1]['w'], params['give']['dense'][1]['b'].reshape(1, -1),
        params['accept']['dense'][0]['w'], params['accept']['dense'][0]['b'].reshape(1, -1),
        params['accept']['dense'][1]['w'], params['accept']['dense'][1]['b'].reshape(1, -1),
    ]
    for hname in ('head1', 'head2', 'head3'):
        hp = params[hname]
        packed += [hp['g'].reshape(1, -1), hp['beta'].reshape(1, -1),
                   hp['w'], hp['b'].reshape(1, -1)]
    return packed


def airwayformer_att_forward(params, x, p=0.0, alpha=0.5):
    # TODO(synk): the PyTorch reference calls Transformer_postnorm_att without
    # `alpha` (a TypeError); we expose alpha explicitly instead.
    # Dropout / head-drop masks use numpy RNG in the reference; with p == 0
    # they are the identity, which is the deterministic path implemented here.
    assert p == 0.0
    heads, dim_head = params['heads'], params['dim_head']
    packed = pack_params(params)
    n = x.shape[0]
    nc1 = params['head1']['w'].shape[1]
    nc2 = params['head2']['w'].shape[1]
    nc3 = params['head3']['w'].shape[1]

    kernel = functools.partial(_fused_kernel, heads=heads, dim_head=dim_head,
                               alpha=float(alpha))
    n_in = 1 + len(packed)
    return pl.pallas_call(
        kernel,
        out_shape=(jax.ShapeDtypeStruct((n, nc1), _F32),
                   jax.ShapeDtypeStruct((n, nc2), _F32),
                   jax.ShapeDtypeStruct((n, nc3), _F32),
                   jax.ShapeDtypeStruct((n, nc2), _F32),
                   jax.ShapeDtypeStruct((n, nc3), _F32)),
        in_specs=[_vmem_spec()] * n_in,
        out_specs=tuple(_vmem_spec() for _ in range(5)),
    )(x, *packed)


# ----------------------------- param init ----------------------------------

def _init_linear(key, in_dim, out_dim, bias=True):
    # matches torch.nn.Linear default init; weight stored as (in, out)
    k1, k2 = jax.random.split(key)
    bound = 1.0 / (in_dim ** 0.5)
    w = jax.random.uniform(k1, (in_dim, out_dim), _F32, -bound, bound)
    b = (jax.random.uniform(k2, (out_dim,), _F32, -bound, bound)
         if bias else jnp.zeros((out_dim,), _F32))
    return {'w': w, 'b': b}


def _init_attention(key, dim, heads, dim_head):
    inner = heads * dim_head
    k1, k2 = jax.random.split(key)
    qkv = _init_linear(k1, dim, 3 * inner, bias=False)
    out = _init_linear(k2, inner, dim)
    return {'wqkv': qkv['w'], 'wout': out['w'], 'bout': out['b']}


def _init_ff(key, dim, hidden):
    k1, k2 = jax.random.split(key)
    l1 = _init_linear(k1, dim, hidden)
    l2 = _init_linear(k2, hidden, dim)
    return {'w1': l1['w'], 'b1': l1['b'], 'w2': l2['w'], 'b2': l2['b']}


def _init_transformer(key, dim, depth, heads, dim_head, mlp_dim):
    keys = jax.random.split(key, 2 * depth)
    layers = [{'attn': _init_attention(keys[2 * i], dim, heads, dim_head),
               'ff': _init_ff(keys[2 * i + 1], dim, mlp_dim)} for i in range(depth)]
    # single shared LayerNorm per transformer, as in the reference `self.norm`
    return {'ln_g': jnp.ones((dim,), _F32), 'ln_b': jnp.zeros((dim,), _F32), 'layers': layers}


def _init_head(key, dim, n_classes):
    lin = _init_linear(key, dim, n_classes)
    return {'g': jnp.ones((dim,), _F32), 'beta': jnp.zeros((dim,), _F32),
            'w': lin['w'], 'b': lin['b']}


def init_airwayformer_att(key, input_dim, nc1, nc2, nc3, dim, heads, mlp_dim, dim_head):
    keys = jax.random.split(key, 13)
    params = {'heads': heads, 'dim_head': dim_head}
    params['to_embedding'] = _init_linear(keys[0], input_dim, dim)
    params['lob'] = _init_transformer(keys[1], dim, 2, heads, dim_head, mlp_dim)
    # AirwayFormer_give: dense Linear((i+2)*dim, dim); tr[0] plain, tr[1] give
    params['give'] = {
        'dense': [_init_linear(keys[2], 2 * dim, dim), _init_linear(keys[3], 3 * dim, dim)],
        'tr': [_init_transformer(keys[4], dim, 2, heads, dim_head, mlp_dim),
               _init_transformer(keys[5], dim, 2, heads, dim_head, mlp_dim)],
    }
    # AirwayFormer_accept: dense Linear(dim+(i+1)*dim, dim); tr[0] att, tr[1] plain
    params['accept'] = {
        'dense': [_init_linear(keys[6], 2 * dim, dim), _init_linear(keys[7], 3 * dim, dim)],
        'tr': [_init_transformer(keys[8], dim, 2, heads, dim_head, mlp_dim),
               _init_transformer(keys[9], dim, 2, heads, dim_head, mlp_dim)],
    }
    params['head1'] = _init_head(keys[10], dim, nc1)
    params['head2'] = _init_head(keys[11], dim, nc2)
    params['head3'] = _init_head(keys[12], dim, nc3)
    return params


# --------------------------------- main -------------------------------------

if __name__ == "__main__":
    input_dim, dim, heads, dim_head, mlp_dim = 12, 16, 2, 8, 32
    nc1, nc2, nc3 = 4, 5, 6
    N = 8  # number of airway nodes (sequence length)

    key = jax.random.PRNGKey(0)
    kp, kx = jax.random.split(key)
    params = init_airwayformer_att(kp, input_dim, nc1, nc2, nc3, dim, heads, mlp_dim, dim_head)
    x = jax.random.normal(kx, (N, input_dim), _F32)

    outs = airwayformer_att_forward(params, x, p=0.0, alpha=0.5)
    outs = jax.block_until_ready(outs)

    assert outs[0].shape == (N, nc1)
    assert outs[1].shape == (N, nc2) and outs[3].shape == (N, nc2)
    assert outs[2].shape == (N, nc3) and outs[4].shape == (N, nc3)
    assert all(bool(jnp.all(jnp.isfinite(o))) for o in outs)
    print("KERNEL_OK")
</pallas_src>

<mosaic_0001>
module attributes {stable_mosaic.version = 11 : i64} {
  func.func @_fused_kernel(%arg0: memref<8x12xf32, #tpu.memory_space<vmem>>, %arg1: memref<12x16xf32, #tpu.memory_space<vmem>>, %arg2: memref<1x16xf32, #tpu.memory_space<vmem>>, %arg3: memref<10x16x48xf32, #tpu.memory_space<vmem>>, %arg4: memref<10x16x16xf32, #tpu.memory_space<vmem>>, %arg5: memref<10x1x16xf32, #tpu.memory_space<vmem>>, %arg6: memref<10x16x32xf32, #tpu.memory_space<vmem>>, %arg7: memref<10x1x32xf32, #tpu.memory_space<vmem>>, %arg8: memref<10x32x16xf32, #tpu.memory_space<vmem>>, %arg9: memref<10x1x16xf32, #tpu.memory_space<vmem>>, %arg10: memref<5x1x16xf32, #tpu.memory_space<vmem>>, %arg11: memref<5x1x16xf32, #tpu.memory_space<vmem>>, %arg12: memref<32x16xf32, #tpu.memory_space<vmem>>, %arg13: memref<1x16xf32, #tpu.memory_space<vmem>>, %arg14: memref<48x16xf32, #tpu.memory_space<vmem>>, %arg15: memref<1x16xf32, #tpu.memory_space<vmem>>, %arg16: memref<32x16xf32, #tpu.memory_space<vmem>>, %arg17: memref<1x16xf32, #tpu.memory_space<vmem>>, %arg18: memref<48x16xf32, #tpu.memory_space<vmem>>, %arg19: memref<1x16xf32, #tpu.memory_space<vmem>>, %arg20: memref<1x16xf32, #tpu.memory_space<vmem>>, %arg21: memref<1x16xf32, #tpu.memory_space<vmem>>, %arg22: memref<16x4xf32, #tpu.memory_space<vmem>>, %arg23: memref<1x4xf32, #tpu.memory_space<vmem>>, %arg24: memref<1x16xf32, #tpu.memory_space<vmem>>, %arg25: memref<1x16xf32, #tpu.memory_space<vmem>>, %arg26: memref<16x5xf32, #tpu.memory_space<vmem>>, %arg27: memref<1x5xf32, #tpu.memory_space<vmem>>, %arg28: memref<1x16xf32, #tpu.memory_space<vmem>>, %arg29: memref<1x16xf32, #tpu.memory_space<vmem>>, %arg30: memref<16x6xf32, #tpu.memory_space<vmem>>, %arg31: memref<1x6xf32, #tpu.memory_space<vmem>>, %arg32: memref<8x4xf32, #tpu.memory_space<vmem>>, %arg33: memref<8x5xf32, #tpu.memory_space<vmem>>, %arg34: memref<8x6xf32, #tpu.memory_space<vmem>>, %arg35: memref<8x5xf32, #tpu.memory_space<vmem>>, %arg36: memref<8x6xf32, #tpu.memory_space<vmem>>) attributes {dimension_semantics = [], scalar_prefetch = 0 : i64, scratch_operands = 0 : i64, tpu.core_type = #tpu.core_type<tc>} {
    %c0 = arith.constant 0 : index
    %c0_0 = arith.constant 0 : index
    %0 = vector.load %arg0[%c0, %c0_0] : memref<8x12xf32, #tpu.memory_space<vmem>>, vector<8x12xf32>
    %c0_1 = arith.constant 0 : index
    %c0_2 = arith.constant 0 : index
    %1 = vector.load %arg1[%c0_1, %c0_2] : memref<12x16xf32, #tpu.memory_space<vmem>>, vector<12x16xf32>
    %cst = arith.constant dense<0.000000e+00> : vector<8x16xf32>
    %2 = tpu.matmul %0, %1, %cst {dimension_numbers = #tpu.dot_dimension_numbers<[1], [0], [0], [1], [0, 0, 1, 1], [], []>} : vector<8x12xf32>, vector<12x16xf32>, vector<8x16xf32> -> vector<8x16xf32>
    %c0_3 = arith.constant 0 : index
    %c0_4 = arith.constant 0 : index
    %3 = vector.load %arg2[%c0_3, %c0_4] : memref<1x16xf32, #tpu.memory_space<vmem>>, vector<1x16xf32>
    %4 = vector.broadcast %3 : vector<1x16xf32> to vector<8x16xf32>
    %5 = arith.addf %2, %4 : vector<8x16xf32>
    %c0_5 = arith.constant 0 : index
    %c0_6 = arith.constant 0 : index
    %c0_7 = arith.constant 0 : index
    %6 = vector.load %arg10[%c0_5, %c0_6, %c0_7] : memref<5x1x16xf32, #tpu.memory_space<vmem>>, vector<1x1x16xf32>
    %7 = vector.shape_cast %6 : vector<1x1x16xf32> to vector<1x16xf32>
    %c0_8 = arith.constant 0 : index
    %c0_9 = arith.constant 0 : index
    %c0_10 = arith.constant 0 : index
    %8 = vector.load %arg11[%c0_8, %c0_9, %c0_10] : memref<5x1x16xf32, #tpu.memory_space<vmem>>, vector<1x1x16xf32>
    %9 = vector.shape_cast %8 : vector<1x1x16xf32> to vector<1x16xf32>
    %c0_11 = arith.constant 0 : index
    %c0_12 = arith.constant 0 : index
    %c0_13 = arith.constant 0 : index
    %10 = vector.load %arg3[%c0_11, %c0_12, %c0_13] : memref<10x16x48xf32, #tpu.memory_space<vmem>>, vector<1x16x48xf32>
    %11 = vector.shape_cast %10 : vector<1x16x48xf32> to vector<16x48xf32>
    %cst_14 = arith.constant dense<0.000000e+00> : vector<8x48xf32>
    %12 = tpu.matmul %5, %11, %cst_14 {dimension_numbers = #tpu.dot_dimension_numbers<[1], [0], [0], [1], [0, 0, 1, 1], [], []>} : vector<8x16xf32>, vector<16x48xf32>, vector<8x48xf32> -> vector<8x48xf32>
    %c0_15 = arith.constant 0 : index
    %c0_16 = arith.constant 0 : index
    %c0_17 = arith.constant 0 : index
    %13 = vector.load %arg4[%c0_15, %c0_16, %c0_17] : memref<10x16x16xf32, #tpu.memory_space<vmem>>, vector<1x16x16xf32>
    %14 = vector.shape_cast %13 : vector<1x16x16xf32> to vector<16x16xf32>
    %15 = vector.extract_strided_slice %12 {offsets = [0, 0], sizes = [8, 8], strides = [1, 1]} : vector<8x48xf32> to vector<8x8xf32>
    %16 = vector.extract_strided_slice %12 {offsets = [0, 16], sizes = [8, 8], strides = [1, 1]} : vector<8x48xf32> to vector<8x8xf32>
    %17 = vector.extract_strided_slice %12 {offsets = [0, 32], sizes = [8, 8], strides = [1, 1]} : vector<8x48xf32> to vector<8x8xf32>
    %cst_18 = arith.constant dense<0.000000e+00> : vector<8x8xf32>
    %18 = tpu.matmul %15, %16, %cst_18 {dimension_numbers = #tpu.dot_dimension_numbers<[1], [1], [0], [0], [0, 0, 1, 0], [], []>} : vector<8x8xf32>, vector<8x8xf32>, vector<8x8xf32> -> vector<8x8xf32>
    %cst_19 = arith.constant dense<0xFF800000> : vector<8xf32>
    %19 = vector.multi_reduction <maximumf>, %18, %cst_19 [1] : vector<8x8xf32> to vector<8xf32>
    %20 = vector.shape_cast %19 : vector<8xf32> to vector<8x1xf32>
    %21 = vector.broadcast %20 : vector<8x1xf32> to vector<8x8xf32>
    %22 = arith.subf %18, %21 : vector<8x8xf32>
    %23 = math.exp %22 : vector<8x8xf32>
    %cst_20 = arith.constant dense<0.000000e+00> : vector<8xf32>
    %24 = vector.multi_reduction <add>, %23, %cst_20 [1] : vector<8x8xf32> to vector<8xf32>
    %25 = vector.shape_cast %24 : vector<8xf32> to vector<8x1xf32>
    %26 = tpu.reciprocal %25 {approx = true} : vector<8x1xf32> -> vector<8x1xf32>
    %27 = vector.broadcast %26 : vector<8x1xf32> to vector<8x8xf32>
    %28 = arith.mulf %23, %27 : vector<8x8xf32>
    %cst_21 = arith.constant dense<0.000000e+00> : vector<8x8xf32>
    %29 = tpu.matmul %28, %17, %cst_21 {dimension_numbers = #tpu.dot_dimension_numbers<[1], [0], [0], [1], [0, 0, 1, 1], [], []>} : vector<8x8xf32>, vector<8x8xf32>, vector<8x8xf32> -> vector<8x8xf32>
    %30 = vector.extract_strided_slice %14 {offsets = [0, 0], sizes = [8, 16], strides = [1, 1]} : vector<16x16xf32> to vector<8x16xf32>
    %cst_22 = arith.constant dense<0.000000e+00> : vector<8x16xf32>
    %31 = tpu.matmul %29, %30, %cst_22 {dimension_numbers = #tpu.dot_dimension_numbers<[1], [0], [0], [1], [0, 0, 1, 1], [], []>} : vector<8x8xf32>, vector<8x16xf32>, vector<8x16xf32> -> vector<8x16xf32>
    %32 = vector.extract_strided_slice %12 {offsets = [0, 8], sizes = [8, 8], strides = [1, 1]} : vector<8x48xf32> to vector<8x8xf32>
    %33 = vector.extract_strided_slice %12 {offsets = [0, 24], sizes = [8, 8], strides = [1, 1]} : vector<8x48xf32> to vector<8x8xf32>
    %34 = vector.extract_strided_slice %12 {offsets = [0, 40], sizes = [8, 8], strides = [1, 1]} : vector<8x48xf32> to vector<8x8xf32>
    %cst_23 = arith.constant dense<0.000000e+00> : vector<8x8xf32>
    %35 = tpu.matmul %32, %33, %cst_23 {dimension_numbers = #tpu.dot_dimension_numbers<[1], [1], [0], [0], [0, 0, 1, 0], [], []>} : vector<8x8xf32>, vector<8x8xf32>, vector<8x8xf32> -> vector<8x8xf32>
    %cst_24 = arith.constant dense<0xFF800000> : vector<8xf32>
    %36 = vector.multi_reduction <maximumf>, %35, %cst_24 [1] : vector<8x8xf32> to vector<8xf32>
    %37 = vector.shape_cast %36 : vector<8xf32> to vector<8x1xf32>
    %38 = vector.broadcast %37 : vector<8x1xf32> to vector<8x8xf32>
    %39 = arith.subf %35, %38 : vector<8x8xf32>
    %40 = math.exp %39 : vector<8x8xf32>
    %cst_25 = arith.constant dense<0.000000e+00> : vector<8xf32>
    %41 = vector.multi_reduction <add>, %40, %cst_25 [1] : vector<8x8xf32> to vector<8xf32>
    %42 = vector.shape_cast %41 : vector<8xf32> to vector<8x1xf32>
    %43 = tpu.reciprocal %42 {approx = true} : vector<8x1xf32> -> vector<8x1xf32>
    %44 = vector.broadcast %43 : vector<8x1xf32> to vector<8x8xf32>
    %45 = arith.mulf %40, %44 : vector<8x8xf32>
    %cst_26 = arith.constant dense<0.000000e+00> : vector<8x8xf32>
    %46 = tpu.matmul %45, %34, %cst_26 {dimension_numbers = #tpu.dot_dimension_numbers<[1], [0], [0], [1], [0, 0, 1, 1], [], []>} : vector<8x8xf32>, vector<8x8xf32>, vector<8x8xf32> -> vector<8x8xf32>
    %47 = vector.extract_strided_slice %14 {offsets = [8, 0], sizes = [8, 16], strides = [1, 1]} : vector<16x16xf32> to vector<8x16xf32>
    %cst_27 = arith.constant dense<0.000000e+00> : vector<8x16xf32>
    %48 = tpu.matmul %46, %47, %cst_27 {dimension_numbers = #tpu.dot_dimension_numbers<[1], [0], [0], [1], [0, 0, 1, 1], [], []>} : vector<8x8xf32>, vector<8x16xf32>, vector<8x16xf32> -> vector<8x16xf32>
    %49 = arith.addf %31, %48 : vector<8x16xf32>
    %c0_28 = arith.constant 0 : index
    %c0_29 = arith.constant 0 : index
    %c0_30 = arith.constant 0 : index
    %50 = vector.load %arg5[%c0_28, %c0_29, %c0_30] : memref<10x1x16xf32, #tpu.memory_space<vmem>>, vector<1x1x16xf32>
    %51 = vector.shape_cast %50 : vector<1x1x16xf32> to vector<1x16xf32>
    %52 = vector.broadcast %51 : vector<1x16xf32> to vector<8x16xf32>
    %53 = arith.addf %49, %52 : vector<8x16xf32>
    %54 = arith.addf %53, %5 : vector<8x16xf32>
    %cst_31 = arith.constant dense<0.000000e+00> : vector<8xf32>
    %55 = vector.multi_reduction <add>, %54, %cst_31 [1] : vector<8x16xf32> to vector<8xf32>
    %56 = vector.shape_cast %55 : vector<8xf32> to vector<8x1xf32>
    %cst_32 = arith.constant 1.600000e+01 : f32
    %57 = vector.broadcast %cst_32 : f32 to vector<8x1xf32>
    %58 = arith.divf %56, %57 : vector<8x1xf32>
    %59 = vector.broadcast %58 : vector<8x1xf32> to vector<8x16xf32>
    %60 = arith.subf %54, %59 : vector<8x16xf32>
    %61 = arith.mulf %60, %60 : vector<8x16xf32>
    %cst_33 = arith.constant dense<0.000000e+00> : vector<8xf32>
    %62 = vector.multi_reduction <add>, %61, %cst_33 [1] : vector<8x16xf32> to vector<8xf32>
    %63 = vector.shape_cast %62 : vector<8xf32> to vector<8x1xf32>
    %cst_34 = arith.constant 1.600000e+01 : f32
    %64 = vector.broadcast %cst_34 : f32 to vector<8x1xf32>
    %65 = arith.divf %63, %64 : vector<8x1xf32>
    %cst_35 = arith.constant 9.99999974E-6 : f32
    %66 = vector.broadcast %cst_35 : f32 to vector<8x1xf32>
    %67 = arith.addf %65, %66 : vector<8x1xf32>
    %68 = math.rsqrt %67 : vector<8x1xf32>
    %69 = vector.broadcast %68 : vector<8x1xf32> to vector<8x16xf32>
    %70 = arith.mulf %60, %69 : vector<8x16xf32>
    %71 = vector.broadcast %7 : vector<1x16xf32> to vector<8x16xf32>
    %72 = arith.mulf %70, %71 : vector<8x16xf32>
    %73 = vector.broadcast %9 : vector<1x16xf32> to vector<8x16xf32>
    %74 = arith.addf %72, %73 : vector<8x16xf32>
    %c0_36 = arith.constant 0 : index
    %c0_37 = arith.constant 0 : index
    %c0_38 = arith.constant 0 : index
    %75 = vector.load %arg6[%c0_36, %c0_37, %c0_38] : memref<10x16x32xf32, #tpu.memory_space<vmem>>, vector<1x16x32xf32>
    %76 = vector.shape_cast %75 : vector<1x16x32xf32> to vector<16x32xf32>
    %cst_39 = arith.constant dense<0.000000e+00> : vector<8x32xf32>
    %77 = tpu.matmul %74, %76, %cst_39 {dimension_numbers = #tpu.dot_dimension_numbers<[1], [0], [0], [1], [0, 0, 1, 1], [], []>} : vector<8x16xf32>, vector<16x32xf32>, vector<8x32xf32> -> vector<8x32xf32>
    %c0_40 = arith.constant 0 : index
    %c0_41 = arith.constant 0 : index
    %c0_42 = arith.constant 0 : index
    %78 = vector.load %arg7[%c0_40, %c0_41, %c0_42] : memref<10x1x32xf32, #tpu.memory_space<vmem>>, vector<1x1x32xf32>
    %79 = vector.shape_cast %78 : vector<1x1x32xf32> to vector<1x32xf32>
    %80 = vector.broadcast %79 : vector<1x32xf32> to vector<8x32xf32>
    %81 = arith.addf %77, %80 : vector<8x32xf32>
    %cst_43 = arith.constant 5.000000e-01 : f32
    %82 = vector.broadcast %cst_43 : f32 to vector<8x32xf32>
    %83 = arith.mulf %82, %81 : vector<8x32xf32>
    %cst_44 = arith.constant 0.707106769 : f32
    %84 = vector.broadcast %cst_44 : f32 to vector<8x32xf32>
    %85 = arith.mulf %81, %84 : vector<8x32xf32>
    %86 = math.absf %85 : vector<8x32xf32>
    %cst_45 = arith.constant 0.327591091 : f32
    %87 = vector.broadcast %cst_45 : f32 to vector<8x32xf32>
    %88 = arith.mulf %87, %86 : vector<8x32xf32>
    %cst_46 = arith.constant 1.000000e+00 : f32
    %89 = vector.broadcast %cst_46 : f32 to vector<8x32xf32>
    %90 = arith.addf %89, %88 : vector<8x32xf32>
    %91 = tpu.reciprocal %90 {approx = true} : vector<8x32xf32> -> vector<8x32xf32>
    %cst_47 = arith.constant 1.06140542 : f32
    %92 = vector.broadcast %cst_47 : f32 to vector<8x32xf32>
    %93 = arith.mulf %92, %91 : vector<8x32xf32>
    %cst_48 = arith.constant -1.45315206 : f32
    %94 = vector.broadcast %cst_48 : f32 to vector<8x32xf32>
    %95 = arith.addf %93, %94 : vector<8x32xf32>
    %96 = arith.mulf %95, %91 : vector<8x32xf32>
    %cst_49 = arith.constant 1.42141378 : f32
    %97 = vector.broadcast %cst_49 : f32 to vector<8x32xf32>
    %98 = arith.addf %96, %97 : vector<8x32xf32>
    %99 = arith.mulf %98, %91 : vector<8x32xf32>
    %cst_50 = arith.constant -0.284496725 : f32
    %100 = vector.broadcast %cst_50 : f32 to vector<8x32xf32>
    %101 = arith.addf %99, %100 : vector<8x32xf32>
    %102 = arith.mulf %101, %91 : vector<8x32xf32>
    %cst_51 = arith.constant 0.254829586 : f32
    %103 = vector.broadcast %cst_51 : f32 to vector<8x32xf32>
    %104 = arith.addf %102, %103 : vector<8x32xf32>
    %105 = arith.mulf %104, %91 : vector<8x32xf32>
    %cst_52 = arith.constant 0.000000e+00 : f32
    %106 = vector.broadcast %cst_52 : f32 to vector<8x32xf32>
    %107 = arith.subf %106, %86 : vector<8x32xf32>
    %108 = arith.mulf %107, %86 : vector<8x32xf32>
    %109 = math.exp %108 : vector<8x32xf32>
    %110 = arith.mulf %105, %109 : vector<8x32xf32>
    %cst_53 = arith.constant 1.000000e+00 : f32
    %111 = vector.broadcast %cst_53 : f32 to vector<8x32xf32>
    %112 = arith.subf %111, %110 : vector<8x32xf32>
    %cst_54 = arith.constant 0.000000e+00 : f32
    %113 = vector.broadcast %cst_54 : f32 to vector<8x32xf32>
    %114 = arith.cmpf oge, %85, %113 : vector<8x32xf32>
    %cst_55 = arith.constant 0.000000e+00 : f32
    %115 = vector.broadcast %cst_55 : f32 to vector<8x32xf32>
    %116 = arith.subf %115, %112 : vector<8x32xf32>
    %117 = arith.select %114, %112, %116 : vector<8x32xi1>, vector<8x32xf32>
    %cst_56 = arith.constant 1.000000e+00 : f32
    %118 = vector.broadcast %cst_56 : f32 to vector<8x32xf32>
    %119 = arith.addf %118, %117 : vector<8x32xf32>
    %120 = arith.mulf %83, %119 : vector<8x32xf32>
    %c0_57 = arith.constant 0 : index
    %c0_58 = arith.constant 0 : index
    %c0_59 = arith.constant 0 : index
    %121 = vector.load %arg8[%c0_57, %c0_58, %c0_59] : memref<10x32x16xf32, #tpu.memory_space<vmem>>, vector<1x32x16xf32>
    %122 = vector.shape_cast %121 : vector<1x32x16xf32> to vector<32x16xf32>
    %cst_60 = arith.constant dense<0.000000e+00> : vector<8x16xf32>
    %123 = tpu.matmul %120, %122, %cst_60 {dimension_numbers = #tpu.dot_dimension_numbers<[1], [0], [0], [1], [0, 0, 1, 1], [], []>} : vector<8x32xf32>, vector<32x16xf32>, vector<8x16xf32> -> vector<8x16xf32>
    %c0_61 = arith.constant 0 : index
    %c0_62 = arith.constant 0 : index
    %c0_63 = arith.constant 0 : index
    %124 = vector.load %arg9[%c0_61, %c0_62, %c0_63] : memref<10x1x16xf32, #tpu.memory_space<vmem>>, vector<1x1x16xf32>
    %125 = vector.shape_cast %124 : vector<1x1x16xf32> to vector<1x16xf32>
    %126 = vector.broadcast %125 : vector<1x16xf32> to vector<8x16xf32>
    %127 = arith.addf %123, %126 : vector<8x16xf32>
    %128 = arith.addf %127, %74 : vector<8x16xf32>
    %cst_64 = arith.constant dense<0.000000e+00> : vector<8xf32>
    %129 = vector.multi_reduction <add>, %128, %cst_64 [1] : vector<8x16xf32> to vector<8xf32>
    %130 = vector.shape_cast %129 : vector<8xf32> to vector<8x1xf32>
    %cst_65 = arith.constant 1.600000e+01 : f32
    %131 = vector.broadcast %cst_65 : f32 to vector<8x1xf32>
    %132 = arith.divf %130, %131 : vector<8x1xf32>
    %133 = vector.broadcast %132 : vector<8x1xf32> to vector<8x16xf32>
    %134 = arith.subf %128, %133 : vector<8x16xf32>
    %135 = arith.mulf %134, %134 : vector<8x16xf32>
    %cst_66 = arith.constant dense<0.000000e+00> : vector<8xf32>
    %136 = vector.multi_reduction <add>, %135, %cst_66 [1] : vector<8x16xf32> to vector<8xf32>
    %137 = vector.shape_cast %136 : vector<8xf32> to vector<8x1xf32>
    %cst_67 = arith.constant 1.600000e+01 : f32
    %138 = vector.broadcast %cst_67 : f32 to vector<8x1xf32>
    %139 = arith.divf %137, %138 : vector<8x1xf32>
    %cst_68 = arith.constant 9.99999974E-6 : f32
    %140 = vector.broadcast %cst_68 : f32 to vector<8x1xf32>
    %141 = arith.addf %139, %140 : vector<8x1xf32>
    %142 = math.rsqrt %141 : vector<8x1xf32>
    %143 = vector.broadcast %142 : vector<8x1xf32> to vector<8x16xf32>
    %144 = arith.mulf %134, %143 : vector<8x16xf32>
    %145 = vector.broadcast %7 : vector<1x16xf32> to vector<8x16xf32>
    %146 = arith.mulf %144, %145 : vector<8x16xf32>
    %147 = vector.broadcast %9 : vector<1x16xf32> to vector<8x16xf32>
    %148 = arith.addf %146, %147 : vector<8x16xf32>
    %c1 = arith.constant 1 : index
    %c0_69 = arith.constant 0 : index
    %c0_70 = arith.constant 0 : index
    %149 = vector.load %arg3[%c1, %c0_69, %c0_70] : memref<10x16x48xf32, #tpu.memory_space<vmem>>, vector<1x16x48xf32>
    %150 = vector.shape_cast %149 : vector<1x16x48xf32> to vector<16x48xf32>
    %cst_71 = arith.constant dense<0.000000e+00> : vector<8x48xf32>
    %151 = tpu.matmul %148, %150, %cst_71 {dimension_numbers = #tpu.dot_dimension_numbers<[1], [0], [0], [1], [0, 0, 1, 1], [], []>} : vector<8x16xf32>, vector<16x48xf32>, vector<8x48xf32> -> vector<8x48xf32>
    %c1_72 = arith.constant 1 : index
    %c0_73 = arith.constant 0 : index
    %c0_74 = arith.constant 0 : index
    %152 = vector.load %arg4[%c1_72, %c0_73, %c0_74] : memref<10x16x16xf32, #tpu.memory_space<vmem>>, vector<1x16x16xf32>
    %153 = vector.shape_cast %152 : vector<1x16x16xf32> to vector<16x16xf32>
    %154 = vector.extract_strided_slice %151 {offsets = [0, 0], sizes = [8, 8], strides = [1, 1]} : vector<8x48xf32> to vector<8x8xf32>
    %155 = vector.extract_strided_slice %151 {offsets = [0, 16], sizes = [8, 8], strides = [1, 1]} : vector<8x48xf32> to vector<8x8xf32>
    %156 = vector.extract_strided_slice %151 {offsets = [0, 32], sizes = [8, 8], strides = [1, 1]} : vector<8x48xf32> to vector<8x8xf32>
    %cst_75 = arith.constant dense<0.000000e+00> : vector<8x8xf32>
    %157 = tpu.matmul %154, %155, %cst_75 {dimension_numbers = #tpu.dot_dimension_numbers<[1], [1], [0], [0], [0, 0, 1, 0], [], []>} : vector<8x8xf32>, vector<8x8xf32>, vector<8x8xf32> -> vector<8x8xf32>
    %cst_76 = arith.constant dense<0xFF800000> : vector<8xf32>
    %158 = vector.multi_reduction <maximumf>, %157, %cst_76 [1] : vector<8x8xf32> to vector<8xf32>
    %159 = vector.shape_cast %158 : vector<8xf32> to vector<8x1xf32>
    %160 = vector.broadcast %159 : vector<8x1xf32> to vector<8x8xf32>
    %161 = arith.subf %157, %160 : vector<8x8xf32>
    %162 = math.exp %161 : vector<8x8xf32>
    %cst_77 = arith.constant dense<0.000000e+00> : vector<8xf32>
    %163 = vector.multi_reduction <add>, %162, %cst_77 [1] : vector<8x8xf32> to vector<8xf32>
    %164 = vector.shape_cast %163 : vector<8xf32> to vector<8x1xf32>
    %165 = tpu.reciprocal %164 {approx = true} : vector<8x1xf32> -> vector<8x1xf32>
    %166 = vector.broadcast %165 : vector<8x1xf32> to vector<8x8xf32>
    %167 = arith.mulf %162, %166 : vector<8x8xf32>
    %cst_78 = arith.constant dense<0.000000e+00> : vector<8x8xf32>
    %168 = tpu.matmul %167, %156, %cst_78 {dimension_numbers = #tpu.dot_dimension_numbers<[1], [0], [0], [1], [0, 0, 1, 1], [], []>} : vector<8x8xf32>, vector<8x8xf32>, vector<8x8xf32> -> vector<8x8xf32>
    %169 = vector.extract_strided_slice %153 {offsets = [0, 0], sizes = [8, 16], strides = [1, 1]} : vector<16x16xf32> to vector<8x16xf32>
    %cst_79 = arith.constant dense<0.000000e+00> : vector<8x16xf32>
    %170 = tpu.matmul %168, %169, %cst_79 {dimension_numbers = #tpu.dot_dimension_numbers<[1], [0], [0], [1], [0, 0, 1, 1], [], []>} : vector<8x8xf32>, vector<8x16xf32>, vector<8x16xf32> -> vector<8x16xf32>
    %171 = vector.extract_strided_slice %151 {offsets = [0, 8], sizes = [8, 8], strides = [1, 1]} : vector<8x48xf32> to vector<8x8xf32>
    %172 = vector.extract_strided_slice %151 {offsets = [0, 24], sizes = [8, 8], strides = [1, 1]} : vector<8x48xf32> to vector<8x8xf32>
    %173 = vector.extract_strided_slice %151 {offsets = [0, 40], sizes = [8, 8], strides = [1, 1]} : vector<8x48xf32> to vector<8x8xf32>
    %cst_80 = arith.constant dense<0.000000e+00> : vector<8x8xf32>
    %174 = tpu.matmul %171, %172, %cst_80 {dimension_numbers = #tpu.dot_dimension_numbers<[1], [1], [0], [0], [0, 0, 1, 0], [], []>} : vector<8x8xf32>, vector<8x8xf32>, vector<8x8xf32> -> vector<8x8xf32>
    %cst_81 = arith.constant dense<0xFF800000> : vector<8xf32>
    %175 = vector.multi_reduction <maximumf>, %174, %cst_81 [1] : vector<8x8xf32> to vector<8xf32>
    %176 = vector.shape_cast %175 : vector<8xf32> to vector<8x1xf32>
    %177 = vector.broadcast %176 : vector<8x1xf32> to vector<8x8xf32>
    %178 = arith.subf %174, %177 : vector<8x8xf32>
    %179 = math.exp %178 : vector<8x8xf32>
    %cst_82 = arith.constant dense<0.000000e+00> : vector<8xf32>
    %180 = vector.multi_reduction <add>, %179, %cst_82 [1] : vector<8x8xf32> to vector<8xf32>
    %181 = vector.shape_cast %180 : vector<8xf32> to vector<8x1xf32>
    %182 = tpu.reciprocal %181 {approx = true} : vector<8x1xf32> -> vector<8x1xf32>
    %183 = vector.broadcast %182 : vector<8x1xf32> to vector<8x8xf32>
    %184 = arith.mulf %179, %183 : vector<8x8xf32>
    %cst_83 = arith.constant dense<0.000000e+00> : vector<8x8xf32>
    %185 = tpu.matmul %184, %173, %cst_83 {dimension_numbers = #tpu.dot_dimension_numbers<[1], [0], [0], [1], [0, 0, 1, 1], [], []>} : vector<8x8xf32>, vector<8x8xf32>, vector<8x8xf32> -> vector<8x8xf32>
    %186 = vector.extract_strided_slice %153 {offsets = [8, 0], sizes = [8, 16], strides = [1, 1]} : vector<16x16xf32> to vector<8x16xf32>
    %cst_84 = arith.constant dense<0.000000e+00> : vector<8x16xf32>
    %187 = tpu.matmul %185, %186, %cst_84 {dimension_numbers = #tpu.dot_dimension_numbers<[1], [0], [0], [1], [0, 0, 1, 1], [], []>} : vector<8x8xf32>, vector<8x16xf32>, vector<8x16xf32> -> vector<8x16xf32>
    %188 = arith.addf %170, %187 : vector<8x16xf32>
    %c1_85 = arith.constant 1 : index
    %c0_86 = arith.constant 0 : index
    %c0_87 = arith.constant 0 : index
    %189 = vector.load %arg5[%c1_85, %c0_86, %c0_87] : memref<10x1x16xf32, #tpu.memory_space<vmem>>, vector<1x1x16xf32>
    %190 = vector.shape_cast %189 : vector<1x1x16xf32> to vector<1x16xf32>
    %191 = vector.broadcast %190 : vector<1x16xf32> to vector<8x16xf32>
    %192 = arith.addf %188, %191 : vector<8x16xf32>
    %193 = arith.addf %192, %148 : vector<8x16xf32>
    %cst_88 = arith.constant dense<0.000000e+00> : vector<8xf32>
    %194 = vector.multi_reduction <add>, %193, %cst_88 [1] : vector<8x16xf32> to vector<8xf32>
    %195 = vector.shape_cast %194 : vector<8xf32> to vector<8x1xf32>
    %cst_89 = arith.constant 1.600000e+01 : f32
    %196 = vector.broadcast %cst_89 : f32 to vector<8x1xf32>
    %197 = arith.divf %195, %196 : vector<8x1xf32>
    %198 = vector.broadcast %197 : vector<8x1xf32> to vector<8x16xf32>
    %199 = arith.subf %193, %198 : vector<8x16xf32>
    %200 = arith.mulf %199, %199 : vector<8x16xf32>
    %cst_90 = arith.constant dense<0.000000e+00> : vector<8xf32>
    %201 = vector.multi_reduction <add>, %200, %cst_90 [1] : vector<8x16xf32> to vector<8xf32>
    %202 = vector.shape_cast %201 : vector<8xf32> to vector<8x1xf32>
    %cst_91 = arith.constant 1.600000e+01 : f32
    %203 = vector.broadcast %cst_91 : f32 to vector<8x1xf32>
    %204 = arith.divf %202, %203 : vector<8x1xf32>
    %cst_92 = arith.constant 9.99999974E-6 : f32
    %205 = vector.broadcast %cst_92 : f32 to vector<8x1xf32>
    %206 = arith.addf %204, %205 : vector<8x1xf32>
    %207 = math.rsqrt %206 : vector<8x1xf32>
    %208 = vector.broadcast %207 : vector<8x1xf32> to vector<8x16xf32>
    %209 = arith.mulf %199, %208 : vector<8x16xf32>
    %210 = vector.broadcast %7 : vector<1x16xf32> to vector<8x16xf32>
    %211 = arith.mulf %209, %210 : vector<8x16xf32>
    %212 = vector.broadcast %9 : vector<1x16xf32> to vector<8x16xf32>
    %213 = arith.addf %211, %212 : vector<8x16xf32>
    %c1_93 = arith.constant 1 : index
    %c0_94 = arith.constant 0 : index
    %c0_95 = arith.constant 0 : index
    %214 = vector.load %arg6[%c1_93, %c0_94, %c0_95] : memref<10x16x32xf32, #tpu.memory_space<vmem>>, vector<1x16x32xf32>
    %215 = vector.shape_cast %214 : vector<1x16x32xf32> to vector<16x32xf32>
    %cst_96 = arith.constant dense<0.000000e+00> : vector<8x32xf32>
    %216 = tpu.matmul %213, %215, %cst_96 {dimension_numbers = #tpu.dot_dimension_numbers<[1], [0], [0], [1], [0, 0, 1, 1], [], []>} : vector<8x16xf32>, vector<16x32xf32>, vector<8x32xf32> -> vector<8x32xf32>
    %c1_97 = arith.constant 1 : index
    %c0_98 = arith.constant 0 : index
    %c0_99 = arith.constant 0 : index
    %217 = vector.load %arg7[%c1_97, %c0_98, %c0_99] : memref<10x1x32xf32, #tpu.memory_space<vmem>>, vector<1x1x32xf32>
    %218 = vector.shape_cast %217 : vector<1x1x32xf32> to vector<1x32xf32>
    %219 = vector.broadcast %218 : vector<1x32xf32> to vector<8x32xf32>
    %220 = arith.addf %216, %219 : vector<8x32xf32>
    %cst_100 = arith.constant 5.000000e-01 : f32
    %221 = vector.broadcast %cst_100 : f32 to vector<8x32xf32>
    %222 = arith.mulf %221, %220 : vector<8x32xf32>
    %cst_101 = arith.constant 0.707106769 : f32
    %223 = vector.broadcast %cst_101 : f32 to vector<8x32xf32>
    %224 = arith.mulf %220, %223 : vector<8x32xf32>
    %225 = math.absf %224 : vector<8x32xf32>
    %cst_102 = arith.constant 0.327591091 : f32
    %226 = vector.broadcast %cst_102 : f32 to vector<8x32xf32>
    %227 = arith.mulf %226, %225 : vector<8x32xf32>
    %cst_103 = arith.constant 1.000000e+00 : f32
    %228 = vector.broadcast %cst_103 : f32 to vector<8x32xf32>
    %229 = arith.addf %228, %227 : vector<8x32xf32>
    %230 = tpu.reciprocal %229 {approx = true} : vector<8x32xf32> -> vector<8x32xf32>
    %cst_104 = arith.constant 1.06140542 : f32
    %231 = vector.broadcast %cst_104 : f32 to vector<8x32xf32>
    %232 = arith.mulf %231, %230 : vector<8x32xf32>
    %cst_105 = arith.constant -1.45315206 : f32
    %233 = vector.broadcast %cst_105 : f32 to vector<8x32xf32>
    %234 = arith.addf %232, %233 : vector<8x32xf32>
    %235 = arith.mulf %234, %230 : vector<8x32xf32>
    %cst_106 = arith.constant 1.42141378 : f32
    %236 = vector.broadcast %cst_106 : f32 to vector<8x32xf32>
    %237 = arith.addf %235, %236 : vector<8x32xf32>
    %238 = arith.mulf %237, %230 : vector<8x32xf32>
    %cst_107 = arith.constant -0.284496725 : f32
    %239 = vector.broadcast %cst_107 : f32 to vector<8x32xf32>
    %240 = arith.addf %238, %239 : vector<8x32xf32>
    %241 = arith.mulf %240, %230 : vector<8x32xf32>
    %cst_108 = arith.constant 0.254829586 : f32
    %242 = vector.broadcast %cst_108 : f32 to vector<8x32xf32>
    %243 = arith.addf %241, %242 : vector<8x32xf32>
    %244 = arith.mulf %243, %230 : vector<8x32xf32>
    %cst_109 = arith.constant 0.000000e+00 : f32
    %245 = vector.broadcast %cst_109 : f32 to vector<8x32xf32>
    %246 = arith.subf %245, %225 : vector<8x32xf32>
    %247 = arith.mulf %246, %225 : vector<8x32xf32>
    %248 = math.exp %247 : vector<8x32xf32>
    %249 = arith.mulf %244, %248 : vector<8x32xf32>
    %cst_110 = arith.constant 1.000000e+00 : f32
    %250 = vector.broadcast %cst_110 : f32 to vector<8x32xf32>
    %251 = arith.subf %250, %249 : vector<8x32xf32>
    %cst_111 = arith.constant 0.000000e+00 : f32
    %252 = vector.broadcast %cst_111 : f32 to vector<8x32xf32>
    %253 = arith.cmpf oge, %224, %252 : vector<8x32xf32>
    %cst_112 = arith.constant 0.000000e+00 : f32
    %254 = vector.broadcast %cst_112 : f32 to vector<8x32xf32>
    %255 = arith.subf %254, %251 : vector<8x32xf32>
    %256 = arith.select %253, %251, %255 : vector<8x32xi1>, vector<8x32xf32>
    %cst_113 = arith.constant 1.000000e+00 : f32
    %257 = vector.broadcast %cst_113 : f32 to vector<8x32xf32>
    %258 = arith.addf %257, %256 : vector<8x32xf32>
    %259 = arith.mulf %222, %258 : vector<8x32xf32>
    %c1_114 = arith.constant 1 : index
    %c0_115 = arith.constant 0 : index
    %c0_116 = arith.constant 0 : index
    %260 = vector.load %arg8[%c1_114, %c0_115, %c0_116] : memref<10x32x16xf32, #tpu.memory_space<vmem>>, vector<1x32x16xf32>
    %261 = vector.shape_cast %260 : vector<1x32x16xf32> to vector<32x16xf32>
    %cst_117 = arith.constant dense<0.000000e+00> : vector<8x16xf32>
    %262 = tpu.matmul %259, %261, %cst_117 {dimension_numbers = #tpu.dot_dimension_numbers<[1], [0], [0], [1], [0, 0, 1, 1], [], []>} : vector<8x32xf32>, vector<32x16xf32>, vector<8x16xf32> -> vector<8x16xf32>
    %c1_118 = arith.constant 1 : index
    %c0_119 = arith.constant 0 : index
    %c0_120 = arith.constant 0 : index
    %263 = vector.load %arg9[%c1_118, %c0_119, %c0_120] : memref<10x1x16xf32, #tpu.memory_space<vmem>>, vector<1x1x16xf32>
    %264 = vector.shape_cast %263 : vector<1x1x16xf32> to vector<1x16xf32>
    %265 = vector.broadcast %264 : vector<1x16xf32> to vector<8x16xf32>
    %266 = arith.addf %262, %265 : vector<8x16xf32>
    %267 = arith.addf %266, %213 : vector<8x16xf32>
    %cst_121 = arith.constant dense<0.000000e+00> : vector<8xf32>
    %268 = vector.multi_reduction <add>, %267, %cst_121 [1] : vector<8x16xf32> to vector<8xf32>
    %269 = vector.shape_cast %268 : vector<8xf32> to vector<8x1xf32>
    %cst_122 = arith.constant 1.600000e+01 : f32
    %270 = vector.broadcast %cst_122 : f32 to vector<8x1xf32>
    %271 = arith.divf %269, %270 : vector<8x1xf32>
    %272 = vector.broadcast %271 : vector<8x1xf32> to vector<8x16xf32>
    %273 = arith.subf %267, %272 : vector<8x16xf32>
    %274 = arith.mulf %273, %273 : vector<8x16xf32>
    %cst_123 = arith.constant dense<0.000000e+00> : vector<8xf32>
    %275 = vector.multi_reduction <add>, %274, %cst_123 [1] : vector<8x16xf32> to vector<8xf32>
    %276 = vector.shape_cast %275 : vector<8xf32> to vector<8x1xf32>
    %cst_124 = arith.constant 1.600000e+01 : f32
    %277 = vector.broadcast %cst_124 : f32 to vector<8x1xf32>
    %278 = arith.divf %276, %277 : vector<8x1xf32>
    %cst_125 = arith.constant 9.99999974E-6 : f32
    %279 = vector.broadcast %cst_125 : f32 to vector<8x1xf32>
    %280 = arith.addf %278, %279 : vector<8x1xf32>
    %281 = math.rsqrt %280 : vector<8x1xf32>
    %282 = vector.broadcast %281 : vector<8x1xf32> to vector<8x16xf32>
    %283 = arith.mulf %273, %282 : vector<8x16xf32>
    %284 = vector.broadcast %7 : vector<1x16xf32> to vector<8x16xf32>
    %285 = arith.mulf %283, %284 : vector<8x16xf32>
    %286 = vector.broadcast %9 : vector<1x16xf32> to vector<8x16xf32>
    %287 = arith.addf %285, %286 : vector<8x16xf32>
    %c0_126 = arith.constant 0 : index
    %c0_127 = arith.constant 0 : index
    %288 = vector.load %arg12[%c0_126, %c0_127] : memref<32x16xf32, #tpu.memory_space<vmem>>, vector<32x16xf32>
    %c0_128 = arith.constant 0 : index
    %c0_129 = arith.constant 0 : index
    %289 = vector.load %arg13[%c0_128, %c0_129] : memref<1x16xf32, #tpu.memory_space<vmem>>, vector<1x16xf32>
    %290 = vector.extract_strided_slice %288 {offsets = [0, 0], sizes = [16, 16], strides = [1, 1]} : vector<32x16xf32> to vector<16x16xf32>
    %cst_130 = arith.constant dense<0.000000e+00> : vector<8x16xf32>
    %291 = tpu.matmul %5, %290, %cst_130 {dimension_numbers = #tpu.dot_dimension_numbers<[1], [0], [0], [1], [0, 0, 1, 1], [], []>} : vector<8x16xf32>, vector<16x16xf32>, vector<8x16xf32> -> vector<8x16xf32>
    %292 = vector.broadcast %289 : vector<1x16xf32> to vector<8x16xf32>
    %293 = arith.addf %292, %291 : vector<8x16xf32>
    %294 = vector.extract_strided_slice %288 {offsets = [16, 0], sizes = [16, 16], strides = [1, 1]} : vector<32x16xf32> to vector<16x16xf32>
    %cst_131 = arith.constant dense<0.000000e+00> : vector<8x16xf32>
    %295 = tpu.matmul %287, %294, %cst_131 {dimension_numbers = #tpu.dot_dimension_numbers<[1], [0], [0], [1], [0, 0, 1, 1], [], []>} : vector<8x16xf32>, vector<16x16xf32>, vector<8x16xf32> -> vector<8x16xf32>
    %296 = arith.addf %293, %295 : vector<8x16xf32>
    %c1_132 = arith.constant 1 : index
    %c0_133 = arith.constant 0 : index
    %c0_134 = arith.constant 0 : index
    %297 = vector.load %arg10[%c1_132, %c0_133, %c0_134] : memref<5x1x16xf32, #tpu.memory_space<vmem>>, vector<1x1x16xf32>
    %298 = vector.shape_cast %297 : vector<1x1x16xf32> to vector<1x16xf32>
    %c1_135 = arith.constant 1 : index
    %c0_136 = arith.constant 0 : index
    %c0_137 = arith.constant 0 : index
    %299 = vector.load %arg11[%c1_135, %c0_136, %c0_137] : memref<5x1x16xf32, #tpu.memory_space<vmem>>, vector<1x1x16xf32>
    %300 = vector.shape_cast %299 : vector<1x1x16xf32> to vector<1x16xf32>
    %c2 = arith.constant 2 : index
    %c0_138 = arith.constant 0 : index
    %c0_139 = arith.constant 0 : index
    %301 = vector.load %arg3[%c2, %c0_138, %c0_139] : memref<10x16x48xf32, #tpu.memory_space<vmem>>, vector<1x16x48xf32>
    %302 = vector.shape_cast %301 : vector<1x16x48xf32> to vector<16x48xf32>
    %cst_140 = arith.constant dense<0.000000e+00> : vector<8x48xf32>
    %303 = tpu.matmul %296, %302, %cst_140 {dimension_numbers = #tpu.dot_dimension_numbers<[1], [0], [0], [1], [0, 0, 1, 1], [], []>} : vector<8x16xf32>, vector<16x48xf32>, vector<8x48xf32> -> vector<8x48xf32>
    %c2_141 = arith.constant 2 : index
    %c0_142 = arith.constant 0 : index
    %c0_143 = arith.constant 0 : index
    %304 = vector.load %arg4[%c2_141, %c0_142, %c0_143] : memref<10x16x16xf32, #tpu.memory_space<vmem>>, vector<1x16x16xf32>
    %305 = vector.shape_cast %304 : vector<1x16x16xf32> to vector<16x16xf32>
    %306 = vector.extract_strided_slice %303 {offsets = [0, 0], sizes = [8, 8], strides = [1, 1]} : vector<8x48xf32> to vector<8x8xf32>
    %307 = vector.extract_strided_slice %303 {offsets = [0, 16], sizes = [8, 8], strides = [1, 1]} : vector<8x48xf32> to vector<8x8xf32>
    %308 = vector.extract_strided_slice %303 {offsets = [0, 32], sizes = [8, 8], strides = [1, 1]} : vector<8x48xf32> to vector<8x8xf32>
    %cst_144 = arith.constant dense<0.000000e+00> : vector<8x8xf32>
    %309 = tpu.matmul %306, %307, %cst_144 {dimension_numbers = #tpu.dot_dimension_numbers<[1], [1], [0], [0], [0, 0, 1, 0], [], []>} : vector<8x8xf32>, vector<8x8xf32>, vector<8x8xf32> -> vector<8x8xf32>
    %cst_145 = arith.constant dense<0xFF800000> : vector<8xf32>
    %310 = vector.multi_reduction <maximumf>, %309, %cst_145 [1] : vector<8x8xf32> to vector<8xf32>
    %311 = vector.shape_cast %310 : vector<8xf32> to vector<8x1xf32>
    %312 = vector.broadcast %311 : vector<8x1xf32> to vector<8x8xf32>
    %313 = arith.subf %309, %312 : vector<8x8xf32>
    %314 = math.exp %313 : vector<8x8xf32>
    %cst_146 = arith.constant dense<0.000000e+00> : vector<8xf32>
    %315 = vector.multi_reduction <add>, %314, %cst_146 [1] : vector<8x8xf32> to vector<8xf32>
    %316 = vector.shape_cast %315 : vector<8xf32> to vector<8x1xf32>
    %317 = tpu.reciprocal %316 {approx = true} : vector<8x1xf32> -> vector<8x1xf32>
    %318 = vector.broadcast %317 : vector<8x1xf32> to vector<8x8xf32>
    %319 = arith.mulf %314, %318 : vector<8x8xf32>
    %cst_147 = arith.constant dense<0.000000e+00> : vector<8x8xf32>
    %320 = tpu.matmul %319, %308, %cst_147 {dimension_numbers = #tpu.dot_dimension_numbers<[1], [0], [0], [1], [0, 0, 1, 1], [], []>} : vector<8x8xf32>, vector<8x8xf32>, vector<8x8xf32> -> vector<8x8xf32>
    %321 = vector.extract_strided_slice %305 {offsets = [0, 0], sizes = [8, 16], strides = [1, 1]} : vector<16x16xf32> to vector<8x16xf32>
    %cst_148 = arith.constant dense<0.000000e+00> : vector<8x16xf32>
    %322 = tpu.matmul %320, %321, %cst_148 {dimension_numbers = #tpu.dot_dimension_numbers<[1], [0], [0], [1], [0, 0, 1, 1], [], []>} : vector<8x8xf32>, vector<8x16xf32>, vector<8x16xf32> -> vector<8x16xf32>
    %323 = vector.extract_strided_slice %303 {offsets = [0, 8], sizes = [8, 8], strides = [1, 1]} : vector<8x48xf32> to vector<8x8xf32>
    %324 = vector.extract_strided_slice %303 {offsets = [0, 24], sizes = [8, 8], strides = [1, 1]} : vector<8x48xf32> to vector<8x8xf32>
    %325 = vector.extract_strided_slice %303 {offsets = [0, 40], sizes = [8, 8], strides = [1, 1]} : vector<8x48xf32> to vector<8x8xf32>
    %cst_149 = arith.constant dense<0.000000e+00> : vector<8x8xf32>
    %326 = tpu.matmul %323, %324, %cst_149 {dimension_numbers = #tpu.dot_dimension_numbers<[1], [1], [0], [0], [0, 0, 1, 0], [], []>} : vector<8x8xf32>, vector<8x8xf32>, vector<8x8xf32> -> vector<8x8xf32>
    %cst_150 = arith.constant dense<0xFF800000> : vector<8xf32>
    %327 = vector.multi_reduction <maximumf>, %326, %cst_150 [1] : vector<8x8xf32> to vector<8xf32>
    %328 = vector.shape_cast %327 : vector<8xf32> to vector<8x1xf32>
    %329 = vector.broadcast %328 : vector<8x1xf32> to vector<8x8xf32>
    %330 = arith.subf %326, %329 : vector<8x8xf32>
    %331 = math.exp %330 : vector<8x8xf32>
    %cst_151 = arith.constant dense<0.000000e+00> : vector<8xf32>
    %332 = vector.multi_reduction <add>, %331, %cst_151 [1] : vector<8x8xf32> to vector<8xf32>
    %333 = vector.shape_cast %332 : vector<8xf32> to vector<8x1xf32>
    %334 = tpu.reciprocal %333 {approx = true} : vector<8x1xf32> -> vector<8x1xf32>
    %335 = vector.broadcast %334 : vector<8x1xf32> to vector<8x8xf32>
    %336 = arith.mulf %331, %335 : vector<8x8xf32>
    %cst_152 = arith.constant dense<0.000000e+00> : vector<8x8xf32>
    %337 = tpu.matmul %336, %325, %cst_152 {dimension_numbers = #tpu.dot_dimension_numbers<[1], [0], [0], [1], [0, 0, 1, 1], [], []>} : vector<8x8xf32>, vector<8x8xf32>, vector<8x8xf32> -> vector<8x8xf32>
    %338 = vector.extract_strided_slice %305 {offsets = [8, 0], sizes = [8, 16], strides = [1, 1]} : vector<16x16xf32> to vector<8x16xf32>
    %cst_153 = arith.constant dense<0.000000e+00> : vector<8x16xf32>
    %339 = tpu.matmul %337, %338, %cst_153 {dimension_numbers = #tpu.dot_dimension_numbers<[1], [0], [0], [1], [0, 0, 1, 1], [], []>} : vector<8x8xf32>, vector<8x16xf32>, vector<8x16xf32> -> vector<8x16xf32>
    %340 = arith.addf %322, %339 : vector<8x16xf32>
    %c2_154 = arith.constant 2 : index
    %c0_155 = arith.constant 0 : index
    %c0_156 = arith.constant 0 : index
    %341 = vector.load %arg5[%c2_154, %c0_155, %c0_156] : memref<10x1x16xf32, #tpu.memory_space<vmem>>, vector<1x1x16xf32>
    %342 = vector.shape_cast %341 : vector<1x1x16xf32> to vector<1x16xf32>
    %343 = vector.broadcast %342 : vector<1x16xf32> to vector<8x16xf32>
    %344 = arith.addf %340, %343 : vector<8x16xf32>
    %345 = arith.addf %344, %296 : vector<8x16xf32>
    %cst_157 = arith.constant dense<0.000000e+00> : vector<8xf32>
    %346 = vector.multi_reduction <add>, %345, %cst_157 [1] : vector<8x16xf32> to vector<8xf32>
    %347 = vector.shape_cast %346 : vector<8xf32> to vector<8x1xf32>
    %cst_158 = arith.constant 1.600000e+01 : f32
    %348 = vector.broadcast %cst_158 : f32 to vector<8x1xf32>
    %349 = arith.divf %347, %348 : vector<8x1xf32>
    %350 = vector.broadcast %349 : vector<8x1xf32> to vector<8x16xf32>
    %351 = arith.subf %345, %350 : vector<8x16xf32>
    %352 = arith.mulf %351, %351 : vector<8x16xf32>
    %cst_159 = arith.constant dense<0.000000e+00> : vector<8xf32>
    %353 = vector.multi_reduction <add>, %352, %cst_159 [1] : vector<8x16xf32> to vector<8xf32>
    %354 = vector.shape_cast %353 : vector<8xf32> to vector<8x1xf32>
    %cst_160 = arith.constant 1.600000e+01 : f32
    %355 = vector.broadcast %cst_160 : f32 to vector<8x1xf32>
    %356 = arith.divf %354, %355 : vector<8x1xf32>
    %cst_161 = arith.constant 9.99999974E-6 : f32
    %357 = vector.broadcast %cst_161 : f32 to vector<8x1xf32>
    %358 = arith.addf %356, %357 : vector<8x1xf32>
    %359 = math.rsqrt %358 : vector<8x1xf32>
    %360 = vector.broadcast %359 : vector<8x1xf32> to vector<8x16xf32>
    %361 = arith.mulf %351, %360 : vector<8x16xf32>
    %362 = vector.broadcast %298 : vector<1x16xf32> to vector<8x16xf32>
    %363 = arith.mulf %361, %362 : vector<8x16xf32>
    %364 = vector.broadcast %300 : vector<1x16xf32> to vector<8x16xf32>
    %365 = arith.addf %363, %364 : vector<8x16xf32>
    %c2_162 = arith.constant 2 : index
    %c0_163 = arith.constant 0 : index
    %c0_164 = arith.constant 0 : index
    %366 = vector.load %arg6[%c2_162, %c0_163, %c0_164] : memref<10x16x32xf32, #tpu.memory_space<vmem>>, vector<1x16x32xf32>
    %367 = vector.shape_cast %366 : vector<1x16x32xf32> to vector<16x32xf32>
    %cst_165 = arith.constant dense<0.000000e+00> : vector<8x32xf32>
    %368 = tpu.matmul %365, %367, %cst_165 {dimension_numbers = #tpu.dot_dimension_numbers<[1], [0], [0], [1], [0, 0, 1, 1], [], []>} : vector<8x16xf32>, vector<16x32xf32>, vector<8x32xf32> -> vector<8x32xf32>
    %c2_166 = arith.constant 2 : index
    %c0_167 = arith.constant 0 : index
    %c0_168 = arith.constant 0 : index
    %369 = vector.load %arg7[%c2_166, %c0_167, %c0_168] : memref<10x1x32xf32, #tpu.memory_space<vmem>>, vector<1x1x32xf32>
    %370 = vector.shape_cast %369 : vector<1x1x32xf32> to vector<1x32xf32>
    %371 = vector.broadcast %370 : vector<1x32xf32> to vector<8x32xf32>
    %372 = arith.addf %368, %371 : vector<8x32xf32>
    %cst_169 = arith.constant 5.000000e-01 : f32
    %373 = vector.broadcast %cst_169 : f32 to vector<8x32xf32>
    %374 = arith.mulf %373, %372 : vector<8x32xf32>
    %cst_170 = arith.constant 0.707106769 : f32
    %375 = vector.broadcast %cst_170 : f32 to vector<8x32xf32>
    %376 = arith.mulf %372, %375 : vector<8x32xf32>
    %377 = math.absf %376 : vector<8x32xf32>
    %cst_171 = arith.constant 0.327591091 : f32
    %378 = vector.broadcast %cst_171 : f32 to vector<8x32xf32>
    %379 = arith.mulf %378, %377 : vector<8x32xf32>
    %cst_172 = arith.constant 1.000000e+00 : f32
    %380 = vector.broadcast %cst_172 : f32 to vector<8x32xf32>
    %381 = arith.addf %380, %379 : vector<8x32xf32>
    %382 = tpu.reciprocal %381 {approx = true} : vector<8x32xf32> -> vector<8x32xf32>
    %cst_173 = arith.constant 1.06140542 : f32
    %383 = vector.broadcast %cst_173 : f32 to vector<8x32xf32>
    %384 = arith.mulf %383, %382 : vector<8x32xf32>
    %cst_174 = arith.constant -1.45315206 : f32
    %385 = vector.broadcast %cst_174 : f32 to vector<8x32xf32>
    %386 = arith.addf %384, %385 : vector<8x32xf32>
    %387 = arith.mulf %386, %382 : vector<8x32xf32>
    %cst_175 = arith.constant 1.42141378 : f32
    %388 = vector.broadcast %cst_175 : f32 to vector<8x32xf32>
    %389 = arith.addf %387, %388 : vector<8x32xf32>
    %390 = arith.mulf %389, %382 : vector<8x32xf32>
    %cst_176 = arith.constant -0.284496725 : f32
    %391 = vector.broadcast %cst_176 : f32 to vector<8x32xf32>
    %392 = arith.addf %390, %391 : vector<8x32xf32>
    %393 = arith.mulf %392, %382 : vector<8x32xf32>
    %cst_177 = arith.constant 0.254829586 : f32
    %394 = vector.broadcast %cst_177 : f32 to vector<8x32xf32>
    %395 = arith.addf %393, %394 : vector<8x32xf32>
    %396 = arith.mulf %395, %382 : vector<8x32xf32>
    %cst_178 = arith.constant 0.000000e+00 : f32
    %397 = vector.broadcast %cst_178 : f32 to vector<8x32xf32>
    %398 = arith.subf %397, %377 : vector<8x32xf32>
    %399 = arith.mulf %398, %377 : vector<8x32xf32>
    %400 = math.exp %399 : vector<8x32xf32>
    %401 = arith.mulf %396, %400 : vector<8x32xf32>
    %cst_179 = arith.constant 1.000000e+00 : f32
    %402 = vector.broadcast %cst_179 : f32 to vector<8x32xf32>
    %403 = arith.subf %402, %401 : vector<8x32xf32>
    %cst_180 = arith.constant 0.000000e+00 : f32
    %404 = vector.broadcast %cst_180 : f32 to vector<8x32xf32>
    %405 = arith.cmpf oge, %376, %404 : vector<8x32xf32>
    %cst_181 = arith.constant 0.000000e+00 : f32
    %406 = vector.broadcast %cst_181 : f32 to vector<8x32xf32>
    %407 = arith.subf %406, %403 : vector<8x32xf32>
    %408 = arith.select %405, %403, %407 : vector<8x32xi1>, vector<8x32xf32>
    %cst_182 = arith.constant 1.000000e+00 : f32
    %409 = vector.broadcast %cst_182 : f32 to vector<8x32xf32>
    %410 = arith.addf %409, %408 : vector<8x32xf32>
    %411 = arith.mulf %374, %410 : vector<8x32xf32>
    %c2_183 = arith.constant 2 : index
    %c0_184 = arith.constant 0 : index
    %c0_185 = arith.constant 0 : index
    %412 = vector.load %arg8[%c2_183, %c0_184, %c0_185] : memref<10x32x16xf32, #tpu.memory_space<vmem>>, vector<1x32x16xf32>
    %413 = vector.shape_cast %412 : vector<1x32x16xf32> to vector<32x16xf32>
    %cst_186 = arith.constant dense<0.000000e+00> : vector<8x16xf32>
    %414 = tpu.matmul %411, %413, %cst_186 {dimension_numbers = #tpu.dot_dimension_numbers<[1], [0], [0], [1], [0, 0, 1, 1], [], []>} : vector<8x32xf32>, vector<32x16xf32>, vector<8x16xf32> -> vector<8x16xf32>
    %c2_187 = arith.constant 2 : index
    %c0_188 = arith.constant 0 : index
    %c0_189 = arith.constant 0 : index
    %415 = vector.load %arg9[%c2_187, %c0_188, %c0_189] : memref<10x1x16xf32, #tpu.memory_space<vmem>>, vector<1x1x16xf32>
    %416 = vector.shape_cast %415 : vector<1x1x16xf32> to vector<1x16xf32>
    %417 = vector.broadcast %416 : vector<1x16xf32> to vector<8x16xf32>
    %418 = arith.addf %414, %417 : vector<8x16xf32>
    %419 = arith.addf %418, %365 : vector<8x16xf32>
    %cst_190 = arith.constant dense<0.000000e+00> : vector<8xf32>
    %420 = vector.multi_reduction <add>, %419, %cst_190 [1] : vector<8x16xf32> to vector<8xf32>
    %421 = vector.shape_cast %420 : vector<8xf32> to vector<8x1xf32>
    %cst_191 = arith.constant 1.600000e+01 : f32
    %422 = vector.broadcast %cst_191 : f32 to vector<8x1xf32>
    %423 = arith.divf %421, %422 : vector<8x1xf32>
    %424 = vector.broadcast %423 : vector<8x1xf32> to vector<8x16xf32>
    %425 = arith.subf %419, %424 : vector<8x16xf32>
    %426 = arith.mulf %425, %425 : vector<8x16xf32>
    %cst_192 = arith.constant dense<0.000000e+00> : vector<8xf32>
    %427 = vector.multi_reduction <add>, %426, %cst_192 [1] : vector<8x16xf32> to vector<8xf32>
    %428 = vector.shape_cast %427 : vector<8xf32> to vector<8x1xf32>
    %cst_193 = arith.constant 1.600000e+01 : f32
    %429 = vector.broadcast %cst_193 : f32 to vector<8x1xf32>
    %430 = arith.divf %428, %429 : vector<8x1xf32>
    %cst_194 = arith.constant 9.99999974E-6 : f32
    %431 = vector.broadcast %cst_194 : f32 to vector<8x1xf32>
    %432 = arith.addf %430, %431 : vector<8x1xf32>
    %433 = math.rsqrt %432 : vector<8x1xf32>
    %434 = vector.broadcast %433 : vector<8x1xf32> to vector<8x16xf32>
    %435 = arith.mulf %425, %434 : vector<8x16xf32>
    %436 = vector.broadcast %298 : vector<1x16xf32> to vector<8x16xf32>
    %437 = arith.mulf %435, %436 : vector<8x16xf32>
    %438 = vector.broadcast %300 : vector<1x16xf32> to vector<8x16xf32>
    %439 = arith.addf %437, %438 : vector<8x16xf32>
    %c3 = arith.constant 3 : index
    %c0_195 = arith.constant 0 : index
    %c0_196 = arith.constant 0 : index
    %440 = vector.load %arg3[%c3, %c0_195, %c0_196] : memref<10x16x48xf32, #tpu.memory_space<vmem>>, vector<1x16x48xf32>
    %441 = vector.shape_cast %440 : vector<1x16x48xf32> to vector<16x48xf32>
    %cst_197 = arith.constant dense<0.000000e+00> : vector<8x48xf32>
    %442 = tpu.matmul %439, %441, %cst_197 {dimension_numbers = #tpu.dot_dimension_numbers<[1], [0], [0], [1], [0, 0, 1, 1], [], []>} : vector<8x16xf32>, vector<16x48xf32>, vector<8x48xf32> -> vector<8x48xf32>
    %c3_198 = arith.constant 3 : index
    %c0_199 = arith.constant 0 : index
    %c0_200 = arith.constant 0 : index
    %443 = vector.load %arg4[%c3_198, %c0_199, %c0_200] : memref<10x16x16xf32, #tpu.memory_space<vmem>>, vector<1x16x16xf32>
    %444 = vector.shape_cast %443 : vector<1x16x16xf32> to vector<16x16xf32>
    %445 = vector.extract_strided_slice %442 {offsets = [0, 0], sizes = [8, 8], strides = [1, 1]} : vector<8x48xf32> to vector<8x8xf32>
    %446 = vector.extract_strided_slice %442 {offsets = [0, 16], sizes = [8, 8], strides = [1, 1]} : vector<8x48xf32> to vector<8x8xf32>
    %447 = vector.extract_strided_slice %442 {offsets = [0, 32], sizes = [8, 8], strides = [1, 1]} : vector<8x48xf32> to vector<8x8xf32>
    %cst_201 = arith.constant dense<0.000000e+00> : vector<8x8xf32>
    %448 = tpu.matmul %445, %446, %cst_201 {dimension_numbers = #tpu.dot_dimension_numbers<[1], [1], [0], [0], [0, 0, 1, 0], [], []>} : vector<8x8xf32>, vector<8x8xf32>, vector<8x8xf32> -> vector<8x8xf32>
    %cst_202 = arith.constant dense<0xFF800000> : vector<8xf32>
    %449 = vector.multi_reduction <maximumf>, %448, %cst_202 [1] : vector<8x8xf32> to vector<8xf32>
    %450 = vector.shape_cast %449 : vector<8xf32> to vector<8x1xf32>
    %451 = vector.broadcast %450 : vector<8x1xf32> to vector<8x8xf32>
    %452 = arith.subf %448, %451 : vector<8x8xf32>
    %453 = math.exp %452 : vector<8x8xf32>
    %cst_203 = arith.constant dense<0.000000e+00> : vector<8xf32>
    %454 = vector.multi_reduction <add>, %453, %cst_203 [1] : vector<8x8xf32> to vector<8xf32>
    %455 = vector.shape_cast %454 : vector<8xf32> to vector<8x1xf32>
    %456 = tpu.reciprocal %455 {approx = true} : vector<8x1xf32> -> vector<8x1xf32>
    %457 = vector.broadcast %456 : vector<8x1xf32> to vector<8x8xf32>
    %458 = arith.mulf %453, %457 : vector<8x8xf32>
    %cst_204 = arith.constant dense<0.000000e+00> : vector<8x8xf32>
    %459 = tpu.matmul %458, %447, %cst_204 {dimension_numbers = #tpu.dot_dimension_numbers<[1], [0], [0], [1], [0, 0, 1, 1], [], []>} : vector<8x8xf32>, vector<8x8xf32>, vector<8x8xf32> -> vector<8x8xf32>
    %460 = vector.extract_strided_slice %444 {offsets = [0, 0], sizes = [8, 16], strides = [1, 1]} : vector<16x16xf32> to vector<8x16xf32>
    %cst_205 = arith.constant dense<0.000000e+00> : vector<8x16xf32>
    %461 = tpu.matmul %459, %460, %cst_205 {dimension_numbers = #tpu.dot_dimension_numbers<[1], [0], [0], [1], [0, 0, 1, 1], [], []>} : vector<8x8xf32>, vector<8x16xf32>, vector<8x16xf32> -> vector<8x16xf32>
    %462 = vector.extract_strided_slice %442 {offsets = [0, 8], sizes = [8, 8], strides = [1, 1]} : vector<8x48xf32> to vector<8x8xf32>
    %463 = vector.extract_strided_slice %442 {offsets = [0, 24], sizes = [8, 8], strides = [1, 1]} : vector<8x48xf32> to vector<8x8xf32>
    %464 = vector.extract_strided_slice %442 {offsets = [0, 40], sizes = [8, 8], strides = [1, 1]} : vector<8x48xf32> to vector<8x8xf32>
    %cst_206 = arith.constant dense<0.000000e+00> : vector<8x8xf32>
    %465 = tpu.matmul %462, %463, %cst_206 {dimension_numbers = #tpu.dot_dimension_numbers<[1], [1], [0], [0], [0, 0, 1, 0], [], []>} : vector<8x8xf32>, vector<8x8xf32>, vector<8x8xf32> -> vector<8x8xf32>
    %cst_207 = arith.constant dense<0xFF800000> : vector<8xf32>
    %466 = vector.multi_reduction <maximumf>, %465, %cst_207 [1] : vector<8x8xf32> to vector<8xf32>
    %467 = vector.shape_cast %466 : vector<8xf32> to vector<8x1xf32>
    %468 = vector.broadcast %467 : vector<8x1xf32> to vector<8x8xf32>
    %469 = arith.subf %465, %468 : vector<8x8xf32>
    %470 = math.exp %469 : vector<8x8xf32>
    %cst_208 = arith.constant dense<0.000000e+00> : vector<8xf32>
    %471 = vector.multi_reduction <add>, %470, %cst_208 [1] : vector<8x8xf32> to vector<8xf32>
    %472 = vector.shape_cast %471 : vector<8xf32> to vector<8x1xf32>
    %473 = tpu.reciprocal %472 {approx = true} : vector<8x1xf32> -> vector<8x1xf32>
    %474 = vector.broadcast %473 : vector<8x1xf32> to vector<8x8xf32>
    %475 = arith.mulf %470, %474 : vector<8x8xf32>
    %cst_209 = arith.constant dense<0.000000e+00> : vector<8x8xf32>
    %476 = tpu.matmul %475, %464, %cst_209 {dimension_numbers = #tpu.dot_dimension_numbers<[1], [0], [0], [1], [0, 0, 1, 1], [], []>} : vector<8x8xf32>, vector<8x8xf32>, vector<8x8xf32> -> vector<8x8xf32>
    %477 = vector.extract_strided_slice %444 {offsets = [8, 0], sizes = [8, 16], strides = [1, 1]} : vector<16x16xf32> to vector<8x16xf32>
    %cst_210 = arith.constant dense<0.000000e+00> : vector<8x16xf32>
    %478 = tpu.matmul %476, %477, %cst_210 {dimension_numbers = #tpu.dot_dimension_numbers<[1], [0], [0], [1], [0, 0, 1, 1], [], []>} : vector<8x8xf32>, vector<8x16xf32>, vector<8x16xf32> -> vector<8x16xf32>
    %479 = arith.addf %461, %478 : vector<8x16xf32>
    %c3_211 = arith.constant 3 : index
    %c0_212 = arith.constant 0 : index
    %c0_213 = arith.constant 0 : index
    %480 = vector.load %arg5[%c3_211, %c0_212, %c0_213] : memref<10x1x16xf32, #tpu.memory_space<vmem>>, vector<1x1x16xf32>
    %481 = vector.shape_cast %480 : vector<1x1x16xf32> to vector<1x16xf32>
    %482 = vector.broadcast %481 : vector<1x16xf32> to vector<8x16xf32>
    %483 = arith.addf %479, %482 : vector<8x16xf32>
    %484 = arith.addf %483, %439 : vector<8x16xf32>
    %cst_214 = arith.constant dense<0.000000e+00> : vector<8xf32>
    %485 = vector.multi_reduction <add>, %484, %cst_214 [1] : vector<8x16xf32> to vector<8xf32>
    %486 = vector.shape_cast %485 : vector<8xf32> to vector<8x1xf32>
    %cst_215 = arith.constant 1.600000e+01 : f32
    %487 = vector.broadcast %cst_215 : f32 to vector<8x1xf32>
    %488 = arith.divf %486, %487 : vector<8x1xf32>
    %489 = vector.broadcast %488 : vector<8x1xf32> to vector<8x16xf32>
    %490 = arith.subf %484, %489 : vector<8x16xf32>
    %491 = arith.mulf %490, %490 : vector<8x16xf32>
    %cst_216 = arith.constant dense<0.000000e+00> : vector<8xf32>
    %492 = vector.multi_reduction <add>, %491, %cst_216 [1] : vector<8x16xf32> to vector<8xf32>
    %493 = vector.shape_cast %492 : vector<8xf32> to vector<8x1xf32>
    %cst_217 = arith.constant 1.600000e+01 : f32
    %494 = vector.broadcast %cst_217 : f32 to vector<8x1xf32>
    %495 = arith.divf %493, %494 : vector<8x1xf32>
    %cst_218 = arith.constant 9.99999974E-6 : f32
    %496 = vector.broadcast %cst_218 : f32 to vector<8x1xf32>
    %497 = arith.addf %495, %496 : vector<8x1xf32>
    %498 = math.rsqrt %497 : vector<8x1xf32>
    %499 = vector.broadcast %498 : vector<8x1xf32> to vector<8x16xf32>
    %500 = arith.mulf %490, %499 : vector<8x16xf32>
    %501 = vector.broadcast %298 : vector<1x16xf32> to vector<8x16xf32>
    %502 = arith.mulf %500, %501 : vector<8x16xf32>
    %503 = vector.broadcast %300 : vector<1x16xf32> to vector<8x16xf32>
    %504 = arith.addf %502, %503 : vector<8x16xf32>
    %c3_219 = arith.constant 3 : index
    %c0_220 = arith.constant 0 : index
    %c0_221 = arith.constant 0 : index
    %505 = vector.load %arg6[%c3_219, %c0_220, %c0_221] : memref<10x16x32xf32, #tpu.memory_space<vmem>>, vector<1x16x32xf32>
    %506 = vector.shape_cast %505 : vector<1x16x32xf32> to vector<16x32xf32>
    %cst_222 = arith.constant dense<0.000000e+00> : vector<8x32xf32>
    %507 = tpu.matmul %504, %506, %cst_222 {dimension_numbers = #tpu.dot_dimension_numbers<[1], [0], [0], [1], [0, 0, 1, 1], [], []>} : vector<8x16xf32>, vector<16x32xf32>, vector<8x32xf32> -> vector<8x32xf32>
    %c3_223 = arith.constant 3 : index
    %c0_224 = arith.constant 0 : index
    %c0_225 = arith.constant 0 : index
    %508 = vector.load %arg7[%c3_223, %c0_224, %c0_225] : memref<10x1x32xf32, #tpu.memory_space<vmem>>, vector<1x1x32xf32>
    %509 = vector.shape_cast %508 : vector<1x1x32xf32> to vector<1x32xf32>
    %510 = vector.broadcast %509 : vector<1x32xf32> to vector<8x32xf32>
    %511 = arith.addf %507, %510 : vector<8x32xf32>
    %cst_226 = arith.constant 5.000000e-01 : f32
    %512 = vector.broadcast %cst_226 : f32 to vector<8x32xf32>
    %513 = arith.mulf %512, %511 : vector<8x32xf32>
    %cst_227 = arith.constant 0.707106769 : f32
    %514 = vector.broadcast %cst_227 : f32 to vector<8x32xf32>
    %515 = arith.mulf %511, %514 : vector<8x32xf32>
    %516 = math.absf %515 : vector<8x32xf32>
    %cst_228 = arith.constant 0.327591091 : f32
    %517 = vector.broadcast %cst_228 : f32 to vector<8x32xf32>
    %518 = arith.mulf %517, %516 : vector<8x32xf32>
    %cst_229 = arith.constant 1.000000e+00 : f32
    %519 = vector.broadcast %cst_229 : f32 to vector<8x32xf32>
    %520 = arith.addf %519, %518 : vector<8x32xf32>
    %521 = tpu.reciprocal %520 {approx = true} : vector<8x32xf32> -> vector<8x32xf32>
    %cst_230 = arith.constant 1.06140542 : f32
    %522 = vector.broadcast %cst_230 : f32 to vector<8x32xf32>
    %523 = arith.mulf %522, %521 : vector<8x32xf32>
    %cst_231 = arith.constant -1.45315206 : f32
    %524 = vector.broadcast %cst_231 : f32 to vector<8x32xf32>
    %525 = arith.addf %523, %524 : vector<8x32xf32>
    %526 = arith.mulf %525, %521 : vector<8x32xf32>
    %cst_232 = arith.constant 1.42141378 : f32
    %527 = vector.broadcast %cst_232 : f32 to vector<8x32xf32>
    %528 = arith.addf %526, %527 : vector<8x32xf32>
    %529 = arith.mulf %528, %521 : vector<8x32xf32>
    %cst_233 = arith.constant -0.284496725 : f32
    %530 = vector.broadcast %cst_233 : f32 to vector<8x32xf32>
    %531 = arith.addf %529, %530 : vector<8x32xf32>
    %532 = arith.mulf %531, %521 : vector<8x32xf32>
    %cst_234 = arith.constant 0.254829586 : f32
    %533 = vector.broadcast %cst_234 : f32 to vector<8x32xf32>
    %534 = arith.addf %532, %533 : vector<8x32xf32>
    %535 = arith.mulf %534, %521 : vector<8x32xf32>
    %cst_235 = arith.constant 0.000000e+00 : f32
    %536 = vector.broadcast %cst_235 : f32 to vector<8x32xf32>
    %537 = arith.subf %536, %516 : vector<8x32xf32>
    %538 = arith.mulf %537, %516 : vector<8x32xf32>
    %539 = math.exp %538 : vector<8x32xf32>
    %540 = arith.mulf %535, %539 : vector<8x32xf32>
    %cst_236 = arith.constant 1.000000e+00 : f32
    %541 = vector.broadcast %cst_236 : f32 to vector<8x32xf32>
    %542 = arith.subf %541, %540 : vector<8x32xf32>
    %cst_237 = arith.constant 0.000000e+00 : f32
    %543 = vector.broadcast %cst_237 : f32 to vector<8x32xf32>
    %544 = arith.cmpf oge, %515, %543 : vector<8x32xf32>
    %cst_238 = arith.constant 0.000000e+00 : f32
    %545 = vector.broadcast %cst_238 : f32 to vector<8x32xf32>
    %546 = arith.subf %545, %542 : vector<8x32xf32>
    %547 = arith.select %544, %542, %546 : vector<8x32xi1>, vector<8x32xf32>
    %cst_239 = arith.constant 1.000000e+00 : f32
    %548 = vector.broadcast %cst_239 : f32 to vector<8x32xf32>
    %549 = arith.addf %548, %547 : vector<8x32xf32>
    %550 = arith.mulf %513, %549 : vector<8x32xf32>
    %c3_240 = arith.constant 3 : index
    %c0_241 = arith.constant 0 : index
    %c0_242 = arith.constant 0 : index
    %551 = vector.load %arg8[%c3_240, %c0_241, %c0_242] : memref<10x32x16xf32, #tpu.memory_space<vmem>>, vector<1x32x16xf32>
    %552 = vector.shape_cast %551 : vector<1x32x16xf32> to vector<32x16xf32>
    %cst_243 = arith.constant dense<0.000000e+00> : vector<8x16xf32>
    %553 = tpu.matmul %550, %552, %cst_243 {dimension_numbers = #tpu.dot_dimension_numbers<[1], [0], [0], [1], [0, 0, 1, 1], [], []>} : vector<8x32xf32>, vector<32x16xf32>, vector<8x16xf32> -> vector<8x16xf32>
    %c3_244 = arith.constant 3 : index
    %c0_245 = arith.constant 0 : index
    %c0_246 = arith.constant 0 : index
    %554 = vector.load %arg9[%c3_244, %c0_245, %c0_246] : memref<10x1x16xf32, #tpu.memory_space<vmem>>, vector<1x1x16xf32>
    %555 = vector.shape_cast %554 : vector<1x1x16xf32> to vector<1x16xf32>
    %556 = vector.broadcast %555 : vector<1x16xf32> to vector<8x16xf32>
    %557 = arith.addf %553, %556 : vector<8x16xf32>
    %558 = arith.addf %557, %504 : vector<8x16xf32>
    %cst_247 = arith.constant dense<0.000000e+00> : vector<8xf32>
    %559 = vector.multi_reduction <add>, %558, %cst_247 [1] : vector<8x16xf32> to vector<8xf32>
    %560 = vector.shape_cast %559 : vector<8xf32> to vector<8x1xf32>
    %cst_248 = arith.constant 1.600000e+01 : f32
    %561 = vector.broadcast %cst_248 : f32 to vector<8x1xf32>
    %562 = arith.divf %560, %561 : vector<8x1xf32>
    %563 = vector.broadcast %562 : vector<8x1xf32> to vector<8x16xf32>
    %564 = arith.subf %558, %563 : vector<8x16xf32>
    %565 = arith.mulf %564, %564 : vector<8x16xf32>
    %cst_249 = arith.constant dense<0.000000e+00> : vector<8xf32>
    %566 = vector.multi_reduction <add>, %565, %cst_249 [1] : vector<8x16xf32> to vector<8xf32>
    %567 = vector.shape_cast %566 : vector<8xf32> to vector<8x1xf32>
    %cst_250 = arith.constant 1.600000e+01 : f32
    %568 = vector.broadcast %cst_250 : f32 to vector<8x1xf32>
    %569 = arith.divf %567, %568 : vector<8x1xf32>
    %cst_251 = arith.constant 9.99999974E-6 : f32
    %570 = vector.broadcast %cst_251 : f32 to vector<8x1xf32>
    %571 = arith.addf %569, %570 : vector<8x1xf32>
    %572 = math.rsqrt %571 : vector<8x1xf32>
    %573 = vector.broadcast %572 : vector<8x1xf32> to vector<8x16xf32>
    %574 = arith.mulf %564, %573 : vector<8x16xf32>
    %575 = vector.broadcast %298 : vector<1x16xf32> to vector<8x16xf32>
    %576 = arith.mulf %574, %575 : vector<8x16xf32>
    %577 = vector.broadcast %300 : vector<1x16xf32> to vector<8x16xf32>
    %578 = arith.addf %576, %577 : vector<8x16xf32>
    %c0_252 = arith.constant 0 : index
    %c0_253 = arith.constant 0 : index
    %579 = vector.load %arg14[%c0_252, %c0_253] : memref<48x16xf32, #tpu.memory_space<vmem>>, vector<48x16xf32>
    %c0_254 = arith.constant 0 : index
    %c0_255 = arith.constant 0 : index
    %580 = vector.load %arg15[%c0_254, %c0_255] : memref<1x16xf32, #tpu.memory_space<vmem>>, vector<1x16xf32>
    %581 = vector.extract_strided_slice %579 {offsets = [0, 0], sizes = [16, 16], strides = [1, 1]} : vector<48x16xf32> to vector<16x16xf32>
    %cst_256 = arith.constant dense<0.000000e+00> : vector<8x16xf32>
    %582 = tpu.matmul %5, %581, %cst_256 {dimension_numbers = #tpu.dot_dimension_numbers<[1], [0], [0], [1], [0, 0, 1, 1], [], []>} : vector<8x16xf32>, vector<16x16xf32>, vector<8x16xf32> -> vector<8x16xf32>
    %583 = vector.broadcast %580 : vector<1x16xf32> to vector<8x16xf32>
    %584 = arith.addf %583, %582 : vector<8x16xf32>
    %585 = vector.extract_strided_slice %579 {offsets = [16, 0], sizes = [16, 16], strides = [1, 1]} : vector<48x16xf32> to vector<16x16xf32>
    %cst_257 = arith.constant dense<0.000000e+00> : vector<8x16xf32>
    %586 = tpu.matmul %287, %585, %cst_257 {dimension_numbers = #tpu.dot_dimension_numbers<[1], [0], [0], [1], [0, 0, 1, 1], [], []>} : vector<8x16xf32>, vector<16x16xf32>, vector<8x16xf32> -> vector<8x16xf32>
    %587 = arith.addf %584, %586 : vector<8x16xf32>
    %588 = vector.extract_strided_slice %579 {offsets = [32, 0], sizes = [16, 16], strides = [1, 1]} : vector<48x16xf32> to vector<16x16xf32>
    %cst_258 = arith.constant dense<0.000000e+00> : vector<8x16xf32>
    %589 = tpu.matmul %578, %588, %cst_258 {dimension_numbers = #tpu.dot_dimension_numbers<[1], [0], [0], [1], [0, 0, 1, 1], [], []>} : vector<8x16xf32>, vector<16x16xf32>, vector<8x16xf32> -> vector<8x16xf32>
    %590 = arith.addf %587, %589 : vector<8x16xf32>
    %c2_259 = arith.constant 2 : index
    %c0_260 = arith.constant 0 : index
    %c0_261 = arith.constant 0 : index
    %591 = vector.load %arg10[%c2_259, %c0_260, %c0_261] : memref<5x1x16xf32, #tpu.memory_space<vmem>>, vector<1x1x16xf32>
    %592 = vector.shape_cast %591 : vector<1x1x16xf32> to vector<1x16xf32>
    %c2_262 = arith.constant 2 : index
    %c0_263 = arith.constant 0 : index
    %c0_264 = arith.constant 0 : index
    %593 = vector.load %arg11[%c2_262, %c0_263, %c0_264] : memref<5x1x16xf32, #tpu.memory_space<vmem>>, vector<1x1x16xf32>
    %594 = vector.shape_cast %593 : vector<1x1x16xf32> to vector<1x16xf32>
    %c4 = arith.constant 4 : index
    %c0_265 = arith.constant 0 : index
    %c0_266 = arith.constant 0 : index
    %595 = vector.load %arg3[%c4, %c0_265, %c0_266] : memref<10x16x48xf32, #tpu.memory_space<vmem>>, vector<1x16x48xf32>
    %596 = vector.shape_cast %595 : vector<1x16x48xf32> to vector<16x48xf32>
    %cst_267 = arith.constant dense<0.000000e+00> : vector<8x48xf32>
    %597 = tpu.matmul %590, %596, %cst_267 {dimension_numbers = #tpu.dot_dimension_numbers<[1], [0], [0], [1], [0, 0, 1, 1], [], []>} : vector<8x16xf32>, vector<16x48xf32>, vector<8x48xf32> -> vector<8x48xf32>
    %c4_268 = arith.constant 4 : index
    %c0_269 = arith.constant 0 : index
    %c0_270 = arith.constant 0 : index
    %598 = vector.load %arg4[%c4_268, %c0_269, %c0_270] : memref<10x16x16xf32, #tpu.memory_space<vmem>>, vector<1x16x16xf32>
    %599 = vector.shape_cast %598 : vector<1x16x16xf32> to vector<16x16xf32>
    %600 = vector.extract_strided_slice %597 {offsets = [0, 0], sizes = [8, 8], strides = [1, 1]} : vector<8x48xf32> to vector<8x8xf32>
    %601 = vector.extract_strided_slice %597 {offsets = [0, 16], sizes = [8, 8], strides = [1, 1]} : vector<8x48xf32> to vector<8x8xf32>
    %602 = vector.extract_strided_slice %597 {offsets = [0, 32], sizes = [8, 8], strides = [1, 1]} : vector<8x48xf32> to vector<8x8xf32>
    %cst_271 = arith.constant dense<0.000000e+00> : vector<8x8xf32>
    %603 = tpu.matmul %600, %601, %cst_271 {dimension_numbers = #tpu.dot_dimension_numbers<[1], [1], [0], [0], [0, 0, 1, 0], [], []>} : vector<8x8xf32>, vector<8x8xf32>, vector<8x8xf32> -> vector<8x8xf32>
    %cst_272 = arith.constant dense<0xFF800000> : vector<8xf32>
    %604 = vector.multi_reduction <maximumf>, %603, %cst_272 [1] : vector<8x8xf32> to vector<8xf32>
    %605 = vector.shape_cast %604 : vector<8xf32> to vector<8x1xf32>
    %606 = vector.broadcast %605 : vector<8x1xf32> to vector<8x8xf32>
    %607 = arith.subf %603, %606 : vector<8x8xf32>
    %608 = math.exp %607 : vector<8x8xf32>
    %cst_273 = arith.constant dense<0.000000e+00> : vector<8xf32>
    %609 = vector.multi_reduction <add>, %608, %cst_273 [1] : vector<8x8xf32> to vector<8xf32>
    %610 = vector.shape_cast %609 : vector<8xf32> to vector<8x1xf32>
    %611 = tpu.reciprocal %610 {approx = true} : vector<8x1xf32> -> vector<8x1xf32>
    %612 = vector.broadcast %611 : vector<8x1xf32> to vector<8x8xf32>
    %613 = arith.mulf %608, %612 : vector<8x8xf32>
    %cst_274 = arith.constant dense<0.000000e+00> : vector<8x8xf32>
    %614 = tpu.matmul %613, %602, %cst_274 {dimension_numbers = #tpu.dot_dimension_numbers<[1], [0], [0], [1], [0, 0, 1, 1], [], []>} : vector<8x8xf32>, vector<8x8xf32>, vector<8x8xf32> -> vector<8x8xf32>
    %615 = vector.extract_strided_slice %599 {offsets = [0, 0], sizes = [8, 16], strides = [1, 1]} : vector<16x16xf32> to vector<8x16xf32>
    %cst_275 = arith.constant dense<0.000000e+00> : vector<8x16xf32>
    %616 = tpu.matmul %614, %615, %cst_275 {dimension_numbers = #tpu.dot_dimension_numbers<[1], [0], [0], [1], [0, 0, 1, 1], [], []>} : vector<8x8xf32>, vector<8x16xf32>, vector<8x16xf32> -> vector<8x16xf32>
    %617 = vector.extract_strided_slice %597 {offsets = [0, 8], sizes = [8, 8], strides = [1, 1]} : vector<8x48xf32> to vector<8x8xf32>
    %618 = vector.extract_strided_slice %597 {offsets = [0, 24], sizes = [8, 8], strides = [1, 1]} : vector<8x48xf32> to vector<8x8xf32>
    %619 = vector.extract_strided_slice %597 {offsets = [0, 40], sizes = [8, 8], strides = [1, 1]} : vector<8x48xf32> to vector<8x8xf32>
    %cst_276 = arith.constant dense<0.000000e+00> : vector<8x8xf32>
    %620 = tpu.matmul %617, %618, %cst_276 {dimension_numbers = #tpu.dot_dimension_numbers<[1], [1], [0], [0], [0, 0, 1, 0], [], []>} : vector<8x8xf32>, vector<8x8xf32>, vector<8x8xf32> -> vector<8x8xf32>
    %cst_277 = arith.constant dense<0xFF800000> : vector<8xf32>
    %621 = vector.multi_reduction <maximumf>, %620, %cst_277 [1] : vector<8x8xf32> to vector<8xf32>
    %622 = vector.shape_cast %621 : vector<8xf32> to vector<8x1xf32>
    %623 = vector.broadcast %622 : vector<8x1xf32> to vector<8x8xf32>
    %624 = arith.subf %620, %623 : vector<8x8xf32>
    %625 = math.exp %624 : vector<8x8xf32>
    %cst_278 = arith.constant dense<0.000000e+00> : vector<8xf32>
    %626 = vector.multi_reduction <add>, %625, %cst_278 [1] : vector<8x8xf32> to vector<8xf32>
    %627 = vector.shape_cast %626 : vector<8xf32> to vector<8x1xf32>
    %628 = tpu.reciprocal %627 {approx = true} : vector<8x1xf32> -> vector<8x1xf32>
    %629 = vector.broadcast %628 : vector<8x1xf32> to vector<8x8xf32>
    %630 = arith.mulf %625, %629 : vector<8x8xf32>
    %cst_279 = arith.constant dense<0.000000e+00> : vector<8x8xf32>
    %631 = tpu.matmul %630, %619, %cst_279 {dimension_numbers = #tpu.dot_dimension_numbers<[1], [0], [0], [1], [0, 0, 1, 1], [], []>} : vector<8x8xf32>, vector<8x8xf32>, vector<8x8xf32> -> vector<8x8xf32>
    %632 = vector.extract_strided_slice %599 {offsets = [8, 0], sizes = [8, 16], strides = [1, 1]} : vector<16x16xf32> to vector<8x16xf32>
    %cst_280 = arith.constant dense<0.000000e+00> : vector<8x16xf32>
    %633 = tpu.matmul %631, %632, %cst_280 {dimension_numbers = #tpu.dot_dimension_numbers<[1], [0], [0], [1], [0, 0, 1, 1], [], []>} : vector<8x8xf32>, vector<8x16xf32>, vector<8x16xf32> -> vector<8x16xf32>
    %634 = arith.addf %616, %633 : vector<8x16xf32>
    %c4_281 = arith.constant 4 : index
    %c0_282 = arith.constant 0 : index
    %c0_283 = arith.constant 0 : index
    %635 = vector.load %arg5[%c4_281, %c0_282, %c0_283] : memref<10x1x16xf32, #tpu.memory_space<vmem>>, vector<1x1x16xf32>
    %636 = vector.shape_cast %635 : vector<1x1x16xf32> to vector<1x16xf32>
    %637 = vector.broadcast %636 : vector<1x16xf32> to vector<8x16xf32>
    %638 = arith.addf %634, %637 : vector<8x16xf32>
    %639 = arith.addf %638, %590 : vector<8x16xf32>
    %cst_284 = arith.constant dense<0.000000e+00> : vector<8xf32>
    %640 = vector.multi_reduction <add>, %639, %cst_284 [1] : vector<8x16xf32> to vector<8xf32>
    %641 = vector.shape_cast %640 : vector<8xf32> to vector<8x1xf32>
    %cst_285 = arith.constant 1.600000e+01 : f32
    %642 = vector.broadcast %cst_285 : f32 to vector<8x1xf32>
    %643 = arith.divf %641, %642 : vector<8x1xf32>
    %644 = vector.broadcast %643 : vector<8x1xf32> to vector<8x16xf32>
    %645 = arith.subf %639, %644 : vector<8x16xf32>
    %646 = arith.mulf %645, %645 : vector<8x16xf32>
    %cst_286 = arith.constant dense<0.000000e+00> : vector<8xf32>
    %647 = vector.multi_reduction <add>, %646, %cst_286 [1] : vector<8x16xf32> to vector<8xf32>
    %648 = vector.shape_cast %647 : vector<8xf32> to vector<8x1xf32>
    %cst_287 = arith.constant 1.600000e+01 : f32
    %649 = vector.broadcast %cst_287 : f32 to vector<8x1xf32>
    %650 = arith.divf %648, %649 : vector<8x1xf32>
    %cst_288 = arith.constant 9.99999974E-6 : f32
    %651 = vector.broadcast %cst_288 : f32 to vector<8x1xf32>
    %652 = arith.addf %650, %651 : vector<8x1xf32>
    %653 = math.rsqrt %652 : vector<8x1xf32>
    %654 = vector.broadcast %653 : vector<8x1xf32> to vector<8x16xf32>
    %655 = arith.mulf %645, %654 : vector<8x16xf32>
    %656 = vector.broadcast %592 : vector<1x16xf32> to vector<8x16xf32>
    %657 = arith.mulf %655, %656 : vector<8x16xf32>
    %658 = vector.broadcast %594 : vector<1x16xf32> to vector<8x16xf32>
    %659 = arith.addf %657, %658 : vector<8x16xf32>
    %c4_289 = arith.constant 4 : index
    %c0_290 = arith.constant 0 : index
    %c0_291 = arith.constant 0 : index
    %660 = vector.load %arg6[%c4_289, %c0_290, %c0_291] : memref<10x16x32xf32, #tpu.memory_space<vmem>>, vector<1x16x32xf32>
    %661 = vector.shape_cast %660 : vector<1x16x32xf32> to vector<16x32xf32>
    %cst_292 = arith.constant dense<0.000000e+00> : vector<8x32xf32>
    %662 = tpu.matmul %659, %661, %cst_292 {dimension_numbers = #tpu.dot_dimension_numbers<[1], [0], [0], [1], [0, 0, 1, 1], [], []>} : vector<8x16xf32>, vector<16x32xf32>, vector<8x32xf32> -> vector<8x32xf32>
    %c4_293 = arith.constant 4 : index
    %c0_294 = arith.constant 0 : index
    %c0_295 = arith.constant 0 : index
    %663 = vector.load %arg7[%c4_293, %c0_294, %c0_295] : memref<10x1x32xf32, #tpu.memory_space<vmem>>, vector<1x1x32xf32>
    %664 = vector.shape_cast %663 : vector<1x1x32xf32> to vector<1x32xf32>
    %665 = vector.broadcast %664 : vector<1x32xf32> to vector<8x32xf32>
    %666 = arith.addf %662, %665 : vector<8x32xf32>
    %cst_296 = arith.constant 5.000000e-01 : f32
    %667 = vector.broadcast %cst_296 : f32 to vector<8x32xf32>
    %668 = arith.mulf %667, %666 : vector<8x32xf32>
    %cst_297 = arith.constant 0.707106769 : f32
    %669 = vector.broadcast %cst_297 : f32 to vector<8x32xf32>
    %670 = arith.mulf %666, %669 : vector<8x32xf32>
    %671 = math.absf %670 : vector<8x32xf32>
    %cst_298 = arith.constant 0.327591091 : f32
    %672 = vector.broadcast %cst_298 : f32 to vector<8x32xf32>
    %673 = arith.mulf %672, %671 : vector<8x32xf32>
    %cst_299 = arith.constant 1.000000e+00 : f32
    %674 = vector.broadcast %cst_299 : f32 to vector<8x32xf32>
    %675 = arith.addf %674, %673 : vector<8x32xf32>
    %676 = tpu.reciprocal %675 {approx = true} : vector<8x32xf32> -> vector<8x32xf32>
    %cst_300 = arith.constant 1.06140542 : f32
    %677 = vector.broadcast %cst_300 : f32 to vector<8x32xf32>
    %678 = arith.mulf %677, %676 : vector<8x32xf32>
    %cst_301 = arith.constant -1.45315206 : f32
    %679 = vector.broadcast %cst_301 : f32 to vector<8x32xf32>
    %680 = arith.addf %678, %679 : vector<8x32xf32>
    %681 = arith.mulf %680, %676 : vector<8x32xf32>
    %cst_302 = arith.constant 1.42141378 : f32
    %682 = vector.broadcast %cst_302 : f32 to vector<8x32xf32>
    %683 = arith.addf %681, %682 : vector<8x32xf32>
    %684 = arith.mulf %683, %676 : vector<8x32xf32>
    %cst_303 = arith.constant -0.284496725 : f32
    %685 = vector.broadcast %cst_303 : f32 to vector<8x32xf32>
    %686 = arith.addf %684, %685 : vector<8x32xf32>
    %687 = arith.mulf %686, %676 : vector<8x32xf32>
    %cst_304 = arith.constant 0.254829586 : f32
    %688 = vector.broadcast %cst_304 : f32 to vector<8x32xf32>
    %689 = arith.addf %687, %688 : vector<8x32xf32>
    %690 = arith.mulf %689, %676 : vector<8x32xf32>
    %cst_305 = arith.constant 0.000000e+00 : f32
    %691 = vector.broadcast %cst_305 : f32 to vector<8x32xf32>
    %692 = arith.subf %691, %671 : vector<8x32xf32>
    %693 = arith.mulf %692, %671 : vector<8x32xf32>
    %694 = math.exp %693 : vector<8x32xf32>
    %695 = arith.mulf %690, %694 : vector<8x32xf32>
    %cst_306 = arith.constant 1.000000e+00 : f32
    %696 = vector.broadcast %cst_306 : f32 to vector<8x32xf32>
    %697 = arith.subf %696, %695 : vector<8x32xf32>
    %cst_307 = arith.constant 0.000000e+00 : f32
    %698 = vector.broadcast %cst_307 : f32 to vector<8x32xf32>
    %699 = arith.cmpf oge, %670, %698 : vector<8x32xf32>
    %cst_308 = arith.constant 0.000000e+00 : f32
    %700 = vector.broadcast %cst_308 : f32 to vector<8x32xf32>
    %701 = arith.subf %700, %697 : vector<8x32xf32>
    %702 = arith.select %699, %697, %701 : vector<8x32xi1>, vector<8x32xf32>
    %cst_309 = arith.constant 1.000000e+00 : f32
    %703 = vector.broadcast %cst_309 : f32 to vector<8x32xf32>
    %704 = arith.addf %703, %702 : vector<8x32xf32>
    %705 = arith.mulf %668, %704 : vector<8x32xf32>
    %c4_310 = arith.constant 4 : index
    %c0_311 = arith.constant 0 : index
    %c0_312 = arith.constant 0 : index
    %706 = vector.load %arg8[%c4_310, %c0_311, %c0_312] : memref<10x32x16xf32, #tpu.memory_space<vmem>>, vector<1x32x16xf32>
    %707 = vector.shape_cast %706 : vector<1x32x16xf32> to vector<32x16xf32>
    %cst_313 = arith.constant dense<0.000000e+00> : vector<8x16xf32>
    %708 = tpu.matmul %705, %707, %cst_313 {dimension_numbers = #tpu.dot_dimension_numbers<[1], [0], [0], [1], [0, 0, 1, 1], [], []>} : vector<8x32xf32>, vector<32x16xf32>, vector<8x16xf32> -> vector<8x16xf32>
    %c4_314 = arith.constant 4 : index
    %c0_315 = arith.constant 0 : index
    %c0_316 = arith.constant 0 : index
    %709 = vector.load %arg9[%c4_314, %c0_315, %c0_316] : memref<10x1x16xf32, #tpu.memory_space<vmem>>, vector<1x1x16xf32>
    %710 = vector.shape_cast %709 : vector<1x1x16xf32> to vector<1x16xf32>
    %711 = vector.broadcast %710 : vector<1x16xf32> to vector<8x16xf32>
    %712 = arith.addf %708, %711 : vector<8x16xf32>
    %713 = arith.addf %712, %659 : vector<8x16xf32>
    %cst_317 = arith.constant dense<0.000000e+00> : vector<8xf32>
    %714 = vector.multi_reduction <add>, %713, %cst_317 [1] : vector<8x16xf32> to vector<8xf32>
    %715 = vector.shape_cast %714 : vector<8xf32> to vector<8x1xf32>
    %cst_318 = arith.constant 1.600000e+01 : f32
    %716 = vector.broadcast %cst_318 : f32 to vector<8x1xf32>
    %717 = arith.divf %715, %716 : vector<8x1xf32>
    %718 = vector.broadcast %717 : vector<8x1xf32> to vector<8x16xf32>
    %719 = arith.subf %713, %718 : vector<8x16xf32>
    %720 = arith.mulf %719, %719 : vector<8x16xf32>
    %cst_319 = arith.constant dense<0.000000e+00> : vector<8xf32>
    %721 = vector.multi_reduction <add>, %720, %cst_319 [1] : vector<8x16xf32> to vector<8xf32>
    %722 = vector.shape_cast %721 : vector<8xf32> to vector<8x1xf32>
    %cst_320 = arith.constant 1.600000e+01 : f32
    %723 = vector.broadcast %cst_320 : f32 to vector<8x1xf32>
    %724 = arith.divf %722, %723 : vector<8x1xf32>
    %cst_321 = arith.constant 9.99999974E-6 : f32
    %725 = vector.broadcast %cst_321 : f32 to vector<8x1xf32>
    %726 = arith.addf %724, %725 : vector<8x1xf32>
    %727 = math.rsqrt %726 : vector<8x1xf32>
    %728 = vector.broadcast %727 : vector<8x1xf32> to vector<8x16xf32>
    %729 = arith.mulf %719, %728 : vector<8x16xf32>
    %730 = vector.broadcast %592 : vector<1x16xf32> to vector<8x16xf32>
    %731 = arith.mulf %729, %730 : vector<8x16xf32>
    %732 = vector.broadcast %594 : vector<1x16xf32> to vector<8x16xf32>
    %733 = arith.addf %731, %732 : vector<8x16xf32>
    %c5 = arith.constant 5 : index
    %c0_322 = arith.constant 0 : index
    %c0_323 = arith.constant 0 : index
    %734 = vector.load %arg3[%c5, %c0_322, %c0_323] : memref<10x16x48xf32, #tpu.memory_space<vmem>>, vector<1x16x48xf32>
    %735 = vector.shape_cast %734 : vector<1x16x48xf32> to vector<16x48xf32>
    %cst_324 = arith.constant dense<0.000000e+00> : vector<8x48xf32>
    %736 = tpu.matmul %733, %735, %cst_324 {dimension_numbers = #tpu.dot_dimension_numbers<[1], [0], [0], [1], [0, 0, 1, 1], [], []>} : vector<8x16xf32>, vector<16x48xf32>, vector<8x48xf32> -> vector<8x48xf32>
    %c5_325 = arith.constant 5 : index
    %c0_326 = arith.constant 0 : index
    %c0_327 = arith.constant 0 : index
    %737 = vector.load %arg4[%c5_325, %c0_326, %c0_327] : memref<10x16x16xf32, #tpu.memory_space<vmem>>, vector<1x16x16xf32>
    %738 = vector.shape_cast %737 : vector<1x16x16xf32> to vector<16x16xf32>
    %739 = vector.extract_strided_slice %736 {offsets = [0, 0], sizes = [8, 8], strides = [1, 1]} : vector<8x48xf32> to vector<8x8xf32>
    %740 = vector.extract_strided_slice %736 {offsets = [0, 16], sizes = [8, 8], strides = [1, 1]} : vector<8x48xf32> to vector<8x8xf32>
    %741 = vector.extract_strided_slice %736 {offsets = [0, 32], sizes = [8, 8], strides = [1, 1]} : vector<8x48xf32> to vector<8x8xf32>
    %cst_328 = arith.constant dense<0.000000e+00> : vector<8x8xf32>
    %742 = tpu.matmul %739, %740, %cst_328 {dimension_numbers = #tpu.dot_dimension_numbers<[1], [1], [0], [0], [0, 0, 1, 0], [], []>} : vector<8x8xf32>, vector<8x8xf32>, vector<8x8xf32> -> vector<8x8xf32>
    %cst_329 = arith.constant dense<0xFF800000> : vector<8xf32>
    %743 = vector.multi_reduction <maximumf>, %742, %cst_329 [1] : vector<8x8xf32> to vector<8xf32>
    %744 = vector.shape_cast %743 : vector<8xf32> to vector<8x1xf32>
    %745 = vector.broadcast %744 : vector<8x1xf32> to vector<8x8xf32>
    %746 = arith.subf %742, %745 : vector<8x8xf32>
    %747 = math.exp %746 : vector<8x8xf32>
    %cst_330 = arith.constant dense<0.000000e+00> : vector<8xf32>
    %748 = vector.multi_reduction <add>, %747, %cst_330 [1] : vector<8x8xf32> to vector<8xf32>
    %749 = vector.shape_cast %748 : vector<8xf32> to vector<8x1xf32>
    %750 = tpu.reciprocal %749 {approx = true} : vector<8x1xf32> -> vector<8x1xf32>
    %751 = vector.broadcast %750 : vector<8x1xf32> to vector<8x8xf32>
    %752 = arith.mulf %747, %751 : vector<8x8xf32>
    %cst_331 = arith.constant dense<0.000000e+00> : vector<8x8xf32>
    %753 = tpu.matmul %752, %741, %cst_331 {dimension_numbers = #tpu.dot_dimension_numbers<[1], [0], [0], [1], [0, 0, 1, 1], [], []>} : vector<8x8xf32>, vector<8x8xf32>, vector<8x8xf32> -> vector<8x8xf32>
    %754 = vector.extract_strided_slice %738 {offsets = [0, 0], sizes = [8, 16], strides = [1, 1]} : vector<16x16xf32> to vector<8x16xf32>
    %cst_332 = arith.constant dense<0.000000e+00> : vector<8x16xf32>
    %755 = tpu.matmul %753, %754, %cst_332 {dimension_numbers = #tpu.dot_dimension_numbers<[1], [0], [0], [1], [0, 0, 1, 1], [], []>} : vector<8x8xf32>, vector<8x16xf32>, vector<8x16xf32> -> vector<8x16xf32>
    %756 = vector.extract_strided_slice %736 {offsets = [0, 8], sizes = [8, 8], strides = [1, 1]} : vector<8x48xf32> to vector<8x8xf32>
    %757 = vector.extract_strided_slice %736 {offsets = [0, 24], sizes = [8, 8], strides = [1, 1]} : vector<8x48xf32> to vector<8x8xf32>
    %758 = vector.extract_strided_slice %736 {offsets = [0, 40], sizes = [8, 8], strides = [1, 1]} : vector<8x48xf32> to vector<8x8xf32>
    %cst_333 = arith.constant dense<0.000000e+00> : vector<8x8xf32>
    %759 = tpu.matmul %756, %757, %cst_333 {dimension_numbers = #tpu.dot_dimension_numbers<[1], [1], [0], [0], [0, 0, 1, 0], [], []>} : vector<8x8xf32>, vector<8x8xf32>, vector<8x8xf32> -> vector<8x8xf32>
    %cst_334 = arith.constant dense<0xFF800000> : vector<8xf32>
    %760 = vector.multi_reduction <maximumf>, %759, %cst_334 [1] : vector<8x8xf32> to vector<8xf32>
    %761 = vector.shape_cast %760 : vector<8xf32> to vector<8x1xf32>
    %762 = vector.broadcast %761 : vector<8x1xf32> to vector<8x8xf32>
    %763 = arith.subf %759, %762 : vector<8x8xf32>
    %764 = math.exp %763 : vector<8x8xf32>
    %cst_335 = arith.constant dense<0.000000e+00> : vector<8xf32>
    %765 = vector.multi_reduction <add>, %764, %cst_335 [1] : vector<8x8xf32> to vector<8xf32>
    %766 = vector.shape_cast %765 : vector<8xf32> to vector<8x1xf32>
    %767 = tpu.reciprocal %766 {approx = true} : vector<8x1xf32> -> vector<8x1xf32>
    %768 = vector.broadcast %767 : vector<8x1xf32> to vector<8x8xf32>
    %769 = arith.mulf %764, %768 : vector<8x8xf32>
    %cst_336 = arith.constant dense<0.000000e+00> : vector<8x8xf32>
    %770 = tpu.matmul %769, %758, %cst_336 {dimension_numbers = #tpu.dot_dimension_numbers<[1], [0], [0], [1], [0, 0, 1, 1], [], []>} : vector<8x8xf32>, vector<8x8xf32>, vector<8x8xf32> -> vector<8x8xf32>
    %771 = vector.extract_strided_slice %738 {offsets = [8, 0], sizes = [8, 16], strides = [1, 1]} : vector<16x16xf32> to vector<8x16xf32>
    %cst_337 = arith.constant dense<0.000000e+00> : vector<8x16xf32>
    %772 = tpu.matmul %770, %771, %cst_337 {dimension_numbers = #tpu.dot_dimension_numbers<[1], [0], [0], [1], [0, 0, 1, 1], [], []>} : vector<8x8xf32>, vector<8x16xf32>, vector<8x16xf32> -> vector<8x16xf32>
    %773 = arith.addf %755, %772 : vector<8x16xf32>
    %c5_338 = arith.constant 5 : index
    %c0_339 = arith.constant 0 : index
    %c0_340 = arith.constant 0 : index
    %774 = vector.load %arg5[%c5_338, %c0_339, %c0_340] : memref<10x1x16xf32, #tpu.memory_space<vmem>>, vector<1x1x16xf32>
    %775 = vector.shape_cast %774 : vector<1x1x16xf32> to vector<1x16xf32>
    %776 = vector.broadcast %775 : vector<1x16xf32> to vector<8x16xf32>
    %777 = arith.addf %773, %776 : vector<8x16xf32>
    %778 = arith.addf %777, %733 : vector<8x16xf32>
    %cst_341 = arith.constant dense<0.000000e+00> : vector<8xf32>
    %779 = vector.multi_reduction <add>, %778, %cst_341 [1] : vector<8x16xf32> to vector<8xf32>
    %780 = vector.shape_cast %779 : vector<8xf32> to vector<8x1xf32>
    %cst_342 = arith.constant 1.600000e+01 : f32
    %781 = vector.broadcast %cst_342 : f32 to vector<8x1xf32>
    %782 = arith.divf %780, %781 : vector<8x1xf32>
    %783 = vector.broadcast %782 : vector<8x1xf32> to vector<8x16xf32>
    %784 = arith.subf %778, %783 : vector<8x16xf32>
    %785 = arith.mulf %784, %784 : vector<8x16xf32>
    %cst_343 = arith.constant dense<0.000000e+00> : vector<8xf32>
    %786 = vector.multi_reduction <add>, %785, %cst_343 [1] : vector<8x16xf32> to vector<8xf32>
    %787 = vector.shape_cast %786 : vector<8xf32> to vector<8x1xf32>
    %cst_344 = arith.constant 1.600000e+01 : f32
    %788 = vector.broadcast %cst_344 : f32 to vector<8x1xf32>
    %789 = arith.divf %787, %788 : vector<8x1xf32>
    %cst_345 = arith.constant 9.99999974E-6 : f32
    %790 = vector.broadcast %cst_345 : f32 to vector<8x1xf32>
    %791 = arith.addf %789, %790 : vector<8x1xf32>
    %792 = math.rsqrt %791 : vector<8x1xf32>
    %793 = vector.broadcast %792 : vector<8x1xf32> to vector<8x16xf32>
    %794 = arith.mulf %784, %793 : vector<8x16xf32>
    %795 = vector.broadcast %592 : vector<1x16xf32> to vector<8x16xf32>
    %796 = arith.mulf %794, %795 : vector<8x16xf32>
    %797 = vector.broadcast %594 : vector<1x16xf32> to vector<8x16xf32>
    %798 = arith.addf %796, %797 : vector<8x16xf32>
    %c5_346 = arith.constant 5 : index
    %c0_347 = arith.constant 0 : index
    %c0_348 = arith.constant 0 : index
    %799 = vector.load %arg6[%c5_346, %c0_347, %c0_348] : memref<10x16x32xf32, #tpu.memory_space<vmem>>, vector<1x16x32xf32>
    %800 = vector.shape_cast %799 : vector<1x16x32xf32> to vector<16x32xf32>
    %cst_349 = arith.constant dense<0.000000e+00> : vector<8x32xf32>
    %801 = tpu.matmul %798, %800, %cst_349 {dimension_numbers = #tpu.dot_dimension_numbers<[1], [0], [0], [1], [0, 0, 1, 1], [], []>} : vector<8x16xf32>, vector<16x32xf32>, vector<8x32xf32> -> vector<8x32xf32>
    %c5_350 = arith.constant 5 : index
    %c0_351 = arith.constant 0 : index
    %c0_352 = arith.constant 0 : index
    %802 = vector.load %arg7[%c5_350, %c0_351, %c0_352] : memref<10x1x32xf32, #tpu.memory_space<vmem>>, vector<1x1x32xf32>
    %803 = vector.shape_cast %802 : vector<1x1x32xf32> to vector<1x32xf32>
    %804 = vector.broadcast %803 : vector<1x32xf32> to vector<8x32xf32>
    %805 = arith.addf %801, %804 : vector<8x32xf32>
    %cst_353 = arith.constant 5.000000e-01 : f32
    %806 = vector.broadcast %cst_353 : f32 to vector<8x32xf32>
    %807 = arith.mulf %806, %805 : vector<8x32xf32>
    %cst_354 = arith.constant 0.707106769 : f32
    %808 = vector.broadcast %cst_354 : f32 to vector<8x32xf32>
    %809 = arith.mulf %805, %808 : vector<8x32xf32>
    %810 = math.absf %809 : vector<8x32xf32>
    %cst_355 = arith.constant 0.327591091 : f32
    %811 = vector.broadcast %cst_355 : f32 to vector<8x32xf32>
    %812 = arith.mulf %811, %810 : vector<8x32xf32>
    %cst_356 = arith.constant 1.000000e+00 : f32
    %813 = vector.broadcast %cst_356 : f32 to vector<8x32xf32>
    %814 = arith.addf %813, %812 : vector<8x32xf32>
    %815 = tpu.reciprocal %814 {approx = true} : vector<8x32xf32> -> vector<8x32xf32>
    %cst_357 = arith.constant 1.06140542 : f32
    %816 = vector.broadcast %cst_357 : f32 to vector<8x32xf32>
    %817 = arith.mulf %816, %815 : vector<8x32xf32>
    %cst_358 = arith.constant -1.45315206 : f32
    %818 = vector.broadcast %cst_358 : f32 to vector<8x32xf32>
    %819 = arith.addf %817, %818 : vector<8x32xf32>
    %820 = arith.mulf %819, %815 : vector<8x32xf32>
    %cst_359 = arith.constant 1.42141378 : f32
    %821 = vector.broadcast %cst_359 : f32 to vector<8x32xf32>
    %822 = arith.addf %820, %821 : vector<8x32xf32>
    %823 = arith.mulf %822, %815 : vector<8x32xf32>
    %cst_360 = arith.constant -0.284496725 : f32
    %824 = vector.broadcast %cst_360 : f32 to vector<8x32xf32>
    %825 = arith.addf %823, %824 : vector<8x32xf32>
    %826 = arith.mulf %825, %815 : vector<8x32xf32>
    %cst_361 = arith.constant 0.254829586 : f32
    %827 = vector.broadcast %cst_361 : f32 to vector<8x32xf32>
    %828 = arith.addf %826, %827 : vector<8x32xf32>
    %829 = arith.mulf %828, %815 : vector<8x32xf32>
    %cst_362 = arith.constant 0.000000e+00 : f32
    %830 = vector.broadcast %cst_362 : f32 to vector<8x32xf32>
    %831 = arith.subf %830, %810 : vector<8x32xf32>
    %832 = arith.mulf %831, %810 : vector<8x32xf32>
    %833 = math.exp %832 : vector<8x32xf32>
    %834 = arith.mulf %829, %833 : vector<8x32xf32>
    %cst_363 = arith.constant 1.000000e+00 : f32
    %835 = vector.broadcast %cst_363 : f32 to vector<8x32xf32>
    %836 = arith.subf %835, %834 : vector<8x32xf32>
    %cst_364 = arith.constant 0.000000e+00 : f32
    %837 = vector.broadcast %cst_364 : f32 to vector<8x32xf32>
    %838 = arith.cmpf oge, %809, %837 : vector<8x32xf32>
    %cst_365 = arith.constant 0.000000e+00 : f32
    %839 = vector.broadcast %cst_365 : f32 to vector<8x32xf32>
    %840 = arith.subf %839, %836 : vector<8x32xf32>
    %841 = arith.select %838, %836, %840 : vector<8x32xi1>, vector<8x32xf32>
    %cst_366 = arith.constant 1.000000e+00 : f32
    %842 = vector.broadcast %cst_366 : f32 to vector<8x32xf32>
    %843 = arith.addf %842, %841 : vector<8x32xf32>
    %844 = arith.mulf %807, %843 : vector<8x32xf32>
    %c5_367 = arith.constant 5 : index
    %c0_368 = arith.constant 0 : index
    %c0_369 = arith.constant 0 : index
    %845 = vector.load %arg8[%c5_367, %c0_368, %c0_369] : memref<10x32x16xf32, #tpu.memory_space<vmem>>, vector<1x32x16xf32>
    %846 = vector.shape_cast %845 : vector<1x32x16xf32> to vector<32x16xf32>
    %cst_370 = arith.constant dense<0.000000e+00> : vector<8x16xf32>
    %847 = tpu.matmul %844, %846, %cst_370 {dimension_numbers = #tpu.dot_dimension_numbers<[1], [0], [0], [1], [0, 0, 1, 1], [], []>} : vector<8x32xf32>, vector<32x16xf32>, vector<8x16xf32> -> vector<8x16xf32>
    %c5_371 = arith.constant 5 : index
    %c0_372 = arith.constant 0 : index
    %c0_373 = arith.constant 0 : index
    %848 = vector.load %arg9[%c5_371, %c0_372, %c0_373] : memref<10x1x16xf32, #tpu.memory_space<vmem>>, vector<1x1x16xf32>
    %849 = vector.shape_cast %848 : vector<1x1x16xf32> to vector<1x16xf32>
    %850 = vector.broadcast %849 : vector<1x16xf32> to vector<8x16xf32>
    %851 = arith.addf %847, %850 : vector<8x16xf32>
    %852 = arith.addf %851, %798 : vector<8x16xf32>
    %cst_374 = arith.constant dense<0.000000e+00> : vector<8xf32>
    %853 = vector.multi_reduction <add>, %852, %cst_374 [1] : vector<8x16xf32> to vector<8xf32>
    %854 = vector.shape_cast %853 : vector<8xf32> to vector<8x1xf32>
    %cst_375 = arith.constant 1.600000e+01 : f32
    %855 = vector.broadcast %cst_375 : f32 to vector<8x1xf32>
    %856 = arith.divf %854, %855 : vector<8x1xf32>
    %857 = vector.broadcast %856 : vector<8x1xf32> to vector<8x16xf32>
    %858 = arith.subf %852, %857 : vector<8x16xf32>
    %859 = arith.mulf %858, %858 : vector<8x16xf32>
    %cst_376 = arith.constant dense<0.000000e+00> : vector<8xf32>
    %860 = vector.multi_reduction <add>, %859, %cst_376 [1] : vector<8x16xf32> to vector<8xf32>
    %861 = vector.shape_cast %860 : vector<8xf32> to vector<8x1xf32>
    %cst_377 = arith.constant 1.600000e+01 : f32
    %862 = vector.broadcast %cst_377 : f32 to vector<8x1xf32>
    %863 = arith.divf %861, %862 : vector<8x1xf32>
    %cst_378 = arith.constant 9.99999974E-6 : f32
    %864 = vector.broadcast %cst_378 : f32 to vector<8x1xf32>
    %865 = arith.addf %863, %864 : vector<8x1xf32>
    %866 = math.rsqrt %865 : vector<8x1xf32>
    %867 = vector.broadcast %866 : vector<8x1xf32> to vector<8x16xf32>
    %868 = arith.mulf %858, %867 : vector<8x16xf32>
    %869 = vector.broadcast %592 : vector<1x16xf32> to vector<8x16xf32>
    %870 = arith.mulf %868, %869 : vector<8x16xf32>
    %871 = vector.broadcast %594 : vector<1x16xf32> to vector<8x16xf32>
    %872 = arith.addf %870, %871 : vector<8x16xf32>
    %cst_379 = arith.constant dense<0xFF800000> : vector<8xf32>
    %873 = vector.multi_reduction <maximumf>, %742, %cst_379 [1] : vector<8x8xf32> to vector<8xf32>
    %874 = vector.shape_cast %873 : vector<8xf32> to vector<8x1xf32>
    %875 = vector.broadcast %874 : vector<8x1xf32> to vector<8x8xf32>
    %876 = arith.subf %742, %875 : vector<8x8xf32>
    %877 = math.exp %876 : vector<8x8xf32>
    %cst_380 = arith.constant dense<0.000000e+00> : vector<8xf32>
    %878 = vector.multi_reduction <add>, %877, %cst_380 [1] : vector<8x8xf32> to vector<8xf32>
    %879 = vector.shape_cast %878 : vector<8xf32> to vector<8x1xf32>
    %880 = tpu.reciprocal %879 {approx = true} : vector<8x1xf32> -> vector<8x1xf32>
    %881 = vector.broadcast %880 : vector<8x1xf32> to vector<8x8xf32>
    %882 = arith.mulf %877, %881 : vector<8x8xf32>
    %cst_381 = arith.constant 5.000000e-01 : f32
    %883 = vector.broadcast %cst_381 : f32 to vector<8x8xf32>
    %884 = arith.mulf %883, %882 : vector<8x8xf32>
    %cst_382 = arith.constant dense<0xFF800000> : vector<8xf32>
    %885 = vector.multi_reduction <maximumf>, %759, %cst_382 [1] : vector<8x8xf32> to vector<8xf32>
    %886 = vector.shape_cast %885 : vector<8xf32> to vector<8x1xf32>
    %887 = vector.broadcast %886 : vector<8x1xf32> to vector<8x8xf32>
    %888 = arith.subf %759, %887 : vector<8x8xf32>
    %889 = math.exp %888 : vector<8x8xf32>
    %cst_383 = arith.constant dense<0.000000e+00> : vector<8xf32>
    %890 = vector.multi_reduction <add>, %889, %cst_383 [1] : vector<8x8xf32> to vector<8xf32>
    %891 = vector.shape_cast %890 : vector<8xf32> to vector<8x1xf32>
    %892 = tpu.reciprocal %891 {approx = true} : vector<8x1xf32> -> vector<8x1xf32>
    %893 = vector.broadcast %892 : vector<8x1xf32> to vector<8x8xf32>
    %894 = arith.mulf %889, %893 : vector<8x8xf32>
    %cst_384 = arith.constant 5.000000e-01 : f32
    %895 = vector.broadcast %cst_384 : f32 to vector<8x8xf32>
    %896 = arith.mulf %895, %894 : vector<8x8xf32>
    %c0_385 = arith.constant 0 : index
    %c0_386 = arith.constant 0 : index
    %897 = vector.load %arg16[%c0_385, %c0_386] : memref<32x16xf32, #tpu.memory_space<vmem>>, vector<32x16xf32>
    %c0_387 = arith.constant 0 : index
    %c0_388 = arith.constant 0 : index
    %898 = vector.load %arg17[%c0_387, %c0_388] : memref<1x16xf32, #tpu.memory_space<vmem>>, vector<1x16xf32>
    %899 = vector.extract_strided_slice %897 {offsets = [0, 0], sizes = [16, 16], strides = [1, 1]} : vector<32x16xf32> to vector<16x16xf32>
    %cst_389 = arith.constant dense<0.000000e+00> : vector<8x16xf32>
    %900 = tpu.matmul %5, %899, %cst_389 {dimension_numbers = #tpu.dot_dimension_numbers<[1], [0], [0], [1], [0, 0, 1, 1], [], []>} : vector<8x16xf32>, vector<16x16xf32>, vector<8x16xf32> -> vector<8x16xf32>
    %901 = vector.broadcast %898 : vector<1x16xf32> to vector<8x16xf32>
    %902 = arith.addf %901, %900 : vector<8x16xf32>
    %903 = vector.extract_strided_slice %897 {offsets = [16, 0], sizes = [16, 16], strides = [1, 1]} : vector<32x16xf32> to vector<16x16xf32>
    %cst_390 = arith.constant dense<0.000000e+00> : vector<8x16xf32>
    %904 = tpu.matmul %287, %903, %cst_390 {dimension_numbers = #tpu.dot_dimension_numbers<[1], [0], [0], [1], [0, 0, 1, 1], [], []>} : vector<8x16xf32>, vector<16x16xf32>, vector<8x16xf32> -> vector<8x16xf32>
    %905 = arith.addf %902, %904 : vector<8x16xf32>
    %c3_391 = arith.constant 3 : index
    %c0_392 = arith.constant 0 : index
    %c0_393 = arith.constant 0 : index
    %906 = vector.load %arg10[%c3_391, %c0_392, %c0_393] : memref<5x1x16xf32, #tpu.memory_space<vmem>>, vector<1x1x16xf32>
    %907 = vector.shape_cast %906 : vector<1x1x16xf32> to vector<1x16xf32>
    %c3_394 = arith.constant 3 : index
    %c0_395 = arith.constant 0 : index
    %c0_396 = arith.constant 0 : index
    %908 = vector.load %arg11[%c3_394, %c0_395, %c0_396] : memref<5x1x16xf32, #tpu.memory_space<vmem>>, vector<1x1x16xf32>
    %909 = vector.shape_cast %908 : vector<1x1x16xf32> to vector<1x16xf32>
    %c6 = arith.constant 6 : index
    %c0_397 = arith.constant 0 : index
    %c0_398 = arith.constant 0 : index
    %910 = vector.load %arg3[%c6, %c0_397, %c0_398] : memref<10x16x48xf32, #tpu.memory_space<vmem>>, vector<1x16x48xf32>
    %911 = vector.shape_cast %910 : vector<1x16x48xf32> to vector<16x48xf32>
    %cst_399 = arith.constant dense<0.000000e+00> : vector<8x48xf32>
    %912 = tpu.matmul %905, %911, %cst_399 {dimension_numbers = #tpu.dot_dimension_numbers<[1], [0], [0], [1], [0, 0, 1, 1], [], []>} : vector<8x16xf32>, vector<16x48xf32>, vector<8x48xf32> -> vector<8x48xf32>
    %c6_400 = arith.constant 6 : index
    %c0_401 = arith.constant 0 : index
    %c0_402 = arith.constant 0 : index
    %913 = vector.load %arg4[%c6_400, %c0_401, %c0_402] : memref<10x16x16xf32, #tpu.memory_space<vmem>>, vector<1x16x16xf32>
    %914 = vector.shape_cast %913 : vector<1x16x16xf32> to vector<16x16xf32>
    %915 = vector.extract_strided_slice %912 {offsets = [0, 0], sizes = [8, 8], strides = [1, 1]} : vector<8x48xf32> to vector<8x8xf32>
    %916 = vector.extract_strided_slice %912 {offsets = [0, 16], sizes = [8, 8], strides = [1, 1]} : vector<8x48xf32> to vector<8x8xf32>
    %917 = vector.extract_strided_slice %912 {offsets = [0, 32], sizes = [8, 8], strides = [1, 1]} : vector<8x48xf32> to vector<8x8xf32>
    %cst_403 = arith.constant dense<0.000000e+00> : vector<8x8xf32>
    %918 = tpu.matmul %915, %916, %cst_403 {dimension_numbers = #tpu.dot_dimension_numbers<[1], [1], [0], [0], [0, 0, 1, 0], [], []>} : vector<8x8xf32>, vector<8x8xf32>, vector<8x8xf32> -> vector<8x8xf32>
    %cst_404 = arith.constant dense<0xFF800000> : vector<8xf32>
    %919 = vector.multi_reduction <maximumf>, %918, %cst_404 [1] : vector<8x8xf32> to vector<8xf32>
    %920 = vector.shape_cast %919 : vector<8xf32> to vector<8x1xf32>
    %921 = vector.broadcast %920 : vector<8x1xf32> to vector<8x8xf32>
    %922 = arith.subf %918, %921 : vector<8x8xf32>
    %923 = math.exp %922 : vector<8x8xf32>
    %cst_405 = arith.constant dense<0.000000e+00> : vector<8xf32>
    %924 = vector.multi_reduction <add>, %923, %cst_405 [1] : vector<8x8xf32> to vector<8xf32>
    %925 = vector.shape_cast %924 : vector<8xf32> to vector<8x1xf32>
    %926 = tpu.reciprocal %925 {approx = true} : vector<8x1xf32> -> vector<8x1xf32>
    %927 = vector.broadcast %926 : vector<8x1xf32> to vector<8x8xf32>
    %928 = arith.mulf %923, %927 : vector<8x8xf32>
    %cst_406 = arith.constant 5.000000e-01 : f32
    %929 = vector.broadcast %cst_406 : f32 to vector<8x8xf32>
    %930 = arith.mulf %929, %928 : vector<8x8xf32>
    %931 = arith.addf %930, %884 : vector<8x8xf32>
    %cst_407 = arith.constant dense<0.000000e+00> : vector<8x8xf32>
    %932 = tpu.matmul %931, %917, %cst_407 {dimension_numbers = #tpu.dot_dimension_numbers<[1], [0], [0], [1], [0, 0, 1, 1], [], []>} : vector<8x8xf32>, vector<8x8xf32>, vector<8x8xf32> -> vector<8x8xf32>
    %933 = vector.extract_strided_slice %914 {offsets = [0, 0], sizes = [8, 16], strides = [1, 1]} : vector<16x16xf32> to vector<8x16xf32>
    %cst_408 = arith.constant dense<0.000000e+00> : vector<8x16xf32>
    %934 = tpu.matmul %932, %933, %cst_408 {dimension_numbers = #tpu.dot_dimension_numbers<[1], [0], [0], [1], [0, 0, 1, 1], [], []>} : vector<8x8xf32>, vector<8x16xf32>, vector<8x16xf32> -> vector<8x16xf32>
    %935 = vector.extract_strided_slice %912 {offsets = [0, 8], sizes = [8, 8], strides = [1, 1]} : vector<8x48xf32> to vector<8x8xf32>
    %936 = vector.extract_strided_slice %912 {offsets = [0, 24], sizes = [8, 8], strides = [1, 1]} : vector<8x48xf32> to vector<8x8xf32>
    %937 = vector.extract_strided_slice %912 {offsets = [0, 40], sizes = [8, 8], strides = [1, 1]} : vector<8x48xf32> to vector<8x8xf32>
    %cst_409 = arith.constant dense<0.000000e+00> : vector<8x8xf32>
    %938 = tpu.matmul %935, %936, %cst_409 {dimension_numbers = #tpu.dot_dimension_numbers<[1], [1], [0], [0], [0, 0, 1, 0], [], []>} : vector<8x8xf32>, vector<8x8xf32>, vector<8x8xf32> -> vector<8x8xf32>
    %cst_410 = arith.constant dense<0xFF800000> : vector<8xf32>
    %939 = vector.multi_reduction <maximumf>, %938, %cst_410 [1] : vector<8x8xf32> to vector<8xf32>
    %940 = vector.shape_cast %939 : vector<8xf32> to vector<8x1xf32>
    %941 = vector.broadcast %940 : vector<8x1xf32> to vector<8x8xf32>
    %942 = arith.subf %938, %941 : vector<8x8xf32>
    %943 = math.exp %942 : vector<8x8xf32>
    %cst_411 = arith.constant dense<0.000000e+00> : vector<8xf32>
    %944 = vector.multi_reduction <add>, %943, %cst_411 [1] : vector<8x8xf32> to vector<8xf32>
    %945 = vector.shape_cast %944 : vector<8xf32> to vector<8x1xf32>
    %946 = tpu.reciprocal %945 {approx = true} : vector<8x1xf32> -> vector<8x1xf32>
    %947 = vector.broadcast %946 : vector<8x1xf32> to vector<8x8xf32>
    %948 = arith.mulf %943, %947 : vector<8x8xf32>
    %cst_412 = arith.constant 5.000000e-01 : f32
    %949 = vector.broadcast %cst_412 : f32 to vector<8x8xf32>
    %950 = arith.mulf %949, %948 : vector<8x8xf32>
    %951 = arith.addf %950, %896 : vector<8x8xf32>
    %cst_413 = arith.constant dense<0.000000e+00> : vector<8x8xf32>
    %952 = tpu.matmul %951, %937, %cst_413 {dimension_numbers = #tpu.dot_dimension_numbers<[1], [0], [0], [1], [0, 0, 1, 1], [], []>} : vector<8x8xf32>, vector<8x8xf32>, vector<8x8xf32> -> vector<8x8xf32>
    %953 = vector.extract_strided_slice %914 {offsets = [8, 0], sizes = [8, 16], strides = [1, 1]} : vector<16x16xf32> to vector<8x16xf32>
    %cst_414 = arith.constant dense<0.000000e+00> : vector<8x16xf32>
    %954 = tpu.matmul %952, %953, %cst_414 {dimension_numbers = #tpu.dot_dimension_numbers<[1], [0], [0], [1], [0, 0, 1, 1], [], []>} : vector<8x8xf32>, vector<8x16xf32>, vector<8x16xf32> -> vector<8x16xf32>
    %955 = arith.addf %934, %954 : vector<8x16xf32>
    %c6_415 = arith.constant 6 : index
    %c0_416 = arith.constant 0 : index
    %c0_417 = arith.constant 0 : index
    %956 = vector.load %arg5[%c6_415, %c0_416, %c0_417] : memref<10x1x16xf32, #tpu.memory_space<vmem>>, vector<1x1x16xf32>
    %957 = vector.shape_cast %956 : vector<1x1x16xf32> to vector<1x16xf32>
    %958 = vector.broadcast %957 : vector<1x16xf32> to vector<8x16xf32>
    %959 = arith.addf %955, %958 : vector<8x16xf32>
    %960 = arith.addf %959, %905 : vector<8x16xf32>
    %cst_418 = arith.constant dense<0.000000e+00> : vector<8xf32>
    %961 = vector.multi_reduction <add>, %960, %cst_418 [1] : vector<8x16xf32> to vector<8xf32>
    %962 = vector.shape_cast %961 : vector<8xf32> to vector<8x1xf32>
    %cst_419 = arith.constant 1.600000e+01 : f32
    %963 = vector.broadcast %cst_419 : f32 to vector<8x1xf32>
    %964 = arith.divf %962, %963 : vector<8x1xf32>
    %965 = vector.broadcast %964 : vector<8x1xf32> to vector<8x16xf32>
    %966 = arith.subf %960, %965 : vector<8x16xf32>
    %967 = arith.mulf %966, %966 : vector<8x16xf32>
    %cst_420 = arith.constant dense<0.000000e+00> : vector<8xf32>
    %968 = vector.multi_reduction <add>, %967, %cst_420 [1] : vector<8x16xf32> to vector<8xf32>
    %969 = vector.shape_cast %968 : vector<8xf32> to vector<8x1xf32>
    %cst_421 = arith.constant 1.600000e+01 : f32
    %970 = vector.broadcast %cst_421 : f32 to vector<8x1xf32>
    %971 = arith.divf %969, %970 : vector<8x1xf32>
    %cst_422 = arith.constant 9.99999974E-6 : f32
    %972 = vector.broadcast %cst_422 : f32 to vector<8x1xf32>
    %973 = arith.addf %971, %972 : vector<8x1xf32>
    %974 = math.rsqrt %973 : vector<8x1xf32>
    %975 = vector.broadcast %974 : vector<8x1xf32> to vector<8x16xf32>
    %976 = arith.mulf %966, %975 : vector<8x16xf32>
    %977 = vector.broadcast %907 : vector<1x16xf32> to vector<8x16xf32>
    %978 = arith.mulf %976, %977 : vector<8x16xf32>
    %979 = vector.broadcast %909 : vector<1x16xf32> to vector<8x16xf32>
    %980 = arith.addf %978, %979 : vector<8x16xf32>
    %c6_423 = arith.constant 6 : index
    %c0_424 = arith.constant 0 : index
    %c0_425 = arith.constant 0 : index
    %981 = vector.load %arg6[%c6_423, %c0_424, %c0_425] : memref<10x16x32xf32, #tpu.memory_space<vmem>>, vector<1x16x32xf32>
    %982 = vector.shape_cast %981 : vector<1x16x32xf32> to vector<16x32xf32>
    %cst_426 = arith.constant dense<0.000000e+00> : vector<8x32xf32>
    %983 = tpu.matmul %980, %982, %cst_426 {dimension_numbers = #tpu.dot_dimension_numbers<[1], [0], [0], [1], [0, 0, 1, 1], [], []>} : vector<8x16xf32>, vector<16x32xf32>, vector<8x32xf32> -> vector<8x32xf32>
    %c6_427 = arith.constant 6 : index
    %c0_428 = arith.constant 0 : index
    %c0_429 = arith.constant 0 : index
    %984 = vector.load %arg7[%c6_427, %c0_428, %c0_429] : memref<10x1x32xf32, #tpu.memory_space<vmem>>, vector<1x1x32xf32>
    %985 = vector.shape_cast %984 : vector<1x1x32xf32> to vector<1x32xf32>
    %986 = vector.broadcast %985 : vector<1x32xf32> to vector<8x32xf32>
    %987 = arith.addf %983, %986 : vector<8x32xf32>
    %cst_430 = arith.constant 5.000000e-01 : f32
    %988 = vector.broadcast %cst_430 : f32 to vector<8x32xf32>
    %989 = arith.mulf %988, %987 : vector<8x32xf32>
    %cst_431 = arith.constant 0.707106769 : f32
    %990 = vector.broadcast %cst_431 : f32 to vector<8x32xf32>
    %991 = arith.mulf %987, %990 : vector<8x32xf32>
    %992 = math.absf %991 : vector<8x32xf32>
    %cst_432 = arith.constant 0.327591091 : f32
    %993 = vector.broadcast %cst_432 : f32 to vector<8x32xf32>
    %994 = arith.mulf %993, %992 : vector<8x32xf32>
    %cst_433 = arith.constant 1.000000e+00 : f32
    %995 = vector.broadcast %cst_433 : f32 to vector<8x32xf32>
    %996 = arith.addf %995, %994 : vector<8x32xf32>
    %997 = tpu.reciprocal %996 {approx = true} : vector<8x32xf32> -> vector<8x32xf32>
    %cst_434 = arith.constant 1.06140542 : f32
    %998 = vector.broadcast %cst_434 : f32 to vector<8x32xf32>
    %999 = arith.mulf %998, %997 : vector<8x32xf32>
    %cst_435 = arith.constant -1.45315206 : f32
    %1000 = vector.broadcast %cst_435 : f32 to vector<8x32xf32>
    %1001 = arith.addf %999, %1000 : vector<8x32xf32>
    %1002 = arith.mulf %1001, %997 : vector<8x32xf32>
    %cst_436 = arith.constant 1.42141378 : f32
    %1003 = vector.broadcast %cst_436 : f32 to vector<8x32xf32>
    %1004 = arith.addf %1002, %1003 : vector<8x32xf32>
    %1005 = arith.mulf %1004, %997 : vector<8x32xf32>
    %cst_437 = arith.constant -0.284496725 : f32
    %1006 = vector.broadcast %cst_437 : f32 to vector<8x32xf32>
    %1007 = arith.addf %1005, %1006 : vector<8x32xf32>
    %1008 = arith.mulf %1007, %997 : vector<8x32xf32>
    %cst_438 = arith.constant 0.254829586 : f32
    %1009 = vector.broadcast %cst_438 : f32 to vector<8x32xf32>
    %1010 = arith.addf %1008, %1009 : vector<8x32xf32>
    %1011 = arith.mulf %1010, %997 : vector<8x32xf32>
    %cst_439 = arith.constant 0.000000e+00 : f32
    %1012 = vector.broadcast %cst_439 : f32 to vector<8x32xf32>
    %1013 = arith.subf %1012, %992 : vector<8x32xf32>
    %1014 = arith.mulf %1013, %992 : vector<8x32xf32>
    %1015 = math.exp %1014 : vector<8x32xf32>
    %1016 = arith.mulf %1011, %1015 : vector<8x32xf32>
    %cst_440 = arith.constant 1.000000e+00 : f32
    %1017 = vector.broadcast %cst_440 : f32 to vector<8x32xf32>
    %1018 = arith.subf %1017, %1016 : vector<8x32xf32>
    %cst_441 = arith.constant 0.000000e+00 : f32
    %1019 = vector.broadcast %cst_441 : f32 to vector<8x32xf32>
    %1020 = arith.cmpf oge, %991, %1019 : vector<8x32xf32>
    %cst_442 = arith.constant 0.000000e+00 : f32
    %1021 = vector.broadcast %cst_442 : f32 to vector<8x32xf32>
    %1022 = arith.subf %1021, %1018 : vector<8x32xf32>
    %1023 = arith.select %1020, %1018, %1022 : vector<8x32xi1>, vector<8x32xf32>
    %cst_443 = arith.constant 1.000000e+00 : f32
    %1024 = vector.broadcast %cst_443 : f32 to vector<8x32xf32>
    %1025 = arith.addf %1024, %1023 : vector<8x32xf32>
    %1026 = arith.mulf %989, %1025 : vector<8x32xf32>
    %c6_444 = arith.constant 6 : index
    %c0_445 = arith.constant 0 : index
    %c0_446 = arith.constant 0 : index
    %1027 = vector.load %arg8[%c6_444, %c0_445, %c0_446] : memref<10x32x16xf32, #tpu.memory_space<vmem>>, vector<1x32x16xf32>
    %1028 = vector.shape_cast %1027 : vector<1x32x16xf32> to vector<32x16xf32>
    %cst_447 = arith.constant dense<0.000000e+00> : vector<8x16xf32>
    %1029 = tpu.matmul %1026, %1028, %cst_447 {dimension_numbers = #tpu.dot_dimension_numbers<[1], [0], [0], [1], [0, 0, 1, 1], [], []>} : vector<8x32xf32>, vector<32x16xf32>, vector<8x16xf32> -> vector<8x16xf32>
    %c6_448 = arith.constant 6 : index
    %c0_449 = arith.constant 0 : index
    %c0_450 = arith.constant 0 : index
    %1030 = vector.load %arg9[%c6_448, %c0_449, %c0_450] : memref<10x1x16xf32, #tpu.memory_space<vmem>>, vector<1x1x16xf32>
    %1031 = vector.shape_cast %1030 : vector<1x1x16xf32> to vector<1x16xf32>
    %1032 = vector.broadcast %1031 : vector<1x16xf32> to vector<8x16xf32>
    %1033 = arith.addf %1029, %1032 : vector<8x16xf32>
    %1034 = arith.addf %1033, %980 : vector<8x16xf32>
    %cst_451 = arith.constant dense<0.000000e+00> : vector<8xf32>
    %1035 = vector.multi_reduction <add>, %1034, %cst_451 [1] : vector<8x16xf32> to vector<8xf32>
    %1036 = vector.shape_cast %1035 : vector<8xf32> to vector<8x1xf32>
    %cst_452 = arith.constant 1.600000e+01 : f32
    %1037 = vector.broadcast %cst_452 : f32 to vector<8x1xf32>
    %1038 = arith.divf %1036, %1037 : vector<8x1xf32>
    %1039 = vector.broadcast %1038 : vector<8x1xf32> to vector<8x16xf32>
    %1040 = arith.subf %1034, %1039 : vector<8x16xf32>
    %1041 = arith.mulf %1040, %1040 : vector<8x16xf32>
    %cst_453 = arith.constant dense<0.000000e+00> : vector<8xf32>
    %1042 = vector.multi_reduction <add>, %1041, %cst_453 [1] : vector<8x16xf32> to vector<8xf32>
    %1043 = vector.shape_cast %1042 : vector<8xf32> to vector<8x1xf32>
    %cst_454 = arith.constant 1.600000e+01 : f32
    %1044 = vector.broadcast %cst_454 : f32 to vector<8x1xf32>
    %1045 = arith.divf %1043, %1044 : vector<8x1xf32>
    %cst_455 = arith.constant 9.99999974E-6 : f32
    %1046 = vector.broadcast %cst_455 : f32 to vector<8x1xf32>
    %1047 = arith.addf %1045, %1046 : vector<8x1xf32>
    %1048 = math.rsqrt %1047 : vector<8x1xf32>
    %1049 = vector.broadcast %1048 : vector<8x1xf32> to vector<8x16xf32>
    %1050 = arith.mulf %1040, %1049 : vector<8x16xf32>
    %1051 = vector.broadcast %907 : vector<1x16xf32> to vector<8x16xf32>
    %1052 = arith.mulf %1050, %1051 : vector<8x16xf32>
    %1053 = vector.broadcast %909 : vector<1x16xf32> to vector<8x16xf32>
    %1054 = arith.addf %1052, %1053 : vector<8x16xf32>
    %c7 = arith.constant 7 : index
    %c0_456 = arith.constant 0 : index
    %c0_457 = arith.constant 0 : index
    %1055 = vector.load %arg3[%c7, %c0_456, %c0_457] : memref<10x16x48xf32, #tpu.memory_space<vmem>>, vector<1x16x48xf32>
    %1056 = vector.shape_cast %1055 : vector<1x16x48xf32> to vector<16x48xf32>
    %cst_458 = arith.constant dense<0.000000e+00> : vector<8x48xf32>
    %1057 = tpu.matmul %1054, %1056, %cst_458 {dimension_numbers = #tpu.dot_dimension_numbers<[1], [0], [0], [1], [0, 0, 1, 1], [], []>} : vector<8x16xf32>, vector<16x48xf32>, vector<8x48xf32> -> vector<8x48xf32>
    %c7_459 = arith.constant 7 : index
    %c0_460 = arith.constant 0 : index
    %c0_461 = arith.constant 0 : index
    %1058 = vector.load %arg4[%c7_459, %c0_460, %c0_461] : memref<10x16x16xf32, #tpu.memory_space<vmem>>, vector<1x16x16xf32>
    %1059 = vector.shape_cast %1058 : vector<1x16x16xf32> to vector<16x16xf32>
    %1060 = vector.extract_strided_slice %1057 {offsets = [0, 0], sizes = [8, 8], strides = [1, 1]} : vector<8x48xf32> to vector<8x8xf32>
    %1061 = vector.extract_strided_slice %1057 {offsets = [0, 16], sizes = [8, 8], strides = [1, 1]} : vector<8x48xf32> to vector<8x8xf32>
    %1062 = vector.extract_strided_slice %1057 {offsets = [0, 32], sizes = [8, 8], strides = [1, 1]} : vector<8x48xf32> to vector<8x8xf32>
    %cst_462 = arith.constant dense<0.000000e+00> : vector<8x8xf32>
    %1063 = tpu.matmul %1060, %1061, %cst_462 {dimension_numbers = #tpu.dot_dimension_numbers<[1], [1], [0], [0], [0, 0, 1, 0], [], []>} : vector<8x8xf32>, vector<8x8xf32>, vector<8x8xf32> -> vector<8x8xf32>
    %cst_463 = arith.constant dense<0xFF800000> : vector<8xf32>
    %1064 = vector.multi_reduction <maximumf>, %1063, %cst_463 [1] : vector<8x8xf32> to vector<8xf32>
    %1065 = vector.shape_cast %1064 : vector<8xf32> to vector<8x1xf32>
    %1066 = vector.broadcast %1065 : vector<8x1xf32> to vector<8x8xf32>
    %1067 = arith.subf %1063, %1066 : vector<8x8xf32>
    %1068 = math.exp %1067 : vector<8x8xf32>
    %cst_464 = arith.constant dense<0.000000e+00> : vector<8xf32>
    %1069 = vector.multi_reduction <add>, %1068, %cst_464 [1] : vector<8x8xf32> to vector<8xf32>
    %1070 = vector.shape_cast %1069 : vector<8xf32> to vector<8x1xf32>
    %1071 = tpu.reciprocal %1070 {approx = true} : vector<8x1xf32> -> vector<8x1xf32>
    %1072 = vector.broadcast %1071 : vector<8x1xf32> to vector<8x8xf32>
    %1073 = arith.mulf %1068, %1072 : vector<8x8xf32>
    %cst_465 = arith.constant 5.000000e-01 : f32
    %1074 = vector.broadcast %cst_465 : f32 to vector<8x8xf32>
    %1075 = arith.mulf %1074, %1073 : vector<8x8xf32>
    %1076 = arith.addf %1075, %884 : vector<8x8xf32>
    %cst_466 = arith.constant dense<0.000000e+00> : vector<8x8xf32>
    %1077 = tpu.matmul %1076, %1062, %cst_466 {dimension_numbers = #tpu.dot_dimension_numbers<[1], [0], [0], [1], [0, 0, 1, 1], [], []>} : vector<8x8xf32>, vector<8x8xf32>, vector<8x8xf32> -> vector<8x8xf32>
    %1078 = vector.extract_strided_slice %1059 {offsets = [0, 0], sizes = [8, 16], strides = [1, 1]} : vector<16x16xf32> to vector<8x16xf32>
    %cst_467 = arith.constant dense<0.000000e+00> : vector<8x16xf32>
    %1079 = tpu.matmul %1077, %1078, %cst_467 {dimension_numbers = #tpu.dot_dimension_numbers<[1], [0], [0], [1], [0, 0, 1, 1], [], []>} : vector<8x8xf32>, vector<8x16xf32>, vector<8x16xf32> -> vector<8x16xf32>
    %1080 = vector.extract_strided_slice %1057 {offsets = [0, 8], sizes = [8, 8], strides = [1, 1]} : vector<8x48xf32> to vector<8x8xf32>
    %1081 = vector.extract_strided_slice %1057 {offsets = [0, 24], sizes = [8, 8], strides = [1, 1]} : vector<8x48xf32> to vector<8x8xf32>
    %1082 = vector.extract_strided_slice %1057 {offsets = [0, 40], sizes = [8, 8], strides = [1, 1]} : vector<8x48xf32> to vector<8x8xf32>
    %cst_468 = arith.constant dense<0.000000e+00> : vector<8x8xf32>
    %1083 = tpu.matmul %1080, %1081, %cst_468 {dimension_numbers = #tpu.dot_dimension_numbers<[1], [1], [0], [0], [0, 0, 1, 0], [], []>} : vector<8x8xf32>, vector<8x8xf32>, vector<8x8xf32> -> vector<8x8xf32>
    %cst_469 = arith.constant dense<0xFF800000> : vector<8xf32>
    %1084 = vector.multi_reduction <maximumf>, %1083, %cst_469 [1] : vector<8x8xf32> to vector<8xf32>
    %1085 = vector.shape_cast %1084 : vector<8xf32> to vector<8x1xf32>
    %1086 = vector.broadcast %1085 : vector<8x1xf32> to vector<8x8xf32>
    %1087 = arith.subf %1083, %1086 : vector<8x8xf32>
    %1088 = math.exp %1087 : vector<8x8xf32>
    %cst_470 = arith.constant dense<0.000000e+00> : vector<8xf32>
    %1089 = vector.multi_reduction <add>, %1088, %cst_470 [1] : vector<8x8xf32> to vector<8xf32>
    %1090 = vector.shape_cast %1089 : vector<8xf32> to vector<8x1xf32>
    %1091 = tpu.reciprocal %1090 {approx = true} : vector<8x1xf32> -> vector<8x1xf32>
    %1092 = vector.broadcast %1091 : vector<8x1xf32> to vector<8x8xf32>
    %1093 = arith.mulf %1088, %1092 : vector<8x8xf32>
    %cst_471 = arith.constant 5.000000e-01 : f32
    %1094 = vector.broadcast %cst_471 : f32 to vector<8x8xf32>
    %1095 = arith.mulf %1094, %1093 : vector<8x8xf32>
    %1096 = arith.addf %1095, %896 : vector<8x8xf32>
    %cst_472 = arith.constant dense<0.000000e+00> : vector<8x8xf32>
    %1097 = tpu.matmul %1096, %1082, %cst_472 {dimension_numbers = #tpu.dot_dimension_numbers<[1], [0], [0], [1], [0, 0, 1, 1], [], []>} : vector<8x8xf32>, vector<8x8xf32>, vector<8x8xf32> -> vector<8x8xf32>
    %1098 = vector.extract_strided_slice %1059 {offsets = [8, 0], sizes = [8, 16], strides = [1, 1]} : vector<16x16xf32> to vector<8x16xf32>
    %cst_473 = arith.constant dense<0.000000e+00> : vector<8x16xf32>
    %1099 = tpu.matmul %1097, %1098, %cst_473 {dimension_numbers = #tpu.dot_dimension_numbers<[1], [0], [0], [1], [0, 0, 1, 1], [], []>} : vector<8x8xf32>, vector<8x16xf32>, vector<8x16xf32> -> vector<8x16xf32>
    %1100 = arith.addf %1079, %1099 : vector<8x16xf32>
    %c7_474 = arith.constant 7 : index
    %c0_475 = arith.constant 0 : index
    %c0_476 = arith.constant 0 : index
    %1101 = vector.load %arg5[%c7_474, %c0_475, %c0_476] : memref<10x1x16xf32, #tpu.memory_space<vmem>>, vector<1x1x16xf32>
    %1102 = vector.shape_cast %1101 : vector<1x1x16xf32> to vector<1x16xf32>
    %1103 = vector.broadcast %1102 : vector<1x16xf32> to vector<8x16xf32>
    %1104 = arith.addf %1100, %1103 : vector<8x16xf32>
    %1105 = arith.addf %1104, %1054 : vector<8x16xf32>
    %cst_477 = arith.constant dense<0.000000e+00> : vector<8xf32>
    %1106 = vector.multi_reduction <add>, %1105, %cst_477 [1] : vector<8x16xf32> to vector<8xf32>
    %1107 = vector.shape_cast %1106 : vector<8xf32> to vector<8x1xf32>
    %cst_478 = arith.constant 1.600000e+01 : f32
    %1108 = vector.broadcast %cst_478 : f32 to vector<8x1xf32>
    %1109 = arith.divf %1107, %1108 : vector<8x1xf32>
    %1110 = vector.broadcast %1109 : vector<8x1xf32> to vector<8x16xf32>
    %1111 = arith.subf %1105, %1110 : vector<8x16xf32>
    %1112 = arith.mulf %1111, %1111 : vector<8x16xf32>
    %cst_479 = arith.constant dense<0.000000e+00> : vector<8xf32>
    %1113 = vector.multi_reduction <add>, %1112, %cst_479 [1] : vector<8x16xf32> to vector<8xf32>
    %1114 = vector.shape_cast %1113 : vector<8xf32> to vector<8x1xf32>
    %cst_480 = arith.constant 1.600000e+01 : f32
    %1115 = vector.broadcast %cst_480 : f32 to vector<8x1xf32>
    %1116 = arith.divf %1114, %1115 : vector<8x1xf32>
    %cst_481 = arith.constant 9.99999974E-6 : f32
    %1117 = vector.broadcast %cst_481 : f32 to vector<8x1xf32>
    %1118 = arith.addf %1116, %1117 : vector<8x1xf32>
    %1119 = math.rsqrt %1118 : vector<8x1xf32>
    %1120 = vector.broadcast %1119 : vector<8x1xf32> to vector<8x16xf32>
    %1121 = arith.mulf %1111, %1120 : vector<8x16xf32>
    %1122 = vector.broadcast %907 : vector<1x16xf32> to vector<8x16xf32>
    %1123 = arith.mulf %1121, %1122 : vector<8x16xf32>
    %1124 = vector.broadcast %909 : vector<1x16xf32> to vector<8x16xf32>
    %1125 = arith.addf %1123, %1124 : vector<8x16xf32>
    %c7_482 = arith.constant 7 : index
    %c0_483 = arith.constant 0 : index
    %c0_484 = arith.constant 0 : index
    %1126 = vector.load %arg6[%c7_482, %c0_483, %c0_484] : memref<10x16x32xf32, #tpu.memory_space<vmem>>, vector<1x16x32xf32>
    %1127 = vector.shape_cast %1126 : vector<1x16x32xf32> to vector<16x32xf32>
    %cst_485 = arith.constant dense<0.000000e+00> : vector<8x32xf32>
    %1128 = tpu.matmul %1125, %1127, %cst_485 {dimension_numbers = #tpu.dot_dimension_numbers<[1], [0], [0], [1], [0, 0, 1, 1], [], []>} : vector<8x16xf32>, vector<16x32xf32>, vector<8x32xf32> -> vector<8x32xf32>
    %c7_486 = arith.constant 7 : index
    %c0_487 = arith.constant 0 : index
    %c0_488 = arith.constant 0 : index
    %1129 = vector.load %arg7[%c7_486, %c0_487, %c0_488] : memref<10x1x32xf32, #tpu.memory_space<vmem>>, vector<1x1x32xf32>
    %1130 = vector.shape_cast %1129 : vector<1x1x32xf32> to vector<1x32xf32>
    %1131 = vector.broadcast %1130 : vector<1x32xf32> to vector<8x32xf32>
    %1132 = arith.addf %1128, %1131 : vector<8x32xf32>
    %cst_489 = arith.constant 5.000000e-01 : f32
    %1133 = vector.broadcast %cst_489 : f32 to vector<8x32xf32>
    %1134 = arith.mulf %1133, %1132 : vector<8x32xf32>
    %cst_490 = arith.constant 0.707106769 : f32
    %1135 = vector.broadcast %cst_490 : f32 to vector<8x32xf32>
    %1136 = arith.mulf %1132, %1135 : vector<8x32xf32>
    %1137 = math.absf %1136 : vector<8x32xf32>
    %cst_491 = arith.constant 0.327591091 : f32
    %1138 = vector.broadcast %cst_491 : f32 to vector<8x32xf32>
    %1139 = arith.mulf %1138, %1137 : vector<8x32xf32>
    %cst_492 = arith.constant 1.000000e+00 : f32
    %1140 = vector.broadcast %cst_492 : f32 to vector<8x32xf32>
    %1141 = arith.addf %1140, %1139 : vector<8x32xf32>
    %1142 = tpu.reciprocal %1141 {approx = true} : vector<8x32xf32> -> vector<8x32xf32>
    %cst_493 = arith.constant 1.06140542 : f32
    %1143 = vector.broadcast %cst_493 : f32 to vector<8x32xf32>
    %1144 = arith.mulf %1143, %1142 : vector<8x32xf32>
    %cst_494 = arith.constant -1.45315206 : f32
    %1145 = vector.broadcast %cst_494 : f32 to vector<8x32xf32>
    %1146 = arith.addf %1144, %1145 : vector<8x32xf32>
    %1147 = arith.mulf %1146, %1142 : vector<8x32xf32>
    %cst_495 = arith.constant 1.42141378 : f32
    %1148 = vector.broadcast %cst_495 : f32 to vector<8x32xf32>
    %1149 = arith.addf %1147, %1148 : vector<8x32xf32>
    %1150 = arith.mulf %1149, %1142 : vector<8x32xf32>
    %cst_496 = arith.constant -0.284496725 : f32
    %1151 = vector.broadcast %cst_496 : f32 to vector<8x32xf32>
    %1152 = arith.addf %1150, %1151 : vector<8x32xf32>
    %1153 = arith.mulf %1152, %1142 : vector<8x32xf32>
    %cst_497 = arith.constant 0.254829586 : f32
    %1154 = vector.broadcast %cst_497 : f32 to vector<8x32xf32>
    %1155 = arith.addf %1153, %1154 : vector<8x32xf32>
    %1156 = arith.mulf %1155, %1142 : vector<8x32xf32>
    %cst_498 = arith.constant 0.000000e+00 : f32
    %1157 = vector.broadcast %cst_498 : f32 to vector<8x32xf32>
    %1158 = arith.subf %1157, %1137 : vector<8x32xf32>
    %1159 = arith.mulf %1158, %1137 : vector<8x32xf32>
    %1160 = math.exp %1159 : vector<8x32xf32>
    %1161 = arith.mulf %1156, %1160 : vector<8x32xf32>
    %cst_499 = arith.constant 1.000000e+00 : f32
    %1162 = vector.broadcast %cst_499 : f32 to vector<8x32xf32>
    %1163 = arith.subf %1162, %1161 : vector<8x32xf32>
    %cst_500 = arith.constant 0.000000e+00 : f32
    %1164 = vector.broadcast %cst_500 : f32 to vector<8x32xf32>
    %1165 = arith.cmpf oge, %1136, %1164 : vector<8x32xf32>
    %cst_501 = arith.constant 0.000000e+00 : f32
    %1166 = vector.broadcast %cst_501 : f32 to vector<8x32xf32>
    %1167 = arith.subf %1166, %1163 : vector<8x32xf32>
    %1168 = arith.select %1165, %1163, %1167 : vector<8x32xi1>, vector<8x32xf32>
    %cst_502 = arith.constant 1.000000e+00 : f32
    %1169 = vector.broadcast %cst_502 : f32 to vector<8x32xf32>
    %1170 = arith.addf %1169, %1168 : vector<8x32xf32>
    %1171 = arith.mulf %1134, %1170 : vector<8x32xf32>
    %c7_503 = arith.constant 7 : index
    %c0_504 = arith.constant 0 : index
    %c0_505 = arith.constant 0 : index
    %1172 = vector.load %arg8[%c7_503, %c0_504, %c0_505] : memref<10x32x16xf32, #tpu.memory_space<vmem>>, vector<1x32x16xf32>
    %1173 = vector.shape_cast %1172 : vector<1x32x16xf32> to vector<32x16xf32>
    %cst_506 = arith.constant dense<0.000000e+00> : vector<8x16xf32>
    %1174 = tpu.matmul %1171, %1173, %cst_506 {dimension_numbers = #tpu.dot_dimension_numbers<[1], [0], [0], [1], [0, 0, 1, 1], [], []>} : vector<8x32xf32>, vector<32x16xf32>, vector<8x16xf32> -> vector<8x16xf32>
    %c7_507 = arith.constant 7 : index
    %c0_508 = arith.constant 0 : index
    %c0_509 = arith.constant 0 : index
    %1175 = vector.load %arg9[%c7_507, %c0_508, %c0_509] : memref<10x1x16xf32, #tpu.memory_space<vmem>>, vector<1x1x16xf32>
    %1176 = vector.shape_cast %1175 : vector<1x1x16xf32> to vector<1x16xf32>
    %1177 = vector.broadcast %1176 : vector<1x16xf32> to vector<8x16xf32>
    %1178 = arith.addf %1174, %1177 : vector<8x16xf32>
    %1179 = arith.addf %1178, %1125 : vector<8x16xf32>
    %cst_510 = arith.constant dense<0.000000e+00> : vector<8xf32>
    %1180 = vector.multi_reduction <add>, %1179, %cst_510 [1] : vector<8x16xf32> to vector<8xf32>
    %1181 = vector.shape_cast %1180 : vector<8xf32> to vector<8x1xf32>
    %cst_511 = arith.constant 1.600000e+01 : f32
    %1182 = vector.broadcast %cst_511 : f32 to vector<8x1xf32>
    %1183 = arith.divf %1181, %1182 : vector<8x1xf32>
    %1184 = vector.broadcast %1183 : vector<8x1xf32> to vector<8x16xf32>
    %1185 = arith.subf %1179, %1184 : vector<8x16xf32>
    %1186 = arith.mulf %1185, %1185 : vector<8x16xf32>
    %cst_512 = arith.constant dense<0.000000e+00> : vector<8xf32>
    %1187 = vector.multi_reduction <add>, %1186, %cst_512 [1] : vector<8x16xf32> to vector<8xf32>
    %1188 = vector.shape_cast %1187 : vector<8xf32> to vector<8x1xf32>
    %cst_513 = arith.constant 1.600000e+01 : f32
    %1189 = vector.broadcast %cst_513 : f32 to vector<8x1xf32>
    %1190 = arith.divf %1188, %1189 : vector<8x1xf32>
    %cst_514 = arith.constant 9.99999974E-6 : f32
    %1191 = vector.broadcast %cst_514 : f32 to vector<8x1xf32>
    %1192 = arith.addf %1190, %1191 : vector<8x1xf32>
    %1193 = math.rsqrt %1192 : vector<8x1xf32>
    %1194 = vector.broadcast %1193 : vector<8x1xf32> to vector<8x16xf32>
    %1195 = arith.mulf %1185, %1194 : vector<8x16xf32>
    %1196 = vector.broadcast %907 : vector<1x16xf32> to vector<8x16xf32>
    %1197 = arith.mulf %1195, %1196 : vector<8x16xf32>
    %1198 = vector.broadcast %909 : vector<1x16xf32> to vector<8x16xf32>
    %1199 = arith.addf %1197, %1198 : vector<8x16xf32>
    %c0_515 = arith.constant 0 : index
    %c0_516 = arith.constant 0 : index
    %1200 = vector.load %arg18[%c0_515, %c0_516] : memref<48x16xf32, #tpu.memory_space<vmem>>, vector<48x16xf32>
    %c0_517 = arith.constant 0 : index
    %c0_518 = arith.constant 0 : index
    %1201 = vector.load %arg19[%c0_517, %c0_518] : memref<1x16xf32, #tpu.memory_space<vmem>>, vector<1x16xf32>
    %1202 = vector.extract_strided_slice %1200 {offsets = [0, 0], sizes = [16, 16], strides = [1, 1]} : vector<48x16xf32> to vector<16x16xf32>
    %cst_519 = arith.constant dense<0.000000e+00> : vector<8x16xf32>
    %1203 = tpu.matmul %5, %1202, %cst_519 {dimension_numbers = #tpu.dot_dimension_numbers<[1], [0], [0], [1], [0, 0, 1, 1], [], []>} : vector<8x16xf32>, vector<16x16xf32>, vector<8x16xf32> -> vector<8x16xf32>
    %1204 = vector.broadcast %1201 : vector<1x16xf32> to vector<8x16xf32>
    %1205 = arith.addf %1204, %1203 : vector<8x16xf32>
    %1206 = vector.extract_strided_slice %1200 {offsets = [16, 0], sizes = [16, 16], strides = [1, 1]} : vector<48x16xf32> to vector<16x16xf32>
    %cst_520 = arith.constant dense<0.000000e+00> : vector<8x16xf32>
    %1207 = tpu.matmul %287, %1206, %cst_520 {dimension_numbers = #tpu.dot_dimension_numbers<[1], [0], [0], [1], [0, 0, 1, 1], [], []>} : vector<8x16xf32>, vector<16x16xf32>, vector<8x16xf32> -> vector<8x16xf32>
    %1208 = arith.addf %1205, %1207 : vector<8x16xf32>
    %1209 = vector.extract_strided_slice %1200 {offsets = [32, 0], sizes = [16, 16], strides = [1, 1]} : vector<48x16xf32> to vector<16x16xf32>
    %cst_521 = arith.constant dense<0.000000e+00> : vector<8x16xf32>
    %1210 = tpu.matmul %1199, %1209, %cst_521 {dimension_numbers = #tpu.dot_dimension_numbers<[1], [0], [0], [1], [0, 0, 1, 1], [], []>} : vector<8x16xf32>, vector<16x16xf32>, vector<8x16xf32> -> vector<8x16xf32>
    %1211 = arith.addf %1208, %1210 : vector<8x16xf32>
    %c4_522 = arith.constant 4 : index
    %c0_523 = arith.constant 0 : index
    %c0_524 = arith.constant 0 : index
    %1212 = vector.load %arg10[%c4_522, %c0_523, %c0_524] : memref<5x1x16xf32, #tpu.memory_space<vmem>>, vector<1x1x16xf32>
    %1213 = vector.shape_cast %1212 : vector<1x1x16xf32> to vector<1x16xf32>
    %c4_525 = arith.constant 4 : index
    %c0_526 = arith.constant 0 : index
    %c0_527 = arith.constant 0 : index
    %1214 = vector.load %arg11[%c4_525, %c0_526, %c0_527] : memref<5x1x16xf32, #tpu.memory_space<vmem>>, vector<1x1x16xf32>
    %1215 = vector.shape_cast %1214 : vector<1x1x16xf32> to vector<1x16xf32>
    %c8 = arith.constant 8 : index
    %c0_528 = arith.constant 0 : index
    %c0_529 = arith.constant 0 : index
    %1216 = vector.load %arg3[%c8, %c0_528, %c0_529] : memref<10x16x48xf32, #tpu.memory_space<vmem>>, vector<1x16x48xf32>
    %1217 = vector.shape_cast %1216 : vector<1x16x48xf32> to vector<16x48xf32>
    %cst_530 = arith.constant dense<0.000000e+00> : vector<8x48xf32>
    %1218 = tpu.matmul %1211, %1217, %cst_530 {dimension_numbers = #tpu.dot_dimension_numbers<[1], [0], [0], [1], [0, 0, 1, 1], [], []>} : vector<8x16xf32>, vector<16x48xf32>, vector<8x48xf32> -> vector<8x48xf32>
    %c8_531 = arith.constant 8 : index
    %c0_532 = arith.constant 0 : index
    %c0_533 = arith.constant 0 : index
    %1219 = vector.load %arg4[%c8_531, %c0_532, %c0_533] : memref<10x16x16xf32, #tpu.memory_space<vmem>>, vector<1x16x16xf32>
    %1220 = vector.shape_cast %1219 : vector<1x16x16xf32> to vector<16x16xf32>
    %1221 = vector.extract_strided_slice %1218 {offsets = [0, 0], sizes = [8, 8], strides = [1, 1]} : vector<8x48xf32> to vector<8x8xf32>
    %1222 = vector.extract_strided_slice %1218 {offsets = [0, 16], sizes = [8, 8], strides = [1, 1]} : vector<8x48xf32> to vector<8x8xf32>
    %1223 = vector.extract_strided_slice %1218 {offsets = [0, 32], sizes = [8, 8], strides = [1, 1]} : vector<8x48xf32> to vector<8x8xf32>
    %cst_534 = arith.constant dense<0.000000e+00> : vector<8x8xf32>
    %1224 = tpu.matmul %1221, %1222, %cst_534 {dimension_numbers = #tpu.dot_dimension_numbers<[1], [1], [0], [0], [0, 0, 1, 0], [], []>} : vector<8x8xf32>, vector<8x8xf32>, vector<8x8xf32> -> vector<8x8xf32>
    %cst_535 = arith.constant dense<0xFF800000> : vector<8xf32>
    %1225 = vector.multi_reduction <maximumf>, %1224, %cst_535 [1] : vector<8x8xf32> to vector<8xf32>
    %1226 = vector.shape_cast %1225 : vector<8xf32> to vector<8x1xf32>
    %1227 = vector.broadcast %1226 : vector<8x1xf32> to vector<8x8xf32>
    %1228 = arith.subf %1224, %1227 : vector<8x8xf32>
    %1229 = math.exp %1228 : vector<8x8xf32>
    %cst_536 = arith.constant dense<0.000000e+00> : vector<8xf32>
    %1230 = vector.multi_reduction <add>, %1229, %cst_536 [1] : vector<8x8xf32> to vector<8xf32>
    %1231 = vector.shape_cast %1230 : vector<8xf32> to vector<8x1xf32>
    %1232 = tpu.reciprocal %1231 {approx = true} : vector<8x1xf32> -> vector<8x1xf32>
    %1233 = vector.broadcast %1232 : vector<8x1xf32> to vector<8x8xf32>
    %1234 = arith.mulf %1229, %1233 : vector<8x8xf32>
    %cst_537 = arith.constant dense<0.000000e+00> : vector<8x8xf32>
    %1235 = tpu.matmul %1234, %1223, %cst_537 {dimension_numbers = #tpu.dot_dimension_numbers<[1], [0], [0], [1], [0, 0, 1, 1], [], []>} : vector<8x8xf32>, vector<8x8xf32>, vector<8x8xf32> -> vector<8x8xf32>
    %1236 = vector.extract_strided_slice %1220 {offsets = [0, 0], sizes = [8, 16], strides = [1, 1]} : vector<16x16xf32> to vector<8x16xf32>
    %cst_538 = arith.constant dense<0.000000e+00> : vector<8x16xf32>
    %1237 = tpu.matmul %1235, %1236, %cst_538 {dimension_numbers = #tpu.dot_dimension_numbers<[1], [0], [0], [1], [0, 0, 1, 1], [], []>} : vector<8x8xf32>, vector<8x16xf32>, vector<8x16xf32> -> vector<8x16xf32>
    %1238 = vector.extract_strided_slice %1218 {offsets = [0, 8], sizes = [8, 8], strides = [1, 1]} : vector<8x48xf32> to vector<8x8xf32>
    %1239 = vector.extract_strided_slice %1218 {offsets = [0, 24], sizes = [8, 8], strides = [1, 1]} : vector<8x48xf32> to vector<8x8xf32>
    %1240 = vector.extract_strided_slice %1218 {offsets = [0, 40], sizes = [8, 8], strides = [1, 1]} : vector<8x48xf32> to vector<8x8xf32>
    %cst_539 = arith.constant dense<0.000000e+00> : vector<8x8xf32>
    %1241 = tpu.matmul %1238, %1239, %cst_539 {dimension_numbers = #tpu.dot_dimension_numbers<[1], [1], [0], [0], [0, 0, 1, 0], [], []>} : vector<8x8xf32>, vector<8x8xf32>, vector<8x8xf32> -> vector<8x8xf32>
    %cst_540 = arith.constant dense<0xFF800000> : vector<8xf32>
    %1242 = vector.multi_reduction <maximumf>, %1241, %cst_540 [1] : vector<8x8xf32> to vector<8xf32>
    %1243 = vector.shape_cast %1242 : vector<8xf32> to vector<8x1xf32>
    %1244 = vector.broadcast %1243 : vector<8x1xf32> to vector<8x8xf32>
    %1245 = arith.subf %1241, %1244 : vector<8x8xf32>
    %1246 = math.exp %1245 : vector<8x8xf32>
    %cst_541 = arith.constant dense<0.000000e+00> : vector<8xf32>
    %1247 = vector.multi_reduction <add>, %1246, %cst_541 [1] : vector<8x8xf32> to vector<8xf32>
    %1248 = vector.shape_cast %1247 : vector<8xf32> to vector<8x1xf32>
    %1249 = tpu.reciprocal %1248 {approx = true} : vector<8x1xf32> -> vector<8x1xf32>
    %1250 = vector.broadcast %1249 : vector<8x1xf32> to vector<8x8xf32>
    %1251 = arith.mulf %1246, %1250 : vector<8x8xf32>
    %cst_542 = arith.constant dense<0.000000e+00> : vector<8x8xf32>
    %1252 = tpu.matmul %1251, %1240, %cst_542 {dimension_numbers = #tpu.dot_dimension_numbers<[1], [0], [0], [1], [0, 0, 1, 1], [], []>} : vector<8x8xf32>, vector<8x8xf32>, vector<8x8xf32> -> vector<8x8xf32>
    %1253 = vector.extract_strided_slice %1220 {offsets = [8, 0], sizes = [8, 16], strides = [1, 1]} : vector<16x16xf32> to vector<8x16xf32>
    %cst_543 = arith.constant dense<0.000000e+00> : vector<8x16xf32>
    %1254 = tpu.matmul %1252, %1253, %cst_543 {dimension_numbers = #tpu.dot_dimension_numbers<[1], [0], [0], [1], [0, 0, 1, 1], [], []>} : vector<8x8xf32>, vector<8x16xf32>, vector<8x16xf32> -> vector<8x16xf32>
    %1255 = arith.addf %1237, %1254 : vector<8x16xf32>
    %c8_544 = arith.constant 8 : index
    %c0_545 = arith.constant 0 : index
    %c0_546 = arith.constant 0 : index
    %1256 = vector.load %arg5[%c8_544, %c0_545, %c0_546] : memref<10x1x16xf32, #tpu.memory_space<vmem>>, vector<1x1x16xf32>
    %1257 = vector.shape_cast %1256 : vector<1x1x16xf32> to vector<1x16xf32>
    %1258 = vector.broadcast %1257 : vector<1x16xf32> to vector<8x16xf32>
    %1259 = arith.addf %1255, %1258 : vector<8x16xf32>
    %1260 = arith.addf %1259, %1211 : vector<8x16xf32>
    %cst_547 = arith.constant dense<0.000000e+00> : vector<8xf32>
    %1261 = vector.multi_reduction <add>, %1260, %cst_547 [1] : vector<8x16xf32> to vector<8xf32>
    %1262 = vector.shape_cast %1261 : vector<8xf32> to vector<8x1xf32>
    %cst_548 = arith.constant 1.600000e+01 : f32
    %1263 = vector.broadcast %cst_548 : f32 to vector<8x1xf32>
    %1264 = arith.divf %1262, %1263 : vector<8x1xf32>
    %1265 = vector.broadcast %1264 : vector<8x1xf32> to vector<8x16xf32>
    %1266 = arith.subf %1260, %1265 : vector<8x16xf32>
    %1267 = arith.mulf %1266, %1266 : vector<8x16xf32>
    %cst_549 = arith.constant dense<0.000000e+00> : vector<8xf32>
    %1268 = vector.multi_reduction <add>, %1267, %cst_549 [1] : vector<8x16xf32> to vector<8xf32>
    %1269 = vector.shape_cast %1268 : vector<8xf32> to vector<8x1xf32>
    %cst_550 = arith.constant 1.600000e+01 : f32
    %1270 = vector.broadcast %cst_550 : f32 to vector<8x1xf32>
    %1271 = arith.divf %1269, %1270 : vector<8x1xf32>
    %cst_551 = arith.constant 9.99999974E-6 : f32
    %1272 = vector.broadcast %cst_551 : f32 to vector<8x1xf32>
    %1273 = arith.addf %1271, %1272 : vector<8x1xf32>
    %1274 = math.rsqrt %1273 : vector<8x1xf32>
    %1275 = vector.broadcast %1274 : vector<8x1xf32> to vector<8x16xf32>
    %1276 = arith.mulf %1266, %1275 : vector<8x16xf32>
    %1277 = vector.broadcast %1213 : vector<1x16xf32> to vector<8x16xf32>
    %1278 = arith.mulf %1276, %1277 : vector<8x16xf32>
    %1279 = vector.broadcast %1215 : vector<1x16xf32> to vector<8x16xf32>
    %1280 = arith.addf %1278, %1279 : vector<8x16xf32>
    %c8_552 = arith.constant 8 : index
    %c0_553 = arith.constant 0 : index
    %c0_554 = arith.constant 0 : index
    %1281 = vector.load %arg6[%c8_552, %c0_553, %c0_554] : memref<10x16x32xf32, #tpu.memory_space<vmem>>, vector<1x16x32xf32>
    %1282 = vector.shape_cast %1281 : vector<1x16x32xf32> to vector<16x32xf32>
    %cst_555 = arith.constant dense<0.000000e+00> : vector<8x32xf32>
    %1283 = tpu.matmul %1280, %1282, %cst_555 {dimension_numbers = #tpu.dot_dimension_numbers<[1], [0], [0], [1], [0, 0, 1, 1], [], []>} : vector<8x16xf32>, vector<16x32xf32>, vector<8x32xf32> -> vector<8x32xf32>
    %c8_556 = arith.constant 8 : index
    %c0_557 = arith.constant 0 : index
    %c0_558 = arith.constant 0 : index
    %1284 = vector.load %arg7[%c8_556, %c0_557, %c0_558] : memref<10x1x32xf32, #tpu.memory_space<vmem>>, vector<1x1x32xf32>
    %1285 = vector.shape_cast %1284 : vector<1x1x32xf32> to vector<1x32xf32>
    %1286 = vector.broadcast %1285 : vector<1x32xf32> to vector<8x32xf32>
    %1287 = arith.addf %1283, %1286 : vector<8x32xf32>
    %cst_559 = arith.constant 5.000000e-01 : f32
    %1288 = vector.broadcast %cst_559 : f32 to vector<8x32xf32>
    %1289 = arith.mulf %1288, %1287 : vector<8x32xf32>
    %cst_560 = arith.constant 0.707106769 : f32
    %1290 = vector.broadcast %cst_560 : f32 to vector<8x32xf32>
    %1291 = arith.mulf %1287, %1290 : vector<8x32xf32>
    %1292 = math.absf %1291 : vector<8x32xf32>
    %cst_561 = arith.constant 0.327591091 : f32
    %1293 = vector.broadcast %cst_561 : f32 to vector<8x32xf32>
    %1294 = arith.mulf %1293, %1292 : vector<8x32xf32>
    %cst_562 = arith.constant 1.000000e+00 : f32
    %1295 = vector.broadcast %cst_562 : f32 to vector<8x32xf32>
    %1296 = arith.addf %1295, %1294 : vector<8x32xf32>
    %1297 = tpu.reciprocal %1296 {approx = true} : vector<8x32xf32> -> vector<8x32xf32>
    %cst_563 = arith.constant 1.06140542 : f32
    %1298 = vector.broadcast %cst_563 : f32 to vector<8x32xf32>
    %1299 = arith.mulf %1298, %1297 : vector<8x32xf32>
    %cst_564 = arith.constant -1.45315206 : f32
    %1300 = vector.broadcast %cst_564 : f32 to vector<8x32xf32>
    %1301 = arith.addf %1299, %1300 : vector<8x32xf32>
    %1302 = arith.mulf %1301, %1297 : vector<8x32xf32>
    %cst_565 = arith.constant 1.42141378 : f32
    %1303 = vector.broadcast %cst_565 : f32 to vector<8x32xf32>
    %1304 = arith.addf %1302, %1303 : vector<8x32xf32>
    %1305 = arith.mulf %1304, %1297 : vector<8x32xf32>
    %cst_566 = arith.constant -0.284496725 : f32
    %1306 = vector.broadcast %cst_566 : f32 to vector<8x32xf32>
    %1307 = arith.addf %1305, %1306 : vector<8x32xf32>
    %1308 = arith.mulf %1307, %1297 : vector<8x32xf32>
    %cst_567 = arith.constant 0.254829586 : f32
    %1309 = vector.broadcast %cst_567 : f32 to vector<8x32xf32>
    %1310 = arith.addf %1308, %1309 : vector<8x32xf32>
    %1311 = arith.mulf %1310, %1297 : vector<8x32xf32>
    %cst_568 = arith.constant 0.000000e+00 : f32
    %1312 = vector.broadcast %cst_568 : f32 to vector<8x32xf32>
    %1313 = arith.subf %1312, %1292 : vector<8x32xf32>
    %1314 = arith.mulf %1313, %1292 : vector<8x32xf32>
    %1315 = math.exp %1314 : vector<8x32xf32>
    %1316 = arith.mulf %1311, %1315 : vector<8x32xf32>
    %cst_569 = arith.constant 1.000000e+00 : f32
    %1317 = vector.broadcast %cst_569 : f32 to vector<8x32xf32>
    %1318 = arith.subf %1317, %1316 : vector<8x32xf32>
    %cst_570 = arith.constant 0.000000e+00 : f32
    %1319 = vector.broadcast %cst_570 : f32 to vector<8x32xf32>
    %1320 = arith.cmpf oge, %1291, %1319 : vector<8x32xf32>
    %cst_571 = arith.constant 0.000000e+00 : f32
    %1321 = vector.broadcast %cst_571 : f32 to vector<8x32xf32>
    %1322 = arith.subf %1321, %1318 : vector<8x32xf32>
    %1323 = arith.select %1320, %1318, %1322 : vector<8x32xi1>, vector<8x32xf32>
    %cst_572 = arith.constant 1.000000e+00 : f32
    %1324 = vector.broadcast %cst_572 : f32 to vector<8x32xf32>
    %1325 = arith.addf %1324, %1323 : vector<8x32xf32>
    %1326 = arith.mulf %1289, %1325 : vector<8x32xf32>
    %c8_573 = arith.constant 8 : index
    %c0_574 = arith.constant 0 : index
    %c0_575 = arith.constant 0 : index
    %1327 = vector.load %arg8[%c8_573, %c0_574, %c0_575] : memref<10x32x16xf32, #tpu.memory_space<vmem>>, vector<1x32x16xf32>
    %1328 = vector.shape_cast %1327 : vector<1x32x16xf32> to vector<32x16xf32>
    %cst_576 = arith.constant dense<0.000000e+00> : vector<8x16xf32>
    %1329 = tpu.matmul %1326, %1328, %cst_576 {dimension_numbers = #tpu.dot_dimension_numbers<[1], [0], [0], [1], [0, 0, 1, 1], [], []>} : vector<8x32xf32>, vector<32x16xf32>, vector<8x16xf32> -> vector<8x16xf32>
    %c8_577 = arith.constant 8 : index
    %c0_578 = arith.constant 0 : index
    %c0_579 = arith.constant 0 : index
    %1330 = vector.load %arg9[%c8_577, %c0_578, %c0_579] : memref<10x1x16xf32, #tpu.memory_space<vmem>>, vector<1x1x16xf32>
    %1331 = vector.shape_cast %1330 : vector<1x1x16xf32> to vector<1x16xf32>
    %1332 = vector.broadcast %1331 : vector<1x16xf32> to vector<8x16xf32>
    %1333 = arith.addf %1329, %1332 : vector<8x16xf32>
    %1334 = arith.addf %1333, %1280 : vector<8x16xf32>
    %cst_580 = arith.constant dense<0.000000e+00> : vector<8xf32>
    %1335 = vector.multi_reduction <add>, %1334, %cst_580 [1] : vector<8x16xf32> to vector<8xf32>
    %1336 = vector.shape_cast %1335 : vector<8xf32> to vector<8x1xf32>
    %cst_581 = arith.constant 1.600000e+01 : f32
    %1337 = vector.broadcast %cst_581 : f32 to vector<8x1xf32>
    %1338 = arith.divf %1336, %1337 : vector<8x1xf32>
    %1339 = vector.broadcast %1338 : vector<8x1xf32> to vector<8x16xf32>
    %1340 = arith.subf %1334, %1339 : vector<8x16xf32>
    %1341 = arith.mulf %1340, %1340 : vector<8x16xf32>
    %cst_582 = arith.constant dense<0.000000e+00> : vector<8xf32>
    %1342 = vector.multi_reduction <add>, %1341, %cst_582 [1] : vector<8x16xf32> to vector<8xf32>
    %1343 = vector.shape_cast %1342 : vector<8xf32> to vector<8x1xf32>
    %cst_583 = arith.constant 1.600000e+01 : f32
    %1344 = vector.broadcast %cst_583 : f32 to vector<8x1xf32>
    %1345 = arith.divf %1343, %1344 : vector<8x1xf32>
    %cst_584 = arith.constant 9.99999974E-6 : f32
    %1346 = vector.broadcast %cst_584 : f32 to vector<8x1xf32>
    %1347 = arith.addf %1345, %1346 : vector<8x1xf32>
    %1348 = math.rsqrt %1347 : vector<8x1xf32>
    %1349 = vector.broadcast %1348 : vector<8x1xf32> to vector<8x16xf32>
    %1350 = arith.mulf %1340, %1349 : vector<8x16xf32>
    %1351 = vector.broadcast %1213 : vector<1x16xf32> to vector<8x16xf32>
    %1352 = arith.mulf %1350, %1351 : vector<8x16xf32>
    %1353 = vector.broadcast %1215 : vector<1x16xf32> to vector<8x16xf32>
    %1354 = arith.addf %1352, %1353 : vector<8x16xf32>
    %c9 = arith.constant 9 : index
    %c0_585 = arith.constant 0 : index
    %c0_586 = arith.constant 0 : index
    %1355 = vector.load %arg3[%c9, %c0_585, %c0_586] : memref<10x16x48xf32, #tpu.memory_space<vmem>>, vector<1x16x48xf32>
    %1356 = vector.shape_cast %1355 : vector<1x16x48xf32> to vector<16x48xf32>
    %cst_587 = arith.constant dense<0.000000e+00> : vector<8x48xf32>
    %1357 = tpu.matmul %1354, %1356, %cst_587 {dimension_numbers = #tpu.dot_dimension_numbers<[1], [0], [0], [1], [0, 0, 1, 1], [], []>} : vector<8x16xf32>, vector<16x48xf32>, vector<8x48xf32> -> vector<8x48xf32>
    %c9_588 = arith.constant 9 : index
    %c0_589 = arith.constant 0 : index
    %c0_590 = arith.constant 0 : index
    %1358 = vector.load %arg4[%c9_588, %c0_589, %c0_590] : memref<10x16x16xf32, #tpu.memory_space<vmem>>, vector<1x16x16xf32>
    %1359 = vector.shape_cast %1358 : vector<1x16x16xf32> to vector<16x16xf32>
    %1360 = vector.extract_strided_slice %1357 {offsets = [0, 0], sizes = [8, 8], strides = [1, 1]} : vector<8x48xf32> to vector<8x8xf32>
    %1361 = vector.extract_strided_slice %1357 {offsets = [0, 16], sizes = [8, 8], strides = [1, 1]} : vector<8x48xf32> to vector<8x8xf32>
    %1362 = vector.extract_strided_slice %1357 {offsets = [0, 32], sizes = [8, 8], strides = [1, 1]} : vector<8x48xf32> to vector<8x8xf32>
    %cst_591 = arith.constant dense<0.000000e+00> : vector<8x8xf32>
    %1363 = tpu.matmul %1360, %1361, %cst_591 {dimension_numbers = #tpu.dot_dimension_numbers<[1], [1], [0], [0], [0, 0, 1, 0], [], []>} : vector<8x8xf32>, vector<8x8xf32>, vector<8x8xf32> -> vector<8x8xf32>
    %cst_592 = arith.constant dense<0xFF800000> : vector<8xf32>
    %1364 = vector.multi_reduction <maximumf>, %1363, %cst_592 [1] : vector<8x8xf32> to vector<8xf32>
    %1365 = vector.shape_cast %1364 : vector<8xf32> to vector<8x1xf32>
    %1366 = vector.broadcast %1365 : vector<8x1xf32> to vector<8x8xf32>
    %1367 = arith.subf %1363, %1366 : vector<8x8xf32>
    %1368 = math.exp %1367 : vector<8x8xf32>
    %cst_593 = arith.constant dense<0.000000e+00> : vector<8xf32>
    %1369 = vector.multi_reduction <add>, %1368, %cst_593 [1] : vector<8x8xf32> to vector<8xf32>
    %1370 = vector.shape_cast %1369 : vector<8xf32> to vector<8x1xf32>
    %1371 = tpu.reciprocal %1370 {approx = true} : vector<8x1xf32> -> vector<8x1xf32>
    %1372 = vector.broadcast %1371 : vector<8x1xf32> to vector<8x8xf32>
    %1373 = arith.mulf %1368, %1372 : vector<8x8xf32>
    %cst_594 = arith.constant dense<0.000000e+00> : vector<8x8xf32>
    %1374 = tpu.matmul %1373, %1362, %cst_594 {dimension_numbers = #tpu.dot_dimension_numbers<[1], [0], [0], [1], [0, 0, 1, 1], [], []>} : vector<8x8xf32>, vector<8x8xf32>, vector<8x8xf32> -> vector<8x8xf32>
    %1375 = vector.extract_strided_slice %1359 {offsets = [0, 0], sizes = [8, 16], strides = [1, 1]} : vector<16x16xf32> to vector<8x16xf32>
    %cst_595 = arith.constant dense<0.000000e+00> : vector<8x16xf32>
    %1376 = tpu.matmul %1374, %1375, %cst_595 {dimension_numbers = #tpu.dot_dimension_numbers<[1], [0], [0], [1], [0, 0, 1, 1], [], []>} : vector<8x8xf32>, vector<8x16xf32>, vector<8x16xf32> -> vector<8x16xf32>
    %1377 = vector.extract_strided_slice %1357 {offsets = [0, 8], sizes = [8, 8], strides = [1, 1]} : vector<8x48xf32> to vector<8x8xf32>
    %1378 = vector.extract_strided_slice %1357 {offsets = [0, 24], sizes = [8, 8], strides = [1, 1]} : vector<8x48xf32> to vector<8x8xf32>
    %1379 = vector.extract_strided_slice %1357 {offsets = [0, 40], sizes = [8, 8], strides = [1, 1]} : vector<8x48xf32> to vector<8x8xf32>
    %cst_596 = arith.constant dense<0.000000e+00> : vector<8x8xf32>
    %1380 = tpu.matmul %1377, %1378, %cst_596 {dimension_numbers = #tpu.dot_dimension_numbers<[1], [1], [0], [0], [0, 0, 1, 0], [], []>} : vector<8x8xf32>, vector<8x8xf32>, vector<8x8xf32> -> vector<8x8xf32>
    %cst_597 = arith.constant dense<0xFF800000> : vector<8xf32>
    %1381 = vector.multi_reduction <maximumf>, %1380, %cst_597 [1] : vector<8x8xf32> to vector<8xf32>
    %1382 = vector.shape_cast %1381 : vector<8xf32> to vector<8x1xf32>
    %1383 = vector.broadcast %1382 : vector<8x1xf32> to vector<8x8xf32>
    %1384 = arith.subf %1380, %1383 : vector<8x8xf32>
    %1385 = math.exp %1384 : vector<8x8xf32>
    %cst_598 = arith.constant dense<0.000000e+00> : vector<8xf32>
    %1386 = vector.multi_reduction <add>, %1385, %cst_598 [1] : vector<8x8xf32> to vector<8xf32>
    %1387 = vector.shape_cast %1386 : vector<8xf32> to vector<8x1xf32>
    %1388 = tpu.reciprocal %1387 {approx = true} : vector<8x1xf32> -> vector<8x1xf32>
    %1389 = vector.broadcast %1388 : vector<8x1xf32> to vector<8x8xf32>
    %1390 = arith.mulf %1385, %1389 : vector<8x8xf32>
    %cst_599 = arith.constant dense<0.000000e+00> : vector<8x8xf32>
    %1391 = tpu.matmul %1390, %1379, %cst_599 {dimension_numbers = #tpu.dot_dimension_numbers<[1], [0], [0], [1], [0, 0, 1, 1], [], []>} : vector<8x8xf32>, vector<8x8xf32>, vector<8x8xf32> -> vector<8x8xf32>
    %1392 = vector.extract_strided_slice %1359 {offsets = [8, 0], sizes = [8, 16], strides = [1, 1]} : vector<16x16xf32> to vector<8x16xf32>
    %cst_600 = arith.constant dense<0.000000e+00> : vector<8x16xf32>
    %1393 = tpu.matmul %1391, %1392, %cst_600 {dimension_numbers = #tpu.dot_dimension_numbers<[1], [0], [0], [1], [0, 0, 1, 1], [], []>} : vector<8x8xf32>, vector<8x16xf32>, vector<8x16xf32> -> vector<8x16xf32>
    %1394 = arith.addf %1376, %1393 : vector<8x16xf32>
    %c9_601 = arith.constant 9 : index
    %c0_602 = arith.constant 0 : index
    %c0_603 = arith.constant 0 : index
    %1395 = vector.load %arg5[%c9_601, %c0_602, %c0_603] : memref<10x1x16xf32, #tpu.memory_space<vmem>>, vector<1x1x16xf32>
    %1396 = vector.shape_cast %1395 : vector<1x1x16xf32> to vector<1x16xf32>
    %1397 = vector.broadcast %1396 : vector<1x16xf32> to vector<8x16xf32>
    %1398 = arith.addf %1394, %1397 : vector<8x16xf32>
    %1399 = arith.addf %1398, %1354 : vector<8x16xf32>
    %cst_604 = arith.constant dense<0.000000e+00> : vector<8xf32>
    %1400 = vector.multi_reduction <add>, %1399, %cst_604 [1] : vector<8x16xf32> to vector<8xf32>
    %1401 = vector.shape_cast %1400 : vector<8xf32> to vector<8x1xf32>
    %cst_605 = arith.constant 1.600000e+01 : f32
    %1402 = vector.broadcast %cst_605 : f32 to vector<8x1xf32>
    %1403 = arith.divf %1401, %1402 : vector<8x1xf32>
    %1404 = vector.broadcast %1403 : vector<8x1xf32> to vector<8x16xf32>
    %1405 = arith.subf %1399, %1404 : vector<8x16xf32>
    %1406 = arith.mulf %1405, %1405 : vector<8x16xf32>
    %cst_606 = arith.constant dense<0.000000e+00> : vector<8xf32>
    %1407 = vector.multi_reduction <add>, %1406, %cst_606 [1] : vector<8x16xf32> to vector<8xf32>
    %1408 = vector.shape_cast %1407 : vector<8xf32> to vector<8x1xf32>
    %cst_607 = arith.constant 1.600000e+01 : f32
    %1409 = vector.broadcast %cst_607 : f32 to vector<8x1xf32>
    %1410 = arith.divf %1408, %1409 : vector<8x1xf32>
    %cst_608 = arith.constant 9.99999974E-6 : f32
    %1411 = vector.broadcast %cst_608 : f32 to vector<8x1xf32>
    %1412 = arith.addf %1410, %1411 : vector<8x1xf32>
    %1413 = math.rsqrt %1412 : vector<8x1xf32>
    %1414 = vector.broadcast %1413 : vector<8x1xf32> to vector<8x16xf32>
    %1415 = arith.mulf %1405, %1414 : vector<8x16xf32>
    %1416 = vector.broadcast %1213 : vector<1x16xf32> to vector<8x16xf32>
    %1417 = arith.mulf %1415, %1416 : vector<8x16xf32>
    %1418 = vector.broadcast %1215 : vector<1x16xf32> to vector<8x16xf32>
    %1419 = arith.addf %1417, %1418 : vector<8x16xf32>
    %c9_609 = arith.constant 9 : index
    %c0_610 = arith.constant 0 : index
    %c0_611 = arith.constant 0 : index
    %1420 = vector.load %arg6[%c9_609, %c0_610, %c0_611] : memref<10x16x32xf32, #tpu.memory_space<vmem>>, vector<1x16x32xf32>
    %1421 = vector.shape_cast %1420 : vector<1x16x32xf32> to vector<16x32xf32>
    %cst_612 = arith.constant dense<0.000000e+00> : vector<8x32xf32>
    %1422 = tpu.matmul %1419, %1421, %cst_612 {dimension_numbers = #tpu.dot_dimension_numbers<[1], [0], [0], [1], [0, 0, 1, 1], [], []>} : vector<8x16xf32>, vector<16x32xf32>, vector<8x32xf32> -> vector<8x32xf32>
    %c9_613 = arith.constant 9 : index
    %c0_614 = arith.constant 0 : index
    %c0_615 = arith.constant 0 : index
    %1423 = vector.load %arg7[%c9_613, %c0_614, %c0_615] : memref<10x1x32xf32, #tpu.memory_space<vmem>>, vector<1x1x32xf32>
    %1424 = vector.shape_cast %1423 : vector<1x1x32xf32> to vector<1x32xf32>
    %1425 = vector.broadcast %1424 : vector<1x32xf32> to vector<8x32xf32>
    %1426 = arith.addf %1422, %1425 : vector<8x32xf32>
    %cst_616 = arith.constant 5.000000e-01 : f32
    %1427 = vector.broadcast %cst_616 : f32 to vector<8x32xf32>
    %1428 = arith.mulf %1427, %1426 : vector<8x32xf32>
    %cst_617 = arith.constant 0.707106769 : f32
    %1429 = vector.broadcast %cst_617 : f32 to vector<8x32xf32>
    %1430 = arith.mulf %1426, %1429 : vector<8x32xf32>
    %1431 = math.absf %1430 : vector<8x32xf32>
    %cst_618 = arith.constant 0.327591091 : f32
    %1432 = vector.broadcast %cst_618 : f32 to vector<8x32xf32>
    %1433 = arith.mulf %1432, %1431 : vector<8x32xf32>
    %cst_619 = arith.constant 1.000000e+00 : f32
    %1434 = vector.broadcast %cst_619 : f32 to vector<8x32xf32>
    %1435 = arith.addf %1434, %1433 : vector<8x32xf32>
    %1436 = tpu.reciprocal %1435 {approx = true} : vector<8x32xf32> -> vector<8x32xf32>
    %cst_620 = arith.constant 1.06140542 : f32
    %1437 = vector.broadcast %cst_620 : f32 to vector<8x32xf32>
    %1438 = arith.mulf %1437, %1436 : vector<8x32xf32>
    %cst_621 = arith.constant -1.45315206 : f32
    %1439 = vector.broadcast %cst_621 : f32 to vector<8x32xf32>
    %1440 = arith.addf %1438, %1439 : vector<8x32xf32>
    %1441 = arith.mulf %1440, %1436 : vector<8x32xf32>
    %cst_622 = arith.constant 1.42141378 : f32
    %1442 = vector.broadcast %cst_622 : f32 to vector<8x32xf32>
    %1443 = arith.addf %1441, %1442 : vector<8x32xf32>
    %1444 = arith.mulf %1443, %1436 : vector<8x32xf32>
    %cst_623 = arith.constant -0.284496725 : f32
    %1445 = vector.broadcast %cst_623 : f32 to vector<8x32xf32>
    %1446 = arith.addf %1444, %1445 : vector<8x32xf32>
    %1447 = arith.mulf %1446, %1436 : vector<8x32xf32>
    %cst_624 = arith.constant 0.254829586 : f32
    %1448 = vector.broadcast %cst_624 : f32 to vector<8x32xf32>
    %1449 = arith.addf %1447, %1448 : vector<8x32xf32>
    %1450 = arith.mulf %1449, %1436 : vector<8x32xf32>
    %cst_625 = arith.constant 0.000000e+00 : f32
    %1451 = vector.broadcast %cst_625 : f32 to vector<8x32xf32>
    %1452 = arith.subf %1451, %1431 : vector<8x32xf32>
    %1453 = arith.mulf %1452, %1431 : vector<8x32xf32>
    %1454 = math.exp %1453 : vector<8x32xf32>
    %1455 = arith.mulf %1450, %1454 : vector<8x32xf32>
    %cst_626 = arith.constant 1.000000e+00 : f32
    %1456 = vector.broadcast %cst_626 : f32 to vector<8x32xf32>
    %1457 = arith.subf %1456, %1455 : vector<8x32xf32>
    %cst_627 = arith.constant 0.000000e+00 : f32
    %1458 = vector.broadcast %cst_627 : f32 to vector<8x32xf32>
    %1459 = arith.cmpf oge, %1430, %1458 : vector<8x32xf32>
    %cst_628 = arith.constant 0.000000e+00 : f32
    %1460 = vector.broadcast %cst_628 : f32 to vector<8x32xf32>
    %1461 = arith.subf %1460, %1457 : vector<8x32xf32>
    %1462 = arith.select %1459, %1457, %1461 : vector<8x32xi1>, vector<8x32xf32>
    %cst_629 = arith.constant 1.000000e+00 : f32
    %1463 = vector.broadcast %cst_629 : f32 to vector<8x32xf32>
    %1464 = arith.addf %1463, %1462 : vector<8x32xf32>
    %1465 = arith.mulf %1428, %1464 : vector<8x32xf32>
    %c9_630 = arith.constant 9 : index
    %c0_631 = arith.constant 0 : index
    %c0_632 = arith.constant 0 : index
    %1466 = vector.load %arg8[%c9_630, %c0_631, %c0_632] : memref<10x32x16xf32, #tpu.memory_space<vmem>>, vector<1x32x16xf32>
    %1467 = vector.shape_cast %1466 : vector<1x32x16xf32> to vector<32x16xf32>
    %cst_633 = arith.constant dense<0.000000e+00> : vector<8x16xf32>
    %1468 = tpu.matmul %1465, %1467, %cst_633 {dimension_numbers = #tpu.dot_dimension_numbers<[1], [0], [0], [1], [0, 0, 1, 1], [], []>} : vector<8x32xf32>, vector<32x16xf32>, vector<8x16xf32> -> vector<8x16xf32>
    %c9_634 = arith.constant 9 : index
    %c0_635 = arith.constant 0 : index
    %c0_636 = arith.constant 0 : index
    %1469 = vector.load %arg9[%c9_634, %c0_635, %c0_636] : memref<10x1x16xf32, #tpu.memory_space<vmem>>, vector<1x1x16xf32>
    %1470 = vector.shape_cast %1469 : vector<1x1x16xf32> to vector<1x16xf32>
    %1471 = vector.broadcast %1470 : vector<1x16xf32> to vector<8x16xf32>
    %1472 = arith.addf %1468, %1471 : vector<8x16xf32>
    %1473 = arith.addf %1472, %1419 : vector<8x16xf32>
    %cst_637 = arith.constant dense<0.000000e+00> : vector<8xf32>
    %1474 = vector.multi_reduction <add>, %1473, %cst_637 [1] : vector<8x16xf32> to vector<8xf32>
    %1475 = vector.shape_cast %1474 : vector<8xf32> to vector<8x1xf32>
    %cst_638 = arith.constant 1.600000e+01 : f32
    %1476 = vector.broadcast %cst_638 : f32 to vector<8x1xf32>
    %1477 = arith.divf %1475, %1476 : vector<8x1xf32>
    %1478 = vector.broadcast %1477 : vector<8x1xf32> to vector<8x16xf32>
    %1479 = arith.subf %1473, %1478 : vector<8x16xf32>
    %1480 = arith.mulf %1479, %1479 : vector<8x16xf32>
    %cst_639 = arith.constant dense<0.000000e+00> : vector<8xf32>
    %1481 = vector.multi_reduction <add>, %1480, %cst_639 [1] : vector<8x16xf32> to vector<8xf32>
    %1482 = vector.shape_cast %1481 : vector<8xf32> to vector<8x1xf32>
    %cst_640 = arith.constant 1.600000e+01 : f32
    %1483 = vector.broadcast %cst_640 : f32 to vector<8x1xf32>
    %1484 = arith.divf %1482, %1483 : vector<8x1xf32>
    %cst_641 = arith.constant 9.99999974E-6 : f32
    %1485 = vector.broadcast %cst_641 : f32 to vector<8x1xf32>
    %1486 = arith.addf %1484, %1485 : vector<8x1xf32>
    %1487 = math.rsqrt %1486 : vector<8x1xf32>
    %1488 = vector.broadcast %1487 : vector<8x1xf32> to vector<8x16xf32>
    %1489 = arith.mulf %1479, %1488 : vector<8x16xf32>
    %1490 = vector.broadcast %1213 : vector<1x16xf32> to vector<8x16xf32>
    %1491 = arith.mulf %1489, %1490 : vector<8x16xf32>
    %1492 = vector.broadcast %1215 : vector<1x16xf32> to vector<8x16xf32>
    %1493 = arith.addf %1491, %1492 : vector<8x16xf32>
    %c0_642 = arith.constant 0 : index
    %c0_643 = arith.constant 0 : index
    %1494 = vector.load %arg20[%c0_642, %c0_643] : memref<1x16xf32, #tpu.memory_space<vmem>>, vector<1x16xf32>
    %c0_644 = arith.constant 0 : index
    %c0_645 = arith.constant 0 : index
    %1495 = vector.load %arg21[%c0_644, %c0_645] : memref<1x16xf32, #tpu.memory_space<vmem>>, vector<1x16xf32>
    %cst_646 = arith.constant dense<0.000000e+00> : vector<8xf32>
    %1496 = vector.multi_reduction <add>, %287, %cst_646 [1] : vector<8x16xf32> to vector<8xf32>
    %1497 = vector.shape_cast %1496 : vector<8xf32> to vector<8x1xf32>
    %cst_647 = arith.constant 1.600000e+01 : f32
    %1498 = vector.broadcast %cst_647 : f32 to vector<8x1xf32>
    %1499 = arith.divf %1497, %1498 : vector<8x1xf32>
    %1500 = vector.broadcast %1499 : vector<8x1xf32> to vector<8x16xf32>
    %1501 = arith.subf %287, %1500 : vector<8x16xf32>
    %1502 = arith.mulf %1501, %1501 : vector<8x16xf32>
    %cst_648 = arith.constant dense<0.000000e+00> : vector<8xf32>
    %1503 = vector.multi_reduction <add>, %1502, %cst_648 [1] : vector<8x16xf32> to vector<8xf32>
    %1504 = vector.shape_cast %1503 : vector<8xf32> to vector<8x1xf32>
    %cst_649 = arith.constant 1.600000e+01 : f32
    %1505 = vector.broadcast %cst_649 : f32 to vector<8x1xf32>
    %1506 = arith.divf %1504, %1505 : vector<8x1xf32>
    %cst_650 = arith.constant 9.99999974E-6 : f32
    %1507 = vector.broadcast %cst_650 : f32 to vector<8x1xf32>
    %1508 = arith.addf %1506, %1507 : vector<8x1xf32>
    %1509 = math.rsqrt %1508 : vector<8x1xf32>
    %1510 = vector.broadcast %1509 : vector<8x1xf32> to vector<8x16xf32>
    %1511 = arith.mulf %1501, %1510 : vector<8x16xf32>
    %1512 = vector.broadcast %1494 : vector<1x16xf32> to vector<8x16xf32>
    %1513 = arith.mulf %1511, %1512 : vector<8x16xf32>
    %1514 = vector.broadcast %1495 : vector<1x16xf32> to vector<8x16xf32>
    %1515 = arith.addf %1513, %1514 : vector<8x16xf32>
    %c0_651 = arith.constant 0 : index
    %c0_652 = arith.constant 0 : index
    %1516 = vector.load %arg22[%c0_651, %c0_652] : memref<16x4xf32, #tpu.memory_space<vmem>>, vector<16x4xf32>
    %cst_653 = arith.constant dense<0.000000e+00> : vector<8x4xf32>
    %1517 = tpu.matmul %1515, %1516, %cst_653 {dimension_numbers = #tpu.dot_dimension_numbers<[1], [0], [0], [1], [0, 0, 1, 1], [], []>} : vector<8x16xf32>, vector<16x4xf32>, vector<8x4xf32> -> vector<8x4xf32>
    %c0_654 = arith.constant 0 : index
    %c0_655 = arith.constant 0 : index
    %1518 = vector.load %arg23[%c0_654, %c0_655] : memref<1x4xf32, #tpu.memory_space<vmem>>, vector<1x4xf32>
    %1519 = vector.broadcast %1518 : vector<1x4xf32> to vector<8x4xf32>
    %1520 = arith.addf %1517, %1519 : vector<8x4xf32>
    %c0_656 = arith.constant 0 : index
    %c0_657 = arith.constant 0 : index
    %1521 = vector.load %arg32[%c0_656, %c0_657] : memref<8x4xf32, #tpu.memory_space<vmem>>, vector<8x4xf32>
    tpu.vector_store %arg32[%c0_656, %c0_657], %1520 {strides = array<i32>} : memref<8x4xf32, #tpu.memory_space<vmem>>, vector<8x4xf32>,
    %c0_658 = arith.constant 0 : index
    %c0_659 = arith.constant 0 : index
    %1522 = vector.load %arg24[%c0_658, %c0_659] : memref<1x16xf32, #tpu.memory_space<vmem>>, vector<1x16xf32>
    %c0_660 = arith.constant 0 : index
    %c0_661 = arith.constant 0 : index
    %1523 = vector.load %arg25[%c0_660, %c0_661] : memref<1x16xf32, #tpu.memory_space<vmem>>, vector<1x16xf32>
    %cst_662 = arith.constant dense<0.000000e+00> : vector<8xf32>
    %1524 = vector.multi_reduction <add>, %578, %cst_662 [1] : vector<8x16xf32> to vector<8xf32>
    %1525 = vector.shape_cast %1524 : vector<8xf32> to vector<8x1xf32>
    %cst_663 = arith.constant 1.600000e+01 : f32
    %1526 = vector.broadcast %cst_663 : f32 to vector<8x1xf32>
    %1527 = arith.divf %1525, %1526 : vector<8x1xf32>
    %1528 = vector.broadcast %1527 : vector<8x1xf32> to vector<8x16xf32>
    %1529 = arith.subf %578, %1528 : vector<8x16xf32>
    %1530 = arith.mulf %1529, %1529 : vector<8x16xf32>
    %cst_664 = arith.constant dense<0.000000e+00> : vector<8xf32>
    %1531 = vector.multi_reduction <add>, %1530, %cst_664 [1] : vector<8x16xf32> to vector<8xf32>
    %1532 = vector.shape_cast %1531 : vector<8xf32> to vector<8x1xf32>
    %cst_665 = arith.constant 1.600000e+01 : f32
    %1533 = vector.broadcast %cst_665 : f32 to vector<8x1xf32>
    %1534 = arith.divf %1532, %1533 : vector<8x1xf32>
    %cst_666 = arith.constant 9.99999974E-6 : f32
    %1535 = vector.broadcast %cst_666 : f32 to vector<8x1xf32>
    %1536 = arith.addf %1534, %1535 : vector<8x1xf32>
    %1537 = math.rsqrt %1536 : vector<8x1xf32>
    %1538 = vector.broadcast %1537 : vector<8x1xf32> to vector<8x16xf32>
    %1539 = arith.mulf %1529, %1538 : vector<8x16xf32>
    %1540 = vector.broadcast %1522 : vector<1x16xf32> to vector<8x16xf32>
    %1541 = arith.mulf %1539, %1540 : vector<8x16xf32>
    %1542 = vector.broadcast %1523 : vector<1x16xf32> to vector<8x16xf32>
    %1543 = arith.addf %1541, %1542 : vector<8x16xf32>
    %c0_667 = arith.constant 0 : index
    %c0_668 = arith.constant 0 : index
    %1544 = vector.load %arg26[%c0_667, %c0_668] : memref<16x5xf32, #tpu.memory_space<vmem>>, vector<16x5xf32>
    %cst_669 = arith.constant dense<0.000000e+00> : vector<8x5xf32>
    %1545 = tpu.matmul %1543, %1544, %cst_669 {dimension_numbers = #tpu.dot_dimension_numbers<[1], [0], [0], [1], [0, 0, 1, 1], [], []>} : vector<8x16xf32>, vector<16x5xf32>, vector<8x5xf32> -> vector<8x5xf32>
    %c0_670 = arith.constant 0 : index
    %c0_671 = arith.constant 0 : index
    %1546 = vector.load %arg27[%c0_670, %c0_671] : memref<1x5xf32, #tpu.memory_space<vmem>>, vector<1x5xf32>
    %1547 = vector.broadcast %1546 : vector<1x5xf32> to vector<8x5xf32>
    %1548 = arith.addf %1545, %1547 : vector<8x5xf32>
    %c0_672 = arith.constant 0 : index
    %c0_673 = arith.constant 0 : index
    %1549 = vector.load %arg33[%c0_672, %c0_673] : memref<8x5xf32, #tpu.memory_space<vmem>>, vector<8x5xf32>
    tpu.vector_store %arg33[%c0_672, %c0_673], %1548 {strides = array<i32>} : memref<8x5xf32, #tpu.memory_space<vmem>>, vector<8x5xf32>,
    %c0_674 = arith.constant 0 : index
    %c0_675 = arith.constant 0 : index
    %1550 = vector.load %arg28[%c0_674, %c0_675] : memref<1x16xf32, #tpu.memory_space<vmem>>, vector<1x16xf32>
    %c0_676 = arith.constant 0 : index
    %c0_677 = arith.constant 0 : index
    %1551 = vector.load %arg29[%c0_676, %c0_677] : memref<1x16xf32, #tpu.memory_space<vmem>>, vector<1x16xf32>
    %cst_678 = arith.constant dense<0.000000e+00> : vector<8xf32>
    %1552 = vector.multi_reduction <add>, %872, %cst_678 [1] : vector<8x16xf32> to vector<8xf32>
    %1553 = vector.shape_cast %1552 : vector<8xf32> to vector<8x1xf32>
    %cst_679 = arith.constant 1.600000e+01 : f32
    %1554 = vector.broadcast %cst_679 : f32 to vector<8x1xf32>
    %1555 = arith.divf %1553, %1554 : vector<8x1xf32>
    %1556 = vector.broadcast %1555 : vector<8x1xf32> to vector<8x16xf32>
    %1557 = arith.subf %872, %1556 : vector<8x16xf32>
    %1558 = arith.mulf %1557, %1557 : vector<8x16xf32>
    %cst_680 = arith.constant dense<0.000000e+00> : vector<8xf32>
    %1559 = vector.multi_reduction <add>, %1558, %cst_680 [1] : vector<8x16xf32> to vector<8xf32>
    %1560 = vector.shape_cast %1559 : vector<8xf32> to vector<8x1xf32>
    %cst_681 = arith.constant 1.600000e+01 : f32
    %1561 = vector.broadcast %cst_681 : f32 to vector<8x1xf32>
    %1562 = arith.divf %1560, %1561 : vector<8x1xf32>
    %cst_682 = arith.constant 9.99999974E-6 : f32
    %1563 = vector.broadcast %cst_682 : f32 to vector<8x1xf32>
    %1564 = arith.addf %1562, %1563 : vector<8x1xf32>
    %1565 = math.rsqrt %1564 : vector<8x1xf32>
    %1566 = vector.broadcast %1565 : vector<8x1xf32> to vector<8x16xf32>
    %1567 = arith.mulf %1557, %1566 : vector<8x16xf32>
    %1568 = vector.broadcast %1550 : vector<1x16xf32> to vector<8x16xf32>
    %1569 = arith.mulf %1567, %1568 : vector<8x16xf32>
    %1570 = vector.broadcast %1551 : vector<1x16xf32> to vector<8x16xf32>
    %1571 = arith.addf %1569, %1570 : vector<8x16xf32>
    %c0_683 = arith.constant 0 : index
    %c0_684 = arith.constant 0 : index
    %1572 = vector.load %arg30[%c0_683, %c0_684] : memref<16x6xf32, #tpu.memory_space<vmem>>, vector<16x6xf32>
    %cst_685 = arith.constant dense<0.000000e+00> : vector<8x6xf32>
    %1573 = tpu.matmul %1571, %1572, %cst_685 {dimension_numbers = #tpu.dot_dimension_numbers<[1], [0], [0], [1], [0, 0, 1, 1], [], []>} : vector<8x16xf32>, vector<16x6xf32>, vector<8x6xf32> -> vector<8x6xf32>
    %c0_686 = arith.constant 0 : index
    %c0_687 = arith.constant 0 : index
    %1574 = vector.load %arg31[%c0_686, %c0_687] : memref<1x6xf32, #tpu.memory_space<vmem>>, vector<1x6xf32>
    %1575 = vector.broadcast %1574 : vector<1x6xf32> to vector<8x6xf32>
    %1576 = arith.addf %1573, %1575 : vector<8x6xf32>
    %c0_688 = arith.constant 0 : index
    %c0_689 = arith.constant 0 : index
    %1577 = vector.load %arg34[%c0_688, %c0_689] : memref<8x6xf32, #tpu.memory_space<vmem>>, vector<8x6xf32>
    tpu.vector_store %arg34[%c0_688, %c0_689], %1576 {strides = array<i32>} : memref<8x6xf32, #tpu.memory_space<vmem>>, vector<8x6xf32>,
    %c0_690 = arith.constant 0 : index
    %c0_691 = arith.constant 0 : index
    %1578 = vector.load %arg24[%c0_690, %c0_691] : memref<1x16xf32, #tpu.memory_space<vmem>>, vector<1x16xf32>
    %c0_692 = arith.constant 0 : index
    %c0_693 = arith.constant 0 : index
    %1579 = vector.load %arg25[%c0_692, %c0_693] : memref<1x16xf32, #tpu.memory_space<vmem>>, vector<1x16xf32>
    %cst_694 = arith.constant dense<0.000000e+00> : vector<8xf32>
    %1580 = vector.multi_reduction <add>, %1199, %cst_694 [1] : vector<8x16xf32> to vector<8xf32>
    %1581 = vector.shape_cast %1580 : vector<8xf32> to vector<8x1xf32>
    %cst_695 = arith.constant 1.600000e+01 : f32
    %1582 = vector.broadcast %cst_695 : f32 to vector<8x1xf32>
    %1583 = arith.divf %1581, %1582 : vector<8x1xf32>
    %1584 = vector.broadcast %1583 : vector<8x1xf32> to vector<8x16xf32>
    %1585 = arith.subf %1199, %1584 : vector<8x16xf32>
    %1586 = arith.mulf %1585, %1585 : vector<8x16xf32>
    %cst_696 = arith.constant dense<0.000000e+00> : vector<8xf32>
    %1587 = vector.multi_reduction <add>, %1586, %cst_696 [1] : vector<8x16xf32> to vector<8xf32>
    %1588 = vector.shape_cast %1587 : vector<8xf32> to vector<8x1xf32>
    %cst_697 = arith.constant 1.600000e+01 : f32
    %1589 = vector.broadcast %cst_697 : f32 to vector<8x1xf32>
    %1590 = arith.divf %1588, %1589 : vector<8x1xf32>
    %cst_698 = arith.constant 9.99999974E-6 : f32
    %1591 = vector.broadcast %cst_698 : f32 to vector<8x1xf32>
    %1592 = arith.addf %1590, %1591 : vector<8x1xf32>
    %1593 = math.rsqrt %1592 : vector<8x1xf32>
    %1594 = vector.broadcast %1593 : vector<8x1xf32> to vector<8x16xf32>
    %1595 = arith.mulf %1585, %1594 : vector<8x16xf32>
    %1596 = vector.broadcast %1578 : vector<1x16xf32> to vector<8x16xf32>
    %1597 = arith.mulf %1595, %1596 : vector<8x16xf32>
    %1598 = vector.broadcast %1579 : vector<1x16xf32> to vector<8x16xf32>
    %1599 = arith.addf %1597, %1598 : vector<8x16xf32>
    %c0_699 = arith.constant 0 : index
    %c0_700 = arith.constant 0 : index
    %1600 = vector.load %arg26[%c0_699, %c0_700] : memref<16x5xf32, #tpu.memory_space<vmem>>, vector<16x5xf32>
    %cst_701 = arith.constant dense<0.000000e+00> : vector<8x5xf32>
    %1601 = tpu.matmul %1599, %1600, %cst_701 {dimension_numbers = #tpu.dot_dimension_numbers<[1], [0], [0], [1], [0, 0, 1, 1], [], []>} : vector<8x16xf32>, vector<16x5xf32>, vector<8x5xf32> -> vector<8x5xf32>
    %c0_702 = arith.constant 0 : index
    %c0_703 = arith.constant 0 : index
    %1602 = vector.load %arg27[%c0_702, %c0_703] : memref<1x5xf32, #tpu.memory_space<vmem>>, vector<1x5xf32>
    %1603 = vector.broadcast %1602 : vector<1x5xf32> to vector<8x5xf32>
    %1604 = arith.addf %1601, %1603 : vector<8x5xf32>
    %c0_704 = arith.constant 0 : index
    %c0_705 = arith.constant 0 : index
    %1605 = vector.load %arg35[%c0_704, %c0_705] : memref<8x5xf32, #tpu.memory_space<vmem>>, vector<8x5xf32>
    tpu.vector_store %arg35[%c0_704, %c0_705], %1604 {strides = array<i32>} : memref<8x5xf32, #tpu.memory_space<vmem>>, vector<8x5xf32>,
    %c0_706 = arith.constant 0 : index
    %c0_707 = arith.constant 0 : index
    %1606 = vector.load %arg28[%c0_706, %c0_707] : memref<1x16xf32, #tpu.memory_space<vmem>>, vector<1x16xf32>
    %c0_708 = arith.constant 0 : index
    %c0_709 = arith.constant 0 : index
    %1607 = vector.load %arg29[%c0_708, %c0_709] : memref<1x16xf32, #tpu.memory_space<vmem>>, vector<1x16xf32>
    %cst_710 = arith.constant dense<0.000000e+00> : vector<8xf32>
    %1608 = vector.multi_reduction <add>, %1493, %cst_710 [1] : vector<8x16xf32> to vector<8xf32>
    %1609 = vector.shape_cast %1608 : vector<8xf32> to vector<8x1xf32>
    %cst_711 = arith.constant 1.600000e+01 : f32
    %1610 = vector.broadcast %cst_711 : f32 to vector<8x1xf32>
    %1611 = arith.divf %1609, %1610 : vector<8x1xf32>
    %1612 = vector.broadcast %1611 : vector<8x1xf32> to vector<8x16xf32>
    %1613 = arith.subf %1493, %1612 : vector<8x16xf32>
    %1614 = arith.mulf %1613, %1613 : vector<8x16xf32>
    %cst_712 = arith.constant dense<0.000000e+00> : vector<8xf32>
    %1615 = vector.multi_reduction <add>, %1614, %cst_712 [1] : vector<8x16xf32> to vector<8xf32>
    %1616 = vector.shape_cast %1615 : vector<8xf32> to vector<8x1xf32>
    %cst_713 = arith.constant 1.600000e+01 : f32
    %1617 = vector.broadcast %cst_713 : f32 to vector<8x1xf32>
    %1618 = arith.divf %1616, %1617 : vector<8x1xf32>
    %cst_714 = arith.constant 9.99999974E-6 : f32
    %1619 = vector.broadcast %cst_714 : f32 to vector<8x1xf32>
    %1620 = arith.addf %1618, %1619 : vector<8x1xf32>
    %1621 = math.rsqrt %1620 : vector<8x1xf32>
    %1622 = vector.broadcast %1621 : vector<8x1xf32> to vector<8x16xf32>
    %1623 = arith.mulf %1613, %1622 : vector<8x16xf32>
    %1624 = vector.broadcast %1606 : vector<1x16xf32> to vector<8x16xf32>
    %1625 = arith.mulf %1623, %1624 : vector<8x16xf32>
    %1626 = vector.broadcast %1607 : vector<1x16xf32> to vector<8x16xf32>
    %1627 = arith.addf %1625, %1626 : vector<8x16xf32>
    %c0_715 = arith.constant 0 : index
    %c0_716 = arith.constant 0 : index
    %1628 = vector.load %arg30[%c0_715, %c0_716] : memref<16x6xf32, #tpu.memory_space<vmem>>, vector<16x6xf32>
    %cst_717 = arith.constant dense<0.000000e+00> : vector<8x6xf32>
    %1629 = tpu.matmul %1627, %1628, %cst_717 {dimension_numbers = #tpu.dot_dimension_numbers<[1], [0], [0], [1], [0, 0, 1, 1], [], []>} : vector<8x16xf32>, vector<16x6xf32>, vector<8x6xf32> -> vector<8x6xf32>
    %c0_718 = arith.constant 0 : index
    %c0_719 = arith.constant 0 : index
    %1630 = vector.load %arg31[%c0_718, %c0_719] : memref<1x6xf32, #tpu.memory_space<vmem>>, vector<1x6xf32>
    %1631 = vector.broadcast %1630 : vector<1x6xf32> to vector<8x6xf32>
    %1632 = arith.addf %1629, %1631 : vector<8x6xf32>
    %c0_720 = arith.constant 0 : index
    %c0_721 = arith.constant 0 : index
    %1633 = vector.load %arg36[%c0_720, %c0_721] : memref<8x6xf32, #tpu.memory_space<vmem>>, vector<8x6xf32>
    tpu.vector_store %arg36[%c0_720, %c0_721], %1632 {strides = array<i32>} : memref<8x6xf32, #tpu.memory_space<vmem>>, vector<8x6xf32>,
    return
  }
}

</mosaic_0001>

<bundles_post_ra>
// kernel: tpu_custom_call.1
= control target key start
LH: loop header
LB: loop body
LE: loop exit
PB: predicated region body
PF: predicated region fallthrough
CT: control target
= control target key end

     0   :  { %s11406_s6 = smov 1   ;;  %s11407_s10 = smov 2   ;;  %s12593_s0 = inlined_call_operand.smem [shape: u32[37], index: -1, kind: input, shape index: {}] }
   0x1   :  { %s11463_s5 = sld [smem:[%s12593_s0]]   ;;  %s11408_s14 = smov 3  }
   0x2   :  { %s11468_s9 = sld [smem:[%s12593_s0 + %s11406_s6]]   ;;  %s11409_s18 = smov 4  }
   0x3   :  { %s11473_s13 = sld [smem:[%s12593_s0 + %s11407_s10]]   ;;  %s11410_s22 = smov 5  }
   0x4   :  { %s11478_s17 = sld [smem:[%s12593_s0 + %s11408_s14]]   ;;  %s11411_s26 = smov 6  }
   0x5   :  { %s11483_s21 = sld [smem:[%s12593_s0 + %s11409_s18]]   ;;  %s11412_s30 = smov 7  }
   0x6   :  { %s11488_s25 = sld [smem:[%s12593_s0 + %s11410_s22]]   ;;  %s11413_s4 = smov 8  }
   0x7   :  { %s11493_s29 = sld [smem:[%s12593_s0 + %s11411_s26]]   ;;  %s11414_s10 = smov 9  }
   0x8   :  { %s11498_s3 = sld [smem:[%s12593_s0 + %s11412_s30]]   ;;  %s11415_s15 = smov 10  }
   0x9   :  { %s11503_s8 = sld [smem:[%s12593_s0 + %s11413_s4]]   ;;  %s11416_s20 = smov 11  }
   0xa   :  { %s11508_s14 = sld [smem:[%s12593_s0 + %s11414_s10]]   ;;  %s11417_s26 = smov 12  }
   0xb   :  { %s11513_s19 = sld [smem:[%s12593_s0 + %s11415_s15]]   ;;  %s11418_s1 = smov 13  }
   0xc   :  { %s11518_s24 = sld [smem:[%s12593_s0 + %s11416_s20]]   ;;  %s11419_s7 = smov 14  }
   0xd   :  { %s11523_s30 = sld [smem:[%s12593_s0 + %s11417_s26]]   ;;  %s11420_s15 = smov 15  }
   0xe   :  { %s11528_s6 = sld [smem:[%s12593_s0 + %s11418_s1]]   ;;  %s11421_s22 = smov 16  }
   0xf   :  { %s11533_s12 = sld [smem:[%s12593_s0 + %s11419_s7]]   ;;  %s11422_s28 = smov 17  }
  0x10   :  { %s11538_s20 = sld [smem:[%s12593_s0 + %s11420_s15]]   ;;  %s11423_s7 = smov 18  }
  0x11   :  { %s11543_s27 = sld [smem:[%s12593_s0 + %s11421_s22]]   ;;  %s11424_s15 = smov 19  }
  0x12   :  { %s11548_s4 = sld [smem:[%s12593_s0 + %s11422_s28]]   ;;  %s11425_s22 = smov 20  }
  0x13   :  { %s11426_s28 = smov 21  }
  0x15   :  { %12600 = sst [smem:[#allocation12_spill]] %s11533_s12 }
  0x16   :  { %12601 = sst [smem:[#allocation13_spill]] %s11538_s20 }
  0x17   :  { %12602 = sst [smem:[#allocation14_spill]] %s11543_s27 }
  0x18   :  { %12603 = sst [smem:[#allocation15_spill]] %s11548_s4 }
  0x19   :  { %s11553_s12 = sld [smem:[%s12593_s0 + %s11423_s7]]   ;;  %s11427_s7 = smov 22  }
  0x1a   :  { %s11558_s20 = sld [smem:[%s12593_s0 + %s11424_s15]]   ;;  %s11428_s15 = smov 23  }
  0x1b   :  { %s11563_s27 = sld [smem:[%s12593_s0 + %s11425_s22]]   ;;  %s11429_s22 = smov 24  }
  0x1c   :  { %s11568_s4 = sld [smem:[%s12593_s0 + %s11426_s28]]   ;;  %s11430_s28 = smov 25  }
  0x1f   :  { %12604 = sst [smem:[#allocation16_spill]] %s11553_s12 }
  0x20   :  { %12605 = sst [smem:[#allocation17_spill]] %s11558_s20 }
  0x21   :  { %12606 = sst [smem:[#allocation18_spill]] %s11563_s27 }
  0x22   :  { %12607 = sst [smem:[#allocation19_spill]] %s11568_s4 }
  0x23   :  { %s11573_s12 = sld [smem:[%s12593_s0 + %s11427_s7]]   ;;  %s11431_s7 = smov 26  }
  0x24   :  { %s11578_s20 = sld [smem:[%s12593_s0 + %s11428_s15]]   ;;  %s11432_s15 = smov 27  }
  0x25   :  { %s11583_s27 = sld [smem:[%s12593_s0 + %s11429_s22]]   ;;  %s11433_s22 = smov 28  }
  0x26   :  { %s11588_s4 = sld [smem:[%s12593_s0 + %s11430_s28]]   ;;  %s11434_s28 = smov 29  }
  0x29   :  { %12608 = sst [smem:[#allocation20_spill]] %s11573_s12 }
  0x2a   :  { %12609 = sst [smem:[#allocation21_spill]] %s11578_s20 }
  0x2b   :  { %12610 = sst [smem:[#allocation22_spill]] %s11583_s27 }
  0x2c   :  { %12611 = sst [smem:[#allocation23_spill]] %s11588_s4 }
  0x2d   :  { %s11593_s12 = sld [smem:[%s12593_s0 + %s11431_s7]]   ;;  %s11435_s7 = smov 30  }
  0x2e   :  { %s11598_s20 = sld [smem:[%s12593_s0 + %s11432_s15]]   ;;  %s11436_s15 = smov 31  }
  0x2f   :  { %s11603_s27 = sld [smem:[%s12593_s0 + %s11433_s22]]   ;;  %s11437_s22 = smov 32  }
  0x30   :  { %s11608_s4 = sld [smem:[%s12593_s0 + %s11434_s28]]   ;;  %s11438_s28 = smov 33  }
  0x33   :  { %12612 = sst [smem:[#allocation24_spill]] %s11593_s12 }
  0x34   :  { %12613 = sst [smem:[#allocation25_spill]] %s11598_s20 }
  0x35   :  { %12614 = sst [smem:[#allocation26_spill]] %s11603_s27 }
  0x36   :  { %12615 = sst [smem:[#allocation27_spill]] %s11608_s4 }
  0x37   :  { %s11613_s12 = sld [smem:[%s12593_s0 + %s11435_s7]]   ;;  %s11439_s7 = smov 34  }
  0x38   :  { %s11618_s20 = sld [smem:[%s12593_s0 + %s11436_s15]]   ;;  %s11440_s15 = smov 35  }
  0x39   :  { %s11623_s27 = sld [smem:[%s12593_s0 + %s11437_s22]]   ;;  %s11441_s22 = smov 36  }
  0x3a   :  { %s11628_s4 = sld [smem:[%s12593_s0 + %s11438_s28]]  }
  0x3d   :  { %12616 = sst [smem:[#allocation28_spill]] %s11613_s12 }
  0x3e   :  { %12617 = sst [smem:[#allocation29_spill]] %s11618_s20 }
  0x3f   :  { %12618 = sst [smem:[#allocation30_spill]] %s11623_s27 }
  0x40   :  { %s11633_s12 = sld [smem:[%s12593_s0 + %s11439_s7]]  }
  0x41   :  { %s11638_s20 = sld [smem:[%s12593_s0 + %s11440_s15]]  }
  0x42   :  { %s11643_s27 = sld [smem:[%s12593_s0 + %s11441_s22]]  }
  0x43   :  { %79 = vsyncpa [#allocation3], 0 }
  0x44   :  { %80 = vsyncpa [#allocation5], 0  ;;  %v147_v0 = vld [vmem:[%s11468_s9] sm:$0xff]  ;;  %v148_v1 = vld [vmem:[%s11468_s9 + $0x8] sm:$0xf]  ;;  %vm160_vm0 = vcmask 1043456  }
  0x45   :  { %v11442_v2 = vmov 0.0|0.0   ;;  %v10907_v3 = vpack.c.bf16 %v148_v1, %v147_v0  ;;  %vm11443_vm1 = vmmov 1   ;;  %vm11444_vm3 = vmmov 0  }
  0x46   :  { %10906 = vmatprep.subr.bf16.mxu0 %v11442_v2  ;;  %vm10908_vm2 = vmpackc.low %vm160_vm0, %vm11443_vm1  ;;  %10910 = vmatprep.subr.bf16.mxu1 %v11442_v2  ;;  %v11445_v4 = vmov 0.0  }
  0x47   :  { %10248 = vmatprep.mubr.msk.f32.mxu0 %vm11444_vm3, %v11445_v4  ;;  %10255 = vmatprep.mubr.msk.f32.mxu1 %vm11444_vm3, %v11445_v4 }
  0x48   :  { %81 = vsyncpa [#allocation8], 0  ;;  %10909 = vmatpush3.bf16.msk.msra.mxu0 %vm10908_vm2, %v10907_v3  ;;  %v146_v5 = vld [vmem:[%s11463_s5] sm:$0xff]  ;;  %vm156_vm4 = vcmask 97280   ;;  %v237_v7 = vld [vmem:[%s11478_s17 + $0x8] sm:$0xff]  ;;  %vm238_vm5 = vcmask 130048  }
  0x49   :  { %10258 = vmatprep.subr.mxu0 %v11445_v4  ;;  %v236_v6 = vld [vmem:[%s11478_s17] sm:$0xff]  ;;  %s11446_s0 = smov 120   ;;  %s11447_s5 = smov 112   ;;  %vm317_vm6 = vcmask 64512   ;;  %v313_v43 = vld [vmem:[%s11483_s21 + $0x8] sm:$0xff]  ;;  %vm946_vm8 = vcmask 261120  }
  0x4a   :  { %v10911_v8 = vpack.c.bf16 %v237_v7, %v236_v6  ;;  %v9654_v9 = vld [vmem:[%s11473_s13] ss:$0 sm:$0xff]  ;;  %s11448_s9 = smov 104   ;;  %s11449_s13 = smov 88   ;;  %v828_v63 = vld [vmem:[%s11493_s29 + $0x8] sm:$0xff]  ;;  %vm9107_vm2 = vcmask 31744  }
  0x4b   :  { %10249 = vmatmul.mubr.msk.f32.vlgmr.msra.gmra.mrb[0].mxu0 %vm156_vm4, %v146_v5  ;;  %s11450_s28 = smov 96   ;;  %v312_v42 = vld [vmem:[%s11483_s21] sm:$0xff]  ;;  %s12621_s1 = sld [smem:[#allocation14_spill]]  ;;  %vm9333_vm4 = vcmask 48128  }
  0x4c   :  { %10260 = vmatprep.mubr.msk.f32.mxu0 %vm11444_vm3, %v11445_v4  ;;  %10912 = vmatpush3.bf16.msra.mxu1 %v10911_v8  ;;  %v9666_v51 = vld [vmem:[%s11488_s25] ss:$0 sm:$0xff]  ;;  %s12622_s2 = sld [smem:[#allocation15_spill]]  ;;  %s12623_s7 = sld [smem:[#allocation16_spill]] }
  0x4d   :  { %10263 = vmatprep.subr.mxu1 %v11445_v4  ;;  %v827_v62 = vld [vmem:[%s11493_s29] sm:$0xff]  ;;  %s12624_s10 = sld [smem:[#allocation17_spill]]  ;;  %s12634_s11 = sld [smem:[#allocation21_spill]] }
  0x4e   :  { %v10914_v0 = vpack.c.bf16 %v828_v63, %v827_v62  ;;  %v11712_v7 = vld [vmem:[%s11513_s19] ss:$0 sm:$0xff]  ;;  %s12635_s15 = sld [smem:[#allocation29_spill]]  ;;  %s12636_s16 = sld [smem:[#allocation30_spill]] }
  0x4f   :  { %s12637_s18 = sld [smem:[#allocation25_spill]]  ;;  %s11451_s22 = smov [#allocation4]  }
  0x50   :  { %s9577_s23 = sshll.u32 %s11451_s22, 4  ;;  %s11452_s26 = smov [#allocation2]   ;;  %s9578_s23 = int_to_ptr.vmem [resolvable:$true] %s9577_s23 }
  0x51   :  { %p11317_p1 = scmp.lt.s32.totalorder %s9578_s23, %s9578_s23 }
 0x11e   :  { %v230_v10 = vpop.f32.mrb[0].mxu0 }
 0x11f   :  { %v11661_v11 = vadd.f32 %v9654_v9, %v230_v10  ;;  %v10250_v12 = vpop.f32.mrb[1].mxu0  ;;  %v11715_v9 = vld [vmem:[%s11518_s24] ss:$0 sm:$0xff] }
 0x121   :  { %10256 = vmatmul.mubr.msk.f32.vlgmr.msra.gmra.mrb[0].mxu1 %vm238_vm5, %v11661_v11 }
 0x122   :  { %10265 = vmatprep.mubr.msk.f32.mxu1 %vm11444_vm3, %v11445_v4 }
 0x1f4   :  { %v308_v13 = vpop.f32.mrb[0].mxu1 }
 0x1f5   :  { %479 = vrot.lane.b32.xlu1 %v308_v13, %s11446_s0  ;;  %315 = vrot.lane.b32.xlu0 %v308_v13, %s11447_s5  ;;  %v10257_v14 = vpop.f32.mrb[1].mxu1 }
 0x1f6   :  { %v936_v14 = vld [vmem:[%s11503_s8 + $0x8] sm:$0xff] }
 0x1f9   :  { %481 = vrot.lane.b32.xlu0 %v308_v13, %s11448_s9 }
 0x267   :  { %v316_v15 = vpop.permute.xlu0 %315  ;;  %v480_v17 = vpop.permute.xlu1 %479 }
 0x268   :  { %10259 = vmatpush3.xpose.msk.msra.mxu0 %vm317_vm6, %v316_v15 }
 0x269   :  { %10268 = vmatprep.subr.mxu0 %v11445_v4 }
 0x26b   :  { %10261 = vmatmul.mubr.msk.f32.vlgmr.msra.gmra.mrb[2].mxu0 %vm317_vm6, %v308_v13  ;;  %v482_v16 = vpop.permute.xlu0 %481 }
 0x26c   :  { %10269 = vmatpush3.xpose.msk.msra.mxu0 %vm317_vm6, %v482_v16  ;;  %10270 = vmatprep.mubr.msk.f32.mxu0 %vm11444_vm3, %v11445_v4  ;;  %v937_v16 = vld [vmem:[%s11503_s8 + $0x10] sm:$0xff] }
 0x26d   :  { %10278 = vmatprep.subr.mxu0 %v11445_v4 }
 0x26f   :  { %10271 = vmatmul.mubr.msk.f32.vlgmr.msra.gmra.mrb[4].mxu0 %vm317_vm6, %v480_v17  ;;  %v938_v17 = vld [vmem:[%s11503_s8 + $0x18] sm:$0xff] }
 0x270   :  { %10280 = vmatprep.mubr.msk.f32.mxu0 %vm11444_vm3, %v11445_v4  ;;  %10279 = vmatpush3.msra.mxu0 %v313_v43 }
 0x271   :  { %10913 = vmatprep.subr.bf16.mxu0 %v11442_v2 }
 0x33e   :  { %v388_v18 = vpop.f32.mrb[2].mxu0 }
 0x33f   :  { %v10262_v19 = vpop.f32.mrb[3].mxu0  ;;  %v392_v20 = vsel %vm317_vm6, %v388_v18, -inf }
 0x340   :  { %393 = vmax.xlane.f32.xlu1 %v392_v20  ;;  %v9669_v19 = vld [vmem:[%s11498_s3] ss:$0 sm:$0xff] }
 0x342   :  { %v553_v21 = vpop.f32.mrb[4].mxu0 }
 0x343   :  { %v10272_v22 = vpop.f32.mrb[5].mxu0  ;;  %v557_v23 = vsel %vm317_vm6, %v553_v21, -inf }
 0x344   :  { %558 = vmax.xlane.f32.xlu0 %v557_v23 }
 0x3cd   :  { %v394_v24 = vpop.xlane.xlu1 %393 }
 0x3ce   :  { %v395_v25 = vsub.f32 %v388_v18, %v394_v24  ;;  %v10920_v18 = vpack.c.bf16 %v938_v17, %v937_v16 }
 0x3d0   :  { %v396_v26 = vmul.f32 1.442695, %v395_v25 }
 0x3d1   :  { %v559_v27 = vpop.xlane.xlu0 %558 }
 0x3d2   :  { %11140 = vpow2.f32 %v396_v26  ;;  %v560_v28 = vsub.f32 %v553_v21, %v559_v27 }
 0x3d4   :  { %v561_v29 = vmul.f32 1.442695, %v560_v28 }
 0x3d6   :  { %11142 = vpow2.f32 %v561_v29 }
 0x3dc   :  { %v11141_v30 = vpop.eup %11140 }
 0x3dd   :  { %v398_v31 = vsel %vm317_vm6, %v11141_v30, 0.0 }
 0x3de   :  { %399 = vadd.xlane.f32.xlu0 %v398_v31 }
 0x3e0   :  { %v11143_v32 = vpop.eup %11142 }
 0x3e1   :  { %v563_v33 = vsel %vm317_vm6, %v11143_v32, 0.0 }
 0x3e2   :  { %564 = vadd.xlane.f32.xlu1 %v563_v33 }
 0x3f3   :  { %568 = vrot.lane.b32.xlu1 %v308_v13, %s11449_s13 }
 0x3f4   :  { %403 = vrot.lane.b32.xlu0 %v308_v13, %s11450_s28  ;;  %v935_v13 = vld [vmem:[%s11503_s8] sm:$0xff] }
 0x3f5   :  { %v10917_v15 = vpack.c.bf16 %v936_v14, %v935_v13 }
 0x46b   :  { %v400_v34 = vpop.xlane.xlu0 %399 }
 0x46c   :  { %11144 = vrcp.f32 %v400_v34 }
 0x46f   :  { %v565_v35 = vpop.xlane.xlu1 %564  ;;  %v404_v36 = vpop.permute.xlu0 %403 }
 0x470   :  { %11146 = vrcp.f32 %v565_v35  ;;  %10264 = vmatpush3.msra.mxu1 %v404_v36 }
 0x471   :  { %10273 = vmatprep.subr.mxu1 %v11445_v4 }
 0x473   :  { %v569_v39 = vpop.permute.xlu1 %568 }
 0x476   :  { %v11145_v37 = vpop.eup %11144 }
 0x477   :  { %v402_v38 = vmul.f32 %v11145_v37, %v11141_v30 }
 0x479   :  { %10266 = vmatmul.mubr.msk.f32.vlgmr.msra.gmra.mrb[2].mxu1 %vm317_vm6, %v402_v38 }
 0x47a   :  { %v11147_v40 = vpop.eup %11146  ;;  %10274 = vmatpush3.msra.mxu1 %v569_v39  ;;  %10275 = vmatprep.mubr.msk.f32.mxu1 %vm11444_vm3, %v11445_v4 }
 0x47b   :  { %v567_v41 = vmul.f32 %v11147_v40, %v11143_v32  ;;  %10283 = vmatprep.subr.mxu1 %v11445_v4 }
 0x47d   :  { %10276 = vmatmul.mubr.msk.f32.vlgmr.msra.gmra.mrb[4].mxu1 %vm317_vm6, %v567_v41 }
 0x47e   :  { %10285 = vmatprep.mubr.msk.f32.mxu1 %vm11444_vm3, %v11445_v4  ;;  %10284 = vmatpush3.msra.mxu1 %v312_v42 }
 0x47f   :  { %10916 = vmatprep.subr.bf16.mxu1 %v11442_v2 }
 0x54c   :  { %v475_v44 = vpop.f32.mrb[2].mxu1 }
 0x54d   :  { %v10267_v45 = vpop.f32.mrb[3].mxu1  ;;  %10286 = vmatmul.mubr.msk.f32.vlgmr.msra.gmra.mrb[6].mxu1 %vm317_vm6, %v475_v44 }
 0x54e   :  { %10303 = vmatprep.mubr.msk.f32.mxu1 %vm11444_vm3, %v11445_v4  ;;  %10918 = vmatpush3.bf16.msra.mxu1 %v10917_v15 }
 0x54f   :  { %10919 = vmatprep.subr.bf16.mxu1 %v11442_v2 }
 0x550   :  { %v640_v46 = vpop.f32.mrb[4].mxu1 }
 0x551   :  { %v10277_v47 = vpop.f32.mrb[5].mxu1  ;;  %10281 = vmatmul.mubr.msk.f32.vlgmr.msra.gmra.mrb[6].mxu0 %vm317_vm6, %v640_v46 }
 0x552   :  { %10292 = vmatprep.mubr.msk.f32.mxu0 %vm11444_vm3, %v11445_v4  ;;  %10915 = vmatpush3.bf16.msra.mxu0 %v10914_v0 }
 0x553   :  { %10922 = vmatprep.subr.bf16.mxu0 %v11442_v2  ;;  %10921 = vmatpush3.bf16.msra.mxu1 %v10920_v18 }
 0x554   :  { %10318 = vmatprep.subr.mxu1 %v11445_v4 }
 0x620   :  { %v786_v48 = vpop.f32.mrb[6].mxu1 }
 0x621   :  { %v10287_v49 = vpop.f32.mrb[7].mxu1 }
 0x624   :  { %v713_v50 = vpop.f32.mrb[6].mxu0 }
 0x625   :  { %v787_v52 = vadd.f32 %v786_v48, %v713_v50  ;;  %v10282_v53 = vpop.f32.mrb[7].mxu0  ;;  %v9671_v48 = vld [vmem:[%s11508_s14] ss:$0 sm:$0xff] }
 0x627   :  { %v797_v54 = vadd.f32 %v9666_v51, %v787_v52 }
 0x629   :  { %v798_v55 = vadd.f32 %v797_v54, %v11661_v11 }
 0x62b   :  { %v799_v56 = vsel %vm238_vm5, %v798_v55, 0.0 }
 0x62c   :  { %800 = vadd.xlane.f32.xlu1 %v799_v56 }
 0x6b9   :  { %v801_v57 = vpop.xlane.xlu1 %800 }
 0x6ba   :  { %v803_v58 = vmul.f32 0.0625, %v801_v57 }
 0x6bc   :  { %v804_v59 = vsub.f32 %v798_v55, %v803_v58 }
 0x6be   :  { %v805_v60 = vmul.f32 %v804_v59, %v804_v59 }
 0x6c0   :  { %v806_v61 = vsel %vm238_vm5, %v805_v60, 0.0  ;;  %v9674_v60 = vld [vmem:[%s11478_s17 + $0x18] sm:$0xff] }
 0x6c1   :  { %807 = vadd.xlane.f32.xlu0 %v806_v61 }
 0x74e   :  { %v808_v1 = vpop.xlane.xlu0 %807 }
 0x74f   :  { %v809_v3 = vmul.f32 0.0625, %v808_v1 }
 0x751   :  { %v810_v5 = vadd.f32 1e-05, %v809_v3 }
 0x753   :  { %11148 = vrsqrt.f32 %v810_v5 }
 0x75d   :  { %v11149_v6 = vpop.eup %11148 }
 0x75e   :  { %v812_v8 = vmul.f32 %v11149_v6, %v804_v59  ;;  %v9673_v59 = vld [vmem:[%s11478_s17 + $0x10] sm:$0xff] }
 0x75f   :  { %v10923_v61 = vpack.c.bf16 %v9674_v60, %v9673_v59  ;;  %v9688_v59 = vld [vmem:[%s11493_s29 + $0x10] sm:$0xff]  ;;  %v9689_v60 = vld [vmem:[%s11493_s29 + $0x18] sm:$0xff] }
 0x760   :  { %v819_v10 = vmul.f32 %v11712_v7, %v812_v8 }
 0x762   :  { %v826_v12 = vadd.f32 %v11715_v9, %v819_v10 }
 0x764   :  { %10293 = vmatmul.mubr.msk.f32.vlgmr.msra.gmra.mrb[8].mxu0 %vm238_vm5, %v826_v12 }
 0x765   :  { %10310 = vmatprep.mubr.msk.f32.mxu0 %vm11444_vm3, %v11445_v4  ;;  %10924 = vmatpush3.bf16.msra.mxu0 %v10923_v61  ;;  %v10926_v61 = vpack.c.bf16 %v9689_v60, %v9688_v59  ;;  %v1829_v59 = vld [vmem:[%s11523_s30 + $0x10] sm:$0xff]  ;;  %v1830_v60 = vld [vmem:[%s11523_s30 + $0x18] sm:$0xff] }
 0x766   :  { %10313 = vmatprep.subr.mxu0 %v11445_v4 }
 0x837   :  { %v905_v20 = vpop.f32.mrb[8].mxu0 }
 0x838   :  { %v906_v21 = vadd.f32 %v9669_v19, %v905_v20  ;;  %v10294_v22 = vpop.f32.mrb[9].mxu0 }
 0x83a   :  { %v910_v23 = vmul.f32 0.70710677, %v906_v21  ;;  %v909_v45 = vmul.f32 0.5, %v906_v21 }
 0x83c   :  { %v911_v24 = vand.u32 2147483647, %v910_v23  ;;  %vm930_vm7 = vcmp.ge.f32.partialorder %v910_v23, 0.0 }
 0x83e   :  { %v912_v25 = vmul.f32 0.3275911, %v911_v24  ;;  %v924_v27 = vsub.f32 0.0, %v911_v24 }
 0x840   :  { %v913_v26 = vadd.f32 1.0, %v912_v25  ;;  %v925_v29 = vmul.f32 %v924_v27, %v911_v24 }
 0x842   :  { %11150 = vrcp.f32 %v913_v26  ;;  %v926_v32 = vmul.f32 1.442695, %v925_v29 }
 0x844   :  { %11152 = vpow2.f32 %v926_v32 }
 0x84c   :  { %v11151_v28 = vpop.eup %11150 }
 0x84d   :  { %v915_v30 = vmul.f32 1.0614054, %v11151_v28 }
 0x84e   :  { %v11153_v40 = vpop.eup %11152 }
 0x84f   :  { %v916_v31 = vadd.f32 -1.4531521, %v915_v30 }
 0x851   :  { %v917_v33 = vmul.f32 %v11151_v28, %v916_v31 }
 0x853   :  { %v918_v34 = vadd.f32 1.4214138, %v917_v33 }
 0x855   :  { %v919_v35 = vmul.f32 %v11151_v28, %v918_v34 }
 0x857   :  { %v920_v36 = vadd.f32 -0.28449672, %v919_v35 }
 0x859   :  { %v921_v37 = vmul.f32 %v11151_v28, %v920_v36 }
 0x85b   :  { %v922_v38 = vadd.f32 0.2548296, %v921_v37 }
 0x85d   :  { %v923_v39 = vmul.f32 %v11151_v28, %v922_v38 }
 0x85f   :  { %v928_v41 = vmul.f32 %v11153_v40, %v923_v39  ;;  %v9676_v39 = vld [vmem:[%s11483_s21 + $0x10] sm:$0xff]  ;;  %v9677_v40 = vld [vmem:[%s11483_s21 + $0x18] sm:$0xff] }
 0x861   :  { %v929_v42 = vsub.f32 1.0, %v928_v41 }
 0x863   :  { %v931_v43 = vsub.f32 0.0, %v929_v42 }
 0x865   :  { %v932_v44 = vsel %vm930_vm7, %v929_v42, %v931_v43 }
 0x866   :  { %v933_v46 = vadd.f32 1.0, %v932_v44 }
 0x868   :  { %v934_v47 = vmul.f32 %v933_v46, %v909_v45 }
 0x86a   :  { %10304 = vmatmul.mubr.msk.f32.vlgmr.msra.gmra.mrb[8].mxu1 %vm946_vm8, %v934_v47 }
 0x86b   :  { %10320 = vmatprep.mubr.msk.f32.mxu1 %vm11444_vm3, %v11445_v4 }
 0x93d   :  { %v1016_v49 = vpop.f32.mrb[8].mxu1 }
 0x93e   :  { %v1017_v50 = vadd.f32 %v9671_v48, %v1016_v49  ;;  %v10305_v51 = vpop.f32.mrb[9].mxu1  ;;  %v9687_v48 = vld [vmem:[%s11488_s25 + $0x1] ss:$0 sm:$0xff] }
 0x940   :  { %v1020_v52 = vadd.f32 %v1017_v50, %v826_v12 }
 0x942   :  { %v1021_v53 = vsel %vm238_vm5, %v1020_v52, 0.0 }
 0x943   :  { %1022 = vadd.xlane.f32.xlu0 %v1021_v53 }
 0x9d0   :  { %v1023_v54 = vpop.xlane.xlu0 %1022 }
 0x9d1   :  { %v1024_v55 = vmul.f32 0.0625, %v1023_v54 }
 0x9d3   :  { %v1025_v56 = vsub.f32 %v1020_v52, %v1024_v55 }
 0x9d5   :  { %v1026_v57 = vmul.f32 %v1025_v56, %v1025_v56 }
 0x9d7   :  { %v1027_v58 = vsel %vm238_vm5, %v1026_v57, 0.0 }
 0x9d8   :  { %1028 = vadd.xlane.f32.xlu1 %v1027_v58 }
 0xa65   :  { %v1029_v62 = vpop.xlane.xlu1 %1028 }
 0xa66   :  { %v1030_v63 = vmul.f32 0.0625, %v1029_v62 }
 0xa68   :  { %v1031_v0 = vadd.f32 1e-05, %v1030_v63 }
 0xa6a   :  { %11154 = vrsqrt.f32 %v1031_v0 }
 0xa74   :  { %v11155_v1 = vpop.eup %11154 }
 0xa75   :  { %v1033_v3 = vmul.f32 %v11155_v1, %v1025_v56 }
 0xa77   :  { %v1034_v5 = vmul.f32 %v11712_v7, %v1033_v3 }
 0xa79   :  { %v11740_v6 = vadd.f32 %v11715_v9, %v1034_v5  ;;  %v1827_v5 = vld [vmem:[%s11523_s30] sm:$0xff] }
 0xa7b   :  { %10311 = vmatmul.mubr.msk.f32.vlgmr.msra.gmra.mrb[10].mxu0 %vm238_vm5, %v11740_v6 }
 0xa7c   :  { %10315 = vmatprep.mubr.msk.f32.mxu0 %vm11444_vm3, %v11445_v4 }
 0xb4e   :  { %v1108_v8 = vpop.f32.mrb[10].mxu0 }
 0xb4f   :  { %1281 = vrot.lane.b32.xlu1 %v1108_v8, %s11448_s9  ;;  %1116 = vrot.lane.b32.xlu0 %v1108_v8, %s11447_s5  ;;  %v10312_v10 = vpop.f32.mrb[11].mxu0 }
 0xb53   :  { %1279 = vrot.lane.b32.xlu1 %v1108_v8, %s11446_s0 }
 0xbc1   :  { %v1117_v12 = vpop.permute.xlu0 %1116  ;;  %v1282_v13 = vpop.permute.xlu1 %1281 }
 0xbc2   :  { %10314 = vmatpush3.xpose.msk.msra.mxu0 %vm317_vm6, %v1117_v12 }
 0xbc3   :  { %10323 = vmatprep.subr.mxu0 %v11445_v4 }
 0xbc5   :  { %10316 = vmatmul.mubr.msk.f32.vlgmr.msra.gmra.mrb[12].mxu0 %vm317_vm6, %v1108_v8  ;;  %v1280_v14 = vpop.permute.xlu1 %1279 }
 0xbc6   :  { %10324 = vmatpush3.xpose.msk.msra.mxu0 %vm317_vm6, %v1282_v13  ;;  %10325 = vmatprep.mubr.msk.f32.mxu0 %vm11444_vm3, %v11445_v4  ;;  %v9693_v13 = vld [vmem:[%s11503_s8 + $0x20] sm:$0xff] }
 0xbc7   :  { %10333 = vmatprep.subr.mxu0 %v11445_v4 }
 0xbc9   :  { %10326 = vmatmul.mubr.msk.f32.vlgmr.msra.gmra.mrb[14].mxu0 %vm317_vm6, %v1280_v14  ;;  %v9694_v14 = vld [vmem:[%s11503_s8 + $0x28] sm:$0xff] }
 0xbca   :  { %10335 = vmatprep.mubr.msk.f32.mxu0 %vm11444_vm3, %v11445_v4  ;;  %10334 = vmatpush3.msra.mxu0 %v9677_v40 }
 0xbcb   :  { %10925 = vmatprep.subr.bf16.mxu0 %v11442_v2 }
 0xc98   :  { %v1188_v15 = vpop.f32.mrb[12].mxu0 }
 0xc99   :  { %v10317_v16 = vpop.f32.mrb[13].mxu0  ;;  %v1192_v17 = vsel %vm317_vm6, %v1188_v15, -inf }
 0xc9a   :  { %1193 = vmax.xlane.f32.xlu0 %v1192_v17  ;;  %v9695_v16 = vld [vmem:[%s11503_s8 + $0x30] sm:$0xff]  ;;  %v9696_v17 = vld [vmem:[%s11503_s8 + $0x38] sm:$0xff] }
 0xc9c   :  { %v1353_v18 = vpop.f32.mrb[14].mxu0 }
 0xc9d   :  { %v10327_v19 = vpop.f32.mrb[15].mxu0  ;;  %v1357_v20 = vsel %vm317_vm6, %v1353_v18, -inf }
 0xc9e   :  { %1358 = vmax.xlane.f32.xlu1 %v1357_v20  ;;  %v9691_v19 = vld [vmem:[%s11498_s3 + $0x1] ss:$0 sm:$0xff] }
 0xcaf   :  { %1203 = vrot.lane.b32.xlu1 %v1108_v8, %s11450_s28 }
 0xd27   :  { %v1194_v21 = vpop.xlane.xlu0 %1193 }
 0xd28   :  { %v1195_v22 = vsub.f32 %v1188_v15, %v1194_v21  ;;  %v10929_v15 = vpack.c.bf16 %v9694_v14, %v9693_v13  ;;  %v9701_v13 = vld [vmem:[%s11528_s6] ss:$0 sm:$0xff]  ;;  %s12620_s6 = sld [smem:[#allocation13_spill]] }
 0xd2a   :  { %v1196_v23 = vmul.f32 1.442695, %v1195_v22 }
 0xd2b   :  { %v1359_v24 = vpop.xlane.xlu1 %1358 }
 0xd2c   :  { %11156 = vpow2.f32 %v1196_v23  ;;  %v1360_v25 = vsub.f32 %v1353_v18, %v1359_v24  ;;  %v10932_v18 = vpack.c.bf16 %v9696_v17, %v9695_v16 }
 0xd2e   :  { %v1361_v26 = vmul.f32 1.442695, %v1360_v25 }
 0xd2f   :  { %v1204_v27 = vpop.permute.xlu1 %1203 }
 0xd30   :  { %11158 = vpow2.f32 %v1361_v26  ;;  %10319 = vmatpush3.msra.mxu1 %v1204_v27 }
 0xd31   :  { %10328 = vmatprep.subr.mxu1 %v11445_v4 }
 0xd36   :  { %v11157_v28 = vpop.eup %11156 }
 0xd37   :  { %v1198_v29 = vsel %vm317_vm6, %v11157_v28, 0.0 }
 0xd38   :  { %1199 = vadd.xlane.f32.xlu0 %v1198_v29 }
 0xd3a   :  { %v11159_v30 = vpop.eup %11158 }
 0xd3b   :  { %v1363_v31 = vsel %vm317_vm6, %v11159_v30, 0.0 }
 0xd3c   :  { %1364 = vadd.xlane.f32.xlu0 %v1363_v31 }
 0xd52   :  { %1368 = vrot.lane.b32.xlu0 %v1108_v8, %s11449_s13 }
 0xdc5   :  { %v1200_v32 = vpop.xlane.xlu0 %1199 }
 0xdc6   :  { %11160 = vrcp.f32 %v1200_v32 }
 0xdc9   :  { %v1365_v33 = vpop.xlane.xlu0 %1364 }
 0xdca   :  { %11162 = vrcp.f32 %v1365_v33 }
 0xdcd   :  { %v1369_v36 = vpop.permute.xlu0 %1368 }
 0xdd0   :  { %v11161_v34 = vpop.eup %11160 }
 0xdd1   :  { %v1202_v35 = vmul.f32 %v11161_v34, %v11157_v28 }
 0xdd3   :  { %10321 = vmatmul.mubr.msk.f32.vlgmr.msra.gmra.mrb[10].mxu1 %vm317_vm6, %v1202_v35 }
 0xdd4   :  { %v11163_v37 = vpop.eup %11162  ;;  %10329 = vmatpush3.msra.mxu1 %v1369_v36  ;;  %10330 = vmatprep.mubr.msk.f32.mxu1 %vm11444_vm3, %v11445_v4 }
 0xdd5   :  { %v1367_v38 = vmul.f32 %v11163_v37, %v11159_v30  ;;  %10338 = vmatprep.subr.mxu1 %v11445_v4 }
 0xdd7   :  { %10331 = vmatmul.mubr.msk.f32.vlgmr.msra.gmra.mrb[12].mxu1 %vm317_vm6, %v1367_v38 }
 0xdd8   :  { %10340 = vmatprep.mubr.msk.f32.mxu1 %vm11444_vm3, %v11445_v4  ;;  %10339 = vmatpush3.msra.mxu1 %v9676_v39 }
 0xdd9   :  { %10928 = vmatprep.subr.bf16.mxu1 %v11442_v2 }
 0xea6   :  { %v1275_v41 = vpop.f32.mrb[10].mxu1 }
 0xea7   :  { %v10322_v42 = vpop.f32.mrb[11].mxu1  ;;  %10341 = vmatmul.mubr.msk.f32.vlgmr.msra.gmra.mrb[14].mxu1 %vm317_vm6, %v1275_v41 }
 0xea8   :  { %10358 = vmatprep.mubr.msk.f32.mxu1 %vm11444_vm3, %v11445_v4  ;;  %10930 = vmatpush3.bf16.msra.mxu1 %v10929_v15 }
 0xea9   :  { %10931 = vmatprep.subr.bf16.mxu1 %v11442_v2 }
 0xeaa   :  { %v1440_v43 = vpop.f32.mrb[12].mxu1 }
 0xeab   :  { %v10332_v44 = vpop.f32.mrb[13].mxu1  ;;  %10336 = vmatmul.mubr.msk.f32.vlgmr.msra.gmra.mrb[16].mxu0 %vm317_vm6, %v1440_v43 }
 0xeac   :  { %10347 = vmatprep.mubr.msk.f32.mxu0 %vm11444_vm3, %v11445_v4  ;;  %10927 = vmatpush3.bf16.msra.mxu0 %v10926_v61  ;;  %v10938_v61 = vpack.c.bf16 %v1830_v60, %v1829_v59 }
 0xead   :  { %10934 = vmatprep.subr.bf16.mxu0 %v11442_v2  ;;  %10933 = vmatpush3.bf16.msra.mxu1 %v10932_v18 }
 0xeae   :  { %10940 = vmatprep.subr.bf16.mxu1 %v11442_v2 }
 0xf7a   :  { %v1586_v45 = vpop.f32.mrb[14].mxu1 }
 0xf7b   :  { %v10342_v46 = vpop.f32.mrb[15].mxu1 }
 0xf7e   :  { %v1513_v47 = vpop.f32.mrb[16].mxu0 }
 0xf7f   :  { %v1587_v49 = vadd.f32 %v1586_v45, %v1513_v47  ;;  %v10337_v50 = vpop.f32.mrb[17].mxu0 }
 0xf81   :  { %v1598_v51 = vadd.f32 %v9687_v48, %v1587_v49  ;;  %v9698_v48 = vld [vmem:[%s11508_s14 + $0x1] ss:$0 sm:$0xff] }
 0xf83   :  { %v1599_v52 = vadd.f32 %v1598_v51, %v11740_v6  ;;  %v1828_v6 = vld [vmem:[%s11523_s30 + $0x8] sm:$0xff]  ;;  %s12619_s30 = sld [smem:[#allocation12_spill]] }
 0xf84   :  { %v10935_v10 = vpack.c.bf16 %v1828_v6, %v1827_v5 }
 0xf85   :  { %v1600_v53 = vsel %vm238_vm5, %v1599_v52, 0.0 }
 0xf86   :  { %1601 = vadd.xlane.f32.xlu1 %v1600_v53 }
0x1013   :  { %v1602_v54 = vpop.xlane.xlu1 %1601 }
0x1014   :  { %v1603_v55 = vmul.f32 0.0625, %v1602_v54 }
0x1016   :  { %v1604_v56 = vsub.f32 %v1599_v52, %v1603_v55 }
0x1018   :  { %v1605_v57 = vmul.f32 %v1604_v56, %v1604_v56 }
0x101a   :  { %v1606_v58 = vsel %vm238_vm5, %v1605_v57, 0.0 }
0x101b   :  { %1607 = vadd.xlane.f32.xlu0 %v1606_v58 }
0x10a8   :  { %v1608_v62 = vpop.xlane.xlu0 %1607 }
0x10a9   :  { %v1609_v63 = vmul.f32 0.0625, %v1608_v62 }
0x10ab   :  { %v1610_v0 = vadd.f32 1e-05, %v1609_v63 }
0x10ad   :  { %11164 = vrsqrt.f32 %v1610_v0 }
0x10b7   :  { %v11165_v1 = vpop.eup %11164 }
0x10b8   :  { %v1612_v3 = vmul.f32 %v11165_v1, %v1604_v56 }
0x10ba   :  { %v1613_v8 = vmul.f32 %v11712_v7, %v1612_v3 }
0x10bc   :  { %v1614_v12 = vadd.f32 %v11715_v9, %v1613_v8  ;;  %v9705_v8 = vld [vmem:[%s11478_s17 + $0x20] sm:$0xff] }
0x10be   :  { %10348 = vmatmul.mubr.msk.f32.vlgmr.msra.gmra.mrb[18].mxu0 %vm238_vm5, %v1614_v12 }
0x10bf   :  { %10936 = vmatpush3.bf16.msra.mxu0 %v10935_v10  ;;  %10365 = vmatprep.mubr.msk.f32.mxu0 %vm11444_vm3, %v11445_v4  ;;  %v9706_v10 = vld [vmem:[%s11478_s17 + $0x28] sm:$0xff] }
0x10c0   :  { %10937 = vmatprep.subr.bf16.mxu0 %v11442_v2 }
0x10c2   :  { %10366 = vmatmul.mubr.msk.f32.vlgmr.msra.gmra.mrb[20].mxu0 %vm238_vm5, %v11661_v11 }
0x10c3   :  { %10372 = vmatprep.mubr.msk.f32.mxu0 %vm11444_vm3, %v11445_v4  ;;  %10939 = vmatpush3.bf16.msra.mxu0 %v10938_v61 }
0x10c4   :  { %10382 = vmatprep.subr.mxu0 %v11445_v4 }
0x1191   :  { %v1695_v20 = vpop.f32.mrb[18].mxu0 }
0x1192   :  { %v1696_v21 = vadd.f32 %v9691_v19, %v1695_v20  ;;  %v10349_v22 = vpop.f32.mrb[19].mxu0 }
0x1194   :  { %v1700_v23 = vmul.f32 0.70710677, %v1696_v21  ;;  %v1699_v45 = vmul.f32 0.5, %v1696_v21 }
0x1196   :  { %v1701_v24 = vand.u32 2147483647, %v1700_v23  ;;  %vm1720_vm9 = vcmp.ge.f32.partialorder %v1700_v23, 0.0 }
0x1198   :  { %v1702_v25 = vmul.f32 0.3275911, %v1701_v24  ;;  %v1714_v27 = vsub.f32 0.0, %v1701_v24 }
0x119a   :  { %v1703_v26 = vadd.f32 1.0, %v1702_v25  ;;  %v1715_v29 = vmul.f32 %v1714_v27, %v1701_v24 }
0x119c   :  { %11166 = vrcp.f32 %v1703_v26  ;;  %v1716_v32 = vmul.f32 1.442695, %v1715_v29 }
0x119e   :  { %11168 = vpow2.f32 %v1716_v32 }
0x11a6   :  { %v11167_v28 = vpop.eup %11166 }
0x11a7   :  { %v1705_v30 = vmul.f32 1.0614054, %v11167_v28 }
0x11a8   :  { %v11169_v40 = vpop.eup %11168 }
0x11a9   :  { %v1706_v31 = vadd.f32 -1.4531521, %v1705_v30 }
0x11ab   :  { %v1707_v33 = vmul.f32 %v11167_v28, %v1706_v31 }
0x11ad   :  { %v1708_v34 = vadd.f32 1.4214138, %v1707_v33 }
0x11af   :  { %v1709_v35 = vmul.f32 %v11167_v28, %v1708_v34 }
0x11b1   :  { %v1710_v36 = vadd.f32 -0.28449672, %v1709_v35 }
0x11b3   :  { %v1711_v37 = vmul.f32 %v11167_v28, %v1710_v36 }
0x11b5   :  { %v1712_v38 = vadd.f32 0.2548296, %v1711_v37 }
0x11b7   :  { %v1713_v39 = vmul.f32 %v11167_v28, %v1712_v38 }
0x11b9   :  { %v1718_v41 = vmul.f32 %v11169_v40, %v1713_v39 }
0x11bb   :  { %v1719_v42 = vsub.f32 1.0, %v1718_v41 }
0x11bd   :  { %v1721_v43 = vsub.f32 0.0, %v1719_v42 }
0x11bf   :  { %v1722_v44 = vsel %vm1720_vm9, %v1719_v42, %v1721_v43 }
0x11c0   :  { %v1723_v46 = vadd.f32 1.0, %v1722_v44  ;;  %v9708_v44 = vld [vmem:[%s11483_s21 + $0x20] sm:$0xff] }
0x11c2   :  { %v1724_v47 = vmul.f32 %v1723_v46, %v1699_v45  ;;  %v9709_v45 = vld [vmem:[%s11483_s21 + $0x28] sm:$0xff] }
0x11c4   :  { %10359 = vmatmul.mubr.msk.f32.vlgmr.msra.gmra.mrb[16].mxu1 %vm946_vm8, %v1724_v47 }
0x11c5   :  { %10379 = vmatprep.mubr.msk.f32.mxu1 %vm11444_vm3, %v11445_v4 }
0x1297   :  { %v1807_v49 = vpop.f32.mrb[16].mxu1 }
0x1298   :  { %v1808_v50 = vadd.f32 %v9698_v48, %v1807_v49  ;;  %v10360_v51 = vpop.f32.mrb[17].mxu1 }
0x129a   :  { %v1811_v52 = vadd.f32 %v1808_v50, %v1614_v12  ;;  %v10941_v12 = vpack.c.bf16 %v9706_v10, %v9705_v8 }
0x129c   :  { %v1812_v53 = vsel %vm238_vm5, %v1811_v52, 0.0  ;;  %10942 = vmatpush3.bf16.msra.mxu1 %v10941_v12 }
0x129d   :  { %1813 = vadd.xlane.f32.xlu1 %v1812_v53  ;;  %10387 = vmatprep.subr.mxu1 %v11445_v4  ;;  %v9719_v53 = vld [vmem:[%s11488_s25 + $0x2] ss:$0 sm:$0xff] }
0x132a   :  { %v1814_v54 = vpop.xlane.xlu1 %1813 }
0x132b   :  { %v1815_v55 = vmul.f32 0.0625, %v1814_v54 }
0x132d   :  { %v1816_v56 = vsub.f32 %v1811_v52, %v1815_v55 }
0x132f   :  { %v1817_v57 = vmul.f32 %v1816_v56, %v1816_v56 }
0x1331   :  { %v1818_v58 = vsel %vm238_vm5, %v1817_v57, 0.0 }
0x1332   :  { %1819 = vadd.xlane.f32.xlu0 %v1818_v58 }
0x13bf   :  { %v1820_v62 = vpop.xlane.xlu0 %1819 }
0x13c0   :  { %v1821_v63 = vmul.f32 0.0625, %v1820_v62 }
0x13c2   :  { %v1822_v0 = vadd.f32 1e-05, %v1821_v63 }
0x13c4   :  { %11170 = vrsqrt.f32 %v1822_v0  ;;  %v9722_v0 = vld [vmem:[%s11493_s29 + $0x20] sm:$0xff] }
0x13ce   :  { %v11171_v1 = vpop.eup %11170 }
0x13cf   :  { %v1824_v3 = vmul.f32 %v11171_v1, %v1816_v56  ;;  %v9723_v1 = vld [vmem:[%s11493_s29 + $0x28] sm:$0xff] }
0x13d1   :  { %v1825_v5 = vmul.f32 %v11712_v7, %v1824_v3  ;;  %v10944_v3 = vpack.c.bf16 %v9723_v1, %v9722_v0 }
0x13d3   :  { %v11820_v6 = vadd.f32 %v11715_v9, %v1825_v5 }
0x13d5   :  { %10373 = vmatmul.mubr.msk.f32.vlgmr.msra.gmra.mrb[20].mxu0 %vm238_vm5, %v11820_v6 }
0x13d6   :  { %10384 = vmatprep.mubr.msk.f32.mxu0 %vm11444_vm3, %v11445_v4 }
0x14a8   :  { %v1978_v14 = vpop.f32.mrb[20].mxu0 }
0x14a9   :  { %v11830_v15 = vadd.f32 %v9701_v13, %v1978_v14  ;;  %v10374_v7 = vpop.f32.mrb[21].mxu0  ;;  %v11881_v13 = vld [vmem:[%s11513_s19 + $0x1] ss:$0 sm:$0xff] }
0x14ab   :  { %10380 = vmatmul.mubr.msk.f32.vlgmr.msra.gmra.mrb[18].mxu1 %vm238_vm5, %v11830_v15 }
0x14ac   :  { %10389 = vmatprep.mubr.msk.f32.mxu1 %vm11444_vm3, %v11445_v4 }
0x157e   :  { %v2059_v9 = vpop.f32.mrb[18].mxu1 }
0x157f   :  { %2232 = vrot.lane.b32.xlu0 %v2059_v9, %s11448_s9  ;;  %2067 = vrot.lane.b32.xlu1 %v2059_v9, %s11447_s5  ;;  %v10381_v16 = vpop.f32.mrb[19].mxu1 }
0x1580   :  { %v9727_v16 = vld [vmem:[%s11503_s8 + $0x40] sm:$0xff] }
0x1583   :  { %2230 = vrot.lane.b32.xlu1 %v2059_v9, %s11446_s0 }
0x15f1   :  { %v2068_v17 = vpop.permute.xlu1 %2067  ;;  %v2233_v18 = vpop.permute.xlu0 %2232 }
0x15f2   :  { %10383 = vmatpush3.xpose.msk.msra.mxu0 %vm317_vm6, %v2068_v17  ;;  %v9728_v17 = vld [vmem:[%s11503_s8 + $0x48] sm:$0xff] }
0x15f3   :  { %10392 = vmatprep.subr.mxu0 %v11445_v4 }
0x15f5   :  { %10385 = vmatmul.mubr.msk.f32.vlgmr.msra.gmra.mrb[22].mxu0 %vm317_vm6, %v2059_v9  ;;  %v2231_v19 = vpop.permute.xlu1 %2230 }
0x15f6   :  { %10393 = vmatpush3.xpose.msk.msra.mxu0 %vm317_vm6, %v2233_v18  ;;  %10394 = vmatprep.mubr.msk.f32.mxu0 %vm11444_vm3, %v11445_v4  ;;  %v10947_v18 = vpack.c.bf16 %v9728_v17, %v9727_v16 }
0x15f7   :  { %10402 = vmatprep.subr.mxu0 %v11445_v4 }
0x15f9   :  { %10395 = vmatmul.mubr.msk.f32.vlgmr.msra.gmra.mrb[24].mxu0 %vm317_vm6, %v2231_v19  ;;  %v9729_v19 = vld [vmem:[%s11503_s8 + $0x50] sm:$0xff] }
0x15fa   :  { %10404 = vmatprep.mubr.msk.f32.mxu0 %vm11444_vm3, %v11445_v4  ;;  %10403 = vmatpush3.msra.mxu0 %v9709_v45 }
0x15fb   :  { %10943 = vmatprep.subr.bf16.mxu0 %v11442_v2 }
0x16c8   :  { %v2139_v20 = vpop.f32.mrb[22].mxu0 }
0x16c9   :  { %v10386_v21 = vpop.f32.mrb[23].mxu0  ;;  %v2143_v22 = vsel %vm317_vm6, %v2139_v20, -inf }
0x16ca   :  { %2144 = vmax.xlane.f32.xlu1 %v2143_v22  ;;  %v9725_v22 = vld [vmem:[%s11498_s3 + $0x2] ss:$0 sm:$0xff] }
0x16cc   :  { %v2304_v23 = vpop.f32.mrb[24].mxu0 }
0x16cd   :  { %v10396_v24 = vpop.f32.mrb[25].mxu0  ;;  %v2308_v25 = vsel %vm317_vm6, %v2304_v23, -inf }
0x16ce   :  { %2309 = vmax.xlane.f32.xlu0 %v2308_v25 }
0x1757   :  { %v2145_v26 = vpop.xlane.xlu1 %2144 }
0x1758   :  { %v2146_v27 = vsub.f32 %v2139_v20, %v2145_v26  ;;  %v9730_v20 = vld [vmem:[%s11503_s8 + $0x58] sm:$0xff] }
0x1759   :  { %v10950_v21 = vpack.c.bf16 %v9730_v20, %v9729_v19 }
0x175a   :  { %v2147_v28 = vmul.f32 1.442695, %v2146_v27 }
0x175b   :  { %v2310_v29 = vpop.xlane.xlu0 %2309 }
0x175c   :  { %11172 = vpow2.f32 %v2147_v28  ;;  %v2311_v30 = vsub.f32 %v2304_v23, %v2310_v29 }
0x175e   :  { %v2312_v31 = vmul.f32 1.442695, %v2311_v30 }
0x1760   :  { %11174 = vpow2.f32 %v2312_v31 }
0x1766   :  { %v11173_v32 = vpop.eup %11172 }
0x1767   :  { %v2149_v33 = vsel %vm317_vm6, %v11173_v32, 0.0 }
0x1768   :  { %2150 = vadd.xlane.f32.xlu0 %v2149_v33 }
0x176a   :  { %v11175_v34 = vpop.eup %11174 }
0x176b   :  { %v2314_v35 = vsel %vm317_vm6, %v11175_v34, 0.0 }
0x176c   :  { %2315 = vadd.xlane.f32.xlu1 %v2314_v35 }
0x177d   :  { %2319 = vrot.lane.b32.xlu1 %v2059_v9, %s11449_s13 }
0x177e   :  { %2154 = vrot.lane.b32.xlu0 %v2059_v9, %s11450_s28 }
0x17f5   :  { %v2151_v36 = vpop.xlane.xlu0 %2150 }
0x17f6   :  { %11176 = vrcp.f32 %v2151_v36 }
0x17f9   :  { %v2316_v37 = vpop.xlane.xlu1 %2315  ;;  %v2155_v38 = vpop.permute.xlu0 %2154 }
0x17fa   :  { %11178 = vrcp.f32 %v2316_v37  ;;  %10388 = vmatpush3.msra.mxu1 %v2155_v38 }
0x17fb   :  { %10397 = vmatprep.subr.mxu1 %v11445_v4 }
0x17fd   :  { %v2320_v41 = vpop.permute.xlu1 %2319 }
0x1800   :  { %v11177_v39 = vpop.eup %11176 }
0x1801   :  { %v2153_v40 = vmul.f32 %v11177_v39, %v11173_v32 }
0x1803   :  { %10390 = vmatmul.mubr.msk.f32.vlgmr.msra.gmra.mrb[20].mxu1 %vm317_vm6, %v2153_v40 }
0x1804   :  { %v11179_v42 = vpop.eup %11178  ;;  %10398 = vmatpush3.msra.mxu1 %v2320_v41  ;;  %10399 = vmatprep.mubr.msk.f32.mxu1 %vm11444_vm3, %v11445_v4 }
0x1805   :  { %v2318_v43 = vmul.f32 %v11179_v42, %v11175_v34  ;;  %10407 = vmatprep.subr.mxu1 %v11445_v4 }
0x1807   :  { %10400 = vmatmul.mubr.msk.f32.vlgmr.msra.gmra.mrb[22].mxu1 %vm317_vm6, %v2318_v43 }
0x1808   :  { %10409 = vmatprep.mubr.msk.f32.mxu1 %vm11444_vm3, %v11445_v4  ;;  %10408 = vmatpush3.msra.mxu1 %v9708_v44 }
0x1809   :  { %10946 = vmatprep.subr.bf16.mxu1 %v11442_v2 }
0x18d6   :  { %v2226_v46 = vpop.f32.mrb[20].mxu1 }
0x18d7   :  { %v10391_v47 = vpop.f32.mrb[21].mxu1  ;;  %10410 = vmatmul.mubr.msk.f32.vlgmr.msra.gmra.mrb[24].mxu1 %vm317_vm6, %v2226_v46 }
0x18d8   :  { %10427 = vmatprep.mubr.msk.f32.mxu1 %vm11444_vm3, %v11445_v4  ;;  %10948 = vmatpush3.bf16.msra.mxu1 %v10947_v18 }
0x18d9   :  { %10949 = vmatprep.subr.bf16.mxu1 %v11442_v2 }
0x18da   :  { %v2391_v48 = vpop.f32.mrb[22].mxu1 }
0x18db   :  { %v10401_v49 = vpop.f32.mrb[23].mxu1  ;;  %10405 = vmatmul.mubr.msk.f32.vlgmr.msra.gmra.mrb[26].mxu0 %vm317_vm6, %v2391_v48 }
0x18dc   :  { %10416 = vmatprep.mubr.msk.f32.mxu0 %vm11444_vm3, %v11445_v4  ;;  %10945 = vmatpush3.bf16.msra.mxu0 %v10944_v3 }
0x18dd   :  { %10952 = vmatprep.subr.bf16.mxu0 %v11442_v2  ;;  %10951 = vmatpush3.bf16.msra.mxu1 %v10950_v21 }
0x18de   :  { %10442 = vmatprep.subr.mxu1 %v11445_v4 }
0x19aa   :  { %v2537_v50 = vpop.f32.mrb[24].mxu1 }
0x19ab   :  { %v10411_v51 = vpop.f32.mrb[25].mxu1 }
0x19ac   :  { %v9732_v51 = vld [vmem:[%s11508_s14 + $0x2] ss:$0 sm:$0xff] }
0x19ae   :  { %v2464_v52 = vpop.f32.mrb[26].mxu0 }
0x19af   :  { %v2538_v54 = vadd.f32 %v2537_v50, %v2464_v52  ;;  %v10406_v55 = vpop.f32.mrb[27].mxu0 }
0x19b1   :  { %v2549_v56 = vadd.f32 %v9719_v53, %v2538_v54 }
0x19b3   :  { %v2550_v57 = vadd.f32 %v11830_v15, %v2549_v56  ;;  %v11884_v15 = vld [vmem:[%s11518_s24 + $0x1] ss:$0 sm:$0xff] }
0x19b5   :  { %v2551_v58 = vsel %vm238_vm5, %v2550_v57, 0.0 }
0x19b6   :  { %2552 = vadd.xlane.f32.xlu1 %v2551_v58 }
0x1a43   :  { %v2553_v59 = vpop.xlane.xlu1 %2552 }
0x1a44   :  { %v2554_v60 = vmul.f32 0.0625, %v2553_v59 }
0x1a46   :  { %v2555_v61 = vsub.f32 %v2550_v57, %v2554_v60 }
0x1a48   :  { %v2556_v62 = vmul.f32 %v2555_v61, %v2555_v61 }
0x1a4a   :  { %v2557_v63 = vsel %vm238_vm5, %v2556_v62, 0.0  ;;  %v9734_v62 = vld [vmem:[%s11478_s17 + $0x30] sm:$0xff] }
0x1a4b   :  { %2558 = vadd.xlane.f32.xlu0 %v2557_v63  ;;  %v9735_v63 = vld [vmem:[%s11478_s17 + $0x38] sm:$0xff] }
0x1a4c   :  { %v10953_v0 = vpack.c.bf16 %v9735_v63, %v9734_v62  ;;  %v9749_v63 = vld [vmem:[%s11493_s29 + $0x30] sm:$0xff] }
0x1ad8   :  { %v2559_v5 = vpop.xlane.xlu0 %2558 }
0x1ad9   :  { %v2560_v8 = vmul.f32 0.0625, %v2559_v5 }
0x1adb   :  { %v2561_v10 = vadd.f32 1e-05, %v2560_v8 }
0x1add   :  { %11180 = vrsqrt.f32 %v2561_v10 }
0x1ae7   :  { %v11181_v12 = vpop.eup %11180 }
0x1ae8   :  { %v2563_v14 = vmul.f32 %v11181_v12, %v2555_v61 }
0x1aea   :  { %v2570_v7 = vmul.f32 %v11881_v13, %v2563_v14 }
0x1aec   :  { %v2577_v9 = vadd.f32 %v11884_v15, %v2570_v7 }
0x1aee   :  { %10417 = vmatmul.mubr.msk.f32.vlgmr.msra.gmra.mrb[28].mxu0 %vm238_vm5, %v2577_v9 }
0x1aef   :  { %10434 = vmatprep.mubr.msk.f32.mxu0 %vm11444_vm3, %v11445_v4  ;;  %10954 = vmatpush3.bf16.msra.mxu0 %v10953_v0  ;;  %v9750_v0 = vld [vmem:[%s11493_s29 + $0x38] sm:$0xff] }
0x1af0   :  { %10437 = vmatprep.subr.mxu0 %v11445_v4 }
0x1bc1   :  { %v2658_v23 = vpop.f32.mrb[28].mxu0 }
0x1bc2   :  { %v2659_v24 = vadd.f32 %v9725_v22, %v2658_v23  ;;  %v10418_v25 = vpop.f32.mrb[29].mxu0 }
0x1bc4   :  { %v2663_v26 = vmul.f32 0.70710677, %v2659_v24  ;;  %v2662_v48 = vmul.f32 0.5, %v2659_v24 }
0x1bc6   :  { %v2664_v27 = vand.u32 2147483647, %v2663_v26  ;;  %vm2683_vm10 = vcmp.ge.f32.partialorder %v2663_v26, 0.0 }
0x1bc8   :  { %v2665_v28 = vmul.f32 0.3275911, %v2664_v27  ;;  %v2677_v30 = vsub.f32 0.0, %v2664_v27 }
0x1bca   :  { %v2666_v29 = vadd.f32 1.0, %v2665_v28  ;;  %v2678_v32 = vmul.f32 %v2677_v30, %v2664_v27 }
0x1bcc   :  { %11182 = vrcp.f32 %v2666_v29  ;;  %v2679_v35 = vmul.f32 1.442695, %v2678_v32 }
0x1bce   :  { %11184 = vpow2.f32 %v2679_v35 }
0x1bd6   :  { %v11183_v31 = vpop.eup %11182 }
0x1bd7   :  { %v2668_v33 = vmul.f32 1.0614054, %v11183_v31 }
0x1bd8   :  { %v11185_v43 = vpop.eup %11184 }
0x1bd9   :  { %v2669_v34 = vadd.f32 -1.4531521, %v2668_v33 }
0x1bdb   :  { %v2670_v36 = vmul.f32 %v11183_v31, %v2669_v34 }
0x1bdd   :  { %v2671_v37 = vadd.f32 1.4214138, %v2670_v36 }
0x1bdf   :  { %v2672_v38 = vmul.f32 %v11183_v31, %v2671_v37 }
0x1be1   :  { %v2673_v39 = vadd.f32 -0.28449672, %v2672_v38 }
0x1be3   :  { %v2674_v40 = vmul.f32 %v11183_v31, %v2673_v39 }
0x1be5   :  { %v2675_v41 = vadd.f32 0.2548296, %v2674_v40 }
0x1be7   :  { %v2676_v42 = vmul.f32 %v11183_v31, %v2675_v41 }
0x1be9   :  { %v2681_v44 = vmul.f32 %v11185_v43, %v2676_v42  ;;  %v9737_v43 = vld [vmem:[%s11483_s21 + $0x30] sm:$0xff] }
0x1beb   :  { %v2682_v45 = vsub.f32 1.0, %v2681_v44  ;;  %v9738_v44 = vld [vmem:[%s11483_s21 + $0x38] sm:$0xff] }
0x1bed   :  { %v2684_v46 = vsub.f32 0.0, %v2682_v45 }
0x1bef   :  { %v2685_v47 = vsel %vm2683_vm10, %v2682_v45, %v2684_v46 }
0x1bf0   :  { %v2686_v49 = vadd.f32 1.0, %v2685_v47 }
0x1bf2   :  { %v2687_v50 = vmul.f32 %v2686_v49, %v2662_v48 }
0x1bf4   :  { %10428 = vmatmul.mubr.msk.f32.vlgmr.msra.gmra.mrb[26].mxu1 %vm946_vm8, %v2687_v50 }
0x1bf5   :  { %10444 = vmatprep.mubr.msk.f32.mxu1 %vm11444_vm3, %v11445_v4 }
0x1cc7   :  { %v2770_v52 = vpop.f32.mrb[26].mxu1 }
0x1cc8   :  { %v2771_v53 = vadd.f32 %v9732_v51, %v2770_v52  ;;  %v10429_v54 = vpop.f32.mrb[27].mxu1  ;;  %v9748_v52 = vld [vmem:[%s11488_s25 + $0x3] ss:$0 sm:$0xff] }
0x1cca   :  { %v2774_v55 = vadd.f32 %v2771_v53, %v2577_v9 }
0x1ccc   :  { %v2775_v56 = vsel %vm238_vm5, %v2774_v55, 0.0 }
0x1ccd   :  { %2776 = vadd.xlane.f32.xlu0 %v2775_v56 }
0x1d5a   :  { %v2777_v57 = vpop.xlane.xlu0 %2776 }
0x1d5b   :  { %v2778_v58 = vmul.f32 0.0625, %v2777_v57 }
0x1d5d   :  { %v2779_v59 = vsub.f32 %v2774_v55, %v2778_v58 }
0x1d5f   :  { %v2780_v60 = vmul.f32 %v2779_v59, %v2779_v59 }
0x1d61   :  { %v2781_v61 = vsel %vm238_vm5, %v2780_v60, 0.0 }
0x1d62   :  { %2782 = vadd.xlane.f32.xlu1 %v2781_v61 }
0x1def   :  { %v2783_v1 = vpop.xlane.xlu1 %2782 }
0x1df0   :  { %v2784_v3 = vmul.f32 0.0625, %v2783_v1  ;;  %v10956_v1 = vpack.c.bf16 %v9750_v0, %v9749_v63 }
0x1df2   :  { %v2785_v5 = vadd.f32 1e-05, %v2784_v3 }
0x1df4   :  { %11186 = vrsqrt.f32 %v2785_v5 }
0x1dfe   :  { %v11187_v8 = vpop.eup %11186 }
0x1dff   :  { %v2787_v10 = vmul.f32 %v11187_v8, %v2779_v59 }
0x1e01   :  { %v2788_v12 = vmul.f32 %v11881_v13, %v2787_v10 }
0x1e03   :  { %v11909_v14 = vadd.f32 %v11884_v15, %v2788_v12 }
0x1e05   :  { %10435 = vmatmul.mubr.msk.f32.vlgmr.msra.gmra.mrb[30].mxu0 %vm238_vm5, %v11909_v14 }
0x1e06   :  { %10439 = vmatprep.mubr.msk.f32.mxu0 %vm11444_vm3, %v11445_v4 }
0x1ed8   :  { %v2862_v7 = vpop.f32.mrb[30].mxu0 }
0x1ed9   :  { %3035 = vrot.lane.b32.xlu1 %v2862_v7, %s11448_s9  ;;  %2870 = vrot.lane.b32.xlu0 %v2862_v7, %s11447_s5  ;;  %v10436_v9 = vpop.f32.mrb[31].mxu0 }
0x1edd   :  { %3033 = vrot.lane.b32.xlu1 %v2862_v7, %s11446_s0 }
0x1f4b   :  { %v2871_v16 = vpop.permute.xlu0 %2870  ;;  %v3036_v17 = vpop.permute.xlu1 %3035 }
0x1f4c   :  { %10438 = vmatpush3.xpose.msk.msra.mxu0 %vm317_vm6, %v2871_v16 }
0x1f4d   :  { %10447 = vmatprep.subr.mxu0 %v11445_v4 }
0x1f4f   :  { %10440 = vmatmul.mubr.msk.f32.vlgmr.msra.gmra.mrb[32].mxu0 %vm317_vm6, %v2862_v7  ;;  %v3034_v18 = vpop.permute.xlu1 %3033 }
0x1f50   :  { %10448 = vmatpush3.xpose.msk.msra.mxu0 %vm317_vm6, %v3036_v17  ;;  %10449 = vmatprep.mubr.msk.f32.mxu0 %vm11444_vm3, %v11445_v4 }
0x1f51   :  { %10457 = vmatprep.subr.mxu0 %v11445_v4 }
0x1f53   :  { %10450 = vmatmul.mubr.msk.f32.vlgmr.msra.gmra.mrb[34].mxu0 %vm317_vm6, %v3034_v18  ;;  %v3583_v18 = vld [vmem:[%s12619_s30 + $0x10] sm:$0xff] }
0x1f54   :  { %10459 = vmatprep.mubr.msk.f32.mxu0 %vm11444_vm3, %v11445_v4  ;;  %10458 = vmatpush3.msra.mxu0 %v9738_v44 }
0x1f55   :  { %10955 = vmatprep.subr.bf16.mxu0 %v11442_v2 }
0x2022   :  { %v2942_v19 = vpop.f32.mrb[32].mxu0 }
0x2023   :  { %v10441_v20 = vpop.f32.mrb[33].mxu0  ;;  %v2946_v21 = vsel %vm317_vm6, %v2942_v19, -inf }
0x2024   :  { %2947 = vmax.xlane.f32.xlu0 %v2946_v21  ;;  %v9754_v21 = vld [vmem:[%s11503_s8 + $0x60] sm:$0xff] }
0x2026   :  { %v3107_v22 = vpop.f32.mrb[34].mxu0 }
0x2027   :  { %v10451_v23 = vpop.f32.mrb[35].mxu0  ;;  %v3111_v24 = vsel %vm317_vm6, %v3107_v22, -inf }
0x2028   :  { %3112 = vmax.xlane.f32.xlu1 %v3111_v24  ;;  %v9756_v24 = vld [vmem:[%s11503_s8 + $0x70] sm:$0xff] }
0x2039   :  { %2957 = vrot.lane.b32.xlu1 %v2862_v7, %s11450_s28 }
0x20b1   :  { %v2948_v25 = vpop.xlane.xlu0 %2947 }
0x20b2   :  { %v2949_v26 = vsub.f32 %v2942_v19, %v2948_v25  ;;  %v3584_v19 = vld [vmem:[%s12619_s30 + $0x18] sm:$0xff] }
0x20b3   :  { %v10968_v20 = vpack.c.bf16 %v3584_v19, %v3583_v18  ;;  %v9757_v25 = vld [vmem:[%s11503_s8 + $0x78] sm:$0xff]  ;;  %v9767_v19 = vld [vmem:[%s11478_s17 + $0x40] sm:$0xff] }
0x20b4   :  { %v2950_v27 = vmul.f32 1.442695, %v2949_v26  ;;  %v10962_v26 = vpack.c.bf16 %v9757_v25, %v9756_v24 }
0x20b5   :  { %v3113_v28 = vpop.xlane.xlu1 %3112 }
0x20b6   :  { %11188 = vpow2.f32 %v2950_v27  ;;  %v3114_v29 = vsub.f32 %v3107_v22, %v3113_v28  ;;  %v9755_v22 = vld [vmem:[%s11503_s8 + $0x68] sm:$0xff]  ;;  %v9752_v27 = vld [vmem:[%s11498_s3 + $0x3] ss:$0 sm:$0xff] }
0x20b7   :  { %v10959_v23 = vpack.c.bf16 %v9755_v22, %v9754_v21  ;;  %v9762_v22 = vld [vmem:[%s12620_s6] ss:$0 sm:$0xff] }
0x20b8   :  { %v3115_v30 = vmul.f32 1.442695, %v3114_v29 }
0x20b9   :  { %v2958_v31 = vpop.permute.xlu1 %2957 }
0x20ba   :  { %11190 = vpow2.f32 %v3115_v30  ;;  %10443 = vmatpush3.msra.mxu1 %v2958_v31 }
0x20bb   :  { %10452 = vmatprep.subr.mxu1 %v11445_v4 }
0x20c0   :  { %v11189_v32 = vpop.eup %11188 }
0x20c1   :  { %v2952_v33 = vsel %vm317_vm6, %v11189_v32, 0.0 }
0x20c2   :  { %2953 = vadd.xlane.f32.xlu0 %v2952_v33 }
0x20c4   :  { %v11191_v34 = vpop.eup %11190 }
0x20c5   :  { %v3117_v35 = vsel %vm317_vm6, %v11191_v34, 0.0 }
0x20c6   :  { %3118 = vadd.xlane.f32.xlu0 %v3117_v35 }
0x20dc   :  { %3122 = vrot.lane.b32.xlu0 %v2862_v7, %s11449_s13  ;;  %v3582_v7 = vld [vmem:[%s12619_s30 + $0x8] sm:$0xff] }
0x214f   :  { %v2954_v36 = vpop.xlane.xlu0 %2953 }
0x2150   :  { %11192 = vrcp.f32 %v2954_v36 }
0x2153   :  { %v3119_v37 = vpop.xlane.xlu0 %3118 }
0x2154   :  { %11194 = vrcp.f32 %v3119_v37 }
0x2157   :  { %v3123_v40 = vpop.permute.xlu0 %3122 }
0x215a   :  { %v11193_v38 = vpop.eup %11192 }
0x215b   :  { %v2956_v39 = vmul.f32 %v11193_v38, %v11189_v32 }
0x215d   :  { %10445 = vmatmul.mubr.msk.f32.vlgmr.msra.gmra.mrb[28].mxu1 %vm317_vm6, %v2956_v39 }
0x215e   :  { %v11195_v41 = vpop.eup %11194  ;;  %10453 = vmatpush3.msra.mxu1 %v3123_v40  ;;  %10454 = vmatprep.mubr.msk.f32.mxu1 %vm11444_vm3, %v11445_v4 }
0x215f   :  { %v3121_v42 = vmul.f32 %v11195_v41, %v11191_v34  ;;  %10462 = vmatprep.subr.mxu1 %v11445_v4 }
0x2161   :  { %10455 = vmatmul.mubr.msk.f32.vlgmr.msra.gmra.mrb[30].mxu1 %vm317_vm6, %v3121_v42 }
0x2162   :  { %10464 = vmatprep.mubr.msk.f32.mxu1 %vm11444_vm3, %v11445_v4  ;;  %10463 = vmatpush3.msra.mxu1 %v9737_v43 }
0x2163   :  { %10958 = vmatprep.subr.bf16.mxu1 %v11442_v2 }
0x2230   :  { %v3029_v45 = vpop.f32.mrb[28].mxu1 }
0x2231   :  { %v10446_v46 = vpop.f32.mrb[29].mxu1  ;;  %10465 = vmatmul.mubr.msk.f32.vlgmr.msra.gmra.mrb[32].mxu1 %vm317_vm6, %v3029_v45 }
0x2232   :  { %10482 = vmatprep.mubr.msk.f32.mxu1 %vm11444_vm3, %v11445_v4  ;;  %10960 = vmatpush3.bf16.msra.mxu1 %v10959_v23 }
0x2233   :  { %10961 = vmatprep.subr.bf16.mxu1 %v11442_v2 }
0x2234   :  { %v3194_v47 = vpop.f32.mrb[30].mxu1 }
0x2235   :  { %v10456_v48 = vpop.f32.mrb[31].mxu1  ;;  %10460 = vmatmul.mubr.msk.f32.vlgmr.msra.gmra.mrb[36].mxu0 %vm317_vm6, %v3194_v47 }
0x2236   :  { %10471 = vmatprep.mubr.msk.f32.mxu0 %vm11444_vm3, %v11445_v4  ;;  %10957 = vmatpush3.bf16.msra.mxu0 %v10956_v1 }
0x2237   :  { %10964 = vmatprep.subr.bf16.mxu0 %v11442_v2  ;;  %10963 = vmatpush3.bf16.msra.mxu1 %v10962_v26 }
0x2238   :  { %10973 = vmatprep.subr.bf16.mxu1 %v11442_v2 }
0x2304   :  { %v3340_v49 = vpop.f32.mrb[32].mxu1 }
0x2305   :  { %v10466_v50 = vpop.f32.mrb[33].mxu1 }
0x2308   :  { %v3267_v51 = vpop.f32.mrb[36].mxu0 }
0x2309   :  { %v3341_v53 = vadd.f32 %v3340_v49, %v3267_v51  ;;  %v10461_v54 = vpop.f32.mrb[37].mxu0 }
0x230b   :  { %v3352_v55 = vadd.f32 %v9748_v52, %v3341_v53 }
0x230d   :  { %v3353_v56 = vadd.f32 %v3352_v55, %v11909_v14  ;;  %v3581_v14 = vld [vmem:[%s12619_s30] sm:$0xff] }
0x230e   :  { %v10965_v16 = vpack.c.bf16 %v3582_v7, %v3581_v14 }
0x230f   :  { %v3354_v57 = vsel %vm238_vm5, %v3353_v56, 0.0 }
0x2310   :  { %3355 = vadd.xlane.f32.xlu1 %v3354_v57 }
0x239d   :  { %v3356_v58 = vpop.xlane.xlu1 %3355 }
0x239e   :  { %v3357_v59 = vmul.f32 0.0625, %v3356_v58 }
0x23a0   :  { %v3358_v60 = vsub.f32 %v3353_v56, %v3357_v59  ;;  %v9759_v56 = vld [vmem:[%s11508_s14 + $0x3] ss:$0 sm:$0xff] }
0x23a2   :  { %v3359_v61 = vmul.f32 %v3358_v60, %v3358_v60 }
0x23a4   :  { %v3360_v62 = vsel %vm238_vm5, %v3359_v61, 0.0 }
0x23a5   :  { %3361 = vadd.xlane.f32.xlu0 %v3360_v62 }
0x2432   :  { %v3362_v3 = vpop.xlane.xlu0 %3361 }
0x2433   :  { %v3363_v5 = vmul.f32 0.0625, %v3362_v3 }
0x2435   :  { %v3364_v8 = vadd.f32 1e-05, %v3363_v5  ;;  %v3585_v5 = vld [vmem:[%s12619_s30 + $0x20] sm:$0xff] }
0x2437   :  { %11196 = vrsqrt.f32 %v3364_v8  ;;  %v3586_v8 = vld [vmem:[%s12619_s30 + $0x28] sm:$0xff] }
0x2441   :  { %v11197_v10 = vpop.eup %11196 }
0x2442   :  { %v3366_v12 = vmul.f32 %v11197_v10, %v3358_v60  ;;  %v10971_v10 = vpack.c.bf16 %v3586_v8, %v3585_v5 }
0x2444   :  { %v3367_v9 = vmul.f32 %v11881_v13, %v3366_v12 }
0x2446   :  { %v3368_v17 = vadd.f32 %v11884_v15, %v3367_v9 }
0x2448   :  { %10472 = vmatmul.mubr.msk.f32.vlgmr.msra.gmra.mrb[38].mxu0 %vm238_vm5, %v3368_v17 }
0x2449   :  { %10966 = vmatpush3.bf16.msra.mxu0 %v10965_v16  ;;  %10489 = vmatprep.mubr.msk.f32.mxu0 %vm11444_vm3, %v11445_v4 }
0x244a   :  { %10967 = vmatprep.subr.bf16.mxu0 %v11442_v2 }
0x244c   :  { %10490 = vmatmul.mubr.msk.f32.vlgmr.msra.gmra.mrb[40].mxu0 %vm238_vm5, %v11661_v11 }
0x244d   :  { %10969 = vmatpush3.bf16.msra.mxu0 %v10968_v20  ;;  %10496 = vmatprep.mubr.msk.f32.mxu0 %vm11444_vm3, %v11445_v4  ;;  %v9768_v20 = vld [vmem:[%s11478_s17 + $0x48] sm:$0xff] }
0x244e   :  { %10970 = vmatprep.subr.bf16.mxu0 %v11442_v2  ;;  %v10974_v21 = vpack.c.bf16 %v9768_v20, %v9767_v19 }
0x2454   :  { %10497 = vmatmul.mubr.msk.f32.vlgmr.msra.gmra.mrb[40].mxu0 %vm238_vm5, %v11820_v6 }
0x2455   :  { %10503 = vmatprep.mubr.msk.f32.mxu0 %vm11444_vm3, %v11445_v4  ;;  %10972 = vmatpush3.bf16.msra.mxu0 %v10971_v10 }
0x2456   :  { %10518 = vmatprep.subr.mxu0 %v11445_v4 }
0x251b   :  { %v3449_v28 = vpop.f32.mrb[38].mxu0 }
0x251c   :  { %v3450_v29 = vadd.f32 %v9752_v27, %v3449_v28  ;;  %v10473_v30 = vpop.f32.mrb[39].mxu0 }
0x251e   :  { %v3454_v31 = vmul.f32 0.70710677, %v3450_v29  ;;  %v3453_v53 = vmul.f32 0.5, %v3450_v29 }
0x2520   :  { %v3455_v32 = vand.u32 2147483647, %v3454_v31  ;;  %vm3474_vm11 = vcmp.ge.f32.partialorder %v3454_v31, 0.0 }
0x2522   :  { %v3456_v33 = vmul.f32 0.3275911, %v3455_v32  ;;  %v3468_v35 = vsub.f32 0.0, %v3455_v32 }
0x2524   :  { %v3457_v34 = vadd.f32 1.0, %v3456_v33  ;;  %v3469_v37 = vmul.f32 %v3468_v35, %v3455_v32 }
0x2526   :  { %11198 = vrcp.f32 %v3457_v34  ;;  %v3470_v40 = vmul.f32 1.442695, %v3469_v37 }
0x2528   :  { %11200 = vpow2.f32 %v3470_v40 }
0x2530   :  { %v11199_v36 = vpop.eup %11198 }
0x2531   :  { %v3459_v38 = vmul.f32 1.0614054, %v11199_v36 }
0x2532   :  { %v11201_v48 = vpop.eup %11200 }
0x2533   :  { %v3460_v39 = vadd.f32 -1.4531521, %v3459_v38 }
0x2535   :  { %v3461_v41 = vmul.f32 %v11199_v36, %v3460_v39 }
0x2537   :  { %v3462_v42 = vadd.f32 1.4214138, %v3461_v41 }
0x2539   :  { %v3463_v43 = vmul.f32 %v11199_v36, %v3462_v42 }
0x253b   :  { %v3464_v44 = vadd.f32 -0.28449672, %v3463_v43 }
0x253d   :  { %v3465_v45 = vmul.f32 %v11199_v36, %v3464_v44 }
0x253f   :  { %v3466_v46 = vadd.f32 0.2548296, %v3465_v45 }
0x2541   :  { %v3467_v47 = vmul.f32 %v11199_v36, %v3466_v46 }
0x2543   :  { %v3472_v49 = vmul.f32 %v11201_v48, %v3467_v47 }
0x2545   :  { %v3473_v50 = vsub.f32 1.0, %v3472_v49 }
0x2547   :  { %v3475_v51 = vsub.f32 0.0, %v3473_v50 }
0x2549   :  { %v3476_v52 = vsel %vm3474_vm11, %v3473_v50, %v3475_v51 }
0x254a   :  { %v3477_v54 = vadd.f32 1.0, %v3476_v52 }
0x254c   :  { %v3478_v55 = vmul.f32 %v3477_v54, %v3453_v53  ;;  %v9770_v53 = vld [vmem:[%s11483_s21 + $0x40] sm:$0xff]  ;;  %v9771_v54 = vld [vmem:[%s11483_s21 + $0x48] sm:$0xff] }
0x254e   :  { %10483 = vmatmul.mubr.msk.f32.vlgmr.msra.gmra.mrb[34].mxu1 %vm946_vm8, %v3478_v55 }
0x254f   :  { %10510 = vmatprep.mubr.msk.f32.mxu1 %vm11444_vm3, %v11445_v4  ;;  %10975 = vmatpush3.bf16.msra.mxu1 %v10974_v21 }
0x2550   :  { %10513 = vmatprep.subr.mxu1 %v11445_v4 }
0x2621   :  { %v3561_v57 = vpop.f32.mrb[34].mxu1 }
0x2622   :  { %v3562_v58 = vadd.f32 %v9759_v56, %v3561_v57  ;;  %v10484_v59 = vpop.f32.mrb[35].mxu1 }
0x2624   :  { %v3565_v60 = vadd.f32 %v3562_v58, %v3368_v17 }
0x2626   :  { %v3566_v61 = vsel %vm238_vm5, %v3565_v60, 0.0 }
0x2627   :  { %3567 = vadd.xlane.f32.xlu1 %v3566_v61 }
0x26b4   :  { %v3568_v62 = vpop.xlane.xlu1 %3567 }
0x26b5   :  { %v3569_v63 = vmul.f32 0.0625, %v3568_v62  ;;  %v9781_v62 = vld [vmem:[%s11488_s25 + $0x4] ss:$0 sm:$0xff] }
0x26b7   :  { %v3570_v0 = vsub.f32 %v3565_v60, %v3569_v63 }
0x26b9   :  { %v3571_v1 = vmul.f32 %v3570_v0, %v3570_v0 }
0x26bb   :  { %v3572_v3 = vsel %vm238_vm5, %v3571_v1, 0.0 }
0x26bc   :  { %3573 = vadd.xlane.f32.xlu0 %v3572_v3 }
0x2749   :  { %v3574_v12 = vpop.xlane.xlu0 %3573 }
0x274a   :  { %v3575_v14 = vmul.f32 0.0625, %v3574_v12 }
0x274c   :  { %v3576_v7 = vadd.f32 1e-05, %v3575_v14 }
0x274e   :  { %11202 = vrsqrt.f32 %v3576_v7 }
0x2758   :  { %v11203_v9 = vpop.eup %11202 }
0x2759   :  { %v3578_v16 = vmul.f32 %v11203_v9, %v3570_v0  ;;  %v9784_v9 = vld [vmem:[%s11493_s29 + $0x40] sm:$0xff] }
0x275b   :  { %v3579_v17 = vmul.f32 %v11881_v13, %v3578_v16  ;;  %v9785_v16 = vld [vmem:[%s11493_s29 + $0x48] sm:$0xff] }
0x275d   :  { %v11996_v18 = vadd.f32 %v11884_v15, %v3579_v17  ;;  %v10977_v17 = vpack.c.bf16 %v9785_v16, %v9784_v9  ;;  %v9797_v9 = vld [vmem:[%s11478_s17 + $0x58] sm:$0xff] }
0x275f   :  { %10504 = vmatmul.mubr.msk.f32.vlgmr.msra.gmra.mrb[40].mxu0 %vm238_vm5, %v11996_v18 }
0x2760   :  { %10520 = vmatprep.mubr.msk.f32.mxu0 %vm11444_vm3, %v11445_v4 }
0x2832   :  { %v3805_v23 = vpop.f32.mrb[40].mxu0 }
0x2833   :  { %v12006_v24 = vadd.f32 %v9762_v22, %v3805_v23  ;;  %v10505_v13 = vpop.f32.mrb[41].mxu0  ;;  %v12057_v23 = vld [vmem:[%s11513_s19 + $0x2] ss:$0 sm:$0xff] }
0x2834   :  { %v12060_v13 = vld [vmem:[%s11518_s24 + $0x2] ss:$0 sm:$0xff] }
0x2835   :  { %10511 = vmatmul.mubr.msk.f32.vlgmr.msra.gmra.mrb[36].mxu1 %vm238_vm5, %v12006_v24 }
0x2836   :  { %10515 = vmatprep.mubr.msk.f32.mxu1 %vm11444_vm3, %v11445_v4 }
0x2908   :  { %v3886_v15 = vpop.f32.mrb[36].mxu1 }
0x2909   :  { %4059 = vrot.lane.b32.xlu0 %v3886_v15, %s11448_s9  ;;  %3894 = vrot.lane.b32.xlu1 %v3886_v15, %s11447_s5  ;;  %v10512_v25 = vpop.f32.mrb[37].mxu1 }
0x290d   :  { %4057 = vrot.lane.b32.xlu1 %v3886_v15, %s11446_s0 }
0x297b   :  { %v3895_v26 = vpop.permute.xlu1 %3894  ;;  %v4060_v27 = vpop.permute.xlu0 %4059 }
0x297c   :  { %10514 = vmatpush3.xpose.msk.msra.mxu1 %vm317_vm6, %v3895_v26  ;;  %v9789_v26 = vld [vmem:[%s11503_s8 + $0x80] sm:$0xff] }
0x297d   :  { %10523 = vmatprep.subr.mxu1 %v11445_v4 }
0x297f   :  { %10516 = vmatmul.mubr.msk.f32.vlgmr.msra.gmra.mrb[38].mxu1 %vm317_vm6, %v3886_v15  ;;  %v4058_v28 = vpop.permute.xlu1 %4057 }
0x2980   :  { %10524 = vmatpush3.xpose.msk.msra.mxu1 %vm317_vm6, %v4060_v27  ;;  %10525 = vmatprep.mubr.msk.f32.mxu1 %vm11444_vm3, %v11445_v4  ;;  %v9790_v27 = vld [vmem:[%s11503_s8 + $0x88] sm:$0xff] }
0x2981   :  { %10533 = vmatprep.subr.mxu1 %v11445_v4 }
0x2983   :  { %10526 = vmatmul.mubr.msk.f32.vlgmr.msra.gmra.mrb[40].mxu1 %vm317_vm6, %v4058_v28  ;;  %v10980_v28 = vpack.c.bf16 %v9790_v27, %v9789_v26 }
0x2984   :  { %10535 = vmatprep.mubr.msk.f32.mxu1 %vm11444_vm3, %v11445_v4  ;;  %10534 = vmatpush3.msra.mxu1 %v9771_v54 }
0x2985   :  { %10976 = vmatprep.subr.bf16.mxu1 %v11442_v2 }
0x2a52   :  { %v3966_v29 = vpop.f32.mrb[38].mxu1 }
0x2a53   :  { %v10517_v30 = vpop.f32.mrb[39].mxu1  ;;  %v3970_v31 = vsel %vm317_vm6, %v3966_v29, -inf }
0x2a54   :  { %3971 = vmax.xlane.f32.xlu1 %v3970_v31  ;;  %v9792_v30 = vld [vmem:[%s11503_s8 + $0x98] sm:$0xff] }
0x2a56   :  { %v4131_v32 = vpop.f32.mrb[40].mxu1 }
0x2a57   :  { %v10527_v33 = vpop.f32.mrb[41].mxu1  ;;  %v4135_v34 = vsel %vm317_vm6, %v4131_v32, -inf }
0x2a58   :  { %4136 = vmax.xlane.f32.xlu0 %v4135_v34 }
0x2ae1   :  { %v3972_v35 = vpop.xlane.xlu1 %3971 }
0x2ae2   :  { %v3973_v36 = vsub.f32 %v3966_v29, %v3972_v35  ;;  %v9791_v29 = vld [vmem:[%s11503_s8 + $0x90] sm:$0xff] }
0x2ae3   :  { %v10983_v31 = vpack.c.bf16 %v9792_v30, %v9791_v29 }
0x2ae4   :  { %v3974_v37 = vmul.f32 1.442695, %v3973_v36 }
0x2ae5   :  { %v4137_v38 = vpop.xlane.xlu0 %4136 }
0x2ae6   :  { %11204 = vpow2.f32 %v3974_v37  ;;  %v4138_v39 = vsub.f32 %v4131_v32, %v4137_v38  ;;  %v9787_v32 = vld [vmem:[%s11498_s3 + $0x4] ss:$0 sm:$0xff] }
0x2ae8   :  { %v4139_v40 = vmul.f32 1.442695, %v4138_v39 }
0x2aea   :  { %11206 = vpow2.f32 %v4139_v40 }
0x2af0   :  { %v11205_v41 = vpop.eup %11204 }
0x2af1   :  { %v3976_v42 = vsel %vm317_vm6, %v11205_v41, 0.0 }
0x2af2   :  { %3977 = vadd.xlane.f32.xlu0 %v3976_v42 }
0x2af4   :  { %v11207_v43 = vpop.eup %11206 }
0x2af5   :  { %v4141_v44 = vsel %vm317_vm6, %v11207_v43, 0.0 }
0x2af6   :  { %4142 = vadd.xlane.f32.xlu1 %v4141_v44 }
0x2b07   :  { %4146 = vrot.lane.b32.xlu1 %v3886_v15, %s11449_s13 }
0x2b08   :  { %3981 = vrot.lane.b32.xlu0 %v3886_v15, %s11450_s28 }
0x2b7f   :  { %v3978_v45 = vpop.xlane.xlu0 %3977 }
0x2b80   :  { %11208 = vrcp.f32 %v3978_v45 }
0x2b83   :  { %v4143_v46 = vpop.xlane.xlu1 %4142  ;;  %v3982_v47 = vpop.permute.xlu0 %3981 }
0x2b84   :  { %11210 = vrcp.f32 %v4143_v46  ;;  %10519 = vmatpush3.msra.mxu0 %v3982_v47 }
0x2b85   :  { %10528 = vmatprep.subr.mxu0 %v11445_v4 }
0x2b87   :  { %v4147_v50 = vpop.permute.xlu1 %4146 }
0x2b8a   :  { %v11209_v48 = vpop.eup %11208 }
0x2b8b   :  { %v3980_v49 = vmul.f32 %v11209_v48, %v11205_v41 }
0x2b8d   :  { %10521 = vmatmul.mubr.msk.f32.vlgmr.msra.gmra.mrb[42].mxu0 %vm317_vm6, %v3980_v49 }
0x2b8e   :  { %v11211_v51 = vpop.eup %11210  ;;  %10529 = vmatpush3.msra.mxu0 %v4147_v50  ;;  %10530 = vmatprep.mubr.msk.f32.mxu0 %vm11444_vm3, %v11445_v4 }
0x2b8f   :  { %v4145_v52 = vmul.f32 %v11211_v51, %v11207_v43  ;;  %10538 = vmatprep.subr.mxu0 %v11445_v4 }
0x2b91   :  { %10531 = vmatmul.mubr.msk.f32.vlgmr.msra.gmra.mrb[44].mxu0 %vm317_vm6, %v4145_v52 }
0x2b92   :  { %10540 = vmatprep.mubr.msk.f32.mxu0 %vm11444_vm3, %v11445_v4  ;;  %10539 = vmatpush3.msra.mxu0 %v9770_v53 }
0x2b93   :  { %10979 = vmatprep.subr.bf16.mxu0 %v11442_v2 }
0x2c60   :  { %v4053_v55 = vpop.f32.mrb[42].mxu0 }
0x2c61   :  { %v10522_v56 = vpop.f32.mrb[43].mxu0  ;;  %10541 = vmatmul.mubr.msk.f32.vlgmr.msra.gmra.mrb[46].mxu0 %vm317_vm6, %v4053_v55 }
0x2c62   :  { %10558 = vmatprep.mubr.msk.f32.mxu0 %vm11444_vm3, %v11445_v4  ;;  %10981 = vmatpush3.bf16.msra.mxu0 %v10980_v28 }
0x2c63   :  { %10982 = vmatprep.subr.bf16.mxu0 %v11442_v2 }
0x2c64   :  { %v4218_v57 = vpop.f32.mrb[44].mxu0 }
0x2c65   :  { %v10532_v58 = vpop.f32.mrb[45].mxu0  ;;  %10536 = vmatmul.mubr.msk.f32.vlgmr.msra.gmra.mrb[42].mxu1 %vm317_vm6, %v4218_v57 }
0x2c66   :  { %10547 = vmatprep.mubr.msk.f32.mxu1 %vm11444_vm3, %v11445_v4  ;;  %10978 = vmatpush3.bf16.msra.mxu1 %v10977_v17 }
0x2c67   :  { %10985 = vmatprep.subr.bf16.mxu1 %v11442_v2  ;;  %10984 = vmatpush3.bf16.msra.mxu0 %v10983_v31 }
0x2c68   :  { %10573 = vmatprep.subr.mxu0 %v11445_v4 }
0x2d34   :  { %v4364_v59 = vpop.f32.mrb[46].mxu0 }
0x2d35   :  { %v10542_v60 = vpop.f32.mrb[47].mxu0 }
0x2d38   :  { %v4291_v61 = vpop.f32.mrb[42].mxu1 }
0x2d39   :  { %v4365_v63 = vadd.f32 %v4364_v59, %v4291_v61  ;;  %v10537_v0 = vpop.f32.mrb[43].mxu1  ;;  %v9794_v61 = vld [vmem:[%s11508_s14 + $0x4] ss:$0 sm:$0xff] }
0x2d3b   :  { %v4376_v1 = vadd.f32 %v9781_v62, %v4365_v63 }
0x2d3d   :  { %v4377_v3 = vadd.f32 %v12006_v24, %v4376_v1 }
0x2d3f   :  { %v4378_v5 = vsel %vm238_vm5, %v4377_v3, 0.0 }
0x2d40   :  { %4379 = vadd.xlane.f32.xlu1 %v4378_v5 }
0x2dcd   :  { %v4380_v8 = vpop.xlane.xlu1 %4379 }
0x2dce   :  { %v4381_v10 = vmul.f32 0.0625, %v4380_v8 }
0x2dd0   :  { %v4382_v12 = vsub.f32 %v4377_v3, %v4381_v10 }
0x2dd2   :  { %v4383_v14 = vmul.f32 %v4382_v12, %v4382_v12 }
0x2dd4   :  { %v4384_v7 = vsel %vm238_vm5, %v4383_v14, 0.0 }
0x2dd5   :  { %4385 = vadd.xlane.f32.xlu0 %v4384_v7  ;;  %v9796_v7 = vld [vmem:[%s11478_s17 + $0x50] sm:$0xff] }
0x2dd6   :  { %v10986_v16 = vpack.c.bf16 %v9797_v9, %v9796_v7 }
0x2e62   :  { %v4386_v19 = vpop.xlane.xlu0 %4385 }
0x2e63   :  { %v4387_v20 = vmul.f32 0.0625, %v4386_v19 }
0x2e65   :  { %v4388_v21 = vadd.f32 1e-05, %v4387_v20 }
0x2e67   :  { %11212 = vrsqrt.f32 %v4388_v21 }
0x2e71   :  { %v11213_v22 = vpop.eup %11212 }
0x2e72   :  { %v4390_v24 = vmul.f32 %v11213_v22, %v4382_v12 }
0x2e74   :  { %v4397_v15 = vmul.f32 %v12057_v23, %v4390_v24 }
0x2e76   :  { %v4404_v25 = vadd.f32 %v12060_v13, %v4397_v15 }
0x2e78   :  { %10548 = vmatmul.mubr.msk.f32.vlgmr.msra.gmra.mrb[44].mxu1 %vm238_vm5, %v4404_v25 }
0x2e79   :  { %10565 = vmatprep.mubr.msk.f32.mxu1 %vm11444_vm3, %v11445_v4  ;;  %10987 = vmatpush3.bf16.msra.mxu1 %v10986_v16  ;;  %v9811_v16 = vld [vmem:[%s11493_s29 + $0x50] sm:$0xff] }
0x2e7a   :  { %10568 = vmatprep.subr.mxu1 %v11445_v4 }
0x2f4b   :  { %v4485_v33 = vpop.f32.mrb[44].mxu1 }
0x2f4c   :  { %v4486_v34 = vadd.f32 %v9787_v32, %v4485_v33  ;;  %v10549_v35 = vpop.f32.mrb[45].mxu1 }
0x2f4e   :  { %v4490_v36 = vmul.f32 0.70710677, %v4486_v34  ;;  %v4489_v58 = vmul.f32 0.5, %v4486_v34 }
0x2f50   :  { %v4491_v37 = vand.u32 2147483647, %v4490_v36  ;;  %vm4510_vm12 = vcmp.ge.f32.partialorder %v4490_v36, 0.0 }
0x2f52   :  { %v4492_v38 = vmul.f32 0.3275911, %v4491_v37  ;;  %v4504_v40 = vsub.f32 0.0, %v4491_v37 }
0x2f54   :  { %v4493_v39 = vadd.f32 1.0, %v4492_v38  ;;  %v4505_v42 = vmul.f32 %v4504_v40, %v4491_v37 }
0x2f56   :  { %11214 = vrcp.f32 %v4493_v39  ;;  %v4506_v45 = vmul.f32 1.442695, %v4505_v42 }
0x2f58   :  { %11216 = vpow2.f32 %v4506_v45 }
0x2f60   :  { %v11215_v41 = vpop.eup %11214 }
0x2f61   :  { %v4495_v43 = vmul.f32 1.0614054, %v11215_v41 }
0x2f62   :  { %v11217_v53 = vpop.eup %11216 }
0x2f63   :  { %v4496_v44 = vadd.f32 -1.4531521, %v4495_v43 }
0x2f65   :  { %v4497_v46 = vmul.f32 %v11215_v41, %v4496_v44 }
0x2f67   :  { %v4498_v47 = vadd.f32 1.4214138, %v4497_v46 }
0x2f69   :  { %v4499_v48 = vmul.f32 %v11215_v41, %v4498_v47 }
0x2f6b   :  { %v4500_v49 = vadd.f32 -0.28449672, %v4499_v48 }
0x2f6d   :  { %v4501_v50 = vmul.f32 %v11215_v41, %v4500_v49 }
0x2f6f   :  { %v4502_v51 = vadd.f32 0.2548296, %v4501_v50 }
0x2f71   :  { %v4503_v52 = vmul.f32 %v11215_v41, %v4502_v51 }
0x2f73   :  { %v4508_v54 = vmul.f32 %v11217_v53, %v4503_v52 }
0x2f75   :  { %v4509_v55 = vsub.f32 1.0, %v4508_v54  ;;  %v9799_v54 = vld [vmem:[%s11483_s21 + $0x50] sm:$0xff] }
0x2f77   :  { %v4511_v56 = vsub.f32 0.0, %v4509_v55 }
0x2f79   :  { %v4512_v57 = vsel %vm4510_vm12, %v4509_v55, %v4511_v56  ;;  %v9800_v55 = vld [vmem:[%s11483_s21 + $0x58] sm:$0xff] }
0x2f7a   :  { %v4513_v59 = vadd.f32 1.0, %v4512_v57 }
0x2f7c   :  { %v4514_v60 = vmul.f32 %v4513_v59, %v4489_v58 }
0x2f7e   :  { %10559 = vmatmul.mubr.msk.f32.vlgmr.msra.gmra.mrb[48].mxu0 %vm946_vm8, %v4514_v60 }
0x2f7f   :  { %10575 = vmatprep.mubr.msk.f32.mxu0 %vm11444_vm3, %v11445_v4 }
0x3051   :  { %v4597_v62 = vpop.f32.mrb[48].mxu0 }
0x3052   :  { %v4598_v63 = vadd.f32 %v9794_v61, %v4597_v62  ;;  %v10560_v0 = vpop.f32.mrb[49].mxu0 }
0x3054   :  { %v4601_v1 = vadd.f32 %v4598_v63, %v4404_v25  ;;  %v9810_v63 = vld [vmem:[%s11488_s25 + $0x5] ss:$0 sm:$0xff] }
0x3056   :  { %v4602_v3 = vsel %vm238_vm5, %v4601_v1, 0.0 }
0x3057   :  { %4603 = vadd.xlane.f32.xlu0 %v4602_v3 }
0x30e4   :  { %v4604_v5 = vpop.xlane.xlu0 %4603 }
0x30e5   :  { %v4605_v8 = vmul.f32 0.0625, %v4604_v5 }
0x30e7   :  { %v4606_v10 = vsub.f32 %v4601_v1, %v4605_v8 }
0x30e9   :  { %v4607_v12 = vmul.f32 %v4606_v10, %v4606_v10 }
0x30eb   :  { %v4608_v14 = vsel %vm238_vm5, %v4607_v12, 0.0 }
0x30ec   :  { %4609 = vadd.xlane.f32.xlu1 %v4608_v14 }
0x3179   :  { %v4610_v17 = vpop.xlane.xlu1 %4609 }
0x317a   :  { %v4611_v19 = vmul.f32 0.0625, %v4610_v17  ;;  %v9812_v17 = vld [vmem:[%s11493_s29 + $0x58] sm:$0xff] }
0x317c   :  { %v4612_v20 = vadd.f32 1e-05, %v4611_v19  ;;  %v10989_v19 = vpack.c.bf16 %v9812_v17, %v9811_v16 }
0x317e   :  { %11218 = vrsqrt.f32 %v4612_v20 }
0x3188   :  { %v11219_v21 = vpop.eup %11218 }
0x3189   :  { %v4614_v22 = vmul.f32 %v11219_v21, %v4606_v10 }
0x318b   :  { %v4615_v24 = vmul.f32 %v12057_v23, %v4614_v22 }
0x318d   :  { %v12085_v15 = vadd.f32 %v12060_v13, %v4615_v24 }
0x318f   :  { %10566 = vmatmul.mubr.msk.f32.vlgmr.msra.gmra.mrb[46].mxu1 %vm238_vm5, %v12085_v15 }
0x3190   :  { %10570 = vmatprep.mubr.msk.f32.mxu1 %vm11444_vm3, %v11445_v4 }
0x3262   :  { %v4689_v25 = vpop.f32.mrb[46].mxu1 }
0x3263   :  { %4862 = vrot.lane.b32.xlu1 %v4689_v25, %s11448_s9  ;;  %4697 = vrot.lane.b32.xlu0 %v4689_v25, %s11447_s5  ;;  %v10567_v26 = vpop.f32.mrb[47].mxu1 }
0x3264   :  { %v5411_v26 = vld [vmem:[%s12621_s1 + $0x8] sm:$0xff] }
0x3267   :  { %4860 = vrot.lane.b32.xlu1 %v4689_v25, %s11446_s0 }
0x32d5   :  { %v4698_v27 = vpop.permute.xlu0 %4697  ;;  %v4863_v28 = vpop.permute.xlu1 %4862 }
0x32d6   :  { %10569 = vmatpush3.xpose.msk.msra.mxu1 %vm317_vm6, %v4698_v27 }
0x32d7   :  { %10578 = vmatprep.subr.mxu1 %v11445_v4 }
0x32d9   :  { %10571 = vmatmul.mubr.msk.f32.vlgmr.msra.gmra.mrb[48].mxu1 %vm317_vm6, %v4689_v25  ;;  %v4861_v29 = vpop.permute.xlu1 %4860 }
0x32da   :  { %10579 = vmatpush3.xpose.msk.msra.mxu1 %vm317_vm6, %v4863_v28  ;;  %10580 = vmatprep.mubr.msk.f32.mxu1 %vm11444_vm3, %v11445_v4 }
0x32db   :  { %10588 = vmatprep.subr.mxu1 %v11445_v4 }
0x32dd   :  { %10581 = vmatmul.mubr.msk.f32.vlgmr.msra.gmra.mrb[50].mxu1 %vm317_vm6, %v4861_v29 }
0x32de   :  { %10590 = vmatprep.mubr.msk.f32.mxu1 %vm11444_vm3, %v11445_v4  ;;  %10589 = vmatpush3.msra.mxu1 %v9800_v55 }
0x32df   :  { %10988 = vmatprep.subr.bf16.mxu1 %v11442_v2 }
0x33ac   :  { %v4769_v30 = vpop.f32.mrb[48].mxu1 }
0x33ad   :  { %v10572_v31 = vpop.f32.mrb[49].mxu1  ;;  %v4773_v32 = vsel %vm317_vm6, %v4769_v30, -inf }
0x33ae   :  { %4774 = vmax.xlane.f32.xlu0 %v4773_v32  ;;  %v5413_v31 = vld [vmem:[%s12621_s1 + $0x18] sm:$0xff] }
0x33b0   :  { %v4934_v33 = vpop.f32.mrb[50].mxu1 }
0x33b1   :  { %v10582_v34 = vpop.f32.mrb[51].mxu1  ;;  %v4938_v35 = vsel %vm317_vm6, %v4934_v33, -inf }
0x33b2   :  { %4939 = vmax.xlane.f32.xlu1 %v4938_v35  ;;  %v9818_v34 = vld [vmem:[%s11503_s8 + $0xb0] sm:$0xff]  ;;  %v9819_v35 = vld [vmem:[%s11503_s8 + $0xb8] sm:$0xff] }
0x33c3   :  { %4784 = vrot.lane.b32.xlu1 %v4689_v25, %s11450_s28 }
0x343b   :  { %v4775_v36 = vpop.xlane.xlu0 %4774 }
0x343c   :  { %v4776_v37 = vsub.f32 %v4769_v30, %v4775_v36  ;;  %v5412_v30 = vld [vmem:[%s12621_s1 + $0x10] sm:$0xff]  ;;  %v10995_v36 = vpack.c.bf16 %v9819_v35, %v9818_v34 }
0x343d   :  { %v11001_v32 = vpack.c.bf16 %v5413_v31, %v5412_v30 }
0x343e   :  { %v4777_v38 = vmul.f32 1.442695, %v4776_v37  ;;  %v9814_v37 = vld [vmem:[%s11498_s3 + $0x5] ss:$0 sm:$0xff] }
0x343f   :  { %v4940_v39 = vpop.xlane.xlu1 %4939 }
0x3440   :  { %11220 = vpow2.f32 %v4777_v38  ;;  %v4941_v40 = vsub.f32 %v4934_v33, %v4940_v39 }
0x3442   :  { %v4942_v41 = vmul.f32 1.442695, %v4941_v40 }
0x3443   :  { %v4785_v42 = vpop.permute.xlu1 %4784 }
0x3444   :  { %11222 = vpow2.f32 %v4942_v41  ;;  %10574 = vmatpush3.msra.mxu0 %v4785_v42 }
0x3445   :  { %10583 = vmatprep.subr.mxu0 %v11445_v4 }
0x344a   :  { %v11221_v43 = vpop.eup %11220 }
0x344b   :  { %v4779_v44 = vsel %vm317_vm6, %v11221_v43, 0.0 }
0x344c   :  { %4780 = vadd.xlane.f32.xlu0 %v4779_v44 }
0x344e   :  { %v11223_v45 = vpop.eup %11222 }
0x344f   :  { %v4944_v46 = vsel %vm317_vm6, %v11223_v45, 0.0 }
0x3450   :  { %4945 = vadd.xlane.f32.xlu0 %v4944_v46 }
0x3466   :  { %4949 = vrot.lane.b32.xlu0 %v4689_v25, %s11449_s13  ;;  %v5410_v25 = vld [vmem:[%s12621_s1] sm:$0xff] }
0x3467   :  { %v10998_v28 = vpack.c.bf16 %v5411_v26, %v5410_v25 }
0x34d9   :  { %v4781_v47 = vpop.xlane.xlu0 %4780 }
0x34da   :  { %11224 = vrcp.f32 %v4781_v47 }
0x34dd   :  { %v4946_v48 = vpop.xlane.xlu0 %4945 }
0x34de   :  { %11226 = vrcp.f32 %v4946_v48 }
0x34e1   :  { %v4950_v51 = vpop.permute.xlu0 %4949 }
0x34e4   :  { %v11225_v49 = vpop.eup %11224 }
0x34e5   :  { %v12111_v50 = vmul.f32 %v11225_v49, %v11221_v43 }
0x34e7   :  { %10576 = vmatmul.mubr.msk.f32.vlgmr.msra.gmra.mrb[50].mxu0 %vm317_vm6, %v12111_v50 }
0x34e8   :  { %v11227_v52 = vpop.eup %11226  ;;  %10584 = vmatpush3.msra.mxu0 %v4950_v51  ;;  %10585 = vmatprep.mubr.msk.f32.mxu0 %vm11444_vm3, %v11445_v4 }
0x34e9   :  { %v12117_v53 = vmul.f32 %v11227_v52, %v11223_v45  ;;  %10593 = vmatprep.subr.mxu0 %v11445_v4 }
0x34eb   :  { %10586 = vmatmul.mubr.msk.f32.vlgmr.msra.gmra.mrb[52].mxu0 %vm317_vm6, %v12117_v53 }
0x34ec   :  { %10595 = vmatprep.mubr.msk.f32.mxu0 %vm11444_vm3, %v11445_v4  ;;  %10594 = vmatpush3.msra.mxu0 %v9799_v54 }
0x34ed   :  { %10991 = vmatprep.subr.bf16.mxu0 %v11442_v2 }
0x35ba   :  { %v4856_v56 = vpop.f32.mrb[50].mxu0 }
0x35bb   :  { %v10577_v57 = vpop.f32.mrb[51].mxu0  ;;  %10596 = vmatmul.mubr.msk.f32.vlgmr.msra.gmra.mrb[54].mxu0 %vm317_vm6, %v4856_v56 }
0x35bc   :  { %10613 = vmatprep.mubr.msk.f32.mxu0 %vm11444_vm3, %v11445_v4 }
0x35be   :  { %v5021_v58 = vpop.f32.mrb[52].mxu0 }
0x35bf   :  { %v10587_v59 = vpop.f32.mrb[53].mxu0  ;;  %10591 = vmatmul.mubr.msk.f32.vlgmr.msra.gmra.mrb[52].mxu1 %vm317_vm6, %v5021_v58 }
0x35c0   :  { %10602 = vmatprep.mubr.msk.f32.mxu1 %vm11444_vm3, %v11445_v4  ;;  %10990 = vmatpush3.bf16.msra.mxu1 %v10989_v19 }
0x35c1   :  { %10997 = vmatprep.subr.bf16.mxu1 %v11442_v2 }
0x368e   :  { %v5167_v60 = vpop.f32.mrb[54].mxu0 }
0x368f   :  { %v10597_v61 = vpop.f32.mrb[55].mxu0 }
0x3692   :  { %v5094_v62 = vpop.f32.mrb[52].mxu1 }
0x3693   :  { %v5168_v0 = vadd.f32 %v5167_v60, %v5094_v62  ;;  %v10592_v1 = vpop.f32.mrb[53].mxu1 }
0x3695   :  { %v5179_v3 = vadd.f32 %v9810_v63, %v5168_v0 }
0x3697   :  { %v5180_v5 = vadd.f32 %v5179_v3, %v12085_v15  ;;  %v9828_v3 = vld [vmem:[%s11478_s17 + $0x60] sm:$0xff] }
0x3699   :  { %v5181_v8 = vsel %vm238_vm5, %v5180_v5, 0.0 }
0x369a   :  { %5182 = vadd.xlane.f32.xlu1 %v5181_v8 }
0x3727   :  { %v5183_v10 = vpop.xlane.xlu1 %5182 }
0x3728   :  { %v5184_v12 = vmul.f32 0.0625, %v5183_v10 }
0x372a   :  { %v5185_v14 = vsub.f32 %v5180_v5, %v5184_v12  ;;  %v9829_v5 = vld [vmem:[%s11478_s17 + $0x68] sm:$0xff] }
0x372c   :  { %v5186_v7 = vmul.f32 %v5185_v14, %v5185_v14 }
0x372e   :  { %v5187_v9 = vsel %vm238_vm5, %v5186_v7, 0.0 }
0x372f   :  { %5188 = vadd.xlane.f32.xlu0 %v5187_v9  ;;  %v9824_v9 = vld [vmem:[%s12622_s2] ss:$0 sm:$0xff] }
0x37bc   :  { %v5189_v20 = vpop.xlane.xlu0 %5188 }
0x37bd   :  { %v5190_v21 = vmul.f32 0.0625, %v5189_v20 }
0x37bf   :  { %v5191_v22 = vadd.f32 1e-05, %v5190_v21 }
0x37c1   :  { %11228 = vrsqrt.f32 %v5191_v22 }
0x37cb   :  { %v11229_v24 = vpop.eup %11228 }
0x37cc   :  { %v5193_v15 = vmul.f32 %v11229_v24, %v5185_v14  ;;  %v11004_v14 = vpack.c.bf16 %v9829_v5, %v9828_v3 }
0x37ce   :  { %v5194_v27 = vmul.f32 %v12057_v23, %v5193_v15  ;;  %v9816_v23 = vld [vmem:[%s11503_s8 + $0xa0] sm:$0xff] }
0x37d0   :  { %v12145_v29 = vadd.f32 %v12060_v13, %v5194_v27  ;;  %v9817_v13 = vld [vmem:[%s11503_s8 + $0xa8] sm:$0xff] }
0x37d1   :  { %v10992_v33 = vpack.c.bf16 %v9817_v13, %v9816_v23 }
0x37d2   :  { %10603 = vmatmul.mubr.msk.f32.vlgmr.msra.gmra.mrb[54].mxu1 %vm238_vm5, %v12145_v29 }
0x37d3   :  { %10999 = vmatpush3.bf16.msra.mxu1 %v10998_v28  ;;  %10620 = vmatprep.mubr.msk.f32.mxu1 %vm11444_vm3, %v11445_v4 }
0x37d4   :  { %11000 = vmatprep.subr.bf16.mxu1 %v11442_v2  ;;  %10993 = vmatpush3.bf16.msra.mxu0 %v10992_v33 }
0x37d5   :  { %10994 = vmatprep.subr.bf16.mxu0 %v11442_v2 }
0x37d6   :  { %10621 = vmatmul.mubr.msk.f32.vlgmr.msra.gmra.mrb[56].mxu1 %vm238_vm5, %v11661_v11 }
0x37d7   :  { %11002 = vmatpush3.bf16.msra.mxu1 %v11001_v32  ;;  %10627 = vmatprep.mubr.msk.f32.mxu1 %vm11444_vm3, %v11445_v4 }
0x37d8   :  { %10637 = vmatprep.subr.mxu1 %v11445_v4  ;;  %10996 = vmatpush3.bf16.msra.mxu0 %v10995_v36 }
0x37d9   :  { %11003 = vmatprep.subr.bf16.mxu0 %v11442_v2 }
0x37de   :  { %10628 = vmatmul.mubr.msk.f32.vlgmr.msra.gmra.mrb[56].mxu1 %vm238_vm5, %v11820_v6 }
0x37df   :  { %10639 = vmatprep.mubr.msk.f32.mxu1 %vm11444_vm3, %v11445_v4 }
0x38a5   :  { %v5276_v38 = vpop.f32.mrb[54].mxu1 }
0x38a6   :  { %v5277_v39 = vadd.f32 %v9814_v37, %v5276_v38  ;;  %v10604_v40 = vpop.f32.mrb[55].mxu1 }
0x38a8   :  { %v5281_v41 = vmul.f32 0.70710677, %v5277_v39  ;;  %v5280_v10 = vmul.f32 0.5, %v5277_v39 }
0x38aa   :  { %v5282_v42 = vand.u32 2147483647, %v5281_v41  ;;  %vm5301_vm13 = vcmp.ge.f32.partialorder %v5281_v41, 0.0 }
0x38ac   :  { %v5283_v43 = vmul.f32 0.3275911, %v5282_v42  ;;  %v5295_v47 = vsub.f32 0.0, %v5282_v42 }
0x38ae   :  { %v5284_v44 = vadd.f32 1.0, %v5283_v43  ;;  %v5296_v49 = vmul.f32 %v5295_v47, %v5282_v42 }
0x38b0   :  { %11230 = vrcp.f32 %v5284_v44  ;;  %v5297_v54 = vmul.f32 1.442695, %v5296_v49 }
0x38b1   :  { %v5558_v45 = vpop.f32.mrb[56].mxu1 }
0x38b2   :  { %v10629_v46 = vpop.f32.mrb[57].mxu1  ;;  %11232 = vpow2.f32 %v5297_v54  ;;  %v12176_v16 = vadd.f32 %v9824_v9, %v5558_v45  ;;  %v12206_v45 = vmul.f32 0.5, %v12111_v50 }
0x38ba   :  { %v11231_v48 = vpop.eup %11230 }
0x38bb   :  { %v5286_v51 = vmul.f32 1.0614054, %v11231_v48 }
0x38bc   :  { %v11233_v62 = vpop.eup %11232 }
0x38bd   :  { %v5287_v52 = vadd.f32 -1.4531521, %v5286_v51  ;;  %v12210_v51 = vmul.f32 0.5, %v12117_v53  ;;  %v9832_v53 = vld [vmem:[%s11483_s21 + $0x68] sm:$0xff] }
0x38bf   :  { %v5288_v55 = vmul.f32 %v11231_v48, %v5287_v52 }
0x38c1   :  { %v5289_v56 = vadd.f32 1.4214138, %v5288_v55  ;;  %v9831_v55 = vld [vmem:[%s11483_s21 + $0x60] sm:$0xff] }
0x38c3   :  { %v5290_v57 = vmul.f32 %v11231_v48, %v5289_v56 }
0x38c5   :  { %v5291_v58 = vadd.f32 -0.28449672, %v5290_v57 }
0x38c7   :  { %v5292_v59 = vmul.f32 %v11231_v48, %v5291_v58 }
0x38c9   :  { %v5293_v60 = vadd.f32 0.2548296, %v5292_v59 }
0x38cb   :  { %v5294_v61 = vmul.f32 %v11231_v48, %v5293_v60 }
0x38cd   :  { %v5299_v63 = vmul.f32 %v11233_v62, %v5294_v61 }
0x38cf   :  { %v5300_v0 = vsub.f32 1.0, %v5299_v63  ;;  %v9842_v63 = vld [vmem:[%s11488_s25 + $0x6] ss:$0 sm:$0xff] }
0x38d1   :  { %v5302_v1 = vsub.f32 0.0, %v5300_v0 }
0x38d3   :  { %v5303_v8 = vsel %vm5301_vm13, %v5300_v0, %v5302_v1 }
0x38d4   :  { %v5304_v12 = vadd.f32 1.0, %v5303_v8 }
0x38d6   :  { %v5305_v7 = vmul.f32 %v5304_v12, %v5280_v10 }
0x38d8   :  { %10614 = vmatmul.mubr.msk.f32.vlgmr.msra.gmra.mrb[56].mxu0 %vm946_vm8, %v5305_v7 }
0x38d9   :  { %11005 = vmatpush3.bf16.msra.mxu0 %v11004_v14  ;;  %10634 = vmatprep.mubr.msk.f32.mxu0 %vm11444_vm3, %v11445_v4 }
0x38da   :  { %10642 = vmatprep.subr.mxu0 %v11445_v4 }
0x38dc   :  { %10635 = vmatmul.mubr.msk.f32.vlgmr.msra.gmra.mrb[58].mxu0 %vm238_vm5, %v12176_v16 }
0x38dd   :  { %10644 = vmatprep.mubr.msk.f32.mxu0 %vm11444_vm3, %v11445_v4 }
0x39ab   :  { %v12183_v17 = vpop.f32.mrb[56].mxu0 }
0x39ac   :  { %v10615_v19 = vpop.f32.mrb[57].mxu0 }
0x39ad   :  { %v9845_v19 = vld [vmem:[%s11493_s29 + $0x60] sm:$0xff] }
0x39af   :  { %v5639_v20 = vpop.f32.mrb[58].mxu0 }
0x39b0   :  { %5814 = vrot.lane.b32.xlu0 %v5639_v20, %s11448_s9  ;;  %5647 = vrot.lane.b32.xlu1 %v5639_v20, %s11447_s5  ;;  %v10636_v21 = vpop.f32.mrb[59].mxu0 }
0x39b4   :  { %5812 = vrot.lane.b32.xlu1 %v5639_v20, %s11446_s0 }
0x3a22   :  { %v5648_v22 = vpop.permute.xlu1 %5647  ;;  %v5815_v24 = vpop.permute.xlu0 %5814 }
0x3a23   :  { %10638 = vmatpush3.xpose.msk.msra.mxu1 %vm317_vm6, %v5648_v22 }
0x3a24   :  { %10647 = vmatprep.subr.mxu1 %v11445_v4 }
0x3a26   :  { %10640 = vmatmul.mubr.msk.f32.vlgmr.msra.gmra.mrb[58].mxu1 %vm317_vm6, %v5639_v20  ;;  %v5813_v15 = vpop.permute.xlu1 %5812 }
0x3a27   :  { %10648 = vmatpush3.xpose.msk.msra.mxu1 %vm317_vm6, %v5815_v24  ;;  %10649 = vmatprep.mubr.msk.f32.mxu1 %vm11444_vm3, %v11445_v4 }
0x3a28   :  { %10657 = vmatprep.subr.mxu1 %v11445_v4 }
0x3a2a   :  { %10650 = vmatmul.mubr.msk.f32.vlgmr.msra.gmra.mrb[60].mxu1 %vm317_vm6, %v5813_v15 }
0x3a2b   :  { %10659 = vmatprep.mubr.msk.f32.mxu1 %vm11444_vm3, %v11445_v4  ;;  %10658 = vmatpush3.msra.mxu1 %v9832_v53 }
0x3a2c   :  { %11006 = vmatprep.subr.bf16.mxu1 %v11442_v2 }
0x3af9   :  { %v5719_v25 = vpop.f32.mrb[58].mxu1 }
0x3afa   :  { %v10641_v26 = vpop.f32.mrb[59].mxu1  ;;  %v5723_v27 = vsel %vm317_vm6, %v5719_v25, -inf }
0x3afb   :  { %5724 = vmax.xlane.f32.xlu1 %v5723_v27  ;;  %v12241_v27 = vld [vmem:[%s11518_s24 + $0x3] ss:$0 sm:$0xff] }
0x3afd   :  { %v5886_v28 = vpop.f32.mrb[60].mxu1 }
0x3afe   :  { %v10651_v30 = vpop.f32.mrb[61].mxu1  ;;  %v5890_v31 = vsel %vm317_vm6, %v5886_v28, -inf }
0x3aff   :  { %5891 = vmax.xlane.f32.xlu0 %v5890_v31  ;;  %v9850_v31 = vld [vmem:[%s11503_s8 + $0xc0] sm:$0xff] }
0x3b88   :  { %v5725_v32 = vpop.xlane.xlu1 %5724 }
0x3b89   :  { %v5726_v23 = vsub.f32 %v5719_v25, %v5725_v32  ;;  %v12238_v25 = vld [vmem:[%s11513_s19 + $0x3] ss:$0 sm:$0xff]  ;;  %v9851_v32 = vld [vmem:[%s11503_s8 + $0xc8] sm:$0xff] }
0x3b8b   :  { %v5727_v13 = vmul.f32 1.442695, %v5726_v23  ;;  %v11010_v23 = vpack.c.bf16 %v9851_v32, %v9850_v31 }
0x3b8c   :  { %v5892_v33 = vpop.xlane.xlu0 %5891 }
0x3b8d   :  { %11234 = vpow2.f32 %v5727_v13  ;;  %v5893_v34 = vsub.f32 %v5886_v28, %v5892_v33  ;;  %v9852_v13 = vld [vmem:[%s11503_s8 + $0xd0] sm:$0xff]  ;;  %v9853_v33 = vld [vmem:[%s11503_s8 + $0xd8] sm:$0xff] }
0x3b8f   :  { %v5894_v35 = vmul.f32 1.442695, %v5893_v34  ;;  %v11013_v34 = vpack.c.bf16 %v9853_v33, %v9852_v13 }
0x3b91   :  { %11236 = vpow2.f32 %v5894_v35  ;;  %v9848_v35 = vld [vmem:[%s11498_s3 + $0x6] ss:$0 sm:$0xff] }
0x3b97   :  { %v11235_v36 = vpop.eup %11234 }
0x3b98   :  { %v5729_v37 = vsel %vm317_vm6, %v11235_v36, 0.0 }
0x3b99   :  { %5730 = vadd.xlane.f32.xlu0 %v5729_v37 }
0x3b9b   :  { %v11237_v38 = vpop.eup %11236 }
0x3b9c   :  { %v5896_v39 = vsel %vm317_vm6, %v11237_v38, 0.0 }
0x3b9d   :  { %5897 = vadd.xlane.f32.xlu1 %v5896_v39 }
0x3bae   :  { %5903 = vrot.lane.b32.xlu1 %v5639_v20, %s11449_s13 }
0x3baf   :  { %5736 = vrot.lane.b32.xlu0 %v5639_v20, %s11450_s28  ;;  %v9846_v20 = vld [vmem:[%s11493_s29 + $0x68] sm:$0xff] }
0x3bb0   :  { %v11007_v21 = vpack.c.bf16 %v9846_v20, %v9845_v19 }
0x3c26   :  { %v5731_v40 = vpop.xlane.xlu0 %5730 }
0x3c27   :  { %11238 = vrcp.f32 %v5731_v40 }
0x3c2a   :  { %v5737_v41 = vpop.permute.xlu0 %5736  ;;  %v5898_v42 = vpop.xlane.xlu1 %5897 }
0x3c2b   :  { %11240 = vrcp.f32 %v5898_v42  ;;  %10643 = vmatpush3.msra.mxu0 %v5737_v41 }
0x3c2c   :  { %10652 = vmatprep.subr.mxu0 %v11445_v4 }
0x3c2e   :  { %v5904_v54 = vpop.permute.xlu1 %5903 }
0x3c31   :  { %v11239_v43 = vpop.eup %11238 }
0x3c32   :  { %v5733_v44 = vmul.f32 %v11239_v43, %v11235_v36 }
0x3c34   :  { %v5734_v46 = vmul.f32 0.5, %v5733_v44 }
0x3c35   :  { %v11241_v47 = vpop.eup %11240 }
0x3c36   :  { %v5900_v48 = vmul.f32 %v11241_v47, %v11237_v38  ;;  %v5735_v49 = vadd.f32 %v5734_v46, %v12206_v45 }
0x3c38   :  { %v5901_v52 = vmul.f32 0.5, %v5900_v48  ;;  %10645 = vmatmul.mubr.msk.f32.vlgmr.msra.gmra.mrb[60].mxu0 %vm317_vm6, %v5735_v49 }
0x3c39   :  { %10653 = vmatpush3.msra.mxu0 %v5904_v54  ;;  %10654 = vmatprep.mubr.msk.f32.mxu0 %vm11444_vm3, %v11445_v4 }
0x3c3a   :  { %v5902_v50 = vadd.f32 %v5901_v52, %v12210_v51  ;;  %10662 = vmatprep.subr.mxu0 %v11445_v4 }
0x3c3c   :  { %10655 = vmatmul.mubr.msk.f32.vlgmr.msra.gmra.mrb[62].mxu0 %vm317_vm6, %v5902_v50 }
0x3c3d   :  { %10664 = vmatprep.mubr.msk.f32.mxu0 %vm11444_vm3, %v11445_v4  ;;  %10663 = vmatpush3.msra.mxu0 %v9831_v55 }
0x3c3e   :  { %11009 = vmatprep.subr.bf16.mxu0 %v11442_v2 }
0x3d0b   :  { %v5808_v56 = vpop.f32.mrb[60].mxu0 }
0x3d0c   :  { %v10646_v57 = vpop.f32.mrb[61].mxu0  ;;  %10665 = vmatmul.mubr.msk.f32.vlgmr.msra.gmra.mrb[64].mxu0 %vm317_vm6, %v5808_v56 }
0x3d0d   :  { %10682 = vmatprep.mubr.msk.f32.mxu0 %vm11444_vm3, %v11445_v4  ;;  %11011 = vmatpush3.bf16.msra.mxu0 %v11010_v23 }
0x3d0e   :  { %11012 = vmatprep.subr.bf16.mxu0 %v11442_v2 }
0x3d0f   :  { %v5975_v58 = vpop.f32.mrb[62].mxu0 }
0x3d10   :  { %v10656_v59 = vpop.f32.mrb[63].mxu0  ;;  %10660 = vmatmul.mubr.msk.f32.vlgmr.msra.gmra.mrb[62].mxu1 %vm317_vm6, %v5975_v58 }
0x3d11   :  { %10671 = vmatprep.mubr.msk.f32.mxu1 %vm11444_vm3, %v11445_v4  ;;  %11008 = vmatpush3.bf16.msra.mxu1 %v11007_v21 }
0x3d12   :  { %11015 = vmatprep.subr.bf16.mxu1 %v11442_v2  ;;  %11014 = vmatpush3.bf16.msra.mxu0 %v11013_v34 }
0x3d13   :  { %10697 = vmatprep.subr.mxu0 %v11445_v4 }
0x3ddf   :  { %v6121_v60 = vpop.f32.mrb[64].mxu0 }
0x3de0   :  { %v10666_v61 = vpop.f32.mrb[65].mxu0 }
0x3de3   :  { %v6048_v62 = vpop.f32.mrb[62].mxu1 }
0x3de4   :  { %v6122_v0 = vadd.f32 %v6121_v60, %v6048_v62  ;;  %v10661_v1 = vpop.f32.mrb[63].mxu1 }
0x3de6   :  { %v6133_v3 = vadd.f32 %v9842_v63, %v6122_v0 }
0x3de8   :  { %v6134_v5 = vadd.f32 %v12176_v16, %v6133_v3  ;;  %v9855_v3 = vld [vmem:[%s11508_s14 + $0x6] ss:$0 sm:$0xff] }
0x3dea   :  { %v6135_v8 = vsel %vm238_vm5, %v6134_v5, 0.0 }
0x3deb   :  { %6136 = vadd.xlane.f32.xlu1 %v6135_v8 }
0x3e78   :  { %v6137_v10 = vpop.xlane.xlu1 %6136 }
0x3e79   :  { %v6138_v12 = vmul.f32 0.0625, %v6137_v10 }
0x3e7b   :  { %v6139_v14 = vsub.f32 %v6134_v5, %v6138_v12 }
0x3e7d   :  { %v6140_v7 = vmul.f32 %v6139_v14, %v6139_v14 }
0x3e7f   :  { %v6141_v9 = vsel %vm238_vm5, %v6140_v7, 0.0 }
0x3e80   :  { %6142 = vadd.xlane.f32.xlu0 %v6141_v9 }
0x3f0d   :  { %v6143_v16 = vpop.xlane.xlu0 %6142 }
0x3f0e   :  { %v6144_v22 = vmul.f32 0.0625, %v6143_v16  ;;  %v9857_v16 = vld [vmem:[%s11478_s17 + $0x70] sm:$0xff] }
0x3f10   :  { %v6145_v24 = vadd.f32 1e-05, %v6144_v22  ;;  %v9858_v22 = vld [vmem:[%s11478_s17 + $0x78] sm:$0xff] }
0x3f12   :  { %11242 = vrsqrt.f32 %v6145_v24  ;;  %v11016_v24 = vpack.c.bf16 %v9858_v22, %v9857_v16 }
0x3f1c   :  { %v11243_v15 = vpop.eup %11242 }
0x3f1d   :  { %v6147_v26 = vmul.f32 %v11243_v15, %v6139_v14 }
0x3f1f   :  { %v6154_v28 = vmul.f32 %v12238_v25, %v6147_v26 }
0x3f21   :  { %v6161_v30 = vadd.f32 %v12241_v27, %v6154_v28 }
0x3f23   :  { %10672 = vmatmul.mubr.msk.f32.vlgmr.msra.gmra.mrb[64].mxu1 %vm238_vm5, %v6161_v30 }
0x3f24   :  { %10689 = vmatprep.mubr.msk.f32.mxu1 %vm11444_vm3, %v11445_v4  ;;  %11017 = vmatpush3.bf16.msra.mxu1 %v11016_v24 }
0x3f25   :  { %10692 = vmatprep.subr.mxu1 %v11445_v4 }
0x3ff6   :  { %v6242_v36 = vpop.f32.mrb[64].mxu1 }
0x3ff7   :  { %v6243_v37 = vadd.f32 %v9848_v35, %v6242_v36  ;;  %v10673_v38 = vpop.f32.mrb[65].mxu1 }
0x3ff9   :  { %v6247_v39 = vmul.f32 0.70710677, %v6243_v37  ;;  %v6246_v63 = vmul.f32 0.5, %v6243_v37 }
0x3ffb   :  { %v6248_v40 = vand.u32 2147483647, %v6247_v39  ;;  %vm6267_vm14 = vcmp.ge.f32.partialorder %v6247_v39, 0.0 }
0x3ffd   :  { %v6249_v41 = vmul.f32 0.3275911, %v6248_v40  ;;  %v6261_v43 = vsub.f32 0.0, %v6248_v40 }
0x3fff   :  { %v6250_v42 = vadd.f32 1.0, %v6249_v41  ;;  %v6262_v46 = vmul.f32 %v6261_v43, %v6248_v40 }
0x4001   :  { %11244 = vrcp.f32 %v6250_v42  ;;  %v6263_v49 = vmul.f32 1.442695, %v6262_v46 }
0x4003   :  { %11246 = vpow2.f32 %v6263_v49 }
0x400b   :  { %v11245_v44 = vpop.eup %11244 }
0x400c   :  { %v6252_v47 = vmul.f32 1.0614054, %v11245_v44 }
0x400d   :  { %v11247_v58 = vpop.eup %11246 }
0x400e   :  { %v6253_v48 = vadd.f32 -1.4531521, %v6252_v47 }
0x4010   :  { %v6254_v52 = vmul.f32 %v11245_v44, %v6253_v48 }
0x4012   :  { %v6255_v54 = vadd.f32 1.4214138, %v6254_v52 }
0x4014   :  { %v6256_v50 = vmul.f32 %v11245_v44, %v6255_v54 }
0x4016   :  { %v6257_v55 = vadd.f32 -0.28449672, %v6256_v50 }
0x4018   :  { %v6258_v53 = vmul.f32 %v11245_v44, %v6257_v55 }
0x401a   :  { %v6259_v56 = vadd.f32 0.2548296, %v6258_v53 }
0x401c   :  { %v6260_v57 = vmul.f32 %v11245_v44, %v6259_v56 }
0x401e   :  { %v6265_v59 = vmul.f32 %v11247_v58, %v6260_v57 }
0x4020   :  { %v6266_v60 = vsub.f32 1.0, %v6265_v59 }
0x4022   :  { %v6268_v61 = vsub.f32 0.0, %v6266_v60 }
0x4024   :  { %v6269_v62 = vsel %vm6267_vm14, %v6266_v60, %v6268_v61 }
0x4025   :  { %v6270_v0 = vadd.f32 1.0, %v6269_v62 }
0x4027   :  { %v6271_v1 = vmul.f32 %v6270_v0, %v6246_v63 }
0x4029   :  { %10683 = vmatmul.mubr.msk.f32.vlgmr.msra.gmra.mrb[66].mxu0 %vm946_vm8, %v6271_v1 }
0x402a   :  { %10699 = vmatprep.mubr.msk.f32.mxu0 %vm11444_vm3, %v11445_v4 }
0x40fc   :  { %v6354_v5 = vpop.f32.mrb[66].mxu0 }
0x40fd   :  { %v6355_v8 = vadd.f32 %v9855_v3, %v6354_v5  ;;  %v10684_v10 = vpop.f32.mrb[67].mxu0  ;;  %v9860_v5 = vld [vmem:[%s11483_s21 + $0x70] sm:$0xff] }
0x40ff   :  { %v6358_v12 = vadd.f32 %v6355_v8, %v6161_v30 }
0x4101   :  { %v6359_v14 = vsel %vm238_vm5, %v6358_v12, 0.0 }
0x4102   :  { %6360 = vadd.xlane.f32.xlu0 %v6359_v14 }
0x418f   :  { %v6361_v7 = vpop.xlane.xlu0 %6360 }
0x4190   :  { %v6362_v9 = vmul.f32 0.0625, %v6361_v7 }
0x4192   :  { %v6363_v19 = vsub.f32 %v6358_v12, %v6362_v9 }
0x4194   :  { %v6364_v20 = vmul.f32 %v6363_v19, %v6363_v19 }
0x4196   :  { %v6365_v21 = vsel %vm238_vm5, %v6364_v20, 0.0 }
0x4197   :  { %6366 = vadd.xlane.f32.xlu1 %v6365_v21 }
0x4224   :  { %v6367_v15 = vpop.xlane.xlu1 %6366 }
0x4225   :  { %v6368_v26 = vmul.f32 0.0625, %v6367_v15 }
0x4227   :  { %v6369_v28 = vadd.f32 1e-05, %v6368_v26 }
0x4229   :  { %11248 = vrsqrt.f32 %v6369_v28 }
0x4233   :  { %v11249_v30 = vpop.eup %11248 }
0x4234   :  { %v6371_v31 = vmul.f32 %v11249_v30, %v6363_v19  ;;  %v9871_v19 = vld [vmem:[%s11488_s25 + $0x7] ss:$0 sm:$0xff] }
0x4236   :  { %v6372_v32 = vmul.f32 %v12238_v25, %v6371_v31 }
0x4238   :  { %v12266_v23 = vadd.f32 %v12241_v27, %v6372_v32  ;;  %v9872_v32 = vld [vmem:[%s11493_s29 + $0x70] sm:$0xff] }
0x423a   :  { %10690 = vmatmul.mubr.msk.f32.vlgmr.msra.gmra.mrb[66].mxu1 %vm238_vm5, %v12266_v23 }
0x423b   :  { %10694 = vmatprep.mubr.msk.f32.mxu1 %vm11444_vm3, %v11445_v4 }
0x430d   :  { %v6446_v13 = vpop.f32.mrb[66].mxu1 }
0x430e   :  { %6621 = vrot.lane.b32.xlu1 %v6446_v13, %s11448_s9  ;;  %6454 = vrot.lane.b32.xlu0 %v6446_v13, %s11447_s5  ;;  %v10691_v33 = vpop.f32.mrb[67].mxu1 }
0x4312   :  { %6619 = vrot.lane.b32.xlu1 %v6446_v13, %s11446_s0 }
0x4380   :  { %v6455_v34 = vpop.permute.xlu0 %6454  ;;  %v6622_v35 = vpop.permute.xlu1 %6621 }
0x4381   :  { %10693 = vmatpush3.xpose.msk.msra.mxu1 %vm317_vm6, %v6455_v34 }
0x4382   :  { %10702 = vmatprep.subr.mxu1 %v11445_v4 }
0x4384   :  { %10695 = vmatmul.mubr.msk.f32.vlgmr.msra.gmra.mrb[68].mxu1 %vm317_vm6, %v6446_v13  ;;  %v6620_v36 = vpop.permute.xlu1 %6619 }
0x4385   :  { %10703 = vmatpush3.xpose.msk.msra.mxu1 %vm317_vm6, %v6622_v35  ;;  %10704 = vmatprep.mubr.msk.f32.mxu1 %vm11444_vm3, %v11445_v4 }
0x4386   :  { %10712 = vmatprep.subr.mxu1 %v11445_v4 }
0x4388   :  { %10705 = vmatmul.mubr.msk.f32.vlgmr.msra.gmra.mrb[70].mxu1 %vm317_vm6, %v6620_v36 }
0x4389   :  { %10714 = vmatprep.mubr.msk.f32.mxu1 %vm11444_vm3, %v11445_v4 }
0x4457   :  { %v6526_v37 = vpop.f32.mrb[68].mxu1 }
0x4458   :  { %v10696_v38 = vpop.f32.mrb[69].mxu1  ;;  %v6530_v39 = vsel %vm317_vm6, %v6526_v37, -inf }
0x4459   :  { %6531 = vmax.xlane.f32.xlu0 %v6530_v39  ;;  %v7169_v38 = vld [vmem:[%s12623_s7] sm:$0xff]  ;;  %v7170_v39 = vld [vmem:[%s12623_s7 + $0x8] sm:$0xff] }
0x445b   :  { %v6693_v40 = vpop.f32.mrb[70].mxu1 }
0x445c   :  { %v10706_v41 = vpop.f32.mrb[71].mxu1  ;;  %v6697_v42 = vsel %vm317_vm6, %v6693_v40, -inf }
0x445d   :  { %6698 = vmax.xlane.f32.xlu1 %v6697_v42  ;;  %v11028_v41 = vpack.c.bf16 %v7170_v39, %v7169_v38 }
0x446e   :  { %6543 = vrot.lane.b32.xlu1 %v6446_v13, %s11450_s28 }
0x44e6   :  { %v6532_v43 = vpop.xlane.xlu0 %6531 }
0x44e7   :  { %v6533_v44 = vsub.f32 %v6526_v37, %v6532_v43  ;;  %v7171_v43 = vld [vmem:[%s12623_s7 + $0x10] sm:$0xff] }
0x44e9   :  { %v6534_v46 = vmul.f32 1.442695, %v6533_v44  ;;  %v7172_v44 = vld [vmem:[%s12623_s7 + $0x18] sm:$0xff] }
0x44ea   :  { %v6699_v47 = vpop.xlane.xlu1 %6698 }
0x44eb   :  { %11250 = vpow2.f32 %v6534_v46  ;;  %v6700_v48 = vsub.f32 %v6693_v40, %v6699_v47  ;;  %v11031_v46 = vpack.c.bf16 %v7172_v44, %v7171_v43  ;;  %v9877_v47 = vld [vmem:[%s11503_s8 + $0xe0] sm:$0xff] }
0x44ed   :  { %v6701_v49 = vmul.f32 1.442695, %v6700_v48  ;;  %v9878_v48 = vld [vmem:[%s11503_s8 + $0xe8] sm:$0xff] }
0x44ee   :  { %v6544_v52 = vpop.permute.xlu1 %6543 }
0x44ef   :  { %11252 = vpow2.f32 %v6701_v49  ;;  %10698 = vmatpush3.msra.mxu0 %v6544_v52  ;;  %v11022_v49 = vpack.c.bf16 %v9878_v48, %v9877_v47  ;;  %v9880_v52 = vld [vmem:[%s11503_s8 + $0xf8] sm:$0xff]  ;;  %v9890_v47 = vld [vmem:[%s11478_s17 + $0x80] sm:$0xff]  ;;  %v9891_v48 = vld [vmem:[%s11478_s17 + $0x88] sm:$0xff] }
0x44f0   :  { %10707 = vmatprep.subr.mxu0 %v11445_v4 }
0x44f5   :  { %v11251_v54 = vpop.eup %11250 }
0x44f6   :  { %v6536_v50 = vsel %vm317_vm6, %v11251_v54, 0.0 }
0x44f7   :  { %6537 = vadd.xlane.f32.xlu0 %v6536_v50  ;;  %v9875_v50 = vld [vmem:[%s11498_s3 + $0x7] ss:$0 sm:$0xff] }
0x44f9   :  { %v11253_v55 = vpop.eup %11252 }
0x44fa   :  { %v6703_v53 = vsel %vm317_vm6, %v11253_v55, 0.0 }
0x44fb   :  { %6704 = vadd.xlane.f32.xlu0 %v6703_v53 }
0x4511   :  { %6710 = vrot.lane.b32.xlu0 %v6446_v13, %s11449_s13  ;;  %v9873_v13 = vld [vmem:[%s11493_s29 + $0x78] sm:$0xff] }
0x4512   :  { %v11019_v33 = vpack.c.bf16 %v9873_v13, %v9872_v32 }
0x4584   :  { %v6538_v56 = vpop.xlane.xlu0 %6537 }
0x4585   :  { %11254 = vrcp.f32 %v6538_v56 }
0x4588   :  { %v6705_v57 = vpop.xlane.xlu0 %6704 }
0x4589   :  { %11256 = vrcp.f32 %v6705_v57 }
0x458c   :  { %v6711_v1 = vpop.permute.xlu0 %6710 }
0x458f   :  { %v11255_v58 = vpop.eup %11254 }
0x4590   :  { %v6540_v59 = vmul.f32 %v11255_v58, %v11251_v54 }
0x4592   :  { %v6541_v60 = vmul.f32 0.5, %v6540_v59 }
0x4593   :  { %v11257_v61 = vpop.eup %11256 }
0x4594   :  { %v6707_v62 = vmul.f32 %v11257_v61, %v11253_v55  ;;  %v6542_v63 = vadd.f32 %v6541_v60, %v12206_v45  ;;  %v9861_v45 = vld [vmem:[%s11483_s21 + $0x78] sm:$0xff] }
0x4595   :  { %10713 = vmatpush3.msra.mxu1 %v9861_v45 }
0x4596   :  { %v6708_v0 = vmul.f32 0.5, %v6707_v62  ;;  %10700 = vmatmul.mubr.msk.f32.vlgmr.msra.gmra.mrb[68].mxu0 %vm317_vm6, %v6542_v63  ;;  %11018 = vmatprep.subr.bf16.mxu1 %v11442_v2 }
0x4597   :  { %10708 = vmatpush3.msra.mxu0 %v6711_v1  ;;  %10709 = vmatprep.mubr.msk.f32.mxu0 %vm11444_vm3, %v11445_v4 }
0x4598   :  { %v6709_v3 = vadd.f32 %v6708_v0, %v12210_v51  ;;  %10717 = vmatprep.subr.mxu0 %v11445_v4 }
0x459a   :  { %10710 = vmatmul.mubr.msk.f32.vlgmr.msra.gmra.mrb[70].mxu0 %vm317_vm6, %v6709_v3 }
0x459b   :  { %10719 = vmatprep.mubr.msk.f32.mxu0 %vm11444_vm3, %v11445_v4  ;;  %10718 = vmatpush3.msra.mxu0 %v9860_v5 }
0x459c   :  { %11021 = vmatprep.subr.bf16.mxu0 %v11442_v2 }
0x4669   :  { %v6615_v8 = vpop.f32.mrb[68].mxu0 }
0x466a   :  { %v10701_v10 = vpop.f32.mrb[69].mxu0  ;;  %10720 = vmatmul.mubr.msk.f32.vlgmr.msra.gmra.mrb[72].mxu0 %vm317_vm6, %v6615_v8 }
0x466b   :  { %10737 = vmatprep.mubr.msk.f32.mxu0 %vm11444_vm3, %v11445_v4  ;;  %11023 = vmatpush3.bf16.msra.mxu0 %v11022_v49  ;;  %v11037_v49 = vpack.c.bf16 %v9891_v48, %v9890_v47  ;;  %v9908_v47 = vld [vmem:[%s11493_s29 + $0x88] sm:$0xff] }
0x466c   :  { %11024 = vmatprep.subr.bf16.mxu0 %v11442_v2 }
0x466d   :  { %v6782_v51 = vpop.f32.mrb[70].mxu0 }
0x466e   :  { %v10711_v12 = vpop.f32.mrb[71].mxu0  ;;  %10715 = vmatmul.mubr.msk.f32.vlgmr.msra.gmra.mrb[72].mxu1 %vm317_vm6, %v6782_v51 }
0x466f   :  { %10726 = vmatprep.mubr.msk.f32.mxu1 %vm11444_vm3, %v11445_v4  ;;  %11020 = vmatpush3.bf16.msra.mxu1 %v11019_v33 }
0x4670   :  { %11027 = vmatprep.subr.bf16.mxu1 %v11442_v2 }
0x473d   :  { %v6928_v14 = vpop.f32.mrb[72].mxu0 }
0x473e   :  { %v10721_v7 = vpop.f32.mrb[73].mxu0 }
0x4741   :  { %v6855_v9 = vpop.f32.mrb[72].mxu1 }
0x4742   :  { %v6929_v20 = vadd.f32 %v6928_v14, %v6855_v9  ;;  %v10716_v21 = vpop.f32.mrb[73].mxu1 }
0x4744   :  { %v6940_v16 = vadd.f32 %v9871_v19, %v6929_v20 }
0x4746   :  { %v6941_v22 = vadd.f32 %v6940_v16, %v12266_v23 }
0x4748   :  { %v6942_v24 = vsel %vm238_vm5, %v6941_v22, 0.0 }
0x4749   :  { %6943 = vadd.xlane.f32.xlu1 %v6942_v24 }
0x47d6   :  { %v6944_v15 = vpop.xlane.xlu1 %6943 }
0x47d7   :  { %v6945_v26 = vmul.f32 0.0625, %v6944_v15  ;;  %v9882_v15 = vld [vmem:[%s11508_s14 + $0x7] ss:$0 sm:$0xff] }
0x47d9   :  { %v6946_v28 = vsub.f32 %v6941_v22, %v6945_v26 }
0x47db   :  { %v6947_v30 = vmul.f32 %v6946_v28, %v6946_v28 }
0x47dd   :  { %v6948_v31 = vsel %vm238_vm5, %v6947_v30, 0.0 }
0x47de   :  { %6949 = vadd.xlane.f32.xlu0 %v6948_v31 }
0x486b   :  { %v6950_v23 = vpop.xlane.xlu0 %6949 }
0x486c   :  { %v6951_v34 = vmul.f32 0.0625, %v6950_v23 }
0x486e   :  { %v6952_v35 = vadd.f32 1e-05, %v6951_v34 }
0x4870   :  { %11258 = vrsqrt.f32 %v6952_v35 }
0x487a   :  { %v11259_v36 = vpop.eup %11258 }
0x487b   :  { %v6954_v37 = vmul.f32 %v11259_v36, %v6946_v28  ;;  %v7173_v36 = vld [vmem:[%s12623_s7 + $0x20] sm:$0xff] }
0x487d   :  { %v6955_v40 = vmul.f32 %v12238_v25, %v6954_v37  ;;  %v7174_v37 = vld [vmem:[%s12623_s7 + $0x28] sm:$0xff] }
0x487e   :  { %v11034_v38 = vpack.c.bf16 %v7174_v37, %v7173_v36 }
0x487f   :  { %v6956_v42 = vadd.f32 %v12241_v27, %v6955_v40 }
0x4881   :  { %10727 = vmatmul.mubr.msk.f32.vlgmr.msra.gmra.mrb[74].mxu1 %vm238_vm5, %v6956_v42 }
0x4882   :  { %11029 = vmatpush3.bf16.msra.mxu1 %v11028_v41  ;;  %10744 = vmatprep.mubr.msk.f32.mxu1 %vm11444_vm3, %v11445_v4 }
0x4883   :  { %11030 = vmatprep.subr.bf16.mxu1 %v11442_v2 }
0x4885   :  { %10745 = vmatmul.mubr.msk.f32.vlgmr.msra.gmra.mrb[76].mxu1 %vm238_vm5, %v11661_v11  ;;  %v9879_v11 = vld [vmem:[%s11503_s8 + $0xf0] sm:$0xff] }
0x4886   :  { %11032 = vmatpush3.bf16.msra.mxu1 %v11031_v46  ;;  %10751 = vmatprep.mubr.msk.f32.mxu1 %vm11444_vm3, %v11445_v4  ;;  %v11025_v54 = vpack.c.bf16 %v9880_v52, %v9879_v11  ;;  %v9885_v11 = vld [vmem:[%s12624_s10] ss:$0 sm:$0xff] }
0x4887   :  { %11033 = vmatprep.subr.bf16.mxu1 %v11442_v2 }
0x4888   :  { %11026 = vmatpush3.bf16.msra.mxu0 %v11025_v54 }
0x4889   :  { %11036 = vmatprep.subr.bf16.mxu0 %v11442_v2 }
0x488d   :  { %10752 = vmatmul.mubr.msk.f32.vlgmr.msra.gmra.mrb[76].mxu1 %vm238_vm5, %v11820_v6 }
0x488e   :  { %10758 = vmatprep.mubr.msk.f32.mxu1 %vm11444_vm3, %v11445_v4  ;;  %11035 = vmatpush3.bf16.msra.mxu1 %v11034_v38 }
0x488f   :  { %10773 = vmatprep.subr.mxu1 %v11445_v4 }
0x4954   :  { %v7037_v55 = vpop.f32.mrb[74].mxu1 }
0x4955   :  { %v7038_v53 = vadd.f32 %v9875_v50, %v7037_v55  ;;  %v10728_v56 = vpop.f32.mrb[75].mxu1 }
0x4957   :  { %v7042_v57 = vmul.f32 0.70710677, %v7038_v53  ;;  %v7041_v16 = vmul.f32 0.5, %v7038_v53 }
0x4959   :  { %v7043_v58 = vand.u32 2147483647, %v7042_v57  ;;  %vm7062_vm15 = vcmp.ge.f32.partialorder %v7042_v57, 0.0 }
0x495b   :  { %v7044_v59 = vmul.f32 0.3275911, %v7043_v58  ;;  %v7056_v61 = vsub.f32 0.0, %v7043_v58 }
0x495d   :  { %v7045_v60 = vadd.f32 1.0, %v7044_v59  ;;  %v7057_v63 = vmul.f32 %v7056_v61, %v7043_v58 }
0x495f   :  { %11260 = vrcp.f32 %v7045_v60  ;;  %v7058_v3 = vmul.f32 1.442695, %v7057_v63 }
0x4961   :  { %11262 = vpow2.f32 %v7058_v3 }
0x4969   :  { %v11261_v62 = vpop.eup %11260 }
0x496a   :  { %v7047_v0 = vmul.f32 1.0614054, %v11261_v62 }
0x496b   :  { %v11263_v7 = vpop.eup %11262 }
0x496c   :  { %v7048_v1 = vadd.f32 -1.4531521, %v7047_v0 }
0x496e   :  { %v7049_v5 = vmul.f32 %v11261_v62, %v7048_v1 }
0x4970   :  { %v7050_v45 = vadd.f32 1.4214138, %v7049_v5 }
0x4972   :  { %v7051_v8 = vmul.f32 %v11261_v62, %v7050_v45 }
0x4974   :  { %v7052_v10 = vadd.f32 -0.28449672, %v7051_v8 }
0x4976   :  { %v7053_v51 = vmul.f32 %v11261_v62, %v7052_v10 }
0x4978   :  { %v7054_v12 = vadd.f32 0.2548296, %v7053_v51 }
0x497a   :  { %v7055_v14 = vmul.f32 %v11261_v62, %v7054_v12 }
0x497c   :  { %v7060_v9 = vmul.f32 %v11263_v7, %v7055_v14 }
0x497e   :  { %v7061_v19 = vsub.f32 1.0, %v7060_v9 }
0x4980   :  { %v7063_v20 = vsub.f32 0.0, %v7061_v19 }
0x4982   :  { %v7064_v21 = vsel %vm7062_vm15, %v7061_v19, %v7063_v20 }
0x4983   :  { %v7065_v22 = vadd.f32 1.0, %v7064_v21 }
0x4985   :  { %v7066_v24 = vmul.f32 %v7065_v22, %v7041_v16 }
0x4987   :  { %10738 = vmatmul.mubr.msk.f32.vlgmr.msra.gmra.mrb[74].mxu0 %vm946_vm8, %v7066_v24  ;;  %v9893_v24 = vld [vmem:[%s11483_s21 + $0x80] sm:$0xff] }
0x4988   :  { %10765 = vmatprep.mubr.msk.f32.mxu0 %vm11444_vm3, %v11445_v4  ;;  %11038 = vmatpush3.bf16.msra.mxu0 %v11037_v49 }
0x4989   :  { %10768 = vmatprep.subr.mxu0 %v11445_v4 }
0x4a5a   :  { %v7149_v26 = vpop.f32.mrb[74].mxu0 }
0x4a5b   :  { %v7150_v28 = vadd.f32 %v9882_v15, %v7149_v26  ;;  %v10739_v30 = vpop.f32.mrb[75].mxu0  ;;  %v9894_v15 = vld [vmem:[%s11483_s21 + $0x88] sm:$0xff] }
0x4a5d   :  { %v7153_v31 = vadd.f32 %v7150_v28, %v6956_v42 }
0x4a5f   :  { %v7154_v32 = vsel %vm238_vm5, %v7153_v31, 0.0 }
0x4a60   :  { %7155 = vadd.xlane.f32.xlu1 %v7154_v32 }
0x4aed   :  { %v7156_v13 = vpop.xlane.xlu1 %7155 }
0x4aee   :  { %v7157_v33 = vmul.f32 0.0625, %v7156_v13 }
0x4af0   :  { %v7158_v23 = vsub.f32 %v7153_v31, %v7157_v33 }
0x4af2   :  { %v7159_v34 = vmul.f32 %v7158_v23, %v7158_v23 }
0x4af4   :  { %v7160_v35 = vsel %vm238_vm5, %v7159_v34, 0.0 }
0x4af5   :  { %7161 = vadd.xlane.f32.xlu0 %v7160_v35 }
0x4b82   :  { %v7162_v39 = vpop.xlane.xlu0 %7161 }
0x4b83   :  { %v7163_v40 = vmul.f32 0.0625, %v7162_v39 }
0x4b85   :  { %v7164_v41 = vadd.f32 1e-05, %v7163_v40 }
0x4b87   :  { %11264 = vrsqrt.f32 %v7164_v41 }
0x4b91   :  { %v11265_v42 = vpop.eup %11264 }
0x4b92   :  { %v7166_v43 = vmul.f32 %v11265_v42, %v7158_v23  ;;  %v9904_v23 = vld [vmem:[%s11488_s25 + $0x8] ss:$0 sm:$0xff] }
0x4b94   :  { %v7167_v44 = vmul.f32 %v12238_v25, %v7166_v43 }
0x4b96   :  { %v12355_v46 = vadd.f32 %v12241_v27, %v7167_v44  ;;  %v9907_v44 = vld [vmem:[%s11493_s29 + $0x80] sm:$0xff] }
0x4b97   :  { %v11040_v48 = vpack.c.bf16 %v9908_v47, %v9907_v44  ;;  %v9919_v47 = vld [vmem:[%s11478_s17 + $0x90] sm:$0xff] }
0x4b98   :  { %10759 = vmatmul.mubr.msk.f32.vlgmr.msra.gmra.mrb[76].mxu1 %vm238_vm5, %v12355_v46 }
0x4b99   :  { %10775 = vmatprep.mubr.msk.f32.mxu1 %vm11444_vm3, %v11445_v4 }
0x4c6b   :  { %v7393_v52 = vpop.f32.mrb[76].mxu1 }
0x4c6c   :  { %v12365_v54 = vadd.f32 %v9885_v11, %v7393_v52  ;;  %v10760_v25 = vpop.f32.mrb[77].mxu1 }
0x4c6d   :  { %v12416_v25 = vld [vmem:[%s11513_s19 + $0x4] ss:$0 sm:$0xff] }
0x4c6e   :  { %10766 = vmatmul.mubr.msk.f32.vlgmr.msra.gmra.mrb[76].mxu0 %vm238_vm5, %v12365_v54 }
0x4c6f   :  { %10770 = vmatprep.mubr.msk.f32.mxu0 %vm11444_vm3, %v11445_v4 }
0x4d41   :  { %v7474_v27 = vpop.f32.mrb[76].mxu0 }
0x4d42   :  { %7647 = vrot.lane.b32.xlu0 %v7474_v27, %s11448_s9  ;;  %7482 = vrot.lane.b32.xlu1 %v7474_v27, %s11447_s5  ;;  %v10767_v50 = vpop.f32.mrb[77].mxu0 }
0x4d43   :  { %v12419_v50 = vld [vmem:[%s11518_s24 + $0x4] ss:$0 sm:$0xff] }
0x4d46   :  { %7645 = vrot.lane.b32.xlu1 %v7474_v27, %s11446_s0 }
0x4db4   :  { %v7483_v55 = vpop.permute.xlu1 %7482  ;;  %v7648_v53 = vpop.permute.xlu0 %7647 }
0x4db5   :  { %10769 = vmatpush3.xpose.msk.msra.mxu0 %vm317_vm6, %v7483_v55 }
0x4db6   :  { %10778 = vmatprep.subr.mxu0 %v11445_v4 }
0x4db8   :  { %10771 = vmatmul.mubr.msk.f32.vlgmr.msra.gmra.mrb[78].mxu0 %vm317_vm6, %v7474_v27  ;;  %v7646_v56 = vpop.permute.xlu1 %7645 }
0x4db9   :  { %10779 = vmatpush3.xpose.msk.msra.mxu0 %vm317_vm6, %v7648_v53  ;;  %10780 = vmatprep.mubr.msk.f32.mxu0 %vm11444_vm3, %v11445_v4 }
0x4dba   :  { %10788 = vmatprep.subr.mxu0 %v11445_v4 }
0x4dbc   :  { %10781 = vmatmul.mubr.msk.f32.vlgmr.msra.gmra.mrb[80].mxu0 %vm317_vm6, %v7646_v56  ;;  %v9912_v56 = vld [vmem:[%s11503_s8 + $0x100] sm:$0xff] }
0x4dbd   :  { %10790 = vmatprep.mubr.msk.f32.mxu0 %vm11444_vm3, %v11445_v4  ;;  %10789 = vmatpush3.msra.mxu0 %v9894_v15 }
0x4dbe   :  { %11039 = vmatprep.subr.bf16.mxu0 %v11442_v2 }
0x4e8b   :  { %v7554_v57 = vpop.f32.mrb[78].mxu0 }
0x4e8c   :  { %v10772_v58 = vpop.f32.mrb[79].mxu0  ;;  %v7558_v59 = vsel %vm317_vm6, %v7554_v57, -inf }
0x4e8d   :  { %7559 = vmax.xlane.f32.xlu1 %v7558_v59  ;;  %v9914_v59 = vld [vmem:[%s11503_s8 + $0x110] sm:$0xff] }
0x4e8f   :  { %v7719_v60 = vpop.f32.mrb[80].mxu0 }
0x4e90   :  { %v10782_v61 = vpop.f32.mrb[81].mxu0  ;;  %v7723_v62 = vsel %vm317_vm6, %v7719_v60, -inf }
0x4e91   :  { %7724 = vmax.xlane.f32.xlu0 %v7723_v62  ;;  %v9910_v62 = vld [vmem:[%s11498_s3 + $0x8] ss:$0 sm:$0xff] }
0x4f1a   :  { %v7560_v63 = vpop.xlane.xlu1 %7559 }
0x4f1b   :  { %v7561_v0 = vsub.f32 %v7554_v57, %v7560_v63  ;;  %v9913_v57 = vld [vmem:[%s11503_s8 + $0x108] sm:$0xff] }
0x4f1c   :  { %v11043_v58 = vpack.c.bf16 %v9913_v57, %v9912_v56 }
0x4f1d   :  { %v7562_v1 = vmul.f32 1.442695, %v7561_v0 }
0x4f1e   :  { %v7725_v3 = vpop.xlane.xlu0 %7724 }
0x4f1f   :  { %11266 = vpow2.f32 %v7562_v1  ;;  %v7726_v5 = vsub.f32 %v7719_v60, %v7725_v3  ;;  %v9915_v60 = vld [vmem:[%s11503_s8 + $0x118] sm:$0xff] }
0x4f20   :  { %v11046_v61 = vpack.c.bf16 %v9915_v60, %v9914_v59 }
0x4f21   :  { %v7727_v45 = vmul.f32 1.442695, %v7726_v5 }
0x4f23   :  { %11268 = vpow2.f32 %v7727_v45 }
0x4f29   :  { %v11267_v8 = vpop.eup %11266 }
0x4f2a   :  { %v7564_v10 = vsel %vm317_vm6, %v11267_v8, 0.0 }
0x4f2b   :  { %7565 = vadd.xlane.f32.xlu0 %v7564_v10 }
0x4f2d   :  { %v11269_v51 = vpop.eup %11268 }
0x4f2e   :  { %v7729_v12 = vsel %vm317_vm6, %v11269_v51, 0.0 }
0x4f2f   :  { %7730 = vadd.xlane.f32.xlu1 %v7729_v12 }
0x4f40   :  { %7734 = vrot.lane.b32.xlu1 %v7474_v27, %s11449_s13 }
0x4f41   :  { %7569 = vrot.lane.b32.xlu0 %v7474_v27, %s11450_s28 }
0x4fb8   :  { %v7566_v14 = vpop.xlane.xlu0 %7565 }
0x4fb9   :  { %11270 = vrcp.f32 %v7566_v14 }
0x4fbc   :  { %v7731_v7 = vpop.xlane.xlu1 %7730  ;;  %v7570_v9 = vpop.permute.xlu0 %7569 }
0x4fbd   :  { %11272 = vrcp.f32 %v7731_v7  ;;  %10774 = vmatpush3.msra.mxu1 %v7570_v9 }
0x4fbe   :  { %10783 = vmatprep.subr.mxu1 %v11445_v4 }
0x4fc0   :  { %v7735_v21 = vpop.permute.xlu1 %7734 }
0x4fc3   :  { %v11271_v19 = vpop.eup %11270 }
0x4fc4   :  { %v7568_v20 = vmul.f32 %v11271_v19, %v11267_v8 }
0x4fc6   :  { %10776 = vmatmul.mubr.msk.f32.vlgmr.msra.gmra.mrb[78].mxu1 %vm317_vm6, %v7568_v20 }
0x4fc7   :  { %v11273_v16 = vpop.eup %11272  ;;  %10784 = vmatpush3.msra.mxu1 %v7735_v21  ;;  %10785 = vmatprep.mubr.msk.f32.mxu1 %vm11444_vm3, %v11445_v4 }
0x4fc8   :  { %v7733_v22 = vmul.f32 %v11273_v16, %v11269_v51  ;;  %10793 = vmatprep.subr.mxu1 %v11445_v4 }
0x4fca   :  { %10786 = vmatmul.mubr.msk.f32.vlgmr.msra.gmra.mrb[80].mxu1 %vm317_vm6, %v7733_v22 }
0x4fcb   :  { %10795 = vmatprep.mubr.msk.f32.mxu1 %vm11444_vm3, %v11445_v4  ;;  %10794 = vmatpush3.msra.mxu1 %v9893_v24 }
0x4fcc   :  { %11042 = vmatprep.subr.bf16.mxu1 %v11442_v2 }
0x5099   :  { %v7641_v26 = vpop.f32.mrb[78].mxu1 }
0x509a   :  { %v10777_v28 = vpop.f32.mrb[79].mxu1  ;;  %10796 = vmatmul.mubr.msk.f32.vlgmr.msra.gmra.mrb[82].mxu1 %vm317_vm6, %v7641_v26 }
0x509b   :  { %10813 = vmatprep.mubr.msk.f32.mxu1 %vm11444_vm3, %v11445_v4  ;;  %11044 = vmatpush3.bf16.msra.mxu1 %v11043_v58 }
0x509c   :  { %11045 = vmatprep.subr.bf16.mxu1 %v11442_v2 }
0x509d   :  { %v7806_v30 = vpop.f32.mrb[80].mxu1 }
0x509e   :  { %v10787_v31 = vpop.f32.mrb[81].mxu1  ;;  %10791 = vmatmul.mubr.msk.f32.vlgmr.msra.gmra.mrb[82].mxu0 %vm317_vm6, %v7806_v30 }
0x509f   :  { %10802 = vmatprep.mubr.msk.f32.mxu0 %vm11444_vm3, %v11445_v4  ;;  %11041 = vmatpush3.bf16.msra.mxu0 %v11040_v48  ;;  %v9920_v48 = vld [vmem:[%s11478_s17 + $0x98] sm:$0xff]  ;;  %s12625_s17 = sld [smem:[#allocation20_spill]] }
0x50a0   :  { %11048 = vmatprep.subr.bf16.mxu0 %v11442_v2  ;;  %11047 = vmatpush3.bf16.msra.mxu1 %v11046_v61 }
0x50a1   :  { %10828 = vmatprep.subr.mxu1 %v11445_v4 }
0x516d   :  { %v7952_v32 = vpop.f32.mrb[82].mxu1 }
0x516e   :  { %v10797_v13 = vpop.f32.mrb[83].mxu1 }
0x5171   :  { %v7879_v33 = vpop.f32.mrb[82].mxu0 }
0x5172   :  { %v7953_v34 = vadd.f32 %v7952_v32, %v7879_v33  ;;  %v10792_v35 = vpop.f32.mrb[83].mxu0 }
0x5174   :  { %v7964_v36 = vadd.f32 %v9904_v23, %v7953_v34  ;;  %v9917_v34 = vld [vmem:[%s11508_s14 + $0x8] ss:$0 sm:$0xff] }
0x5176   :  { %v7965_v37 = vadd.f32 %v12365_v54, %v7964_v36 }
0x5178   :  { %v7966_v38 = vsel %vm238_vm5, %v7965_v37, 0.0 }
0x5179   :  { %7967 = vadd.xlane.f32.xlu1 %v7966_v38 }
0x5206   :  { %v7968_v39 = vpop.xlane.xlu1 %7967 }
0x5207   :  { %v7969_v40 = vmul.f32 0.0625, %v7968_v39 }
0x5209   :  { %v7970_v41 = vsub.f32 %v7965_v37, %v7969_v40 }
0x520b   :  { %v7971_v42 = vmul.f32 %v7970_v41, %v7970_v41 }
0x520d   :  { %v7972_v43 = vsel %vm238_vm5, %v7971_v42, 0.0 }
0x520e   :  { %7973 = vadd.xlane.f32.xlu0 %v7972_v43 }
0x529b   :  { %v7974_v49 = vpop.xlane.xlu0 %7973 }
0x529c   :  { %v7975_v11 = vmul.f32 0.0625, %v7974_v49  ;;  %v11049_v49 = vpack.c.bf16 %v9920_v48, %v9919_v47 }
0x529e   :  { %v7976_v52 = vadd.f32 1e-05, %v7975_v11 }
0x52a0   :  { %11274 = vrsqrt.f32 %v7976_v52 }
0x52aa   :  { %v11275_v54 = vpop.eup %11274 }
0x52ab   :  { %v7978_v27 = vmul.f32 %v11275_v54, %v7970_v41 }
0x52ad   :  { %v7985_v55 = vmul.f32 %v12416_v25, %v7978_v27 }
0x52af   :  { %v7992_v53 = vadd.f32 %v12419_v50, %v7985_v55 }
0x52b1   :  { %10803 = vmatmul.mubr.msk.f32.vlgmr.msra.gmra.mrb[84].mxu0 %vm238_vm5, %v7992_v53 }
0x52b2   :  { %10820 = vmatprep.mubr.msk.f32.mxu0 %vm11444_vm3, %v11445_v4  ;;  %11050 = vmatpush3.bf16.msra.mxu0 %v11049_v49 }
0x52b3   :  { %10823 = vmatprep.subr.mxu0 %v11445_v4 }
0x5384   :  { %v8073_v63 = vpop.f32.mrb[84].mxu0 }
0x5385   :  { %v8074_v0 = vadd.f32 %v9910_v62, %v8073_v63  ;;  %v10804_v1 = vpop.f32.mrb[85].mxu0 }
0x5387   :  { %v8078_v3 = vmul.f32 0.70710677, %v8074_v0  ;;  %v8077_v13 = vmul.f32 0.5, %v8074_v0 }
0x5389   :  { %v8079_v5 = vand.u32 2147483647, %v8078_v3  ;;  %vm8098_vm0 = vcmp.ge.f32.partialorder %v8078_v3, 0.0 }
0x538b   :  { %v8080_v45 = vmul.f32 0.3275911, %v8079_v5  ;;  %v8092_v10 = vsub.f32 0.0, %v8079_v5 }
0x538d   :  { %v8081_v8 = vadd.f32 1.0, %v8080_v45  ;;  %v8093_v12 = vmul.f32 %v8092_v10, %v8079_v5 }
0x538f   :  { %11276 = vrcp.f32 %v8081_v8  ;;  %v8094_v9 = vmul.f32 1.442695, %v8093_v12 }
0x5391   :  { %11278 = vpow2.f32 %v8094_v9 }
0x5399   :  { %v11277_v51 = vpop.eup %11276 }
0x539a   :  { %v8083_v14 = vmul.f32 1.0614054, %v11277_v51 }
0x539b   :  { %v11279_v26 = vpop.eup %11278 }
0x539c   :  { %v8084_v7 = vadd.f32 -1.4531521, %v8083_v14 }
0x539e   :  { %v8085_v19 = vmul.f32 %v11277_v51, %v8084_v7 }
0x53a0   :  { %v8086_v20 = vadd.f32 1.4214138, %v8085_v19 }
0x53a2   :  { %v8087_v21 = vmul.f32 %v11277_v51, %v8086_v20 }
0x53a4   :  { %v8088_v16 = vadd.f32 -0.28449672, %v8087_v21 }
0x53a6   :  { %v8089_v22 = vmul.f32 %v11277_v51, %v8088_v16 }
0x53a8   :  { %v8090_v24 = vadd.f32 0.2548296, %v8089_v22 }
0x53aa   :  { %v8091_v15 = vmul.f32 %v11277_v51, %v8090_v24 }
0x53ac   :  { %v8096_v28 = vmul.f32 %v11279_v26, %v8091_v15 }
0x53ae   :  { %v8097_v30 = vsub.f32 1.0, %v8096_v28 }
0x53b0   :  { %v8099_v31 = vsub.f32 0.0, %v8097_v30 }
0x53b2   :  { %v8100_v32 = vsel %vm8098_vm0, %v8097_v30, %v8099_v31  ;;  %v9922_v31 = vld [vmem:[%s11483_s21 + $0x90] sm:$0xff] }
0x53b3   :  { %v8101_v33 = vadd.f32 1.0, %v8100_v32  ;;  %v9923_v32 = vld [vmem:[%s11483_s21 + $0x98] sm:$0xff]  ;;  %s12626_s21 = sld [smem:[#allocation28_spill]] }
0x53b5   :  { %v8102_v23 = vmul.f32 %v8101_v33, %v8077_v13 }
0x53b7   :  { %10814 = vmatmul.mubr.msk.f32.vlgmr.msra.gmra.mrb[84].mxu1 %vm946_vm8, %v8102_v23 }
0x53b8   :  { %10830 = vmatprep.mubr.msk.f32.mxu1 %vm11444_vm3, %v11445_v4 }
0x548a   :  { %v8185_v35 = vpop.f32.mrb[84].mxu1 }
0x548b   :  { %v8186_v36 = vadd.f32 %v9917_v34, %v8185_v35  ;;  %v10815_v37 = vpop.f32.mrb[85].mxu1 }
0x548c   :  { %v9821_v37 = vld [vmem:[%s11508_s14 + $0x5] ss:$0 sm:$0xff] }
0x548d   :  { %v8189_v38 = vadd.f32 %v8186_v36, %v7992_v53 }
0x548f   :  { %v8190_v39 = vsel %vm238_vm5, %v8189_v38, 0.0 }
0x5490   :  { %8191 = vadd.xlane.f32.xlu0 %v8190_v39  ;;  %v9933_v39 = vld [vmem:[%s11488_s25 + $0x9] ss:$0 sm:$0xff]  ;;  %s12627_s25 = sld [smem:[#allocation18_spill]] }
0x551d   :  { %v8192_v40 = vpop.xlane.xlu0 %8191 }
0x551e   :  { %v8193_v41 = vmul.f32 0.0625, %v8192_v40 }
0x5520   :  { %v8194_v42 = vsub.f32 %v8189_v38, %v8193_v41 }
0x5522   :  { %v8195_v43 = vmul.f32 %v8194_v42, %v8194_v42 }
0x5524   :  { %v8196_v44 = vsel %vm238_vm5, %v8195_v43, 0.0 }
0x5525   :  { %8197 = vadd.xlane.f32.xlu1 %v8196_v44 }
0x55b2   :  { %v8198_v11 = vpop.xlane.xlu1 %8197 }
0x55b3   :  { %v8199_v52 = vmul.f32 0.0625, %v8198_v11 }
0x55b5   :  { %v8200_v54 = vadd.f32 1e-05, %v8199_v52 }
0x55b7   :  { %11280 = vrsqrt.f32 %v8200_v54 }
0x55c1   :  { %v11281_v27 = vpop.eup %11280 }
0x55c2   :  { %v8202_v55 = vmul.f32 %v11281_v27, %v8194_v42  ;;  %v5389_v42 = vadd.f32 %v9821_v37, %v12183_v17 }
0x55c4   :  { %v8203_v53 = vmul.f32 %v12416_v25, %v8202_v55  ;;  %v5392_v47 = vadd.f32 %v5389_v42, %v12145_v29 }
0x55c6   :  { %v12444_v56 = vadd.f32 %v12419_v50, %v8203_v53  ;;  %v5393_v49 = vsel %vm238_vm5, %v5392_v47, 0.0 }
0x55c8   :  { %10821 = vmatmul.mubr.msk.f32.vlgmr.msra.gmra.mrb[86].mxu0 %vm238_vm5, %v12444_v56 }
0x55c9   :  { %10825 = vmatprep.mubr.msk.f32.mxu0 %vm11444_vm3, %v11445_v4 }
0x569b   :  { %v8277_v57 = vpop.f32.mrb[86].mxu0 }
0x569c   :  { %8450 = vrot.lane.b32.xlu1 %v8277_v57, %s11448_s9  ;;  %8285 = vrot.lane.b32.xlu0 %v8277_v57, %s11447_s5  ;;  %v10822_v58 = vpop.f32.mrb[87].mxu0  ;;  %s11312_s5 = scalar_lea.vmem %s9578_s23, 128 }
0x569d   :  { %v8998_v58 = vsel %vm238_vm5, %v11820_v6, 0.0  ;;  %p11313_p0 = scmp.ne.s32.totalorder %s9578_s23, %s11312_s5  ;;  %p11318_p2 = scmp.lt.s32.totalorder %s11312_s5, %s11312_s5 }
0x569f   :  { %p11319_p3 = por %p11318_p2, %p11317_p1 }
0x56a0   :  { %8448 = vrot.lane.b32.xlu1 %v8277_v57, %s11446_s0  ;;  %s9567_s0 = sshll.u32 %s11452_s26, 4  ;;  %s9568_s0 = int_to_ptr.vmem [resolvable:$true] %s9567_s0 }
0x56a1   :  { %p11320_p4 = pnand %p11319_p3, %p11313_p0 }
0x570e   :  { %v8286_v59 = vpop.permute.xlu0 %8285  ;;  %v8451_v60 = vpop.permute.xlu1 %8450 }
0x570f   :  { %10824 = vmatpush3.xpose.msk.msra.mxu0 %vm317_vm6, %v8286_v59  ;;  %v9934_v59 = vld [vmem:[%s11493_s29 + $0x90] sm:$0xff] }
0x5710   :  { %10833 = vmatprep.subr.mxu0 %v11445_v4 }
0x5712   :  { %10826 = vmatmul.mubr.msk.f32.vlgmr.msra.gmra.mrb[88].mxu0 %vm317_vm6, %v8277_v57  ;;  %v8449_v61 = vpop.permute.xlu1 %8448 }
0x5713   :  { %10834 = vmatpush3.xpose.msk.msra.mxu0 %vm317_vm6, %v8451_v60  ;;  %10835 = vmatprep.mubr.msk.f32.mxu0 %vm11444_vm3, %v11445_v4  ;;  %v9935_v60 = vld [vmem:[%s11493_s29 + $0x98] sm:$0xff]  ;;  %s12628_s29 = sld [smem:[#allocation19_spill]] }
0x5714   :  { %10843 = vmatprep.subr.mxu0 %v11445_v4 }
0x5716   :  { %10836 = vmatmul.mubr.msk.f32.vlgmr.msra.gmra.mrb[90].mxu0 %vm317_vm6, %v8449_v61  ;;  %v11052_v61 = vpack.c.bf16 %v9935_v60, %v9934_v59 }
0x5717   :  { %10845 = vmatprep.mubr.msk.f32.mxu0 %vm11444_vm3, %v11445_v4  ;;  %10844 = vmatpush3.msra.mxu0 %v9923_v32 }
0x5718   :  { %11051 = vmatprep.subr.bf16.mxu0 %v11442_v2 }
0x57e5   :  { %v8357_v62 = vpop.f32.mrb[88].mxu0 }
0x57e6   :  { %v10827_v63 = vpop.f32.mrb[89].mxu0  ;;  %v8361_v0 = vsel %vm317_vm6, %v8357_v62, -inf }
0x57e7   :  { %8362 = vmax.xlane.f32.xlu0 %v8361_v0 }
0x57e9   :  { %v8522_v1 = vpop.f32.mrb[90].mxu0 }
0x57ea   :  { %v10837_v3 = vpop.f32.mrb[91].mxu0  ;;  %v8526_v5 = vsel %vm317_vm6, %v8522_v1, -inf }
0x57eb   :  { %8527 = vmax.xlane.f32.xlu1 %v8526_v5 }
0x57fc   :  { %8372 = vrot.lane.b32.xlu1 %v8277_v57, %s11450_s28 }
0x5874   :  { %v8363_v45 = vpop.xlane.xlu0 %8362 }
0x5875   :  { %v8364_v8 = vsub.f32 %v8357_v62, %v8363_v45 }
0x5877   :  { %v8365_v10 = vmul.f32 1.442695, %v8364_v8 }
0x5878   :  { %v8528_v51 = vpop.xlane.xlu1 %8527 }
0x5879   :  { %11282 = vpow2.f32 %v8365_v10  ;;  %v8529_v12 = vsub.f32 %v8522_v1, %v8528_v51 }
0x587b   :  { %v8530_v14 = vmul.f32 1.442695, %v8529_v12 }
0x587c   :  { %v8373_v7 = vpop.permute.xlu1 %8372 }
0x587d   :  { %11284 = vpow2.f32 %v8530_v14  ;;  %10829 = vmatpush3.msra.mxu1 %v8373_v7  ;;  %v11310_v7 = vld [vmem:[%s11513_s19 + $0x2] ss:$0 sm:$0xff]  ;;  %s12632_s19 = sld [smem:[#allocation22_spill]] }
0x587e   :  { %10838 = vmatprep.subr.mxu1 %v11445_v4 }
0x5883   :  { %v11283_v9 = vpop.eup %11282 }
0x5884   :  { %v8367_v19 = vsel %vm317_vm6, %v11283_v9, 0.0 }
0x5885   :  { %8368 = vadd.xlane.f32.xlu0 %v8367_v19  ;;  %v11311_v19 = vld [vmem:[%s11518_s24 + $0x2] ss:$0 sm:$0xff]  ;;  %s12633_s24 = sld [smem:[#allocation23_spill]] }
0x5887   :  { %v11285_v20 = vpop.eup %11284 }
0x5888   :  { %v8532_v21 = vsel %vm317_vm6, %v11285_v20, 0.0 }
0x5889   :  { %8533 = vadd.xlane.f32.xlu0 %v8532_v21 }
0x589f   :  { %8537 = vrot.lane.b32.xlu0 %v8277_v57, %s11449_s13 }
0x5912   :  { %v8369_v16 = vpop.xlane.xlu0 %8368 }
0x5913   :  { %11286 = vrcp.f32 %v8369_v16  ;;  %v9939_v16 = vld [vmem:[%s11503_s8 + $0x120] sm:$0xff] }
0x5916   :  { %v8534_v22 = vpop.xlane.xlu0 %8533 }
0x5917   :  { %11288 = vrcp.f32 %v8534_v22  ;;  %v9940_v22 = vld [vmem:[%s11503_s8 + $0x128] sm:$0xff] }
0x591a   :  { %v8538_v26 = vpop.permute.xlu0 %8537 }
0x591d   :  { %v11287_v24 = vpop.eup %11286 }
0x591e   :  { %v8371_v15 = vmul.f32 %v11287_v24, %v11283_v9  ;;  %v11055_v24 = vpack.c.bf16 %v9940_v22, %v9939_v16  ;;  %v9025_v22 = vld [vmem:[%s12625_s17] sm:$0xff] }
0x5920   :  { %10831 = vmatmul.mubr.msk.f32.vlgmr.msra.gmra.mrb[86].mxu1 %vm317_vm6, %v8371_v15  ;;  %v9941_v15 = vld [vmem:[%s11503_s8 + $0x130] sm:$0xff] }
0x5921   :  { %v11289_v28 = vpop.eup %11288  ;;  %10839 = vmatpush3.msra.mxu1 %v8538_v26  ;;  %10840 = vmatprep.mubr.msk.f32.mxu1 %vm11444_vm3, %v11445_v4  ;;  %v9942_v26 = vld [vmem:[%s11503_s8 + $0x138] sm:$0xff]  ;;  %s12630_s8 = sld [smem:[#allocation27_spill]] }
0x5922   :  { %v8536_v30 = vmul.f32 %v11289_v28, %v11285_v20  ;;  %10848 = vmatprep.subr.mxu1 %v11445_v4  ;;  %v11058_v28 = vpack.c.bf16 %v9942_v26, %v9941_v15  ;;  %v9251_v26 = vld [vmem:[%s12626_s21] sm:$0xff] }
0x5924   :  { %10841 = vmatmul.mubr.msk.f32.vlgmr.msra.gmra.mrb[88].mxu1 %vm317_vm6, %v8536_v30  ;;  %v9937_v30 = vld [vmem:[%s11498_s3 + $0x9] ss:$0 sm:$0xff]  ;;  %s12629_s3 = sld [smem:[#allocation26_spill]] }
0x5925   :  { %10850 = vmatprep.mubr.msk.f32.mxu1 %vm11444_vm3, %v11445_v4  ;;  %10849 = vmatpush3.msra.mxu1 %v9922_v31 }
0x5926   :  { %11054 = vmatprep.subr.bf16.mxu1 %v11442_v2 }
0x59f3   :  { %v8444_v13 = vpop.f32.mrb[86].mxu1 }
0x59f4   :  { %v10832_v33 = vpop.f32.mrb[87].mxu1  ;;  %10851 = vmatmul.mubr.msk.f32.vlgmr.msra.gmra.mrb[90].mxu1 %vm317_vm6, %v8444_v13 }
0x59f5   :  { %10868 = vmatprep.mubr.msk.f32.mxu1 %vm11444_vm3, %v11445_v4  ;;  %11056 = vmatpush3.bf16.msra.mxu1 %v11055_v24  ;;  %v9026_v24 = vld [vmem:[%s12625_s17 + $0x8] sm:$0xff] }
0x59f6   :  { %11057 = vmatprep.subr.bf16.mxu1 %v11442_v2  ;;  %v11061_v15 = vpack.c.bf16 %v9026_v24, %v9025_v22 }
0x59f7   :  { %v8609_v23 = vpop.f32.mrb[88].mxu1 }
0x59f8   :  { %v10842_v34 = vpop.f32.mrb[89].mxu1  ;;  %10846 = vmatmul.mubr.msk.f32.vlgmr.msra.gmra.mrb[92].mxu0 %vm317_vm6, %v8609_v23 }
0x59f9   :  { %10857 = vmatprep.mubr.msk.f32.mxu0 %vm11444_vm3, %v11445_v4  ;;  %11053 = vmatpush3.bf16.msra.mxu0 %v11052_v61 }
0x59fa   :  { %11060 = vmatprep.subr.bf16.mxu0 %v11442_v2  ;;  %11059 = vmatpush3.bf16.msra.mxu1 %v11058_v28  ;;  %v9252_v28 = vld [vmem:[%s12626_s21 + $0x8] sm:$0xff] }
0x59fb   :  { %11066 = vmatprep.subr.bf16.mxu1 %v11442_v2 }
0x5ac7   :  { %v8755_v35 = vpop.f32.mrb[90].mxu1 }
0x5ac8   :  { %v10852_v36 = vpop.f32.mrb[91].mxu1 }
0x5acb   :  { %v8682_v38 = vpop.f32.mrb[92].mxu0 }
0x5acc   :  { %v8756_v40 = vadd.f32 %v8755_v35, %v8682_v38  ;;  %v10847_v41 = vpop.f32.mrb[93].mxu0 }
0x5ace   :  { %v8767_v43 = vadd.f32 %v9933_v39, %v8756_v40 }
0x5ad0   :  { %v8768_v44 = vadd.f32 %v8767_v43, %v12444_v56 }
0x5ad2   :  { %v8769_v48 = vsel %vm238_vm5, %v8768_v44, 0.0 }
0x5ad3   :  { %8770 = vadd.xlane.f32.xlu1 %v8769_v48 }
0x5ad7   :  { %5394 = vadd.xlane.f32.xlu1 %v5393_v49 }
0x5b60   :  { %v8771_v11 = vpop.xlane.xlu1 %8770 }
0x5b61   :  { %v8772_v52 = vmul.f32 0.0625, %v8771_v11 }
0x5b63   :  { %v8773_v54 = vsub.f32 %v8768_v44, %v8772_v52 }
0x5b64   :  { %v5395_v27 = vpop.xlane.xlu1 %5394 }
0x5b65   :  { %v5396_v55 = vmul.f32 0.0625, %v5395_v27  ;;  %v8774_v53 = vmul.f32 %v8773_v54, %v8773_v54 }
0x5b67   :  { %v5397_v17 = vsub.f32 %v5392_v47, %v5396_v55  ;;  %v8775_v57 = vsel %vm238_vm5, %v8774_v53, 0.0 }
0x5b68   :  { %8776 = vadd.xlane.f32.xlu0 %v8775_v57 }
0x5b69   :  { %v5398_v56 = vmul.f32 %v5397_v17, %v5397_v17 }
0x5b6b   :  { %v5399_v29 = vsel %vm238_vm5, %v5398_v56, 0.0 }
0x5b6c   :  { %5400 = vadd.xlane.f32.xlu1 %v5399_v29  ;;  %v9944_v29 = vld [vmem:[%s11508_s14 + $0x9] ss:$0 sm:$0xff]  ;;  %s12631_s14 = sld [smem:[#allocation24_spill]] }
0x5b70   :  { %8999 = vadd.xlane.f32.xlu1 %v8998_v58 }
0x5bf5   :  { %v8777_v62 = vpop.xlane.xlu0 %8776 }
0x5bf6   :  { %v8778_v63 = vmul.f32 0.0625, %v8777_v62 }
0x5bf8   :  { %v8779_v0 = vadd.f32 1e-05, %v8778_v63 }
0x5bf9   :  { %v5401_v1 = vpop.xlane.xlu1 %5400 }
0x5bfa   :  { %11290 = vrsqrt.f32 %v8779_v0  ;;  %v5402_v3 = vmul.f32 0.0625, %v5401_v1 }
0x5bfc   :  { %v5403_v5 = vadd.f32 1e-05, %v5402_v3 }
0x5bfd   :  { %v9000_v3 = vpop.xlane.xlu1 %8999 }
0x5bfe   :  { %11292 = vrsqrt.f32 %v5403_v5 }
0x5c04   :  { %v11291_v45 = vpop.eup %11290 }
0x5c05   :  { %v8781_v8 = vmul.f32 %v11291_v45, %v8773_v54  ;;  %v9001_v45 = vmul.f32 0.0625, %v9000_v3 }
0x5c07   :  { %v8782_v10 = vmul.f32 %v12416_v25, %v8781_v8 }
0x5c08   :  { %v11293_v51 = vpop.eup %11292 }
0x5c09   :  { %v8783_v12 = vadd.f32 %v12419_v50, %v8782_v10  ;;  %v5405_v14 = vmul.f32 %v11293_v51, %v5397_v17  ;;  %v9002_v51 = vsub.f32 %v11820_v6, %v9001_v45 }
0x5c0b   :  { %10858 = vmatmul.mubr.msk.f32.vlgmr.msra.gmra.mrb[94].mxu0 %vm238_vm5, %v8783_v12  ;;  %v5406_v9 = vmul.f32 %v11310_v7, %v5405_v14 }
0x5c0c   :  { %10875 = vmatprep.mubr.msk.f32.mxu0 %vm11444_vm3, %v11445_v4  ;;  %11062 = vmatpush3.bf16.msra.mxu0 %v11061_v15 }
0x5c0d   :  { %v12508_v20 = vadd.f32 %v11311_v19, %v5406_v9  ;;  %v9337_v9 = vsel %vm238_vm5, %v12355_v46, 0.0  ;;  %v9003_v19 = vmul.f32 %v9002_v51, %v9002_v51  ;;  %11063 = vmatprep.subr.bf16.mxu0 %v11442_v2 }
0x5c0f   :  { %v9224_v21 = vsel %vm238_vm5, %v12508_v20, 0.0 }
0x5c10   :  { %9225 = vadd.xlane.f32.xlu1 %v9224_v21  ;;  %v9004_v21 = vsel %vm238_vm5, %v9003_v19, 0.0  ;;  %v9951_v19 = vld [vmem:[%s12633_s24] ss:$0 sm:$0xff] }
0x5c9d   :  { %v9226_v10 = vpop.xlane.xlu1 %9225 }
0x5c9e   :  { %v9227_v14 = vmul.f32 0.0625, %v9226_v10 }
0x5ca0   :  { %v9228_v7 = vsub.f32 %v12508_v20, %v9227_v14  ;;  %v11067_v20 = vpack.c.bf16 %v9252_v28, %v9251_v26  ;;  %v9948_v26 = vld [vmem:[%s12634_s11] ss:$0 sm:$0xff] }
0x5ca2   :  { %v9229_v16 = vmul.f32 %v9228_v7, %v9228_v7 }
0x5ca4   :  { %v9230_v6 = vsel %vm238_vm5, %v9229_v16, 0.0 }
0x5cde   :  { %v8864_v31 = vpop.f32.mrb[94].mxu0 }
0x5cdf   :  { %v8865_v32 = vadd.f32 %v9937_v30, %v8864_v31  ;;  %v10859_v13 = vpop.f32.mrb[95].mxu0 }
0x5ce1   :  { %v8869_v33 = vmul.f32 0.70710677, %v8865_v32  ;;  %v8868_v17 = vmul.f32 0.5, %v8865_v32 }
0x5ce3   :  { %v8870_v23 = vand.u32 2147483647, %v8869_v33  ;;  %vm8889_vm1 = vcmp.ge.f32.partialorder %v8869_v33, 0.0 }
0x5ce5   :  { %v8871_v34 = vmul.f32 0.3275911, %v8870_v23  ;;  %v8883_v36 = vsub.f32 0.0, %v8870_v23 }
0x5ce7   :  { %v8872_v35 = vadd.f32 1.0, %v8871_v34  ;;  %v8884_v38 = vmul.f32 %v8883_v36, %v8870_v23 }
0x5ce9   :  { %11294 = vrcp.f32 %v8872_v35  ;;  %v8885_v41 = vmul.f32 1.442695, %v8884_v38 }
0x5ceb   :  { %11296 = vpow2.f32 %v8885_v41 }
0x5cf3   :  { %v11295_v37 = vpop.eup %11294 }
0x5cf4   :  { %v8874_v39 = vmul.f32 1.0614054, %v11295_v37 }
0x5cf5   :  { %v11297_v52 = vpop.eup %11296 }
0x5cf6   :  { %v8875_v40 = vadd.f32 -1.4531521, %v8874_v39 }
0x5cf8   :  { %v8876_v42 = vmul.f32 %v11295_v37, %v8875_v40 }
0x5cfa   :  { %v8877_v43 = vadd.f32 1.4214138, %v8876_v42 }
0x5cfc   :  { %v8878_v44 = vmul.f32 %v11295_v37, %v8877_v43 }
0x5cfe   :  { %v8879_v47 = vadd.f32 -0.28449672, %v8878_v44 }
0x5d00   :  { %v8880_v48 = vmul.f32 %v11295_v37, %v8879_v47 }
0x5d02   :  { %v8881_v49 = vadd.f32 0.2548296, %v8880_v48 }
0x5d04   :  { %v8882_v11 = vmul.f32 %v11295_v37, %v8881_v49 }
0x5d06   :  { %v8887_v54 = vmul.f32 %v11297_v52, %v8882_v11 }
0x5d08   :  { %v8888_v27 = vsub.f32 1.0, %v8887_v54 }
0x5d0a   :  { %v8890_v55 = vsub.f32 0.0, %v8888_v27 }
0x5d0c   :  { %v8891_v53 = vsel %vm8889_vm1, %v8888_v27, %v8890_v55  ;;  %v9946_v27 = vld [vmem:[%s12627_s25] ss:$0 sm:$0xff] }
0x5d0d   :  { %v8892_v57 = vadd.f32 1.0, %v8891_v53 }
0x5d0f   :  { %v8893_v56 = vmul.f32 %v8892_v57, %v8868_v17 }
0x5d11   :  { %10869 = vmatmul.mubr.msk.f32.vlgmr.msra.gmra.mrb[92].mxu1 %vm946_vm8, %v8893_v56 }
0x5d12   :  { %10889 = vmatprep.mubr.msk.f32.mxu1 %vm11444_vm3, %v11445_v4  ;;  %11068 = vmatpush3.bf16.msra.mxu1 %v11067_v20 }
0x5d13   :  { %11072 = vmatprep.subr.bf16.mxu1 %v11442_v2 }
0x5de4   :  { %v8976_v58 = vpop.f32.mrb[92].mxu1 }
0x5de5   :  { %v8977_v59 = vadd.f32 %v9944_v29, %v8976_v58  ;;  %v10870_v60 = vpop.f32.mrb[93].mxu1  ;;  %v9955_v29 = vld [vmem:[%s12630_s8] ss:$0 sm:$0xff] }
0x5de6   :  { %v9138_v60 = vld [vmem:[%s12631_s14] sm:$0xff] }
0x5de7   :  { %v8980_v61 = vadd.f32 %v8977_v59, %v8783_v12  ;;  %v9111_v12 = vsel %vm238_vm5, %v11996_v18, 0.0 }
0x5de9   :  { %v8981_v62 = vsel %vm238_vm5, %v8980_v61, 0.0 }
0x5dea   :  { %8982 = vadd.xlane.f32.xlu0 %v8981_v62 }
0x5e77   :  { %v8983_v63 = vpop.xlane.xlu0 %8982 }
0x5e78   :  { %v8984_v0 = vmul.f32 0.0625, %v8983_v63 }
0x5e7a   :  { %v8985_v1 = vsub.f32 %v8980_v61, %v8984_v0  ;;  %v9139_v61 = vld [vmem:[%s12631_s14 + $0x8] sm:$0xff] }
0x5e7b   :  { %v11064_v62 = vpack.c.bf16 %v9139_v61, %v9138_v60 }
0x5e7c   :  { %v8986_v5 = vmul.f32 %v8985_v1, %v8985_v1 }
0x5e7e   :  { %v8987_v8 = vsel %vm238_vm5, %v8986_v5, 0.0 }
0x5e7f   :  { %8988 = vadd.xlane.f32.xlu0 %v8987_v8 }
0x5e83   :  { %9112 = vadd.xlane.f32.xlu0 %v9111_v12 }
0x5e87   :  { %9338 = vadd.xlane.f32.xlu0 %v9337_v9 }
0x5e8b   :  { %9005 = vadd.xlane.f32.xlu0 %v9004_v21 }
0x5e8f   :  { %9231 = vadd.xlane.f32.xlu0 %v9230_v6 }
0x5f0c   :  { %v8989_v30 = vpop.xlane.xlu0 %8988 }
0x5f0d   :  { %v8990_v31 = vmul.f32 0.0625, %v8989_v30 }
0x5f0f   :  { %v8991_v32 = vadd.f32 1e-05, %v8990_v31  ;;  %v12568_v31 = vld [vmem:[%s12635_s15] ss:$0 sm:$0xff] }
0x5f10   :  { %v9113_v13 = vpop.xlane.xlu0 %9112 }
0x5f11   :  { %11298 = vrsqrt.f32 %v8991_v32  ;;  %v9114_v35 = vmul.f32 0.0625, %v9113_v13 }
0x5f13   :  { %v9115_v41 = vsub.f32 %v11996_v18, %v9114_v35 }
0x5f14   :  { %v9339_v33 = vpop.xlane.xlu0 %9338 }
0x5f15   :  { %v9340_v42 = vmul.f32 0.0625, %v9339_v33  ;;  %v9116_v11 = vmul.f32 %v9115_v41, %v9115_v41 }
0x5f17   :  { %v9341_v48 = vsub.f32 %v12355_v46, %v9340_v42  ;;  %v9117_v52 = vsel %vm238_vm5, %v9116_v11, 0.0  ;;  %v9954_v46 = vld [vmem:[%s12629_s3] ss:$0 sm:$0xff] }
0x5f18   :  { %v9006_v23 = vpop.xlane.xlu0 %9005 }
0x5f19   :  { %v9007_v34 = vmul.f32 0.0625, %v9006_v23  ;;  %v9342_v54 = vmul.f32 %v9341_v48, %v9341_v48 }
0x5f1b   :  { %v11299_v36 = vpop.eup %11298  ;;  %v9008_v37 = vadd.f32 1e-05, %v9007_v34 }
0x5f1c   :  { %v9232_v38 = vpop.xlane.xlu0 %9231  ;;  %v8993_v39 = vmul.f32 %v11299_v36, %v8985_v1 }
0x5f1d   :  { %11300 = vrsqrt.f32 %v9008_v37  ;;  %v9233_v40 = vmul.f32 0.0625, %v9232_v38 }
0x5f1e   :  { %v8994_v43 = vmul.f32 %v12416_v25, %v8993_v39  ;;  %v9947_v25 = vld [vmem:[%s12628_s29] ss:$0 sm:$0xff] }
0x5f1f   :  { %v9234_v44 = vadd.f32 1e-05, %v9233_v40  ;;  %v9952_v39 = vld [vmem:[%s12637_s18] ss:$0 sm:$0xff] }
0x5f20   :  { %v8995_v47 = vadd.f32 %v12419_v50, %v8994_v43  ;;  %v9343_v50 = vsel %vm238_vm5, %v9342_v54, 0.0 }
0x5f21   :  { %11302 = vrsqrt.f32 %v9234_v44 }
0x5f22   :  { %v9449_v49 = vsel %vm238_vm5, %v8995_v47, 0.0 }
0x5f23   :  { %9450 = vadd.xlane.f32.xlu1 %v9449_v49 }
0x5f27   :  { %v11301_v18 = vpop.eup %11300  ;;  %9118 = vadd.xlane.f32.xlu1 %v9117_v52 }
0x5f28   :  { %v9010_v55 = vmul.f32 %v11301_v18, %v9002_v51 }
0x5f2a   :  { %v9017_v53 = vmul.f32 %v9946_v27, %v9010_v55 }
0x5f2b   :  { %v11303_v17 = vpop.eup %11302  ;;  %9344 = vadd.xlane.f32.xlu1 %v9343_v50 }
0x5f2c   :  { %v9236_v57 = vmul.f32 %v11303_v17, %v9228_v7  ;;  %v9024_v56 = vadd.f32 %v9947_v25, %v9017_v53 }
0x5f2e   :  { %10876 = vmatmul.mubr.msk.f32.vlgmr.msra.gmra.mrb[96].mxu0 %vm238_vm5, %v9024_v56  ;;  %v9243_v58 = vmul.f32 %v9954_v46, %v9236_v57 }
0x5f2f   :  { %10882 = vmatprep.mubr.msk.f32.mxu0 %vm11444_vm3, %v11445_v4  ;;  %11065 = vmatpush3.bf16.msra.mxu0 %v11064_v62 }
0x5f30   :  { %v9250_v59 = vadd.f32 %v9955_v29, %v9243_v58  ;;  %11069 = vmatprep.subr.bf16.mxu0 %v11442_v2  ;;  %v9958_v2 = vld [vmem:[%s12632_s19] ss:$0 sm:$0xff] }
0x5f32   :  { %10890 = vmatmul.mubr.msk.f32.vlgmr.msra.gmra.mrb[94].mxu1 %vm238_vm5, %v9250_v59 }
0x5f33   :  { %11074 = vmatpush3.bf16.msra.mxu1 %v11067_v20  ;;  %10903 = vmatprep.mubr.msk.f32.mxu1 %vm11444_vm3, %v11445_v4 }
0x5fb0   :  { %v9451_v63 = vpop.xlane.xlu1 %9450 }
0x5fb1   :  { %v9452_v0 = vmul.f32 0.0625, %v9451_v63 }
0x5fb3   :  { %v9453_v1 = vsub.f32 %v8995_v47, %v9452_v0 }
0x5fb4   :  { %v9119_v3 = vpop.xlane.xlu1 %9118 }
0x5fb5   :  { %v9120_v5 = vmul.f32 0.0625, %v9119_v3  ;;  %v9454_v45 = vmul.f32 %v9453_v1, %v9453_v1 }
0x5fb7   :  { %v9121_v8 = vadd.f32 1e-05, %v9120_v5  ;;  %v9455_v10 = vsel %vm238_vm5, %v9454_v45, 0.0 }
0x5fb8   :  { %9456 = vadd.xlane.f32.xlu0 %v9455_v10  ;;  %v9345_v51 = vpop.xlane.xlu1 %9344 }
0x5fb9   :  { %11304 = vrsqrt.f32 %v9121_v8  ;;  %v9346_v14 = vmul.f32 0.0625, %v9345_v51 }
0x5fbb   :  { %v9347_v12 = vadd.f32 1e-05, %v9346_v14 }
0x5fbd   :  { %11306 = vrsqrt.f32 %v9347_v12 }
0x5fc3   :  { %v11305_v7 = vpop.eup %11304 }
0x5fc4   :  { %v9123_v9 = vmul.f32 %v11305_v7, %v9115_v41 }
0x5fc6   :  { %v9130_v21 = vmul.f32 %v9958_v2, %v9123_v9 }
0x5fc7   :  { %v11307_v16 = vpop.eup %11306 }
0x5fc8   :  { %v9349_v6 = vmul.f32 %v11307_v16, %v9341_v48  ;;  %v9137_v22 = vadd.f32 %v9951_v19, %v9130_v21 }
0x5fca   :  { %v9356_v24 = vmul.f32 %v9958_v2, %v9349_v6  ;;  %10883 = vmatmul.mubr.msk.f32.vlgmr.msra.gmra.mrb[98].mxu0 %vm238_vm5, %v9137_v22 }
0x5fcb   :  { %11071 = vmatpush3.bf16.msra.mxu0 %v11064_v62  ;;  %10896 = vmatprep.mubr.msk.f32.mxu0 %vm11444_vm3, %v11445_v4  ;;  %vm9220_vm3 = vcmask 39936  }
0x5fcc   :  { %v9363_v15 = vadd.f32 %v9951_v19, %v9356_v24 }
0x5fce   :  { %10897 = vmatmul.mubr.msk.f32.vlgmr.msra.gmra.mrb[100].mxu0 %vm238_vm5, %v9363_v15 }
0x6001   :  { %v9103_v28 = vpop.f32.mrb[96].mxu0 }
0x6002   :  { %v9104_v20 = vadd.f32 %v9948_v26, %v9103_v28  ;;  %v10877_v30 = vpop.f32.mrb[97].mxu0 }
0x6004   :  { %9108 = vst.msk [vmem:[%s12636_s16] sm:$0xff] %vm9107_vm2, %v9104_v20 }
0x6005   :  { %v9329_v32 = vpop.f32.mrb[94].mxu1 }
0x6006   :  { %v9330_v13 = vadd.f32 %v12568_v31, %v9329_v32  ;;  %v10891_v33 = vpop.f32.mrb[95].mxu1 }
0x6008   :  { %9334 = vst.msk [vmem:[#allocation4] sm:$0xff] %vm9333_vm4, %v9330_v13 }
0x6045   :  { %v9457_v4 = vpop.xlane.xlu0 %9456 }
0x6046   :  { %v9458_v23 = vmul.f32 0.0625, %v9457_v4 }
0x6048   :  { %v9459_v34 = vadd.f32 1e-05, %v9458_v23 }
0x604a   :  { %11308 = vrsqrt.f32 %v9459_v34 }
0x6054   :  { %v11309_v35 = vpop.eup %11308 }
0x6055   :  { %v9461_v36 = vmul.f32 %v11309_v35, %v9453_v1 }
0x6057   :  { %v9468_v37 = vmul.f32 %v9954_v46, %v9461_v36 }
0x6059   :  { %v9475_v38 = vadd.f32 %v9955_v29, %v9468_v37 }
0x605b   :  { %10904 = vmatmul.mubr.msk.f32.vlgmr.msra.gmra.mrb[96].mxu1 %vm238_vm5, %v9475_v38 }
0x609d   :  { %v9216_v40 = vpop.f32.mrb[98].mxu0 }
0x609e   :  { %v9217_v41 = vadd.f32 %v9952_v39, %v9216_v40  ;;  %v10884_v42 = vpop.f32.mrb[99].mxu0 }
0x60a0   :  { %9221 = vst.msk [vmem:[#allocation2] sm:$0xff] %vm9220_vm3, %v9217_v41 }
0x60a1   :  { %v9442_v43 = vpop.f32.mrb[100].mxu0 }
0x60a2   :  { %v9443_v44 = vadd.f32 %v9952_v39, %v9442_v43  ;;  %v10898_v47 = vpop.f32.mrb[101].mxu0 }
0x60a4   :  { %9446 = vst.msk [vmem:[#allocation6] sm:$0xff] %vm9220_vm3, %v9443_v44 }
0x60a5   :  { %11323 = shalt.err (!%p11320_p4)
}
0x60a6   :  { %s11324_s9 = scalar_lea.hbm %s11633_s12, 128 }
0x60a7   :  { %p11325_p5 = scmp.ne.s32.totalorder %s11633_s12, %s11324_s9  ;;  %p11328_p6 = scmp.lt.u32.totalorder %s11324_s9, %s11633_s12 }
0x60a9   :  { %p11330_p7 = pnand %p11328_p6, %p11325_p5 }
0x60ab   :  { %11333 = shalt.err (!%p11330_p7)
}
0x60ac   :  { %9580 = dma.vmem_to_hbm [thread:$0]  %s9578_s23, 128, %s11633_s12, [#allocation5]  }
0x60ad   :  { %s11334_s13 = scalar_lea.vmem %s9568_s0, 128  ;;  %p11339_p9 = scmp.lt.s32.totalorder %s9568_s0, %s9568_s0 }
0x60ae   :  { %p11335_p8 = scmp.ne.s32.totalorder %s9568_s0, %s11334_s13  ;;  %p11340_p10 = scmp.lt.s32.totalorder %s11334_s13, %s11334_s13 }
0x60b0   :  { %p11341_p11 = por %p11340_p10, %p11339_p9 }
0x60b2   :  { %p11342_p12 = pnand %p11341_p11, %p11335_p8 }
0x60b4   :  { %11345 = shalt.err (!%p11342_p12)
}
0x60b5   :  { %s11346_s28 = scalar_lea.hbm %s11628_s4, 128 }
0x60b6   :  { %p11347_p13 = scmp.ne.s32.totalorder %s11628_s4, %s11346_s28  ;;  %p11350_p0 = scmp.lt.u32.totalorder %s11346_s28, %s11628_s4 }
0x60b8   :  { %p11352_p1 = pnand %p11350_p0, %p11347_p13 }
0x60ba   :  { %11355 = shalt.err (!%p11352_p1)
}
0x60bb   :  { %9570 = dma.vmem_to_hbm [thread:$0]  %s9568_s0, 128, %s11628_s4, [#allocation3]  }
0x60bc   :  { %s11453_s30 = smov [#allocation6]  }
0x60bd   :  { %s9587_s12 = sshll.u32 %s11453_s30, 4  ;;  %s9588_s12 = int_to_ptr.vmem [resolvable:$true] %s9587_s12 }
0x60be   :  { %s11356_s6 = scalar_lea.vmem %s9588_s12, 128  ;;  %p11361_p3 = scmp.lt.s32.totalorder %s9588_s12, %s9588_s12 }
0x60bf   :  { %p11357_p2 = scmp.ne.s32.totalorder %s9588_s12, %s11356_s6  ;;  %p11362_p4 = scmp.lt.s32.totalorder %s11356_s6, %s11356_s6 }
0x60c1   :  { %p11363_p5 = por %p11362_p4, %p11361_p3 }
0x60c3   :  { %p11364_p6 = pnand %p11363_p5, %p11357_p2 }
0x60c5   :  { %11367 = shalt.err (!%p11364_p6)
}
0x60c6   :  { %s11368_s1 = scalar_lea.hbm %s11638_s20, 128 }
0x60c7   :  { %p11369_p7 = scmp.ne.s32.totalorder %s11638_s20, %s11368_s1  ;;  %p11372_p8 = scmp.lt.u32.totalorder %s11368_s1, %s11638_s20 }
0x60c9   :  { %p11374_p9 = pnand %p11372_p8, %p11369_p7 }
0x60cb   :  { %11377 = shalt.err (!%p11374_p9)
}
0x60cc   :  { %9590 = dma.vmem_to_hbm [thread:$0]  %s9588_s12, 128, %s11638_s20, [#allocation5]  }
0x60cd   :  { %s11454_s4 = smov [#allocation7]  }
0x60ce   :  { %s9597_s2 = sshll.u32 %s11454_s4, 4  ;;  %s9598_s2 = int_to_ptr.vmem [resolvable:$true] %s9597_s2 }
0x60cf   :  { %s11378_s7 = scalar_lea.vmem %s9598_s2, 128  ;;  %p11383_p11 = scmp.lt.s32.totalorder %s9598_s2, %s9598_s2 }
0x60d0   :  { %p11379_p10 = scmp.ne.s32.totalorder %s9598_s2, %s11378_s7  ;;  %p11384_p12 = scmp.lt.s32.totalorder %s11378_s7, %s11378_s7 }
0x60d2   :  { %p11385_p13 = por %p11384_p12, %p11383_p11 }
0x60d4   :  { %p11386_p0 = pnand %p11385_p13, %p11379_p10 }
0x612e   :  { %v9554_v48 = vpop.f32.mrb[96].mxu1 }
0x612f   :  { %v9555_v49 = vadd.f32 %v12568_v31, %v9554_v48  ;;  %v10905_v11 = vpop.f32.mrb[97].mxu1 }
0x6131   :  { %9558 = vst.msk [vmem:[#allocation7] sm:$0xff] %vm9333_vm4, %v9555_v49 }
0x6132   :  { %11389 = shalt.err (!%p11386_p0)
}
0x6133   :  { %s11390_s20 = scalar_lea.hbm %s11643_s27, 128 }
0x6134   :  { %p11391_p1 = scmp.ne.s32.totalorder %s11643_s27, %s11390_s20  ;;  %p11394_p2 = scmp.lt.u32.totalorder %s11390_s20, %s11643_s27 }
0x6136   :  { %p11396_p3 = pnand %p11394_p2, %p11391_p1 }
0x6138   :  { %11399 = shalt.err (!%p11396_p3)
}
0x6139   :  { %9600 = dma.vmem_to_hbm [thread:$0]  %s9598_s2, 128, %s11643_s27, [#allocation8]  }
0x613a   :  { %11400 = dma.done.wait [#allocation3], 128  }
0x613b   :  { %11401 = vsyncadd [#allocation3], 4294967168 }
0x613c   :  { %11402 = dma.done.wait [#allocation5], 256  }
0x613d   :  { %11403 = vsyncadd [#allocation5], 4294967040 }
0x613e   :  { %11404 = dma.done.wait [#allocation8], 128  }
0x613f   :  { %11405 = vsyncadd [#allocation8], 4294967168 }
0x6140   :  { %9615 = vsyncpa [#allocation3], 1 }
0x6141   :  { %9616 = vsyncpa [#allocation5], 1 }
0x6142   :  { %9617 = vsyncpa [#allocation8], 1 }

</bundles_post_ra>
